<compile_context>
chip_gen: v7x
topology: tpu7x:2x2x1
jax: 0.10.0
libtpu: 0.0.40
codegen_flags: <defaults>
</compile_context>

<pallas_src>
import math

import jax
import jax.numpy as jnp
from jax.experimental import pallas as pl
from jax.experimental.pallas import tpu as pltpu


def film_siren_kernel(x_ref, gamma_ref, beta_ref, w_ref, b_ref, o_ref):
    """One (batch, point-tile) step: bf16 MXU matmul + f32 FiLM + sin."""
    # x_ref: (1, TN, Cin) bf16, w_ref: (Cin, Cout) bf16, rest f32.
    h = jnp.dot(x_ref[0], w_ref[...], preferred_element_type=jnp.float32)
    h = h + b_ref[...]                                   # (TN, Cout) f32
    o_ref[0] = jnp.sin(gamma_ref[0] * h + beta_ref[0])   # FiLM + sin, f32


def init_params(key, in_channel, out_channel, style_dim, is_first=False):
    """Deterministic synthetic parameters mimicking the PyTorch init distributions."""
    kw, kb, kgw, kgb, kbw, kbb = jax.random.split(key, 6)

    if is_first:
        lim = 1.0 / in_channel
    else:
        lim = math.sqrt(6.0 / in_channel) / 25.0
    # stored as (in, out) so the kernel does x @ w  (== F.linear with weight (out, in))
    w = jax.random.uniform(kw, (in_channel, out_channel), jnp.float32, -lim, lim)
    b_lim = math.sqrt(1.0 / in_channel)
    b = jax.random.uniform(kb, (out_channel,), jnp.float32, -b_lim, b_lim)

    # LinearLayer default weight init: 0.25 * kaiming_normal(a=0.2, fan_in=style_dim)
    k_std = 0.25 * math.sqrt(2.0 / (1.0 + 0.2 ** 2)) / math.sqrt(style_dim)
    gw = k_std * jax.random.normal(kgw, (style_dim, out_channel), jnp.float32)
    bw = k_std * jax.random.normal(kbw, (style_dim, out_channel), jnp.float32)
    s_lim = math.sqrt(1.0 / style_dim)
    gb = jax.random.uniform(kgb, (out_channel,), jnp.float32, -s_lim, s_lim)
    bb = jax.random.uniform(kbb, (out_channel,), jnp.float32, -s_lim, s_lim)

    return dict(w=w, b=b, gamma_w=gw, gamma_b=gb, beta_w=bw, beta_b=bb)


def film_siren_forward(x, style, params, *, tn=256):
    """x: (B, n1, n2, n3, Cin) f32, style: (B, style_dim) f32 -> (B, n1, n2, n3, Cout)."""
    B = x.shape[0]
    lead = x.shape[1:-1]
    cin = x.shape[-1]
    cout = params["w"].shape[1]
    N = int(math.prod(lead))

    assert tn % 128 == 0, "point tile must be a multiple of 128 (MXU / lane alignment)"
    n_pad = pl.cdiv(N, tn) * tn

    x_flat = x.reshape(B, N, cin)
    if n_pad != N:
        x_flat = jnp.pad(x_flat, ((0, 0), (0, n_pad - N), (0, 0)))
    x_bf = x_flat.astype(jnp.bfloat16)                       # bf16 MXU operand
    w_bf = params["w"].astype(jnp.bfloat16)
    bias = params["b"].reshape(1, cout).astype(jnp.float32)

    # FiLM parameters: M=B style matmuls precomputed in the wrapper (perf review),
    # so the kernel never re-runs a near-empty MXU pass per tile.
    gamma = 15.0 * (style @ params["gamma_w"] + params["gamma_b"]) + 30.0
    beta = 0.25 * (style @ params["beta_w"] + params["beta_b"])
    gamma = gamma.reshape(B, 1, cout).astype(jnp.float32)
    beta = beta.reshape(B, 1, cout).astype(jnp.float32)

    grid = (B, n_pad // tn)
    out = pl.pallas_call(
        film_siren_kernel,
        out_shape=jax.ShapeDtypeStruct((B, n_pad, cout), jnp.float32),
        grid=grid,
        in_specs=[
            pl.BlockSpec((1, tn, cin), lambda b, t: (b, t, 0)),     # point tile
            pl.BlockSpec((1, 1, cout), lambda b, t: (b, 0, 0)),     # gamma  (per batch)
            pl.BlockSpec((1, 1, cout), lambda b, t: (b, 0, 0)),     # beta   (per batch)
            pl.BlockSpec((cin, cout), lambda b, t: (0, 0)),         # weight (resident)
            pl.BlockSpec((1, cout), lambda b, t: (0, 0)),           # bias   (resident)
        ],
        out_specs=pl.BlockSpec((1, tn, cout), lambda b, t: (b, t, 0)),
        compiler_params=pltpu.CompilerParams(
            dimension_semantics=("parallel", "parallel")),
    )(x_bf, gamma, beta, w_bf, bias)

    out = out[:, :N, :]
    return out.reshape((B,) + lead + (cout,))


def reference_forward(x, style, params):
    """Pure-JAX f32 reference mirroring the PyTorch FiLMSiren.forward exactly."""
    out = jnp.einsum("...i,io->...o", x, params["w"]) + params["b"]
    gamma = 15.0 * (style @ params["gamma_w"] + params["gamma_b"]) + 30.0
    beta = 0.25 * (style @ params["beta_w"] + params["beta_b"])
    bshape = (style.shape[0],) + (1,) * (x.ndim - 2) + (params["w"].shape[1],)
    return jnp.sin(gamma.reshape(bshape) * out + beta.reshape(bshape))


if __name__ == "__main__":
    key = jax.random.PRNGKey(0)
    kx, ks, kp = jax.random.split(key, 3)

    # Small shapes consistent with the module: 5-D input, out_channel == style_dim
    # (required by the .view(batch, 1, 1, 1, features) in the PyTorch forward).
    B, n1, n2, n3 = 2, 4, 8, 15          # N = 480 points per batch (exercises padding)
    IN_CH = 256                          # is_first=False hidden-layer case
    OUT_CH = 256
    STYLE_DIM = 256

    x = jax.random.uniform(kx, (B, n1, n2, n3, IN_CH), jnp.float32,
                           minval=-1.0, maxval=1.0)
    style = jax.random.normal(ks, (B, STYLE_DIM), jnp.float32)
    params = init_params(kp, IN_CH, OUT_CH, STYLE_DIM, is_first=False)

    out = film_siren_forward(x, style, params, tn=256)
    out = jax.block_until_ready(out)

    ref = reference_forward(x, style, params)
    assert out.shape == (B, n1, n2, n3, OUT_CH), out.shape
    max_err = jnp.max(jnp.abs(out - ref))
    assert jnp.allclose(out, ref, rtol=3e-2, atol=3e-2), f"max err {max_err}"
    print("KERNEL_OK")
</pallas_src>

<mosaic_0001>
module attributes {stable_mosaic.version = 11 : i64} {
  func.func @film_siren_kernel(%arg0: i32, %arg1: i32, %arg2: memref<1x256x256xbf16, #tpu.memory_space<vmem>>, %arg3: memref<1x1x256xf32, #tpu.memory_space<vmem>>, %arg4: memref<1x1x256xf32, #tpu.memory_space<vmem>>, %arg5: memref<256x256xbf16, #tpu.memory_space<vmem>>, %arg6: memref<1x256xf32, #tpu.memory_space<vmem>>, %arg7: memref<1x256x256xf32, #tpu.memory_space<vmem>>) attributes {dimension_semantics = [#tpu.dimension_semantics<parallel>, #tpu.dimension_semantics<parallel>], iteration_bounds = array<i64: 2, 2>, scalar_prefetch = 0 : i64, scratch_operands = 0 : i64, tpu.core_type = #tpu.core_type<tc>, window_params = [{transform_indices = @transform_0, window_bounds = array<i64: 1, 256, 256>}, {transform_indices = @transform_1, window_bounds = array<i64: 1, 1, 256>}, {transform_indices = @transform_2, window_bounds = array<i64: 1, 1, 256>}, {pipeline_mode = #tpu.pipeline_mode<synchronous>, transform_indices = @transform_3, window_bounds = array<i64: 256, 256>}, {pipeline_mode = #tpu.pipeline_mode<synchronous>, transform_indices = @transform_4, window_bounds = array<i64: 1, 256>}, {transform_indices = @transform_5, window_bounds = array<i64: 1, 256, 256>}]} {
    %c0 = arith.constant 0 : index
    %c0_0 = arith.constant 0 : index
    %c0_1 = arith.constant 0 : index
    %0 = vector.load %arg2[%c0, %c0_0, %c0_1] : memref<1x256x256xbf16, #tpu.memory_space<vmem>>, vector<1x256x256xbf16>
    %1 = vector.shape_cast %0 : vector<1x256x256xbf16> to vector<256x256xbf16>
    %c0_2 = arith.constant 0 : index
    %c0_3 = arith.constant 0 : index
    %2 = vector.load %arg5[%c0_2, %c0_3] : memref<256x256xbf16, #tpu.memory_space<vmem>>, vector<256x256xbf16>
    %cst = arith.constant dense<0.000000e+00> : vector<256x256xf32>
    %3 = tpu.matmul %1, %2, %cst {dimension_numbers = #tpu.dot_dimension_numbers<[1], [0], [0], [1], [0, 0, 1, 1], [], []>} : vector<256x256xbf16>, vector<256x256xbf16>, vector<256x256xf32> -> vector<256x256xf32>
    %c0_4 = arith.constant 0 : index
    %c0_5 = arith.constant 0 : index
    %4 = vector.load %arg6[%c0_4, %c0_5] : memref<1x256xf32, #tpu.memory_space<vmem>>, vector<1x256xf32>
    %5 = vector.broadcast %4 : vector<1x256xf32> to vector<256x256xf32>
    %6 = arith.addf %3, %5 : vector<256x256xf32>
    %c0_6 = arith.constant 0 : index
    %c0_7 = arith.constant 0 : index
    %c0_8 = arith.constant 0 : index
    %7 = vector.load %arg3[%c0_6, %c0_7, %c0_8] : memref<1x1x256xf32, #tpu.memory_space<vmem>>, vector<1x1x256xf32>
    %8 = vector.shape_cast %7 : vector<1x1x256xf32> to vector<1x256xf32>
    %9 = vector.broadcast %8 : vector<1x256xf32> to vector<256x256xf32>
    %10 = arith.mulf %9, %6 : vector<256x256xf32>
    %c0_9 = arith.constant 0 : index
    %c0_10 = arith.constant 0 : index
    %c0_11 = arith.constant 0 : index
    %11 = vector.load %arg4[%c0_9, %c0_10, %c0_11] : memref<1x1x256xf32, #tpu.memory_space<vmem>>, vector<1x1x256xf32>
    %12 = vector.shape_cast %11 : vector<1x1x256xf32> to vector<1x256xf32>
    %13 = vector.broadcast %12 : vector<1x256xf32> to vector<256x256xf32>
    %14 = arith.addf %10, %13 : vector<256x256xf32>
    %15 = math.sin %14 : vector<256x256xf32>
    %c0_12 = arith.constant 0 : index
    %c0_13 = arith.constant 0 : index
    %c0_14 = arith.constant 0 : index
    %16 = vector.load %arg7[%c0_12, %c0_13, %c0_14] : memref<1x256x256xf32, #tpu.memory_space<vmem>>, vector<1x256x256xf32>
    %17 = vector.shape_cast %16 : vector<1x256x256xf32> to vector<256x256xf32>
    %18 = vector.shape_cast %15 : vector<256x256xf32> to vector<1x256x256xf32>
    tpu.vector_store %arg7[%c0_12, %c0_13, %c0_14], %18 {strides = array<i32>} : memref<1x256x256xf32, #tpu.memory_space<vmem>>, vector<1x256x256xf32>,
    return
  }
  func.func @transform_0(%arg0: i32, %arg1: i32) -> (i32, i32, i32) {
    %c0_i32 = arith.constant 0 : i32
    %c0_i32_0 = arith.constant 0 : i32
    return %arg0, %arg1, %c0_i32 : i32, i32, i32
  }
  func.func @transform_1(%arg0: i32, %arg1: i32) -> (i32, i32, i32) {
    %c0_i32 = arith.constant 0 : i32
    %c0_i32_0 = arith.constant 0 : i32
    %c0_i32_1 = arith.constant 0 : i32
    return %arg0, %c0_i32, %c0_i32_0 : i32, i32, i32
  }
  func.func @transform_2(%arg0: i32, %arg1: i32) -> (i32, i32, i32) {
    %c0_i32 = arith.constant 0 : i32
    %c0_i32_0 = arith.constant 0 : i32
    %c0_i32_1 = arith.constant 0 : i32
    return %arg0, %c0_i32, %c0_i32_0 : i32, i32, i32
  }
  func.func @transform_3(%arg0: i32, %arg1: i32) -> (i32, i32) {
    %c0_i32 = arith.constant 0 : i32
    %c0_i32_0 = arith.constant 0 : i32
    %c0_i32_1 = arith.constant 0 : i32
    return %c0_i32, %c0_i32_0 : i32, i32
  }
  func.func @transform_4(%arg0: i32, %arg1: i32) -> (i32, i32) {
    %c0_i32 = arith.constant 0 : i32
    %c0_i32_0 = arith.constant 0 : i32
    %c0_i32_1 = arith.constant 0 : i32
    return %c0_i32, %c0_i32_0 : i32, i32
  }
  func.func @transform_5(%arg0: i32, %arg1: i32) -> (i32, i32, i32) {
    %c0_i32 = arith.constant 0 : i32
    %c0_i32_0 = arith.constant 0 : i32
    return %arg0, %arg1, %c0_i32 : i32, i32, i32
  }
}

</mosaic_0001>

<bundles_post_ra>
// kernel: tpu_custom_call.1
= control target key start
LH: loop header
LB: loop body
LE: loop exit
PB: predicated region body
PF: predicated region fallthrough
CT: control target
= control target key end

     0   :  { %s15165_s0 = inlined_call_operand.hbm [shape: bf16[2,512,256], index: 0, kind: input, shape index: {}]   ;;  %s15166_s1 = inlined_call_operand.hbm [shape: f32[2,1,256], index: 1, kind: input, shape index: {}]   ;;  %s15167_s2 = inlined_call_operand.vmem [shape: f32[2,1,256], index: 2, kind: input, shape index: {}]   ;;  %s15168_s3 = inlined_call_operand.hbm [shape: bf16[256,256], index: 3, kind: input, shape index: {}]   ;;  %s15169_s4 = inlined_call_operand.vmem [shape: f32[1,256], index: 4, kind: input, shape index: {}]   ;;  %s15170_s5 = inlined_call_operand.hbm [shape: f32[2,512,256], index: 5, kind: output, shape index: {}]  }
   0x1   :  { %15186 = sst [smem:[#allocation19_spill]] %s15167_s2 }
   0x2   :  { %15187 = sst [smem:[#allocation20_spill]] %s15168_s3 }
   0x3   :  { %15188 = sst [smem:[#allocation21_spill]] %s15169_s4 }
   0x4   :  { %15189 = sst [smem:[#allocation22_spill]] %s15170_s5 }
   0x5   :  { %10 = vsyncpa [#allocation3], 0 }
   0x6   :  { %12 = vsyncpa [#allocation3 + $0x1], 0 }
   0x7   :  { %13 = vsyncpa [#allocation6], 0 }
   0x8   :  { %15 = vsyncpa [#allocation6 + $0x1], 0 }
   0x9   :  { %16 = vsyncpa [#allocation4], 0 }
   0xa   :  { %18 = vsyncpa [#allocation4 + $0x1], 0  ;;  %s9326_s18 = smov 0   ;;  %s9328_s19 = smov 0  }
   0xb   :  { %s9330_s20 = smov 0   ;;  %s9332_s21 = smov 0  }
   0xc   :  { %s9334_s22 = smov 0   ;;  %s9336_s23 = smov 0  }
   0xd   :  { %s9338_s24 = smov 0   ;;  %s9340_s25 = smov 0  }
   0xe   :  { %s9342_s26 = smov 0   ;;  %s9344_s27 = smov 0  }
   0xf   :  { %s9346_s28 = smov 0  }
  0x10 LB: > { %15190 = sst [smem:[#allocation13_spill]] %s9252_s21  ;;  %s9382_s29 = sadd.s32 4294967295, %s9280_s28   ;;  %s9280_s28 = sphi %s9346_s28, %s24_s28   ;;  %s9276_s27 = sphi %s9344_s27, %s15362_s27   ;;  %s9272_s26 = sphi %s9342_s26, %s15361_s26   ;;  %s9268_s25 = sphi %s9340_s25, %s15360_s25   ;;  %s9264_s24 = sphi %s9338_s24, %s15359_s24   ;;  %s9260_s23 = sphi %s9336_s23, %s15358_s23   ;;  %s9256_s22 = sphi %s9334_s22, %s15357_s22   ;;  %s9252_s21 = sphi %s9332_s21, %s15356_s21   ;;  %s9248_s20 = sphi %s9330_s20, %s15355_s20   ;;  %s9244_s19 = sphi %s9328_s19, %s15354_s19   ;;  %s9240_s18 = sphi %s9326_s18, %s15353_s18  }
  0x11   : > { %15191 = sst [smem:[#allocation14_spill]] %s9264_s24  ;;  %s7946_s30 = sadd.s32 4294967294, %s9280_s28  }
  0x12   : > { %p58_p0 = scmp.ne.s32.totalorder %s9256_s22, %s9252_s21  ;;  %p15171_p1 = scmp.eq.s32.totalorder %s9382_s29, 0 }
  0x13   : > { %p184_p3 = scmp.eq.s32.totalorder %s7946_s30, 3  ;;  %p7947_p5 = scmp.ge.s32.totalorder %s9280_s28, 1 }
  0x14   : > { %p9391_p4 = por %p15171_p1, %p58_p0  ;;  %p191_p7 = scmp.lt.s32.totalorder %s9280_s28, 5 }
  0x15   : > { %p9396_p6 = por %p184_p3, %p58_p0  ;;  %s9282_s9 = smov [#allocation7]  }
  0x16   : > { %s15192_s6 = scalar_select %p9391_p4, 1, 0 }
  0x17   : > { %s15193_s7 = scalar_select %p9396_p6, 1, 0 }
  0x18   : > { %p9401_p8 = pnand %p7947_p5, %p191_p7  ;;  %s203_s10 = sshll.u32 %s9282_s9, 4  ;;  %s204_s10 = int_to_ptr.vmem [resolvable:$true] %s203_s10 }
  0x19   : > { %15194 = sst [smem:[#allocation15_spill]] %s15193_s7  ;;  %s15197_s3 = sld [smem:[#allocation20_spill]] }
  0x1a   : > { %s15195_s8 = scalar_select %p9401_p8, 1, 0 }
  0x1b   : > { %p8592_p9 = pneg %p9401_p8 }
  0x1d   : > { %p9409_p10 = pnand %p8592_p9, %p15171_p1 }
  0x1f   : > { %s9062_s14 = scalar_lea.hbm %s15197_s3, 4096  ;;  %p9064_p12 = pneg %p9409_p10 }
  0x20   : > { %p9063_p11 = scmp.ne.s32.totalorder %s15197_s3, %s9062_s14  ;;  %p9069_p3 = scmp.lt.u32.totalorder %s9062_s14, %s15197_s3 }
  0x22   : > { %p9065_p13 = pnand %p9064_p12, %p9063_p11 }
  0x24   : > { %p9066_p0 = pneg %p9065_p13 }
  0x26   : > { %p9071_p5 = pnand %p9069_p3, %p9066_p0 }
  0x28   : > { %9074 = shalt.err (!%p9071_p5)
}
  0x29   : > { %s9075_s9 = scalar_lea.vmem %s204_s10, 4096  ;;  %p9083_p2 = scmp.lt.s32.totalorder %s204_s10, %s204_s10 }
  0x2a   : > { %p9076_p7 = scmp.ne.s32.totalorder %s204_s10, %s9075_s9  ;;  %p9084_p6 = scmp.lt.s32.totalorder %s9075_s9, %s9075_s9 }
  0x2c   : > { %p9078_p9 = pnand %p9076_p7, %p9064_p12  ;;  %p9085_p4 = por %p9084_p6, %p9083_p2 }
  0x2e   : > { %p9079_p1 = pneg %p9078_p9 }
  0x30   : > { %p9086_p8 = pnand %p9085_p4, %p9079_p1 }
  0x32   : > { %9089 = shalt.err (!%p9086_p8)
}
  0x33   : > { %s15174_s12 = smov 128   ;;  %s15175_s13 = smov 8  }
  0x34   : > { %8595 = dma.hbm_to_vmem [thread:$0]  (!%p9409_p10), %s15197_s3, 4096, %s204_s10, [#allocation6], %s15174_s12, %s15174_s12, %s15175_s13  }
  0x35   : > { %s33_s16 = sadd.s32 1, %s9272_s26  ;;  %s36_s17 = sadd.s32 1, %s9276_s27 }
  0x36   : > { %p34_p1 = scmp.ge.s32.totalorder %s33_s16, 2  ;;  %s45_s30 = sadd.s32 1, %s9260_s23 }
  0x37   : > { %p52_p2 = scmp.ne.s32.totalorder %s9260_s23, %s9256_s22  ;;  %p15184_p4 = scmp.eq.s32.totalorder %s9280_s28, 0 }
  0x38   : > { %s15364_s16 = smov (%p34_p1, %s33_s16), 0  ;;  %s15366_s17 = smov (!%p34_p1, %s36_s17), %s9276_s27 }
  0x39   : > { %15198 = sst [smem:[#allocation16_spill]] %s15364_s16  ;;  %s41_s11 = ssub.s32 %s9272_s26, %s15364_s16 }
  0x3a   : > { %p38_p6 = scmp.ge.s32.totalorder %s15366_s17, 2  ;;  %p15199_p8 = scmp.eq.s32.totalorder %s9382_s29, 3 }
  0x3b   : > { %p9451_p10 = por %p15184_p4, %p52_p2  ;;  %p15183_p12 = scmp.lt.s32.totalorder %s9280_s28, 4 }
  0x3c   : > { %p9445_p11 = por %p15199_p8, %p52_p2  ;;  %s15368_s17 = smov (%p38_p6, %s15366_s17), 0 }
  0x3d   : > { %15203 = sst [smem:[#allocation18_spill]] %s15368_s17  ;;  %s220_s14 = sand.u32 1, %s9260_s23  }
  0x3e   : > { %s15200_s9 = scalar_select %p9445_p11, 1, 0 }
  0x3f   : > { %s8291_s15 = sshll.u32 %s9272_s26, 6  ;;  %s9462_s12 = ssub.s32 %s9276_s27, %s15368_s17 }
  0x40   : > { %15201 = sst [smem:[#allocation17_spill]] %s15200_s9  ;;  %s42_s13 = sor.u32 %s41_s11, %s9462_s12 }
  0x41   : > { %p43_p0 = scmp.eq.s32.totalorder %s42_s13, 0  ;;  %s7950_s3 = sshll.u32 %s220_s14, 8 }
  0x42   : > { %s7953_s16 = sshll.u32 %s9276_s27, 7  ;;  %s224_s5 = scalar_lea.vmem [#allocation2], %s7950_s3 }
  0x43   : > { %s9468_s7 = scalar_select %p43_p0, %s9260_s23, %s45_s30  }
  0x44   : > { %s231_s21 = sadd.s32 %s8291_s15, %s7953_s16  ;;  %s234_s9 = sshll.u32 %s224_s5, 4  ;;  %s9470_s9 = int_to_ptr.vmem [resolvable:$true] %s234_s9 }
  0x45   : > { %s7954_s24 = sshll.u32 %s231_s21, 6  ;;  %p9481_p3 = pnand %p15183_p12, %p9451_p10 }
  0x46   : > { %s9475_s17 = scalar_lea.hbm %s15165_s0, %s7954_s24  ;;  %s9485_s3 = scalar_lea.sflag [#allocation3], %s220_s14 }
  0x47   : > { %s9090_s5 = scalar_lea.hbm %s9475_s17, 4096  ;;  %p9092_p7 = pneg %p9481_p3 }
  0x48   : > { %p9091_p5 = scmp.ne.s32.totalorder %s9475_s17, %s9090_s5  ;;  %s9095_s21 = scalar_lea.hbm %s15165_s0, 16384 }
  0x49   : > { %p9096_p2 = scmp.lt.u32.totalorder %s9475_s17, %s15165_s0  ;;  %p9097_p6 = scmp.lt.u32.totalorder %s9095_s21, %s9090_s5 }
  0x4a   : > { %p9093_p9 = pnand %p9092_p7, %p9091_p5  ;;  %p9099_p10 = scmp.lt.u32.totalorder %s9090_s5, %s9475_s17 }
  0x4b   : > { %p9098_p8 = por %p9097_p6, %p9096_p2 }
  0x4c   : > { %p9094_p1 = pneg %p9093_p9 }
  0x4d   : > { %p9100_p0 = por %p9099_p10, %p9098_p8 }
  0x4f   : > { %p9101_p12 = pnand %p9100_p0, %p9094_p1 }
  0x51   : > { %9104 = shalt.err (!%p9101_p12)
}
  0x52   : > { %s9105_s30 = scalar_lea.vmem %s9470_s9, 4096  ;;  %s9285_s11 = smov [#allocation2]  }
  0x53   : > { %p9106_p5 = scmp.ne.s32.totalorder %s9470_s9, %s9105_s30  ;;  %s9110_s10 = sshll.u32 %s9285_s11, 4  ;;  %s9111_s10 = int_to_ptr.vmem [resolvable:$false] %s9110_s10 }
  0x54   : > { %s9112_s14 = scalar_lea.vmem %s9111_s10, 8192  ;;  %p9113_p13 = scmp.lt.s32.totalorder %s9470_s9, %s9111_s10 }
  0x55   : > { %p9108_p9 = pnand %p9106_p5, %p9092_p7  ;;  %p9114_p2 = scmp.lt.s32.totalorder %s9112_s14, %s9105_s30 }
  0x57   : > { %p9109_p4 = pneg %p9108_p9  ;;  %p9115_p6 = por %p9114_p2, %p9113_p13 }
  0x59   : > { %p9116_p8 = pnand %p9115_p6, %p9109_p4 }
  0x5b   : > { %9119 = shalt.err (!%p9116_p8)
}
  0x5c   : > { %s15205_s15 = smov 8   ;;  %s15206_s5 = smov 128  }
  0x5d   : > { %8599 = dma.hbm_to_vmem [thread:$0]  (!%p9481_p3), %s9475_s17, 4096, %s9470_s9, %s9485_s3, %s15206_s5, %s15206_s5, %s15205_s15  }
  0x5e   : > { %s71_s13 = sadd.s32 1, %s9248_s20  ;;  %p15207_p4 = scmp.eq.s32.totalorder %s9462_s12, 0 }
  0x5f   : > { %p78_p12 = scmp.ne.s32.totalorder %s9248_s20, %s9244_s19  ;;  %p84_p13 = scmp.ne.s32.totalorder %s9244_s19, %s9240_s18 }
  0x60   : > { %s9520_s2 = scalar_select %p15207_p4, %s9248_s20, %s71_s13  }
  0x61   : > { %s244_s4 = sand.u32 1, %s9280_s28   ;;  %s246_s21 = sand.u32 1, %s9248_s20  }
  0x62   : > { %p15208_p7 = scmp.eq.s32.totalorder %s9280_s28, 0  ;;  %p15209_p10 = scmp.eq.s32.totalorder %s9382_s29, 0 }
  0x63   : > { %s7955_s16 = sshll.u32 %s246_s21, 1  ;;  %s8292_s30 = sshll.u32 %s9276_s27, 5 }
  0x64   : > { %p80_p1 = por %p78_p12, %p15208_p7  ;;  %p9532_p0 = por %p84_p13, %p15209_p10 }
  0x65   : > { %s9540_s17 = scalar_lea.hbm %s15166_s1, %s8292_s30  ;;  %s248_s18 = scalar_lea.vmem [#allocation5], %s7955_s16 }
  0x66   : > { %s256_s12 = sshll.u32 %s248_s18, 4  ;;  %p15211_p3 = scmp.lt.s32.totalorder %s9280_s28, 4  ;;  %s9542_s12 = int_to_ptr.vmem [resolvable:$true] %s256_s12 }
  0x67   : > { %s245_s3 = scalar_lea.sflag [#allocation6], %s244_s4  ;;  %s9120_s14 = scalar_lea.hbm %s9540_s17, 32 }
  0x68   : > { %p9546_p5 = pnand %p15211_p3, %p80_p1  ;;  %p9121_p9 = scmp.ne.s32.totalorder %s9540_s17, %s9120_s14 }
  0x69   : > { %s9125_s13 = scalar_lea.hbm %s15166_s1, 64  ;;  %p9126_p4 = scmp.lt.u32.totalorder %s9540_s17, %s15166_s1 }
  0x6a   : > { %p9122_p2 = pneg %p9546_p5  ;;  %p9127_p12 = scmp.lt.u32.totalorder %s9125_s13, %s9120_s14 }
  0x6b   : > { %p9129_p7 = scmp.lt.u32.totalorder %s9120_s14, %s9540_s17 }
  0x6c   : > { %p9123_p6 = pnand %p9122_p2, %p9121_p9  ;;  %p9128_p13 = por %p9127_p12, %p9126_p4 }
  0x6e   : > { %p9124_p8 = pneg %p9123_p6  ;;  %p9130_p1 = por %p9129_p7, %p9128_p13 }
  0x70   : > { %p9131_p10 = pnand %p9130_p1, %p9124_p8 }
  0x72   : > { %9134 = shalt.err (!%p9131_p10)
}
  0x73   : > { %s9135_s4 = scalar_lea.vmem %s9542_s12, 32  ;;  %s9286_s30 = smov [#allocation5]  }
  0x74   : > { %p9136_p3 = scmp.ne.s32.totalorder %s9542_s12, %s9135_s4  ;;  %s9140_s11 = sshll.u32 %s9286_s30, 4  ;;  %s9141_s11 = int_to_ptr.vmem [resolvable:$false] %s9140_s11 }
  0x75   : > { %s9142_s10 = scalar_lea.vmem %s9141_s11, 64  ;;  %p9143_p11 = scmp.lt.s32.totalorder %s9542_s12, %s9141_s11 }
  0x76   : > { %p9138_p9 = pnand %p9136_p3, %p9122_p2  ;;  %p9144_p4 = scmp.lt.s32.totalorder %s9142_s10, %s9135_s4 }
  0x78   : > { %p9139_p6 = pneg %p9138_p9  ;;  %p9145_p12 = por %p9144_p4, %p9143_p11 }
  0x7a   : > { %p9146_p13 = pnand %p9145_p12, %p9139_p6 }
  0x7c   : > { %9149 = shalt.err (!%p9146_p13)
}
  0x7d   : > { %8602 = dma.hbm_to_vmem [thread:$0]  (!%p9546_p5), %s9540_s17, 32, %s9542_s12, %s245_s3  }
  0x7e   : > { %p15213_p8 = scmp.ne.s32.totalorder %s15195_s8, 0 }
  0x7f   : > { %s9578_s18 = sand.u32 (!%p15213_p8), 1, %s9256_s22   ;;  %p15214_p11 = scmp.ne.s32.totalorder (!%p15213_p8), %s15192_s6, 0 }
  0x80   : > { %272 = sbr.rel (%p15213_p8) target bundleno = 2090 (0x82a), region = 40  ;;  %s7959_s14 = sshll.u32 (!%p15213_p8), %s9578_s18, 8 }
  0x81   : > { %s275_s15 = scalar_lea.sflag (!%p15213_p8), [#allocation3], %s9578_s18  ;;  %s9582_s5 = scalar_lea.vmem (!%p15213_p8), [#allocation2], %s7959_s14 }
  0x87   : > { %9223 = dma.done.wait (%p15214_p11), %s275_s15, 4096  }
  0x88   : > { %9225 = vsyncadd (%p15214_p11), %s275_s15, 4294963200  ;;  %s283_s8 = sand.u32 1, %s9382_s29   ;;  %s285_s17 = sand.u32 1, %s9244_s19  }
  0x89   : > { %s9590_s12 = sshll.u32 %s285_s17, 1  ;;  %s284_s9 = scalar_lea.sflag [#allocation6], %s283_s8 }
  0x8a   : > { %s287_s3 = scalar_lea.vmem [#allocation5], %s9590_s12 }
  0x8b   : > { %9227 = dma.done.wait (%p9532_p0), %s284_s9, 32  }
  0x8c   : > { %9229 = vsyncadd (%p9532_p0), %s284_s9, 4294967264  ;;  %p15215_p5 = scmp.eq.s32.totalorder %s9382_s29, 0 }
  0x8e   : > { %9231 = dma.done.wait (%p15215_p5), [#allocation6], 4096   ;;  %p15216_p2 = pmov %p15215_p5 }
  0x8f   : > { %v8710_v0 = vld [vmem:[#allocation7 + $0x4] ss:$8 sps:$4 sm:$0xff]   ;;  %v8712_v1 = vld [vmem:[#allocation7] ss:$8 sps:$4 sm:$0xff]   ;;  %v8713_v2 = vld [vmem:[#allocation7 + $0x14] ss:$8 sps:$4 sm:$0xff]  }
  0x90   : > { %9233 = vsyncadd (%p15216_p2), [#allocation6], 4294963200  ;;  %729 = vmatprep.subr.bf16.mxu0 %v8710_v0  ;;  %8294 = vmatprep.subr.bf16.mxu1 %v8710_v0  ;;  %v8715_v3 = vld [vmem:[#allocation7 + $0x10] ss:$8 sps:$4 sm:$0xff]   ;;  %v8716_v4 = vld [vmem:[#allocation7 + $0x24] ss:$8 sps:$4 sm:$0xff]   ;;  %v399_v0 = vlaneseq }
  0x91   : > { %730 = vmatpush1.bf16.msra.mxu0 %v8712_v1  ;;  %8310 = vmatpush1.bf16.msra.mxu1 %v8712_v1  ;;  %v8718_v5 = vld [vmem:[#allocation7 + $0x20] ss:$8 sps:$4 sm:$0xff]   ;;  %v8719_v6 = vld [vmem:[#allocation7 + $0x34] ss:$8 sps:$4 sm:$0xff]   ;;  %v8721_v7 = vld [vmem:[#allocation7 + $0x30] ss:$8 sps:$4 sm:$0xff]  }
  0x92   : > { %731 = vmatprep.subr.bf16.mxu0 %v8713_v2  ;;  %8295 = vmatprep.subr.bf16.mxu1 %v8713_v2  ;;  %v8722_v8 = vld [vmem:[#allocation7 + $0x44] ss:$8 sps:$4 sm:$0xff]   ;;  %v8724_v9 = vld [vmem:[#allocation7 + $0x40] ss:$8 sps:$4 sm:$0xff]   ;;  %v8725_v10 = vld [vmem:[#allocation7 + $0x54] ss:$8 sps:$4 sm:$0xff]  }
  0x93   : > { %v8727_v11 = vld [vmem:[#allocation7 + $0x50] ss:$8 sps:$4 sm:$0xff]   ;;  %v8728_v12 = vld [vmem:[#allocation7 + $0x64] ss:$8 sps:$4 sm:$0xff]   ;;  %v8760_v13 = vld [vmem:[%s9582_s5 + $0x4] ss:$8 sps:$4 sm:$0xff]  }
  0x94   : > { %v8730_v14 = vld [vmem:[#allocation7 + $0x60] ss:$8 sps:$4 sm:$0xff]   ;;  %v8731_v16 = vld [vmem:[#allocation7 + $0x74] ss:$8 sps:$4 sm:$0xff]   ;;  %761 = vmatprep.mubr.bf16.mxu0 %v8760_v13  ;;  %v8733_v17 = vld [vmem:[#allocation7 + $0x70] ss:$8 sps:$4 sm:$0xff]  }
  0x95   : > { %732 = vmatpush1.bf16.msra.mxu0 %v8715_v3  ;;  %8311 = vmatpush1.bf16.msra.mxu1 %v8715_v3  ;;  %v8763_v15 = vld [vmem:[%s9582_s5 + $0x84] ss:$8 sps:$4 sm:$0xff]   ;;  %v8734_v18 = vld [vmem:[#allocation7 + $0x84] ss:$8 sps:$4 sm:$0xff]   ;;  %v8737_v20 = vld [vmem:[#allocation7 + $0x94] ss:$8 sps:$4 sm:$0xff]  }
  0x96   : > { %733 = vmatprep.subr.bf16.mxu0 %v8716_v4  ;;  %8296 = vmatprep.subr.bf16.mxu1 %v8716_v4  ;;  %v8736_v19 = vld [vmem:[#allocation7 + $0x80] ss:$8 sps:$4 sm:$0xff]   ;;  %v8739_v21 = vld [vmem:[#allocation7 + $0x90] ss:$8 sps:$4 sm:$0xff]   ;;  %v8740_v22 = vld [vmem:[#allocation7 + $0xa4] ss:$8 sps:$4 sm:$0xff]  }
  0x97   : > { %841 = vmatprep.mubr.bf16.mxu1 %v8763_v15  ;;  %v8742_v23 = vld [vmem:[#allocation7 + $0xa0] ss:$8 sps:$4 sm:$0xff]   ;;  %v8743_v24 = vld [vmem:[#allocation7 + $0xb4] ss:$8 sps:$4 sm:$0xff]   ;;  %v8745_v25 = vld [vmem:[#allocation7 + $0xb0] ss:$8 sps:$4 sm:$0xff]  }
  0x98   : > { %v8746_v26 = vld [vmem:[#allocation7 + $0xc4] ss:$8 sps:$4 sm:$0xff]   ;;  %v8748_v27 = vld [vmem:[#allocation7 + $0xc0] ss:$8 sps:$4 sm:$0xff]   ;;  %v8749_v28 = vld [vmem:[#allocation7 + $0xd4] ss:$8 sps:$4 sm:$0xff]  }
  0x99   : > { %734 = vmatpush1.bf16.msra.mxu0 %v8718_v5  ;;  %8312 = vmatpush1.bf16.msra.mxu1 %v8718_v5  ;;  %v8751_v29 = vld [vmem:[#allocation7 + $0xd0] ss:$8 sps:$4 sm:$0xff]   ;;  %v8752_v30 = vld [vmem:[#allocation7 + $0xe4] ss:$8 sps:$4 sm:$0xff]   ;;  %v8754_v31 = vld [vmem:[#allocation7 + $0xe0] ss:$8 sps:$4 sm:$0xff]  }
  0x9a   : > { %735 = vmatprep.subr.bf16.mxu0 %v8719_v6  ;;  %8297 = vmatprep.subr.bf16.mxu1 %v8719_v6  ;;  %v8755_v32 = vld [vmem:[#allocation7 + $0xf4] ss:$8 sps:$4 sm:$0xff]   ;;  %v8757_v33 = vld [vmem:[#allocation7 + $0xf0] ss:$8 sps:$4 sm:$0xff]   ;;  %v8770_v40 = vld [vmem:[%s9582_s5 + $0x24] ss:$8 sps:$4 sm:$0xff]  }
  0x9b   : > { %v8758_v34 = vld [vmem:[%s9582_s5] ss:$8 sps:$4 sm:$0xff]   ;;  %v8764_v36 = vld [vmem:[%s9582_s5 + $0x14] ss:$8 sps:$4 sm:$0xff]   ;;  %v8768_v38 = vld [vmem:[%s9582_s5 + $0x10] ss:$8 sps:$4 sm:$0xff]  }
  0x9c   : > { %v8761_v35 = vld [vmem:[%s9582_s5 + $0x80] ss:$8 sps:$4 sm:$0xff]   ;;  %v8766_v37 = vld [vmem:[%s9582_s5 + $0x94] ss:$8 sps:$4 sm:$0xff]   ;;  %v8769_v39 = vld [vmem:[%s9582_s5 + $0x90] ss:$8 sps:$4 sm:$0xff]  }
  0x9d   : > { %736 = vmatpush1.bf16.msra.mxu0 %v8721_v7  ;;  %8313 = vmatpush1.bf16.msra.mxu1 %v8721_v7  ;;  %v8772_v41 = vld [vmem:[%s9582_s5 + $0xa4] ss:$8 sps:$4 sm:$0xff]   ;;  %v8774_v42 = vld [vmem:[%s9582_s5 + $0x20] ss:$8 sps:$4 sm:$0xff]   ;;  %v8776_v44 = vld [vmem:[%s9582_s5 + $0x34] ss:$8 sps:$4 sm:$0xff]  }
  0x9e   : > { %737 = vmatprep.subr.bf16.mxu0 %v8722_v8  ;;  %8298 = vmatprep.subr.bf16.mxu1 %v8722_v8  ;;  %v8775_v43 = vld [vmem:[%s9582_s5 + $0xa0] ss:$8 sps:$4 sm:$0xff]   ;;  %v8778_v45 = vld [vmem:[%s9582_s5 + $0xb4] ss:$8 sps:$4 sm:$0xff]   ;;  %v8780_v46 = vld [vmem:[%s9582_s5 + $0x30] ss:$8 sps:$4 sm:$0xff]  }
  0x9f   : > { %v8781_v47 = vld [vmem:[%s9582_s5 + $0xb0] ss:$8 sps:$4 sm:$0xff]   ;;  %v8782_v48 = vld [vmem:[%s9582_s5 + $0x44] ss:$8 sps:$4 sm:$0xff]   ;;  %v8786_v50 = vld [vmem:[%s9582_s5 + $0x40] ss:$8 sps:$4 sm:$0xff]  }
  0xa0   : > { %v8784_v49 = vld [vmem:[%s9582_s5 + $0xc4] ss:$8 sps:$4 sm:$0xff]   ;;  %v8787_v51 = vld [vmem:[%s9582_s5 + $0xc0] ss:$8 sps:$4 sm:$0xff]   ;;  %v8788_v52 = vld [vmem:[%s9582_s5 + $0x54] ss:$8 sps:$4 sm:$0xff]  }
  0xa1   : > { %738 = vmatpush1.bf16.msra.mxu0 %v8724_v9  ;;  %8314 = vmatpush1.bf16.msra.mxu1 %v8724_v9  ;;  %v8790_v53 = vld [vmem:[%s9582_s5 + $0xd4] ss:$8 sps:$4 sm:$0xff]   ;;  %v8792_v54 = vld [vmem:[%s9582_s5 + $0x50] ss:$8 sps:$4 sm:$0xff]   ;;  %v8794_v56 = vld [vmem:[%s9582_s5 + $0x64] ss:$8 sps:$4 sm:$0xff]  }
  0xa2   : > { %739 = vmatprep.subr.bf16.mxu0 %v8725_v10  ;;  %8299 = vmatprep.subr.bf16.mxu1 %v8725_v10  ;;  %v8793_v55 = vld [vmem:[%s9582_s5 + $0xd0] ss:$8 sps:$4 sm:$0xff]   ;;  %v8796_v57 = vld [vmem:[%s9582_s5 + $0xe4] ss:$8 sps:$4 sm:$0xff]   ;;  %v8798_v58 = vld [vmem:[%s9582_s5 + $0x60] ss:$8 sps:$4 sm:$0xff]  }
  0xa3   : > { %v8799_v59 = vld [vmem:[%s9582_s5 + $0xe0] ss:$8 sps:$4 sm:$0xff]   ;;  %v8800_v60 = vld [vmem:[%s9582_s5 + $0x74] ss:$8 sps:$4 sm:$0xff]   ;;  %v8804_v62 = vld [vmem:[%s9582_s5 + $0x70] ss:$8 sps:$4 sm:$0xff]  }
  0xa4   : > { %v8802_v61 = vld [vmem:[%s9582_s5 + $0xf4] ss:$8 sps:$4 sm:$0xff]   ;;  %v8805_v63 = vld [vmem:[%s9582_s5 + $0xf0] ss:$8 sps:$4 sm:$0xff]   ;;  %p328_p0 = scmp.lt.s32.totalorder %s9268_s25, 1  ;;  %v400_v1 = vshrl.u32 %v399_v0, 7 }
  0xa5   : > { %740 = vmatpush1.bf16.msra.mxu0 %v8727_v11  ;;  %8315 = vmatpush1.bf16.msra.mxu1 %v8727_v11  ;;  %s15217_s21 = sld [smem:[#allocation21_spill]]  ;;  %s15218_s30 = sld [smem:[#allocation19_spill]]  ;;  %v922_v5 = vld [vmem:[%s287_s3] sm:$0x3] }
  0xa6   : > { %741 = vmatprep.subr.bf16.mxu0 %v8728_v12  ;;  %8300 = vmatprep.subr.bf16.mxu1 %v8728_v12  ;;  %s329_s29 = scalar_select %p328_p0, %s9268_s25, 1  ;;  %v401_v2 = vsub.s32 0, %v400_v1  ;;  %v405_v4 = vsub.s32 1, %v400_v1  ;;  %v9288_v1 = vmov 2475754826  }
  0xa7   : > { %s7962_s10 = sshll.u32 %s9578_s18, 9  ;;  %s15343_s15 = sld [smem:[#allocation14_spill]] }
  0xa8   : > { %s7963_s6 = sshll.u32 %s329_s29, 1  ;;  %v9647_v9 = vrot.slane %v922_v5, %v401_v2  ;;  %v9649_v12 = vrot.slane %v922_v5, %v405_v4  ;;  %v9290_v5 = vmov 2102212464   ;;  %s10000_s14 = scalar_lea.vmem [#allocation8], %s7962_s10 }
  0xa9   : > { %742 = vmatpush1.bf16.msra.mxu0 %v8730_v14  ;;  %8316 = vmatpush1.bf16.msra.mxu1 %v8730_v14  ;;  %s8287_s8 = sshll.u32 %s9268_s25, 7  ;;  %s7811_s9 = sshll.u32 %s10000_s14, 4  ;;  %s15100_s9 = int_to_ptr.vmem [resolvable:$true] %s7811_s9 }
  0xaa   : > { %743 = vmatprep.subr.bf16.mxu0 %v8731_v16  ;;  %8301 = vmatprep.subr.bf16.mxu1 %v8731_v16  ;;  %s15344_s3 = sld [smem:[#allocation17_spill]]  ;;  %s15345_s24 = sld [smem:[#allocation22_spill]] }
  0xab   : > { %v397_v3 = vld [vmem:[%s15217_s21] sm:$0x3]  ;;  %s331_s11 = scalar_lea.vmem %s15218_s30, %s7963_s6  ;;  %s7795_s21 = scalar_lea.sflag [#allocation4], %s9578_s18 }
  0xac   : > { %v9643_v6 = vrot.slane %v397_v3, %v401_v2  ;;  %v998_v7 = vld [vmem:[%s331_s11] sm:$0x3]  ;;  %v9645_v8 = vrot.slane %v397_v3, %v405_v4  ;;  %v9289_v3 = vmov 2131351028   ;;  %s9150_s16 = scalar_lea.vmem %s15100_s9, 8192  ;;  %s9293_s4 = smov [#allocation8]  }
  0xad   : > { %744 = vmatpush1.bf16.msra.mxu0 %v8733_v17  ;;  %8317 = vmatpush1.bf16.msra.mxu1 %v8733_v17  ;;  %v9652_v14 = vrot.slane %v998_v7, %v401_v2  ;;  %s8293_s5 = sshll.u32 %s15343_s15, 6  ;;  %p9151_p7 = scmp.ne.s32.totalorder %s15100_s9, %s9150_s16 }
  0xae   : > { %745 = vmatprep.subr.bf16.mxu0 %v8734_v18  ;;  %8302 = vmatprep.subr.bf16.mxu1 %v8734_v18  ;;  %s7808_s17 = sadd.s32 %s8293_s5, %s8287_s8  ;;  %s9154_s30 = sshll.u32 %s9293_s4, 4  ;;  %s9155_s30 = int_to_ptr.vmem [resolvable:$false] %s9154_s30 }
  0xaf   : > { %s8288_s12 = sshll.u32 %s7808_s17, 7  ;;  %s9156_s11 = scalar_lea.vmem %s9155_s30, 16384 }
  0xb0   : > { %s15346_s13 = smov %s15345_s24  ;;  %s15098_s25 = scalar_lea.hbm %s15345_s24, %s8288_s12 }
  0xb1   : > { %746 = vmatpush1.bf16.msra.mxu0 %v8736_v19  ;;  %8318 = vmatpush1.bf16.msra.mxu1 %v8736_v19  ;;  %v9656_v19 = vrot.slane %v998_v7, %v405_v4  ;;  %p15347_p1 = scmp.ne.s32.totalorder %s15344_s3, 0  ;;  %p9157_p9 = scmp.lt.s32.totalorder %s15100_s9, %s9155_s30 }
  0xb2   : > { %747 = vmatprep.subr.bf16.mxu0 %v8737_v20  ;;  %8303 = vmatprep.subr.bf16.mxu1 %v8737_v20  ;;  %p9158_p6 = scmp.lt.s32.totalorder %s9156_s11, %s9150_s16 }
  0xb3   : > { %p9152_p10 = pnand %p9151_p7, %p15347_p1 }
  0xb4   : > { %p9159_p4 = por %p9158_p6, %p9157_p9 }
  0xb5   : > { %748 = vmatpush1.bf16.msra.mxu0 %v8739_v21  ;;  %8319 = vmatpush1.bf16.msra.mxu1 %v8739_v21  ;;  %p9153_p3 = pneg %p9152_p10 }
  0xb6   : > { %749 = vmatprep.subr.bf16.mxu0 %v8740_v22  ;;  %8304 = vmatprep.subr.bf16.mxu1 %v8740_v22 }
  0xb7   : > { %p9160_p12 = pnand %p9159_p4, %p9153_p3 }
  0xb9   : > { %750 = vmatpush1.bf16.msra.mxu0 %v8742_v23  ;;  %8320 = vmatpush1.bf16.msra.mxu1 %v8742_v23 }
  0xba   : > { %751 = vmatprep.subr.bf16.mxu0 %v8743_v24  ;;  %8305 = vmatprep.subr.bf16.mxu1 %v8743_v24 }
  0xbd   : > { %752 = vmatpush1.bf16.msra.mxu0 %v8745_v25  ;;  %8321 = vmatpush1.bf16.msra.mxu1 %v8745_v25 }
  0xbe   : > { %753 = vmatprep.subr.bf16.mxu0 %v8746_v26  ;;  %8306 = vmatprep.subr.bf16.mxu1 %v8746_v26 }
  0xc1   : > { %754 = vmatpush1.bf16.msra.mxu0 %v8748_v27  ;;  %8322 = vmatpush1.bf16.msra.mxu1 %v8748_v27 }
  0xc2   : > { %755 = vmatprep.subr.bf16.mxu0 %v8749_v28  ;;  %8307 = vmatprep.subr.bf16.mxu1 %v8749_v28 }
  0xc5   : > { %756 = vmatpush1.bf16.msra.mxu0 %v8751_v29  ;;  %8323 = vmatpush1.bf16.msra.mxu1 %v8751_v29 }
  0xc6   : > { %757 = vmatprep.subr.bf16.mxu0 %v8752_v30  ;;  %8308 = vmatprep.subr.bf16.mxu1 %v8752_v30 }
  0xc9   : > { %758 = vmatpush1.bf16.msra.mxu0 %v8754_v31  ;;  %8324 = vmatpush1.bf16.msra.mxu1 %v8754_v31 }
  0xca   : > { %759 = vmatprep.subr.bf16.mxu0 %v8755_v32  ;;  %8309 = vmatprep.subr.bf16.mxu1 %v8755_v32 }
  0xcd   : > { %760 = vmatpush1.bf16.msra.mxu0 %v8757_v33  ;;  %8325 = vmatpush1.bf16.msra.mxu1 %v8757_v33 }
  0xd0   : > { %762 = vmatmul.mubr.bf16.vlgmr.msra.gmra.mrb[0].mxu0 %v8758_v34  ;;  %842 = vmatmul.mubr.bf16.vlgmr.msra.gmra.mrb[0].mxu1 %v8761_v35 }
  0xd1   : > { %771 = vmatprep.mubr.bf16.mxu0 %v8764_v36  ;;  %851 = vmatprep.mubr.bf16.mxu1 %v8766_v37 }
  0xd8   : > { %772 = vmatmul.mubr.bf16.gmra.mrb[4].mxu0 %v8768_v38  ;;  %852 = vmatmul.mubr.bf16.gmra.mrb[4].mxu1 %v8769_v39 }
  0xd9   : > { %781 = vmatprep.mubr.bf16.mxu0 %v8770_v40  ;;  %861 = vmatprep.mubr.bf16.mxu1 %v8772_v41 }
  0xe0   : > { %782 = vmatmul.mubr.bf16.gmra.mrb[8].mxu0 %v8774_v42  ;;  %862 = vmatmul.mubr.bf16.gmra.mrb[8].mxu1 %v8775_v43 }
  0xe1   : > { %791 = vmatprep.mubr.bf16.mxu0 %v8776_v44  ;;  %871 = vmatprep.mubr.bf16.mxu1 %v8778_v45 }
  0xe8   : > { %792 = vmatmul.mubr.bf16.gmra.mrb[12].mxu0 %v8780_v46  ;;  %872 = vmatmul.mubr.bf16.gmra.mrb[12].mxu1 %v8781_v47 }
  0xe9   : > { %801 = vmatprep.mubr.bf16.mxu0 %v8782_v48  ;;  %881 = vmatprep.mubr.bf16.mxu1 %v8784_v49 }
  0xf0   : > { %802 = vmatmul.mubr.bf16.gmra.mrb[16].mxu0 %v8786_v50  ;;  %882 = vmatmul.mubr.bf16.gmra.mrb[16].mxu1 %v8787_v51 }
  0xf1   : > { %811 = vmatprep.mubr.bf16.mxu0 %v8788_v52  ;;  %891 = vmatprep.mubr.bf16.mxu1 %v8790_v53 }
  0xf8   : > { %812 = vmatmul.mubr.bf16.gmra.mrb[20].mxu0 %v8792_v54  ;;  %892 = vmatmul.mubr.bf16.gmra.mrb[20].mxu1 %v8793_v55 }
  0xf9   : > { %821 = vmatprep.mubr.bf16.mxu0 %v8794_v56  ;;  %901 = vmatprep.mubr.bf16.mxu1 %v8796_v57 }
 0x100   : > { %822 = vmatmul.mubr.bf16.gmra.mrb[24].mxu0 %v8798_v58  ;;  %902 = vmatmul.mubr.bf16.gmra.mrb[24].mxu1 %v8799_v59 }
 0x101   : > { %831 = vmatprep.mubr.bf16.mxu0 %v8800_v60  ;;  %911 = vmatprep.mubr.bf16.mxu1 %v8802_v61  ;;  %v9287_v61 = vmov 683565275  }
 0x108   : > { %832 = vmatmul.mubr.bf16.gmra.mrb[28].mxu0 %v8804_v62  ;;  %912 = vmatmul.mubr.bf16.gmra.mrb[28].mxu1 %v8805_v63 }
 0x1a3   : > { %v763_v10 = vpop.f32.mrb[0].mxu0  ;;  %v843_v11 = vpop.f32.mrb[0].mxu1 }
 0x1a4   : > { %v764_v13 = vadd.f32 %v763_v10, %v9643_v6  ;;  %v844_v15 = vadd.f32 %v843_v11, %v9643_v6  ;;  %v765_v16 = vpop.f32.mrb[1].mxu0  ;;  %v845_v17 = vpop.f32.mrb[1].mxu1  ;;  %v9291_v10 = vmov 920167782  }
 0x1a5   : > { %v766_v18 = vadd.f32 %v765_v16, %v9645_v8  ;;  %v9658_v20 = vpop.f32.mrb[2].mxu0  ;;  %v9660_v21 = vpop.f32.mrb[2].mxu1  ;;  %v846_v28 = vadd.f32 %v845_v17, %v9645_v8 }
 0x1a6   : > { %v934_v22 = vmul.f32 %v9647_v9, %v764_v13  ;;  %v966_v23 = vmul.f32 %v9647_v9, %v844_v15  ;;  %v9664_v24 = vpop.f32.mrb[3].mxu0  ;;  %v9687_v41 = vpop.f32.mrb[3].mxu1 }
 0x1a7   : > { %v935_v25 = vmul.f32 %v9649_v12, %v766_v18  ;;  %v967_v36 = vmul.f32 %v9649_v12, %v846_v28 }
 0x1a8   : > { %v9668_v26 = vadd.f32 %v9652_v14, %v934_v22  ;;  %v9671_v27 = vadd.f32 %v9652_v14, %v966_v23  ;;  %v9292_v22 = vmov 1326507024  }
 0x1a9   : > { %v9675_v29 = vadd.f32 %v9656_v19, %v935_v25  ;;  %v9690_v46 = vadd.f32 %v9656_v19, %v967_v36 }
 0x1aa   : > { %v1074_v30 = vand.u32 2147483647, %v9668_v26  ;;  %v1077_v31 = vand.u32 2139095040, %v9668_v26  ;;  %v4402_v32 = vand.u32 2147483647, %v9671_v27  ;;  %v4405_v33 = vand.u32 2139095040, %v9671_v27 }
 0x1ab   : > { %v1181_v39 = vand.u32 2139095040, %v9675_v29  ;;  %v1178_v49 = vand.u32 2147483647, %v9675_v29  ;;  %v4509_v59 = vand.u32 2139095040, %v9690_v46  ;;  %vm1076_vm13 = vcmp.lt.s32.totalorder %v9668_v26, 0 }
 0x1ac   : > { %v1078_v34 = vshrl.u32 %v1077_v31, 23  ;;  %v1081_v35 = vand.u32 8388607, %v1074_v30  ;;  %v4406_v37 = vshrl.u32 %v4405_v33, 23  ;;  %v4409_v38 = vand.u32 8388607, %v4402_v32 }
 0x1ad   : > { %v1182_v43 = vshrl.u32 %v1181_v39, 23  ;;  %v9699_v57 = vand.u32 8388607, %v1178_v49  ;;  %vm9803_vm14 = vcmp.le.f32.partialorder %v1074_v30, 0.7853982 }
 0x1ae   : > { %v8028_v40 = vadd.s32 4294967169, %v1078_v34  ;;  %v8156_v42 = vadd.s32 4294967169, %v4406_v37  ;;  %v1082_v44 = vor.u32 8388608, %v1081_v35  ;;  %v4410_v47 = vor.u32 8388608, %v4409_v38 }
 0x1af   : > { %v8032_v50 = vadd.s32 4294967169, %v1182_v43 }
 0x1b0   : > { %v1084_v45 = vadd.s32 1, %v8028_v40  ;;  %v4412_v48 = vadd.s32 1, %v8156_v42  ;;  %v9693_v54 = vshll.u32 %v1082_v44, 8  ;;  %v9695_v56 = vshll.u32 %v4410_v47, 8 }
 0x1b1   : > { %v9701_v58 = vadd.s32 1, %v8032_v50 }
 0x1b2   : > { %vm1085_vm0 = vcmp.gt.s32.totalorder %v1084_v45, 0  ;;  %vm4413_vm1 = vcmp.gt.s32.totalorder %v4412_v48, 0 }
 0x1b3   : > { %v1086_v51 = vsel %vm1085_vm0, %v1084_v45, 0  ;;  %v4414_v55 = vsel %vm4413_vm1, %v4412_v48, 0  ;;  %vm1189_vm6 = vcmp.gt.s32.totalorder %v9701_v58, 0 }
 0x1b4   : > { %v1087_v52 = vshrl.u32 %v1086_v51, 5  ;;  %v1088_v53 = vand.u32 31, %v1086_v51  ;;  %v9705_v63 = vshrl.u32 %v4414_v55, 5  ;;  %v4416_v0 = vand.u32 31, %v4414_v55 }
 0x1b6   : > { %v1089_v60 = vsub.s32 32, %v1088_v53  ;;  %v1091_v62 = vshll.u32 %v9287_v61, %v1088_v53  ;;  %v1094_v2 = vshll.u32 %v9288_v1, %v1088_v53  ;;  %v1097_v4 = vshll.u32 %v9289_v3, %v1088_v53 }
 0x1b7   : > { %v1100_v7 = vshll.u32 %v9290_v5, %v1088_v53  ;;  %v1103_v11 = vshll.u32 %v9291_v10, %v1088_v53  ;;  %vm1106_vm2 = vcmp.lt.s32.totalorder %v1087_v52, 1  ;;  %vm1107_vm3 = vcmp.lt.s32.totalorder %v1087_v52, 2 }
 0x1b8   : > { %v1092_v13 = vshrl.u32 %v9288_v1, %v1089_v60  ;;  %v1095_v15 = vshrl.u32 %v9289_v3, %v1089_v60  ;;  %v1098_v16 = vshrl.u32 %v9290_v5, %v1089_v60  ;;  %v1090_v17 = vshrl.u32 %v9287_v61, %v1089_v60 }
 0x1b9   : > { %v1101_v18 = vshrl.u32 %v9291_v10, %v1089_v60  ;;  %v1104_v23 = vshrl.u32 %v9292_v22, %v1089_v60  ;;  %v4417_v33 = vsub.s32 32, %v4416_v0  ;;  %vm1108_vm4 = vcmp.lt.s32.totalorder %v1087_v52, 3 }
 0x1ba   : > { %v1093_v25 = vor.u32 %v1092_v13, %v1091_v62  ;;  %v1096_v28 = vor.u32 %v1095_v15, %v1094_v2  ;;  %v1099_v31 = vor.u32 %v1098_v16, %v1097_v4  ;;  %vm1109_vm5 = vcmp.lt.s32.totalorder %v1087_v52, 4 }
 0x1bb   : > { %v1102_v34 = vor.u32 %v1101_v18, %v1100_v7  ;;  %v1105_v35 = vor.u32 %v1104_v23, %v1103_v11  ;;  %v4419_v44 = vshll.u32 %v9287_v61, %v4416_v0  ;;  %v4420_v48 = vshrl.u32 %v9288_v1, %v4417_v33 }
 0x1bc   : > { %v1110_v36 = vsel %vm1106_vm2, %v1090_v17, %v1093_v25  ;;  %v1111_v37 = vsel %vm1109_vm5, %v1099_v31, 2102212464  ;;  %v1114_v38 = vsel %vm1106_vm2, %v1093_v25, %v1096_v28  ;;  %v1118_v39 = vsel %vm1106_vm2, %v1096_v28, %v1099_v31 }
 0x1bd   : > { %v1112_v40 = vsel %vm1108_vm4, %v1096_v28, %v1111_v37  ;;  %v1115_v42 = vsel %vm1109_vm5, %v1102_v34, 920167782  ;;  %v1119_v43 = vsel %vm1109_vm5, %v1105_v35, 1326507024  ;;  %v4422_v50 = vshll.u32 %v9288_v1, %v4416_v0 }
 0x1be   : > { %v1116_v45 = vsel %vm1108_vm4, %v1099_v31, %v1115_v42  ;;  %v1120_v47 = vsel %vm1108_vm4, %v1102_v34, %v1119_v43  ;;  %v1113_v51 = vsel %vm1107_vm3, %v1110_v36, %v1112_v40  ;;  %v4423_v60 = vshrl.u32 %v9289_v3, %v4417_v33 }
 0x1bf   : > { %v1117_v53 = vsel %vm1107_vm3, %v1114_v38, %v1116_v45  ;;  %v1121_v55 = vsel %vm1107_vm3, %v1118_v39, %v1120_v47  ;;  %v4421_v11 = vor.u32 %v4420_v48, %v4419_v44  ;;  %v4425_v15 = vshll.u32 %v9289_v3, %v4416_v0 }
 0x1c0   : > { %v9729_v62 = vmul.u32.u64.low %v9693_v54, %v1121_v55  ;;  %v9730_v2 = vmul.u32.u64.high %v9693_v54, %v1121_v55, %v9729_v62  ;;  %v9733_v4 = vmul.u32.u64.low %v9693_v54, %v1117_v53  ;;  %v9734_v7 = vmul.u32.u64.high %v9693_v54, %v1117_v53, %v9733_v4 }
 0x1c1   : > { %v4424_v13 = vor.u32 %v4423_v60, %v4422_v50  ;;  %v4426_v16 = vshrl.u32 %v9290_v5, %v4417_v33  ;;  %v4418_v17 = vshrl.u32 %v9287_v61, %v4417_v33  ;;  %v4428_v52 = vshll.u32 %v9290_v5, %v4416_v0 }
 0x1c2   : > { %v4429_v18 = vshrl.u32 %v9291_v10, %v4417_v33  ;;  %v4432_v23 = vshrl.u32 %v9292_v22, %v4417_v33  ;;  %v1129_v25 = vmul.u32 %v9693_v54, %v1113_v51  ;;  %v4431_v31 = vshll.u32 %v9291_v10, %v4416_v0 }
 0x1c3   : > { %v4427_v28 = vor.u32 %v4426_v16, %v4425_v15  ;;  %vm4434_vm7 = vcmp.lt.s32.totalorder %v9705_v63, 1  ;;  %vm1131_vm8 = vc.u32 %v9730_v2, %v9733_v4  ;;  %v1132_v34 = vadd.s32 1, %v9734_v7 }
 0x1c4   : > { %v4430_v35 = vor.u32 %v4429_v18, %v4428_v52  ;;  %vm4435_vm9 = vcmp.lt.s32.totalorder %v9705_v63, 2  ;;  %v4433_v36 = vor.u32 %v4432_v23, %v4431_v31  ;;  %vm4436_vm10 = vcmp.lt.s32.totalorder %v9705_v63, 3 }
 0x1c5   : > { %vm4437_vm11 = vcmp.lt.s32.totalorder %v9705_v63, 4  ;;  %v4442_v33 = vsel %vm4434_vm7, %v4421_v11, %v4424_v13  ;;  %v1133_v54 = vsel %vm1131_vm8, %v1132_v34, %v9734_v7  ;;  %v4446_v0 = vsel %vm4434_vm7, %v4424_v13, %v4427_v28  ;;  %v9782_v63 = vpop.f32.mrb[4].mxu0 }
 0x1c6   : > { %v4439_v37 = vsel %vm4437_vm11, %v4427_v28, 2102212464  ;;  %v4443_v38 = vsel %vm4437_vm11, %v4430_v35, 920167782  ;;  %v1134_v39 = vadd.s32 %v1133_v54, %v1129_v25  ;;  %v4438_v40 = vsel %vm4434_vm7, %v4418_v17, %v4421_v11 }
 0x1c7   : > { %v4444_v42 = vsel %vm4436_vm10, %v4427_v28, %v4443_v38  ;;  %v4447_v43 = vsel %vm4437_vm11, %v4433_v36, 1326507024  ;;  %v4440_v44 = vsel %vm4436_vm10, %v4424_v13, %v4439_v37  ;;  %v1190_v48 = vsel %vm1189_vm6, %v9701_v58, 0 }
 0x1c8   : > { %v4445_v45 = vsel %vm4435_vm9, %v4442_v33, %v4444_v42  ;;  %v4448_v47 = vsel %vm4436_vm10, %v4430_v35, %v4447_v43  ;;  %v1135_v50 = vadd.s32 536870912, %v1134_v39  ;;  %v4506_v7 = vand.u32 2147483647, %v9690_v46 }
 0x1c9   : > { %v4449_v51 = vsel %vm4435_vm9, %v4446_v0, %v4448_v47  ;;  %v9759_v53 = vmul.u32.u64.low %v9695_v56, %v4445_v45  ;;  %v9760_v55 = vmul.u32.u64.high %v9695_v56, %v4445_v45, %v9759_v53  ;;  %v4441_v13 = vsel %vm4435_vm9, %v4438_v40, %v4440_v44 }
 0x1ca   : > { %v9764_v60 = vmul.u32.u64.low %v9695_v56, %v4449_v51  ;;  %v9765_v62 = vmul.u32.u64.high %v9695_v56, %v4449_v51, %v9764_v60  ;;  %v1136_v11 = vshrl.u32 %v1135_v50, 30  ;;  %v1186_v58 = vor.u32 8388608, %v9699_v57 }
 0x1cb   : > { %v1192_v15 = vand.u32 31, %v1190_v48  ;;  %v9773_v16 = vadd.f32 %v9658_v20, %v9643_v6  ;;  %v9777_v17 = vadd.f32 %v9660_v21, %v9643_v6  ;;  %v4460_v18 = vadd.s32 1, %v9760_v55 }
 0x1cc   : > { %v1137_v52 = vshll.u32 %v1136_v11, 30  ;;  %v4510_v25 = vshrl.u32 %v4509_v59, 23  ;;  %v4457_v57 = vmul.u32 %v9695_v56, %v4441_v13  ;;  %vm4459_vm12 = vc.u32 %v9765_v62, %v9759_v53 }
 0x1cd   : > { %v1193_v23 = vsub.s32 32, %v1192_v15  ;;  %v9789_v20 = vand.u32 8388607, %v4506_v7  ;;  %v9793_v21 = vadd.f32 %v9664_v24, %v9645_v8  ;;  %v4461_v59 = vsel %vm4459_vm12, %v4460_v18, %v9760_v55 }
 0x1ce   : > { %v9796_v28 = vsub.s32 %v1134_v39, %v1137_v52  ;;  %v9799_v31 = vshll.u32 %v1186_v58, 8  ;;  %v1130_v34 = vadd.s32 %v9733_v4, %v9730_v2  ;;  %v4462_v35 = vadd.s32 %v4461_v59, %v4457_v57 }
 0x1cf   : > { %v9808_v36 = vshrl.u32 %v1190_v48, 5  ;;  %v1196_v24 = vshrl.u32 %v9288_v1, %v1193_v23  ;;  %v1199_v54 = vshrl.u32 %v9289_v3, %v1193_v23  ;;  %v1202_v37 = vshrl.u32 %v9290_v5, %v1193_v23 }
 0x1d0   : > { %v1140_v33 = vsub.s32 0, %v9796_v28  ;;  %v8160_v38 = vadd.s32 4294967169, %v4510_v25  ;;  %v1160_v0 = vsub.s32 4, %v1136_v11  ;;  %v4463_v39 = vadd.s32 536870912, %v4462_v35 }
 0x1d1   : > { %v1195_v30 = vshll.u32 %v9287_v61, %v1192_v15  ;;  %v4514_v40 = vor.u32 8388608, %v9789_v20  ;;  %v1198_v4 = vshll.u32 %v9288_v1, %v1192_v15  ;;  %v1201_v42 = vshll.u32 %v9289_v3, %v1192_v15 }
 0x1d2   : > { %v8029_v2 = vmin.u32 %v1140_v33, %v9796_v28  ;;  %v1205_v43 = vshrl.u32 %v9291_v10, %v1193_v23  ;;  %v4464_v44 = vshrl.u32 %v4463_v39, 30  ;;  %v1204_v47 = vshll.u32 %v9290_v5, %v1192_v15 }
 0x1d3   : > { %v1197_v45 = vor.u32 %v1196_v24, %v1195_v30  ;;  %v1208_v48 = vshrl.u32 %v9292_v22, %v1193_v23  ;;  %v1200_v51 = vor.u32 %v1199_v54, %v1198_v4  ;;  %v1203_v55 = vor.u32 %v1202_v37, %v1201_v42 }
 0x1d4   : > { %v1142_v50 = vclz %v8029_v2  ;;  %v1207_v60 = vshll.u32 %v9291_v10, %v1192_v15  ;;  %v1161_v13 = vsel %vm1076_vm13, %v1160_v0, %v1136_v11  ;;  %v4465_v58 = vshll.u32 %v4464_v44, 30  ;;  %v9844_v0 = vpop.f32.mrb[4].mxu1 }
 0x1d5   : > { %v1206_v52 = vor.u32 %v1205_v43, %v1204_v47  ;;  %vm1210_vm15 = vcmp.lt.s32.totalorder %v9808_v36, 1  ;;  %vm1211_vm0 = vcmp.lt.s32.totalorder %v9808_v36, 2  ;;  %vm1213_vm1 = vcmp.lt.s32.totalorder %v9808_v36, 4 }
 0x1d6   : > { %v8030_v18 = vadd.s32 4294967294, %v1142_v50  ;;  %v1209_v25 = vor.u32 %v1208_v48, %v1207_v60  ;;  %vm4404_vm2 = vcmp.lt.s32.totalorder %v9671_v27, 0  ;;  %v9829_v57 = vsub.s32 %v4462_v35, %v4465_v58 }
 0x1d7   : > { %v1194_v59 = vshrl.u32 %v9287_v61, %v1193_v23  ;;  %vm1212_vm3 = vcmp.lt.s32.totalorder %v9808_v36, 3  ;;  %v1219_v11 = vsel %vm1213_vm1, %v1206_v52, 920167782  ;;  %v1163_v15 = vsel %vm9803_vm14, 0, %v1161_v13 }
 0x1d8   : > { %vm8031_vm4 = vcmp.lt.s32.totalorder %v8030_v18, 0  ;;  %v1218_v24 = vsel %vm1210_vm15, %v1197_v45, %v1200_v51  ;;  %v1220_v33 = vsel %vm1212_vm3, %v1203_v55, %v1219_v11  ;;  %v4468_v35 = vsub.s32 0, %v9829_v57 }
 0x1d9   : > { %v1145_v54 = vsel %vm8031_vm4, 0, %v8030_v18  ;;  %v4488_v37 = vsub.s32 4, %v4464_v44  ;;  %v1222_v23 = vsel %vm1210_vm15, %v1200_v51, %v1203_v55  ;;  %vm9848_vm5 = vcmp.le.f32.partialorder %v4402_v32, 0.7853982 }
 0x1da   : > { %v1146_v39 = vsub.s32 32, %v1145_v54  ;;  %v1150_v30 = vsub.s32 4294967266, %v1145_v54  ;;  %v1215_v4 = vsel %vm1213_vm1, %v1203_v55, 2102212464  ;;  %v1223_v42 = vsel %vm1213_vm1, %v1209_v25, 1326507024 }
 0x1db   : > { %v1147_v43 = vshll.u32 %v9796_v28, %v1145_v54  ;;  %v8157_v47 = vmin.u32 %v4468_v35, %v9829_v57  ;;  %v1221_v48 = vsel %vm1211_vm0, %v1218_v24, %v1220_v33  ;;  %v1224_v50 = vsel %vm1212_vm3, %v1206_v52, %v1223_v42 }
 0x1dc   : > { %v1148_v32 = vshrl.u32 %v1130_v34, %v1146_v39  ;;  %v1151_v60 = vadd.s32 127, %v1150_v30  ;;  %v1225_v13 = vsel %vm1211_vm0, %v1222_v23, %v1224_v50  ;;  %v4516_v58 = vadd.s32 1, %v8160_v38 }
 0x1dd   : > { %v1167_v55 = vadd.s32 3, %v1163_v15  ;;  %v4470_v18 = vclz %v8157_v47  ;;  %v1214_v25 = vsel %vm1210_vm15, %v1194_v59, %v1197_v45  ;;  %v1216_v28 = vsel %vm1212_vm3, %v1200_v51, %v1215_v4 }
 0x1de   : > { %v1149_v11 = vor.u32 %v1148_v32, %v1147_v43  ;;  %v1152_v54 = vshll.u32 %v1151_v60, 23  ;;  %v9869_v24 = vmul.u32.u64.low %v9799_v31, %v1225_v13  ;;  %v9870_v33 = vmul.u32.u64.high %v9799_v31, %v1225_v13, %v9869_v24 }
 0x1df   : > { %v8158_v34 = vadd.s32 4294967294, %v4470_v18  ;;  %v9873_v52 = vmul.u32.u64.low %v9799_v31, %v1221_v48  ;;  %v9874_v35 = vmul.u32.u64.high %v9799_v31, %v1221_v48, %v9873_v52  ;;  %vm4517_vm6 = vcmp.gt.s32.totalorder %v4516_v58, 0 }
 0x1e0   : > { %v1153_v38 = vor.u32 4788187, %v1152_v54  ;;  %v4458_v45 = vadd.s32 %v9759_v53, %v9765_v62  ;;  %v4489_v51 = vsel %vm4404_vm2, %v4488_v37, %v4464_v44  ;;  %v4518_v59 = vsel %vm4517_vm6, %v4516_v58, 0 }
 0x1e1   : > { %v9881_v15 = vand.u32 3, %v1167_v55  ;;  %vm8159_vm7 = vcmp.lt.s32.totalorder %v8158_v34, 0  ;;  %v1217_v23 = vsel %vm1211_vm0, %v1214_v25, %v1216_v28  ;;  %v4520_v39 = vand.u32 31, %v4518_v59 }
 0x1e2   : > { %v1154_v30 = vand.u32 2147483647, %v1153_v38  ;;  %v1156_v4 = vcvt.s32.f32 %v1149_v11  ;;  %v4473_v42 = vsel %vm8159_vm7, 0, %v8158_v34  ;;  %vm1235_vm8 = vc.u32 %v9870_v33, %v9873_v52 }
 0x1e3   : > { %v4474_v43 = vsub.s32 32, %v4473_v42  ;;  %v4478_v47 = vsub.s32 4294967266, %v4473_v42  ;;  %v4491_v53 = vsel %vm9848_vm5, 0, %v4489_v51  ;;  %v1236_v62 = vadd.s32 1, %v9874_v35 }
 0x1e4   : > { %v1157_v44 = vmul.f32 %v1156_v4, %v1154_v30  ;;  %v1233_v37 = vmul.u32 %v9799_v31, %v1217_v23  ;;  %v9891_v48 = vshrl.u32 %v4518_v59, 5  ;;  %v4521_v36 = vsub.s32 32, %v4520_v39 }
 0x1e5   : > { %v4475_v50 = vshll.u32 %v9829_v57, %v4473_v42  ;;  %v4476_v32 = vshrl.u32 %v4458_v45, %v4474_v43  ;;  %v4479_v60 = vadd.s32 127, %v4478_v47  ;;  %v1237_v13 = vsel %vm1235_vm8, %v1236_v62, %v9874_v35 }
 0x1e6   : > { %v1158_v58 = vxor.u32 2147483648, %v1157_v44  ;;  %v1238_v55 = vadd.s32 %v1237_v13, %v1233_v37  ;;  %v4523_v18 = vshll.u32 %v9287_v61, %v4520_v39  ;;  %v4524_v25 = vshrl.u32 %v9288_v1, %v4521_v36 }
 0x1e7   : > { %v4477_v28 = vor.u32 %v4476_v32, %v4475_v50  ;;  %v4480_v11 = vshll.u32 %v4479_v60, 23  ;;  %v4526_v54 = vshll.u32 %v9288_v1, %v4520_v39  ;;  %v4527_v31 = vshrl.u32 %v9289_v3, %v4521_v36 }
 0x1e8   : > { %v1159_v24 = vsel %vm1076_vm13, %v1158_v58, %v1157_v44  ;;  %v1239_v57 = vadd.s32 536870912, %v1238_v55  ;;  %v4529_v34 = vshll.u32 %v9289_v3, %v4520_v39  ;;  %v4530_v35 = vshrl.u32 %v9290_v5, %v4521_v36 }
 0x1e9   : > { %v1162_v38 = vsel %vm9803_vm14, %v9668_v26, %v1159_v24  ;;  %v4481_v45 = vor.u32 4788187, %v4480_v11  ;;  %v4525_v51 = vor.u32 %v4524_v25, %v4523_v18  ;;  %v4532_v59 = vshll.u32 %v9290_v5, %v4520_v39 }
 0x1ea   : > { %8806 = vcosq.f32 %v1162_v38  ;;  %v4484_v23 = vcvt.s32.f32 %v4477_v28  ;;  %v9907_v30 = vshrl.u32 %v1239_v57, 30  ;;  %v4533_v4 = vshrl.u32 %v9291_v10, %v4521_v36 }
 0x1eb   : > { %8808 = vsinq.f32 %v1162_v38  ;;  %v4482_v42 = vand.u32 2147483647, %v4481_v45  ;;  %v4528_v43 = vor.u32 %v4527_v31, %v4526_v54  ;;  %v4536_v47 = vshrl.u32 %v9292_v22, %v4521_v36 }
 0x1ec   : > { %v1241_v62 = vshll.u32 %v9907_v30, 30  ;;  %v4534_v44 = vor.u32 %v4533_v4, %v4532_v59  ;;  %v936_v56 = vmul.f32 %v9647_v9, %v9773_v16  ;;  %v9916_v37 = vmul.f32 %v9647_v9, %v9777_v17 }
 0x1ed   : > { %v4485_v50 = vmul.f32 %v4484_v23, %v4482_v42  ;;  %v4531_v32 = vor.u32 %v4530_v35, %v4529_v34  ;;  %v4535_v60 = vshll.u32 %v9291_v10, %v4520_v39  ;;  %v9921_v13 = vmul.f32 %v9649_v12, %v9793_v21 }
 0x1ee   : > { %v4495_v58 = vadd.s32 3, %v4491_v53  ;;  %v9923_v18 = vsub.s32 %v1238_v55, %v1241_v62  ;;  %vm4538_vm9 = vcmp.lt.s32.totalorder %v9891_v48, 1  ;;  %v9928_v16 = vshll.u32 %v4514_v40, 8 }
 0x1ef   : > { %vm1170_vm10 = vcmp.eq.s32.totalorder %v9881_v15, 0  ;;  %v4486_v17 = vxor.u32 2147483648, %v4485_v50  ;;  %v4537_v25 = vor.u32 %v4536_v47, %v4535_v60  ;;  %vm4541_vm11 = vcmp.lt.s32.totalorder %v9891_v48, 4 }
 0x1f0   : > { %v4546_v39 = vsel %vm4538_vm9, %v4525_v51, %v4528_v43  ;;  %vm1169_vm12 = vcmp.lt.s32.totalorder %v9881_v15, 2  ;;  %v1244_v21 = vsub.s32 0, %v9923_v18  ;;  %v4522_v53 = vshrl.u32 %v9287_v61, %v4521_v36 }
 0x1f1   : > { %vm4540_vm13 = vcmp.lt.s32.totalorder %v9891_v48, 3  ;;  %v4547_v20 = vsel %vm4541_vm11, %v4534_v44, 920167782  ;;  %vm1166_vm14 = vweird.f32 %v9668_v26  ;;  %v4487_v40 = vsel %vm4404_vm2, %v4486_v17, %v4485_v50 }
 0x1f2   : > { %vm1180_vm15 = vcmp.lt.s32.totalorder %v9675_v29, 0  ;;  %vm4539_vm0 = vcmp.lt.s32.totalorder %v9891_v48, 2  ;;  %v4543_v55 = vsel %vm4541_vm11, %v4531_v32, 2102212464  ;;  %v4548_v36 = vsel %vm4540_vm13, %v4531_v32, %v4547_v20 }
 0x1f3   : > { %v4490_v28 = vsel %vm9848_vm5, %v9671_v27, %v4487_v40  ;;  %v8033_v11 = vmin.u32 %v1244_v21, %v9923_v18  ;;  %v4549_v54 = vsel %vm4539_vm0, %v4546_v39, %v4548_v36  ;;  %v4550_v31 = vsel %vm4538_vm9, %v4528_v43, %v4531_v32  ;;  %v9987_v21 = vpop.f32.mrb[5].mxu0 }
 0x1f4   : > { %8810 = vcosq.f32 %v4490_v28  ;;  %v4551_v24 = vsel %vm4541_vm11, %v4537_v25, 1326507024  ;;  %v9960_v57 = vmul.u32.u64.low %v9928_v16, %v4549_v54  ;;  %v9961_v34 = vmul.u32.u64.high %v9928_v16, %v4549_v54, %v9960_v57  ;;  %v8807_v35 = vpop.eup %8806 }
 0x1f5   : > { %vm1173_vm1 = vcmp.eq.s32.totalorder %v9881_v15, 2  ;;  %8812 = vsinq.f32 %v4490_v28  ;;  %v1246_v2 = vclz %v8033_v11  ;;  %v1264_v38 = vsub.s32 4, %v9907_v30  ;;  %v8809_v45 = vpop.eup %8808 }
 0x1f6   : > { %v1174_v59 = vxor.u32 2147483648, %v8807_v35  ;;  %v4542_v23 = vsel %vm4538_vm9, %v4522_v53, %v4525_v51  ;;  %v4544_v4 = vsel %vm4540_vm13, %v4528_v43, %v4543_v55  ;;  %v4552_v42 = vsel %vm4540_vm13, %v4534_v44, %v4551_v24 }
 0x1f7   : > { %v1171_v47 = vxor.u32 2147483648, %v8809_v45  ;;  %v8034_v62 = vadd.s32 4294967294, %v1246_v2  ;;  %v4553_v50 = vsel %vm4539_vm0, %v4550_v31, %v4552_v42  ;;  %v9976_v32 = vadd.f32 %v9652_v14, %v936_v56 }
 0x1f8   : > { %v1175_v60 = vsel %vm1173_vm1, %v1174_v59, %v8809_v45  ;;  %v4496_v17 = vand.u32 3, %v4495_v58  ;;  %v9979_v25 = vmul.u32.u64.low %v9928_v16, %v4553_v50  ;;  %v9980_v39 = vmul.u32.u64.high %v9928_v16, %v4553_v50, %v9979_v25 }
 0x1f9   : > { %v1172_v51 = vsel %vm1170_vm10, %v8807_v35, %v1171_v47  ;;  %vm8035_vm2 = vcmp.lt.s32.totalorder %v8034_v62, 0  ;;  %v4545_v43 = vsel %vm4539_vm0, %v4542_v23, %v4544_v4  ;;  %v4564_v44 = vadd.s32 1, %v9961_v34 }
 0x1fa   : > { %v1176_v56 = vsel %vm1169_vm12, %v1172_v51, %v1175_v60  ;;  %v1234_v58 = vadd.s32 %v9873_v52, %v9870_v33  ;;  %v1249_v53 = vsel %vm8035_vm2, 0, %v8034_v62  ;;  %v1285_v20 = vand.u32 2139095040, %v9976_v32 }
 0x1fb   : > { %v1177_v40 = vsel %vm1166_vm14, nan, %v1176_v56  ;;  %vm4494_vm3 = vweird.f32 %v9671_v27  ;;  %v1250_v48 = vsub.s32 32, %v1249_v53  ;;  %v1254_v55 = vsub.s32 4294967266, %v1249_v53 }
 0x1fc   : > { %v1265_v36 = vsel %vm1180_vm15, %v1264_v38, %v9907_v30  ;;  %7730 = vst [vmem:[%s10000_s14] sm:$0xff] %v1177_v40  ;;  %v4561_v33 = vmul.u32 %v9928_v16, %v4545_v43  ;;  %vm4563_vm4 = vc.u32 %v9980_v39, %v9960_v57  ;;  %v1282_v26 = vand.u32 2147483647, %v9976_v32 }
 0x1fd   : > { %v1286_v52 = vshrl.u32 %v1285_v20, 23  ;;  %v1251_v15 = vshll.u32 %v9923_v18, %v1249_v53  ;;  %v1252_v28 = vshrl.u32 %v1234_v58, %v1250_v48  ;;  %v1255_v11 = vadd.s32 127, %v1254_v55 }
 0x1fe   : > { %v4565_v54 = vsel %vm4563_vm4, %v4564_v44, %v9961_v34  ;;  %v8811_v31 = vpop.eup %8810  ;;  %vm4501_vm5 = vcmp.eq.s32.totalorder %v4496_v17, 2  ;;  %vm10011_vm6 = vcmp.le.f32.partialorder %v1178_v49, 0.7853982  ;;  %v1289_v34 = vand.u32 8388607, %v1282_v26 }
 0x1ff   : > { %v4566_v16 = vadd.s32 %v4565_v54, %v4561_v33  ;;  %v8036_v24 = vadd.s32 4294967169, %v1286_v52  ;;  %v8813_v35 = vpop.eup %8812  ;;  %v4502_v2 = vxor.u32 2147483648, %v8811_v31  ;;  %v1253_v38 = vor.u32 %v1252_v28, %v1251_v15 }
 0x200   : > { %v1256_v45 = vshll.u32 %v1255_v11, 23  ;;  %v1267_v18 = vsel %vm10011_vm6, 0, %v1265_v36  ;;  %v4499_v59 = vxor.u32 2147483648, %v8813_v35  ;;  %vm4497_vm7 = vcmp.lt.s32.totalorder %v4496_v17, 2 }
 0x201   : > { %v4567_v23 = vadd.s32 536870912, %v4566_v16  ;;  %v1292_v4 = vadd.s32 1, %v8036_v24  ;;  %vm4498_vm8 = vcmp.eq.s32.totalorder %v4496_v17, 0  ;;  %v4503_v49 = vsel %vm4501_vm5, %v4502_v2, %v8813_v35 }
 0x202   : > { %v1257_v42 = vor.u32 4788187, %v1256_v45  ;;  %v4500_v47 = vsel %vm4498_vm8, %v8811_v31, %v4499_v59  ;;  %v1271_v62 = vadd.s32 3, %v1267_v18  ;;  %v1260_v51 = vcvt.s32.f32 %v1253_v38 }
 0x203   : > { %v10019_v50 = vshrl.u32 %v4567_v23, 30  ;;  %vm1293_vm9 = vcmp.gt.s32.totalorder %v1292_v4, 0  ;;  %v4504_v60 = vsel %vm4497_vm7, %v4500_v47, %v4503_v49  ;;  %v1290_v58 = vor.u32 8388608, %v1289_v34 }
 0x204   : > { %v1258_v25 = vand.u32 2147483647, %v1257_v42  ;;  %v1294_v43 = vsel %vm1293_vm9, %v1292_v4, 0  ;;  %v4505_v44 = vsel %vm4494_vm3, nan, %v4504_v60  ;;  %v10026_v17 = vadd.f32 %v9652_v14, %v9916_v37 }
 0x205   : > { %v4569_v56 = vshll.u32 %v10019_v50, 30  ;;  %7762 = vst [vmem:[%s10000_s14 + $0x100] sm:$0xff] %v4505_v44  ;;  %v1296_v20 = vand.u32 31, %v1294_v43  ;;  %v10029_v40 = vand.u32 3, %v1271_v62  ;;  %v4562_v36 = vadd.s32 %v9960_v57, %v9980_v39 }
 0x206   : > { %v1261_v53 = vmul.f32 %v1260_v51, %v1258_v25  ;;  %v10037_v33 = vadd.f32 %v9656_v19, %v9921_v13  ;;  %v10040_v37 = vshrl.u32 %v1294_v43, 5  ;;  %v10042_v15 = vshll.u32 %v1290_v58, 8 }
 0x207   : > { %v10031_v48 = vsub.s32 %v4566_v16, %v4569_v56  ;;  %v1297_v27 = vsub.s32 32, %v1296_v20  ;;  %v4610_v28 = vand.u32 2147483647, %v10026_v17  ;;  %v1299_v54 = vshll.u32 %v9287_v61, %v1296_v20 }
 0x208   : > { %v1262_v55 = vxor.u32 2147483648, %v1261_v53  ;;  %v1302_v16 = vshll.u32 %v9288_v1, %v1296_v20  ;;  %v4592_v35 = vsub.s32 4, %v10019_v50  ;;  %v1305_v2 = vshll.u32 %v9289_v3, %v1296_v20 }
 0x209   : > { %v4572_v52 = vsub.s32 0, %v10031_v48  ;;  %v1300_v57 = vshrl.u32 %v9288_v1, %v1297_v27  ;;  %v1303_v39 = vshrl.u32 %v9289_v3, %v1297_v27  ;;  %v1306_v24 = vshrl.u32 %v9290_v5, %v1297_v27 }
 0x20a   : > { %v1263_v11 = vsel %vm1180_vm15, %v1262_v55, %v1261_v53  ;;  %v4613_v38 = vand.u32 2139095040, %v10026_v17  ;;  %vm4508_vm10 = vcmp.lt.s32.totalorder %v9690_v46, 0  ;;  %v1308_v23 = vshll.u32 %v9290_v5, %v1296_v20  ;;  %v10086_v53 = vpop.f32.mrb[5].mxu1 }
 0x20b   : > { %v1266_v13 = vsel %vm10011_vm6, %v9675_v29, %v1263_v11  ;;  %v8161_v31 = vmin.u32 %v4572_v52, %v10031_v48  ;;  %v1301_v18 = vor.u32 %v1300_v57, %v1299_v54  ;;  %v1304_v59 = vor.u32 %v1303_v39, %v1302_v16 }
 0x20c   : > { %8814 = vcosq.f32 %v1266_v13  ;;  %v1307_v30 = vor.u32 %v1306_v24, %v1305_v2  ;;  %v1309_v34 = vshrl.u32 %v9291_v10, %v1297_v27  ;;  %vm1314_vm11 = vcmp.lt.s32.totalorder %v10040_v37, 1 }
 0x20d   : > { %8816 = vsinq.f32 %v1266_v13  ;;  %v4574_v45 = vclz %v8161_v31  ;;  %v1311_v49 = vshll.u32 %v9291_v10, %v1296_v20  ;;  %v1312_v42 = vshrl.u32 %v9292_v22, %v1297_v27 }
 0x20e   : > { %vm1315_vm12 = vcmp.lt.s32.totalorder %v10040_v37, 2  ;;  %vm1277_vm13 = vcmp.eq.s32.totalorder %v10029_v40, 2  ;;  %v1298_v47 = vshrl.u32 %v9287_v61, %v1297_v27  ;;  %v1310_v62 = vor.u32 %v1309_v34, %v1308_v23 }
 0x20f   : > { %v8162_v4 = vadd.s32 4294967294, %v4574_v45  ;;  %vm1316_vm14 = vcmp.lt.s32.totalorder %v10040_v37, 3  ;;  %vm1317_vm15 = vcmp.lt.s32.totalorder %v10040_v37, 4  ;;  %vm1274_vm0 = vcmp.eq.s32.totalorder %v10029_v40, 0 }
 0x210   : > { %vm10073_vm1 = vcmp.le.f32.partialorder %v4506_v7, 0.7853982  ;;  %v1313_v25 = vor.u32 %v1312_v42, %v1311_v49  ;;  %v1319_v51 = vsel %vm1317_vm15, %v1307_v30, 2102212464  ;;  %v1322_v43 = vsel %vm1314_vm11, %v1301_v18, %v1304_v59 }
 0x211   : > { %vm8163_vm2 = vcmp.lt.s32.totalorder %v8162_v4, 0  ;;  %vm1273_vm3 = vcmp.lt.s32.totalorder %v10029_v40, 2  ;;  %v1318_v56 = vsel %vm1314_vm11, %v1298_v47, %v1301_v18  ;;  %v1323_v7 = vsel %vm1317_vm15, %v1310_v62, 920167782 }
 0x212   : > { %v4577_v44 = vsel %vm8163_vm2, 0, %v8162_v4  ;;  %v4614_v58 = vshrl.u32 %v4613_v38, 23  ;;  %vm1270_vm4 = vweird.f32 %v9675_v29  ;;  %v1324_v27 = vsel %vm1316_vm14, %v1307_v30, %v1323_v7 }
 0x213   : > { %v4578_v20 = vsub.s32 32, %v4577_v44  ;;  %v4582_v55 = vsub.s32 4294967266, %v4577_v44  ;;  %v1326_v52 = vsel %vm1314_vm11, %v1304_v59, %v1307_v30  ;;  %v1320_v11 = vsel %vm1316_vm14, %v1304_v59, %v1319_v51 }
 0x214   : > { %v1325_v54 = vsel %vm1315_vm12, %v1322_v43, %v1324_v27  ;;  %v1327_v57 = vsel %vm1317_vm15, %v1313_v25, 1326507024  ;;  %v8164_v39 = vadd.s32 4294967169, %v4614_v58  ;;  %v4579_v13 = vshll.u32 %v10031_v48, %v4577_v44 }
 0x215   : > { %v4580_v31 = vshrl.u32 %v4562_v36, %v4578_v20  ;;  %v4583_v16 = vadd.s32 127, %v4582_v55  ;;  %v1328_v24 = vsel %vm1316_vm14, %v1310_v62, %v1327_v57  ;;  %v4593_v48 = vsel %vm4508_vm10, %v4592_v35, %v10019_v50 }
 0x216   : > { %v8815_v2 = vpop.eup %8814  ;;  %v1329_v38 = vsel %vm1315_vm12, %v1326_v52, %v1328_v24  ;;  %v10105_v45 = vmul.u32.u64.low %v10042_v15, %v1325_v54  ;;  %v10106_v18 = vmul.u32.u64.high %v10042_v15, %v1325_v54, %v10105_v45  ;;  %v4620_v59 = vadd.s32 1, %v8164_v39 }
 0x217   : > { %v8817_v30 = vpop.eup %8816  ;;  %v1278_v23 = vxor.u32 2147483648, %v8815_v2  ;;  %v4581_v34 = vor.u32 %v4580_v31, %v4579_v13  ;;  %v4584_v4 = vshll.u32 %v4583_v16, 23  ;;  %v1321_v25 = vsel %vm1315_vm12, %v1318_v56, %v1320_v11 }
 0x218   : > { %v1275_v36 = vxor.u32 2147483648, %v8817_v30  ;;  %v10113_v49 = vmul.u32.u64.low %v10042_v15, %v1329_v38  ;;  %v10114_v42 = vmul.u32.u64.high %v10042_v15, %v1329_v38, %v10113_v49  ;;  %vm4621_vm5 = vcmp.gt.s32.totalorder %v4620_v59, 0 }
 0x219   : > { %v1279_v47 = vsel %vm1277_vm13, %v1278_v23, %v8817_v30  ;;  %v4585_v62 = vor.u32 4788187, %v4584_v4  ;;  %v4622_v51 = vsel %vm4621_vm5, %v4620_v59, 0  ;;  %v4595_v50 = vsel %vm10073_vm1, 0, %v4593_v48 }
 0x21a   : > { %v1276_v43 = vsel %vm1274_vm0, %v8815_v2, %v1275_v36  ;;  %v1340_v35 = vadd.s32 1, %v10106_v18  ;;  %v4624_v44 = vand.u32 31, %v4622_v51  ;;  %v4588_v20 = vcvt.s32.f32 %v4581_v34 }
 0x21b   : > { %v1280_v7 = vsel %vm1273_vm3, %v1276_v43, %v1279_v47  ;;  %v4586_v58 = vand.u32 2147483647, %v4585_v62  ;;  %v4617_v55 = vand.u32 8388607, %v4610_v28  ;;  %v1337_v56 = vmul.u32 %v10042_v15, %v1321_v25 }
 0x21c   : > { %v1281_v37 = vsel %vm1270_vm4, nan, %v1280_v7  ;;  %vm1339_vm6 = vc.u32 %v10114_v42, %v10105_v45  ;;  %v4625_v27 = vsub.s32 32, %v4624_v44  ;;  %v4599_v11 = vadd.s32 3, %v4595_v50 }
 0x21d   : > { %7731 = vst [vmem:[%s10000_s14 + $0x8] sm:$0xff] %v1281_v37  ;;  %v4589_v52 = vmul.f32 %v4588_v20, %v4586_v58  ;;  %v1341_v40 = vsel %vm1339_vm6, %v1340_v35, %v10106_v18  ;;  %v4623_v54 = vshrl.u32 %v4622_v51, 5  ;;  %v4627_v39 = vshll.u32 %v9287_v61, %v4624_v44 }
 0x21e   : > { %v1342_v57 = vadd.s32 %v1341_v40, %v1337_v56  ;;  %v4628_v13 = vshrl.u32 %v9288_v1, %v4625_v27  ;;  %v4631_v29 = vshrl.u32 %v9289_v3, %v4625_v27  ;;  %v4630_v15 = vshll.u32 %v9288_v1, %v4624_v44 }
 0x21f   : > { %v4590_v31 = vxor.u32 2147483648, %v4589_v52  ;;  %v4633_v16 = vshll.u32 %v9289_v3, %v4624_v44  ;;  %v4634_v24 = vshrl.u32 %v9290_v5, %v4625_v27  ;;  %v4636_v59 = vshll.u32 %v9290_v5, %v4624_v44 }
 0x220   : > { %v1343_v2 = vadd.s32 536870912, %v1342_v57  ;;  %v4629_v38 = vor.u32 %v4628_v13, %v4627_v39  ;;  %v4637_v18 = vshrl.u32 %v9291_v10, %v4625_v27  ;;  %v4632_v23 = vor.u32 %v4631_v29, %v4630_v15 }
 0x221   : > { %v4591_v30 = vsel %vm4508_vm10, %v4590_v31, %v4589_v52  ;;  %v4635_v34 = vor.u32 %v4634_v24, %v4633_v16  ;;  %v4640_v4 = vshrl.u32 %v9292_v22, %v4625_v27  ;;  %v4639_v47 = vshll.u32 %v9291_v10, %v4624_v44 }
 0x222   : > { %v4594_v48 = vsel %vm10073_vm1, %v9690_v46, %v4591_v30  ;;  %v1344_v36 = vshrl.u32 %v1343_v2, 30  ;;  %v4638_v49 = vor.u32 %v4637_v18, %v4636_v59  ;;  %v4618_v62 = vor.u32 8388608, %v4617_v55  ;;  %v10179_v18 = vpop.f32.mrb[6].mxu0 }
 0x223   : > { %8818 = vcosq.f32 %v4594_v48  ;;  %v4626_v25 = vshrl.u32 %v9287_v61, %v4625_v27  ;;  %vm4642_vm7 = vcmp.lt.s32.totalorder %v4623_v54, 1  ;;  %v4641_v43 = vor.u32 %v4640_v4, %v4639_v47 }
 0x224   : > { %8820 = vsinq.f32 %v4594_v48  ;;  %v1345_v51 = vshll.u32 %v1344_v36, 30  ;;  %vm4645_vm8 = vcmp.lt.s32.totalorder %v4623_v54, 4  ;;  %vm4644_vm9 = vcmp.lt.s32.totalorder %v4623_v54, 3 }
 0x225   : > { %v4647_v50 = vsel %vm4645_vm8, %v4635_v34, 2102212464  ;;  %v4650_v35 = vsel %vm4642_vm7, %v4629_v38, %v4632_v23  ;;  %v4651_v60 = vsel %vm4645_vm8, %v4638_v49, 920167782  ;;  %v1368_v58 = vsub.s32 4, %v1344_v36 }
 0x226   : > { %v10155_v7 = vsub.s32 %v1342_v57, %v1345_v51  ;;  %vm4643_vm10 = vcmp.lt.s32.totalorder %v4623_v54, 2  ;;  %v4652_v44 = vsel %vm4644_vm9, %v4635_v34, %v4651_v60  ;;  %v4600_v20 = vand.u32 3, %v4599_v11 }
 0x227   : > { %v4653_v55 = vsel %vm4643_vm10, %v4650_v35, %v4652_v44  ;;  %v4654_v37 = vsel %vm4642_vm7, %v4632_v23, %v4635_v34  ;;  %v4658_v56 = vshll.u32 %v4618_v62, 8  ;;  %v4646_v52 = vsel %vm4642_vm7, %v4626_v25, %v4629_v38 }
 0x228   : > { %v1348_v27 = vsub.s32 0, %v10155_v7  ;;  %v4648_v40 = vsel %vm4644_vm9, %v4632_v23, %v4647_v50  ;;  %v4655_v39 = vsel %vm4645_vm8, %v4641_v43, 1326507024  ;;  %vm1284_vm11 = vcmp.lt.s32.totalorder %v9976_v32, 0 }
 0x229   : > { %v4656_v57 = vsel %vm4644_vm9, %v4638_v49, %v4655_v39  ;;  %v10166_v13 = vmul.u32.u64.low %v4658_v56, %v4653_v55  ;;  %v10167_v29 = vmul.u32.u64.high %v4658_v56, %v4653_v55, %v10166_v13  ;;  %v1369_v31 = vsel %vm1284_vm11, %v1368_v58, %v1344_v36 }
 0x22a   : > { %v8037_v11 = vmin.u32 %v1348_v27, %v10155_v7  ;;  %v4657_v15 = vsel %vm4643_vm10, %v4654_v37, %v4656_v57  ;;  %v1386_v16 = vand.u32 2147483647, %v10037_v33  ;;  %v4649_v24 = vsel %vm4643_vm10, %v4646_v52, %v4648_v40 }
 0x22b   : > { %v10175_v2 = vmul.u32.u64.low %v4658_v56, %v4657_v15  ;;  %v10176_v38 = vmul.u32.u64.high %v4658_v56, %v4657_v15, %v10175_v2  ;;  %v1389_v59 = vand.u32 2139095040, %v10037_v33  ;;  %vm4598_vm12 = vweird.f32 %v9690_v46 }
 0x22c   : > { %vm4601_vm13 = vcmp.lt.s32.totalorder %v4600_v20, 2  ;;  %vm10184_vm14 = vcmp.le.f32.partialorder %v1282_v26, 0.7853982  ;;  %v1350_v23 = vclz %v8037_v11  ;;  %vm4602_vm15 = vcmp.eq.s32.totalorder %v4600_v20, 0 }
 0x22d   : > { %v8819_v34 = vpop.eup %8818  ;;  %vm4605_vm0 = vcmp.eq.s32.totalorder %v4600_v20, 2  ;;  %v4668_v54 = vadd.s32 1, %v10167_v29  ;;  %v1390_v4 = vshrl.u32 %v1389_v59, 23  ;;  %v1371_v47 = vsel %vm10184_vm14, 0, %v1369_v31 }
 0x22e   : > { %v8821_v48 = vpop.eup %8820  ;;  %v4606_v36 = vxor.u32 2147483648, %v8819_v34  ;;  %v8038_v49 = vadd.s32 4294967294, %v1350_v23  ;;  %v4665_v62 = vmul.u32 %v4658_v56, %v4649_v24  ;;  %vm4667_vm1 = vc.u32 %v10176_v38, %v10166_v13 }
 0x22f   : > { %v4603_v25 = vxor.u32 2147483648, %v8821_v48  ;;  %v8040_v26 = vadd.s32 4294967169, %v1390_v4  ;;  %v1393_v51 = vand.u32 8388607, %v1386_v16  ;;  %v1338_v50 = vadd.s32 %v10105_v45, %v10114_v42 }
 0x230   : > { %v4607_v43 = vsel %vm4605_vm0, %v4606_v36, %v8821_v48  ;;  %vm8039_vm2 = vcmp.lt.s32.totalorder %v8038_v49, 0  ;;  %v4669_v35 = vsel %vm4667_vm1, %v4668_v54, %v10167_v29  ;;  %v1375_v52 = vadd.s32 3, %v1371_v47 }
 0x231   : > { %v4604_v60 = vsel %vm4602_vm15, %v8819_v34, %v4603_v25  ;;  %v1353_v58 = vsel %vm8039_vm2, 0, %v8038_v49  ;;  %v4670_v44 = vadd.s32 %v4669_v35, %v4665_v62  ;;  %v1396_v55 = vadd.s32 1, %v8040_v26 }
 0x232   : > { %v4608_v37 = vsel %vm4601_vm13, %v4604_v60, %v4607_v43  ;;  %v1354_v56 = vsub.s32 32, %v1353_v58  ;;  %v1358_v27 = vsub.s32 4294967266, %v1353_v58  ;;  %v1394_v57 = vor.u32 8388608, %v1393_v51 }
 0x233   : > { %v4609_v40 = vsel %vm4598_vm12, nan, %v4608_v37  ;;  %v4671_v39 = vadd.s32 536870912, %v4670_v44  ;;  %vm1397_vm3 = vcmp.gt.s32.totalorder %v1396_v55, 0  ;;  %v1355_v45 = vshll.u32 %v10155_v7, %v1353_v58 }
 0x234   : > { %7763 = vst [vmem:[%s10000_s14 + $0x108] sm:$0xff] %v4609_v40  ;;  %v1356_v42 = vshrl.u32 %v1338_v50, %v1354_v56  ;;  %v1359_v29 = vadd.s32 127, %v1358_v27  ;;  %v1398_v11 = vsel %vm1397_vm3, %v1396_v55, 0  ;;  %v850_v20 = vadd.f32 %v9687_v41, %v9645_v8 }
 0x235   : > { %v4672_v31 = vshrl.u32 %v4671_v39, 30  ;;  %v1400_v15 = vand.u32 31, %v1398_v11  ;;  %v10205_v59 = vand.u32 3, %v1375_v52  ;;  %vm4612_vm4 = vcmp.lt.s32.totalorder %v10026_v17, 0 }
 0x236   : > { %v1357_v24 = vor.u32 %v1356_v42, %v1355_v45  ;;  %v1360_v2 = vshll.u32 %v1359_v29, 23  ;;  %v4666_v54 = vadd.s32 %v10166_v13, %v10176_v38  ;;  %v10209_v7 = vshll.u32 %v1394_v57, 8 }
 0x237   : > { %v4673_v46 = vshll.u32 %v4672_v31, 30  ;;  %v1401_v23 = vsub.s32 32, %v1400_v15  ;;  %v774_v4 = vadd.f32 %v9782_v63, %v9643_v6  ;;  %v1399_v36 = vshrl.u32 %v1398_v11, 5 }
 0x238   : > { %v1361_v34 = vor.u32 4788187, %v1360_v2  ;;  %v969_v49 = vmul.f32 %v9649_v12, %v850_v20  ;;  %v1364_v62 = vcvt.s32.f32 %v1357_v24  ;;  %v4696_v38 = vsub.s32 4, %v4672_v31 }
 0x239   : > { %v10213_v48 = vsub.s32 %v4670_v44, %v4673_v46  ;;  %v1404_v41 = vshrl.u32 %v9288_v1, %v1401_v23  ;;  %v1407_v25 = vshrl.u32 %v9289_v3, %v1401_v23  ;;  %v1410_v26 = vshrl.u32 %v9290_v5, %v1401_v23 }
 0x23a   : > { %v1362_v47 = vand.u32 2147483647, %v1361_v34  ;;  %v1403_v51 = vshll.u32 %v9287_v61, %v1400_v15  ;;  %v1406_v63 = vshll.u32 %v9288_v1, %v1400_v15  ;;  %v1409_v50 = vshll.u32 %v9289_v3, %v1400_v15 }
 0x23b   : > { %v4676_v13 = vsub.s32 0, %v10213_v48  ;;  %v1412_v35 = vshll.u32 %v9290_v5, %v1400_v15  ;;  %v1413_v60 = vshrl.u32 %v9291_v10, %v1401_v23  ;;  %v1416_v37 = vshrl.u32 %v9292_v22, %v1401_v23 }
 0x23c   : > { %v1365_v43 = vmul.f32 %v1364_v62, %v1362_v47  ;;  %v1405_v44 = vor.u32 %v1404_v41, %v1403_v51  ;;  %v1408_v55 = vor.u32 %v1407_v25, %v1406_v63  ;;  %v1411_v27 = vor.u32 %v1410_v26, %v1409_v50 }
 0x23d   : > { %v8165_v58 = vmin.u32 %v4676_v13, %v10213_v48  ;;  %v1414_v52 = vor.u32 %v1413_v60, %v1412_v35  ;;  %v1415_v40 = vshll.u32 %v9291_v10, %v1400_v15  ;;  %v10230_v57 = vsel %vm4612_vm4, %v4696_v38, %v4672_v31 }
 0x23e   : > { %v1366_v56 = vxor.u32 2147483648, %v1365_v43  ;;  %v1402_v45 = vshrl.u32 %v9287_v61, %v1401_v23  ;;  %v10234_v42 = vadd.f32 %v9656_v19, %v969_v49  ;;  %vm1418_vm5 = vcmp.lt.s32.totalorder %v1399_v36, 1 }
 0x23f   : > { %v4678_v39 = vclz %v8165_v58  ;;  %v1417_v11 = vor.u32 %v1416_v37, %v1415_v40  ;;  %vm1419_vm6 = vcmp.lt.s32.totalorder %v1399_v36, 2  ;;  %vm1420_vm7 = vcmp.lt.s32.totalorder %v1399_v36, 3  ;;  %v10261_v37 = vpop.f32.mrb[6].mxu1 }
 0x240   : > { %v1367_v29 = vsel %vm1284_vm11, %v1366_v56, %v1365_v43  ;;  %vm1421_vm8 = vcmp.lt.s32.totalorder %v1399_v36, 4  ;;  %v1426_v24 = vsel %vm1418_vm5, %v1405_v44, %v1408_v55  ;;  %v1422_v46 = vsel %vm1418_vm5, %v1402_v45, %v1405_v44 }
 0x241   : > { %v1370_v15 = vsel %vm10184_vm14, %v9976_v32, %v1367_v29  ;;  %v8166_v20 = vadd.s32 4294967294, %v4678_v39  ;;  %v1423_v31 = vsel %vm1421_vm8, %v1411_v27, 2102212464  ;;  %v1427_v2 = vsel %vm1421_vm8, %v1414_v52, 920167782 }
 0x242   : > { %8822 = vcosq.f32 %v1370_v15  ;;  %v1428_v23 = vsel %vm1420_vm7, %v1411_v27, %v1427_v2  ;;  %v1430_v30 = vsel %vm1418_vm5, %v1408_v55, %v1411_v27  ;;  %v1431_v49 = vsel %vm1421_vm8, %v1417_v11, 1326507024 }
 0x243   : > { %8824 = vsinq.f32 %v1370_v15  ;;  %vm8167_vm9 = vcmp.lt.s32.totalorder %v8166_v20, 0  ;;  %v1429_v41 = vsel %vm1419_vm6, %v1426_v24, %v1428_v23  ;;  %v1424_v25 = vsel %vm1420_vm7, %v1408_v55, %v1423_v31 }
 0x244   : > { %v4681_v34 = vsel %vm8167_vm9, 0, %v8166_v20  ;;  %v1432_v26 = vsel %vm1420_vm7, %v1414_v52, %v1431_v49  ;;  %v10251_v51 = vmul.u32.u64.low %v10209_v7, %v1429_v41  ;;  %v10252_v63 = vmul.u32.u64.high %v10209_v7, %v1429_v41, %v10251_v51 }
 0x245   : > { %v4682_v47 = vsub.s32 32, %v4681_v34  ;;  %v4686_v62 = vsub.s32 4294967266, %v4681_v34  ;;  %v4683_v13 = vshll.u32 %v10213_v48, %v4681_v34  ;;  %v1433_v38 = vsel %vm1419_vm6, %v1430_v30, %v1432_v26 }
 0x246   : > { %v10255_v35 = vmul.u32.u64.low %v10209_v7, %v1433_v38  ;;  %v10256_v60 = vmul.u32.u64.high %v10209_v7, %v1433_v38, %v10255_v35  ;;  %v1425_v58 = vsel %vm1419_vm6, %v1422_v46, %v1424_v25  ;;  %v4717_v44 = vand.u32 2139095040, %v10234_v42 }
 0x247   : > { %v4684_v43 = vshrl.u32 %v4666_v54, %v4682_v47  ;;  %v4687_v50 = vadd.s32 127, %v4686_v62  ;;  %v938_v55 = vmul.f32 %v9647_v9, %v774_v4  ;;  %vm1374_vm10 = vweird.f32 %v9976_v32 }
 0x248   : > { %vm10266_vm11 = vcmp.le.f32.partialorder %v4610_v28, 0.7853982  ;;  %vm1377_vm12 = vcmp.lt.s32.totalorder %v10205_v59, 2  ;;  %v1444_v4 = vadd.s32 1, %v10252_v63  ;;  %v4718_v27 = vshrl.u32 %v4717_v44, 23 }
 0x249   : > { %v4685_v54 = vor.u32 %v4684_v43, %v4683_v13  ;;  %v4688_v56 = vshll.u32 %v4687_v50, 23  ;;  %v4699_v36 = vsel %vm10266_vm11, 0, %v10230_v57  ;;  %v1441_v40 = vmul.u32 %v10209_v7, %v1425_v58 }
 0x24a   : > { %vm1443_vm13 = vc.u32 %v10256_v60, %v10251_v51  ;;  %v4714_v28 = vand.u32 2147483647, %v10234_v42  ;;  %vm1378_vm14 = vcmp.eq.s32.totalorder %v10205_v59, 0  ;;  %v8168_v29 = vadd.s32 4294967169, %v4718_v27 }
 0x24b   : > { %v4689_v52 = vor.u32 4788187, %v4688_v56  ;;  %v1445_v45 = vsel %vm1443_vm13, %v1444_v4, %v10252_v63  ;;  %v10281_v11 = vadd.f32 %v9652_v14, %v938_v55  ;;  %v4692_v31 = vcvt.s32.f32 %v4685_v54 }
 0x24c   : > { %v8823_v39 = vpop.eup %8822  ;;  %v1446_v24 = vadd.s32 %v1445_v45, %v1441_v40  ;;  %vm1381_vm15 = vcmp.eq.s32.totalorder %v10205_v59, 2  ;;  %v4703_v7 = vadd.s32 3, %v4699_v36  ;;  %v4724_v46 = vadd.s32 1, %v8168_v29 }
 0x24d   : > { %v8825_v57 = vpop.eup %8824  ;;  %v1382_v15 = vxor.u32 2147483648, %v8823_v39  ;;  %v4690_v20 = vand.u32 2147483647, %v4689_v52  ;;  %v4721_v30 = vand.u32 8388607, %v4714_v28  ;;  %v1493_v62 = vand.u32 2139095040, %v10281_v11 }
 0x24e   : > { %v1379_v2 = vxor.u32 2147483648, %v8825_v57  ;;  %v1447_v41 = vadd.s32 536870912, %v1446_v24  ;;  %vm4725_vm0 = vcmp.gt.s32.totalorder %v4724_v46, 0  ;;  %v1490_v47 = vand.u32 2147483647, %v10281_v11 }
 0x24f   : > { %v1383_v23 = vsel %vm1381_vm15, %v1382_v15, %v8825_v57  ;;  %v4693_v34 = vmul.f32 %v4692_v31, %v4690_v20  ;;  %v4726_v38 = vsel %vm4725_vm0, %v4724_v46, 0  ;;  %v10294_v43 = vand.u32 3, %v4703_v7 }
 0x250   : > { %v1380_v49 = vsel %vm1378_vm14, %v8823_v39, %v1379_v2  ;;  %v1448_v13 = vshrl.u32 %v1447_v41, 30  ;;  %vm1388_vm1 = vcmp.lt.s32.totalorder %v10037_v33, 0  ;;  %v4728_v50 = vand.u32 31, %v4726_v38 }
 0x251   : > { %v1384_v25 = vsel %vm1377_vm12, %v1380_v49, %v1383_v23  ;;  %v4694_v26 = vxor.u32 2147483648, %v4693_v34  ;;  %v10299_v35 = vadd.f32 %v9844_v0, %v9643_v6  ;;  %v10305_v58 = vadd.s32 %v10251_v51, %v10256_v60 }
 0x252   : > { %v1385_v63 = vsel %vm1374_vm10, nan, %v1384_v25  ;;  %v1449_v44 = vshll.u32 %v1448_v13, 30  ;;  %v4722_v55 = vor.u32 8388608, %v4721_v30  ;;  %v4729_v54 = vsub.s32 32, %v4728_v50 }
 0x253   : > { %7732 = vst [vmem:[%s10000_s14 + $0x10] sm:$0xff] %v1385_v63  ;;  %v4695_v59 = vsel %vm4612_vm4, %v4694_v26, %v4693_v34  ;;  %v1494_v56 = vshrl.u32 %v1493_v62, 23  ;;  %v10312_v36 = vand.u32 8388607, %v1490_v47  ;;  %v1472_v4 = vsub.s32 4, %v1448_v13 }
 0x254   : > { %v4698_v32 = vsel %vm10266_vm11, %v10026_v17, %v4695_v59  ;;  %v10314_v0 = vsub.s32 %v1446_v24, %v1449_v44  ;;  %v4727_v27 = vshrl.u32 %v4726_v38, 5  ;;  %vm10318_vm2 = vcmp.le.f32.partialorder %v1386_v16, 0.7853982 }
 0x255   : > { %8826 = vcosq.f32 %v4698_v32  ;;  %v4731_v60 = vshll.u32 %v9287_v61, %v4728_v50  ;;  %v4732_v48 = vshrl.u32 %v9288_v1, %v4729_v54  ;;  %v4734_v52 = vshll.u32 %v9288_v1, %v4728_v50 }
 0x256   : > { %8828 = vsinq.f32 %v4698_v32  ;;  %v1452_v40 = vsub.s32 0, %v10314_v0  ;;  %v4735_v39 = vshrl.u32 %v9289_v3, %v4729_v54  ;;  %v4737_v45 = vshll.u32 %v9289_v3, %v4728_v50 }
 0x257   : > { %v4738_v29 = vshrl.u32 %v9290_v5, %v4729_v54  ;;  %v4733_v57 = vor.u32 %v4732_v48, %v4731_v60  ;;  %v4740_v16 = vshll.u32 %v9290_v5, %v4728_v50  ;;  %v4741_v15 = vshrl.u32 %v9291_v10, %v4729_v54 }
 0x258   : > { %v10331_v20 = vshll.u32 %v4722_v55, 8  ;;  %vm4709_vm3 = vcmp.eq.s32.totalorder %v10294_v43, 2  ;;  %v8041_v31 = vmin.u32 %v1452_v40, %v10314_v0  ;;  %v4736_v24 = vor.u32 %v4735_v39, %v4734_v52 }
 0x259   : > { %v4739_v2 = vor.u32 %v4738_v29, %v4737_v45  ;;  %v1498_v7 = vor.u32 8388608, %v10312_v36  ;;  %vm4706_vm4 = vcmp.eq.s32.totalorder %v10294_v43, 0  ;;  %v4730_v46 = vshrl.u32 %v9287_v61, %v4729_v54  ;;  %v10346_v36 = vpop.f32.mrb[7].mxu0 }
 0x25a   : > { %v4742_v23 = vor.u32 %v4741_v15, %v4740_v16  ;;  %v4743_v34 = vshll.u32 %v9291_v10, %v4728_v50  ;;  %v4744_v41 = vshrl.u32 %v9292_v22, %v4729_v54  ;;  %vm4705_vm5 = vcmp.lt.s32.totalorder %v10294_v43, 2 }
 0x25b   : > { %v1454_v30 = vclz %v8041_v31  ;;  %v1473_v49 = vsel %vm1388_vm1, %v1472_v4, %v1448_v13  ;;  %vm4746_vm6 = vcmp.lt.s32.totalorder %v4727_v27, 1  ;;  %v8044_v62 = vadd.s32 4294967169, %v1494_v56 }
 0x25c   : > { %vm4702_vm7 = vweird.f32 %v10026_v17  ;;  %v4745_v25 = vor.u32 %v4744_v41, %v4743_v34  ;;  %vm4748_vm8 = vcmp.lt.s32.totalorder %v4727_v27, 3  ;;  %vm4749_vm9 = vcmp.lt.s32.totalorder %v4727_v27, 4 }
 0x25d   : > { %v4750_v26 = vsel %vm4746_vm6, %v4730_v46, %v4733_v57  ;;  %v8042_v38 = vadd.s32 4294967294, %v1454_v30  ;;  %v4751_v63 = vsel %vm4749_vm9, %v4739_v2, 2102212464  ;;  %v4754_v59 = vsel %vm4746_vm6, %v4733_v57, %v4736_v24 }
 0x25e   : > { %v4755_v50 = vsel %vm4749_vm9, %v4742_v23, 920167782  ;;  %v4752_v44 = vsel %vm4748_vm8, %v4736_v24, %v4751_v63  ;;  %v4758_v32 = vsel %vm4746_vm6, %v4736_v24, %v4739_v2  ;;  %v4759_v54 = vsel %vm4749_vm9, %v4745_v25, 1326507024 }
 0x25f   : > { %v4756_v55 = vsel %vm4748_vm8, %v4739_v2, %v4755_v50  ;;  %v8827_v13 = vpop.eup %8826  ;;  %vm8043_vm10 = vcmp.lt.s32.totalorder %v8042_v38, 0  ;;  %v1475_v56 = vsel %vm10318_vm2, 0, %v1473_v49  ;;  %vm4747_vm11 = vcmp.lt.s32.totalorder %v4727_v27, 2 }
 0x260   : > { %v4760_v4 = vsel %vm4748_vm8, %v4742_v23, %v4759_v54  ;;  %v8829_v60 = vpop.eup %8828  ;;  %v4710_v48 = vxor.u32 2147483648, %v8827_v13  ;;  %v1457_v52 = vsel %vm8043_vm10, 0, %v8042_v38  ;;  %v4753_v40 = vsel %vm4747_vm11, %v4750_v26, %v4752_v44 }
 0x261   : > { %v4761_v39 = vsel %vm4747_vm11, %v4758_v32, %v4760_v4  ;;  %v4707_v45 = vxor.u32 2147483648, %v8829_v60  ;;  %v1458_v29 = vsub.s32 32, %v1457_v52  ;;  %v1462_v57 = vsub.s32 4294967266, %v1457_v52 }
 0x262   : > { %v4757_v16 = vsel %vm4747_vm11, %v4754_v59, %v4756_v55  ;;  %v4711_v15 = vsel %vm4709_vm3, %v4710_v48, %v8829_v60  ;;  %v10354_v31 = vmul.u32.u64.low %v10331_v20, %v4761_v39  ;;  %v10355_v24 = vmul.u32.u64.high %v10331_v20, %v4761_v39, %v10354_v31 }
 0x263   : > { %v1500_v2 = vadd.s32 1, %v8044_v62  ;;  %v4708_v27 = vsel %vm4706_vm4, %v8827_v13, %v4707_v45  ;;  %v1459_v46 = vshll.u32 %v10314_v0, %v1457_v52  ;;  %v1460_v23 = vshrl.u32 %v10305_v58, %v1458_v29 }
 0x264   : > { %v1463_v34 = vadd.s32 127, %v1462_v57  ;;  %v4712_v41 = vsel %vm4705_vm5, %v4708_v27, %v4711_v15  ;;  %v10364_v30 = vmul.u32.u64.low %v10331_v20, %v4757_v16  ;;  %v10365_v49 = vmul.u32.u64.high %v10331_v20, %v4757_v16, %v10364_v30 }
 0x265   : > { %vm1501_vm12 = vcmp.gt.s32.totalorder %v1500_v2, 0  ;;  %v4713_v62 = vsel %vm4702_vm7, nan, %v4712_v41  ;;  %v1461_v25 = vor.u32 %v1460_v23, %v1459_v46  ;;  %v1479_v0 = vadd.s32 3, %v1475_v56 }
 0x266   : > { %v1464_v26 = vshll.u32 %v1463_v34, 23  ;;  %v1502_v38 = vsel %vm1501_vm12, %v1500_v2, 0  ;;  %7764 = vst [vmem:[%s10000_s14 + $0x110] sm:$0xff] %v4713_v62  ;;  %v10371_v58 = vshll.u32 %v1498_v7, 8  ;;  %v4769_v43 = vmul.u32 %v10331_v20, %v4753_v40 }
 0x267   : > { %v1504_v63 = vand.u32 31, %v1502_v38  ;;  %vm4771_vm13 = vc.u32 %v10355_v24, %v10364_v30  ;;  %v970_v50 = vmul.f32 %v9647_v9, %v10299_v35  ;;  %v1468_v44 = vcvt.s32.f32 %v1461_v25 }
 0x268   : > { %v1465_v59 = vor.u32 4788187, %v1464_v26  ;;  %v4772_v17 = vadd.s32 1, %v10365_v49  ;;  %v1503_v55 = vshrl.u32 %v1502_v38, 5  ;;  %vm10429_vm5 = vcmp.le.f32.partialorder %v4714_v28, 0.7853982 }
 0x269   : > { %v1505_v32 = vsub.s32 32, %v1504_v63  ;;  %v1507_v13 = vshll.u32 %v9287_v61, %v1504_v63  ;;  %v1510_v7 = vshll.u32 %v9288_v1, %v1504_v63  ;;  %v1513_v56 = vshll.u32 %v9289_v3, %v1504_v63 }
 0x26a   : > { %v1466_v54 = vand.u32 2147483647, %v1465_v59  ;;  %v4773_v20 = vsel %vm4771_vm13, %v4772_v17, %v10365_v49  ;;  %v1516_v35 = vshll.u32 %v9290_v5, %v1504_v63  ;;  %v1519_v57 = vshll.u32 %v9291_v10, %v1504_v63 }
 0x26b   : > { %v1508_v4 = vshrl.u32 %v9288_v1, %v1505_v32  ;;  %v1511_v60 = vshrl.u32 %v9289_v3, %v1505_v32  ;;  %v4774_v52 = vadd.s32 %v4773_v20, %v4769_v43  ;;  %v1514_v40 = vshrl.u32 %v9290_v5, %v1505_v32 }
 0x26c   : > { %v1469_v48 = vmul.f32 %v1468_v44, %v1466_v54  ;;  %v1517_v39 = vshrl.u32 %v9291_v10, %v1505_v32  ;;  %v1520_v16 = vshrl.u32 %v9292_v22, %v1505_v32  ;;  %v1506_v46 = vshrl.u32 %v9287_v61, %v1505_v32 }
 0x26d   : > { %v1509_v45 = vor.u32 %v1508_v4, %v1507_v13  ;;  %v1512_v29 = vor.u32 %v1511_v60, %v1510_v7  ;;  %v4775_v31 = vadd.s32 536870912, %v4774_v52  ;;  %v1515_v2 = vor.u32 %v1514_v40, %v1513_v56 }
 0x26e   : > { %v1470_v15 = vxor.u32 2147483648, %v1469_v48  ;;  %v1518_v27 = vor.u32 %v1517_v39, %v1516_v35  ;;  %v1521_v23 = vor.u32 %v1520_v16, %v1519_v57  ;;  %vm1522_vm14 = vcmp.lt.s32.totalorder %v1503_v55, 1 }
 0x26f   : > { %v10392_v34 = vadd.f32 %v9652_v14, %v970_v50  ;;  %v4776_v49 = vshrl.u32 %v4775_v31, 30  ;;  %vm1523_vm15 = vcmp.lt.s32.totalorder %v1503_v55, 2  ;;  %vm1525_vm0 = vcmp.lt.s32.totalorder %v1503_v55, 4 }
 0x270   : > { %v1471_v41 = vsel %vm1388_vm1, %v1470_v15, %v1469_v48  ;;  %v1527_v25 = vsel %vm1525_vm0, %v1515_v2, 2102212464  ;;  %v1530_v26 = vsel %vm1522_vm14, %v1509_v45, %v1512_v29  ;;  %v1531_v38 = vsel %vm1525_vm0, %v1518_v27, 920167782 }
 0x271   : > { %v1474_v62 = vsel %vm10318_vm2, %v10037_v33, %v1471_v41  ;;  %v4777_v63 = vshll.u32 %v4776_v49, 30  ;;  %vm1524_vm3 = vcmp.lt.s32.totalorder %v1503_v55, 3  ;;  %v1526_v59 = vsel %vm1522_vm14, %v1506_v46, %v1509_v45  ;;  %v10420_v45 = vpop.f32.mrb[7].mxu1 }
 0x272   : > { %8830 = vcosq.f32 %v1474_v62  ;;  %v1532_v43 = vsel %vm1524_vm3, %v1515_v2, %v1531_v38  ;;  %v1534_v50 = vsel %vm1522_vm14, %v1512_v29, %v1515_v2  ;;  %v1535_v44 = vsel %vm1525_vm0, %v1521_v23, 1326507024 }
 0x273   : > { %8832 = vsinq.f32 %v1474_v62  ;;  %v10402_v17 = vsub.s32 %v4774_v52, %v4777_v63  ;;  %v1528_v32 = vsel %vm1524_vm3, %v1512_v29, %v1527_v25  ;;  %v1533_v51 = vsel %vm1523_vm15, %v1530_v26, %v1532_v43 }
 0x274   : > { %v1536_v54 = vsel %vm1524_vm3, %v1518_v27, %v1535_v44  ;;  %v4800_v13 = vsub.s32 4, %v4776_v49  ;;  %v10407_v56 = vmul.u32.u64.low %v10371_v58, %v1533_v51  ;;  %v10408_v20 = vmul.u32.u64.high %v10371_v58, %v1533_v51, %v10407_v56 }
 0x275   : > { %v1537_v7 = vsel %vm1523_vm15, %v1534_v50, %v1536_v54  ;;  %v1480_v4 = vand.u32 3, %v1479_v0  ;;  %v4780_v60 = vsub.s32 0, %v10402_v17  ;;  %v4821_v52 = vand.u32 2139095040, %v10392_v34 }
 0x276   : > { %v10413_v35 = vmul.u32.u64.low %v10371_v58, %v1537_v7  ;;  %v10414_v48 = vmul.u32.u64.high %v10371_v58, %v1537_v7, %v10413_v35  ;;  %vm4716_vm1 = vcmp.lt.s32.totalorder %v10234_v42, 0  ;;  %v1529_v39 = vsel %vm1523_vm15, %v1526_v59, %v1528_v32 }
 0x277   : > { %v8169_v40 = vmin.u32 %v4780_v60, %v10402_v17  ;;  %vm1478_vm2 = vweird.f32 %v10037_v33  ;;  %v4801_v0 = vsel %vm4716_vm1, %v4800_v13, %v4776_v49  ;;  %v1548_v29 = vadd.s32 1, %v10408_v20 }
 0x278   : > { %v4818_v57 = vand.u32 2147483647, %v10392_v34  ;;  %v4822_v16 = vshrl.u32 %v4821_v52, 23  ;;  %vm1481_vm4 = vcmp.lt.s32.totalorder %v1480_v4, 2  ;;  %v776_v31 = vadd.f32 %v9987_v21, %v9645_v8 }
 0x279   : > { %v4782_v55 = vclz %v8169_v40  ;;  %vm1482_vm6 = vcmp.eq.s32.totalorder %v1480_v4, 0  ;;  %v1545_v2 = vmul.u32 %v10371_v58, %v1529_v39  ;;  %vm1547_vm7 = vc.u32 %v10414_v48, %v10407_v56 }
 0x27a   : > { %v8172_v27 = vadd.s32 4294967169, %v4822_v16  ;;  %vm1485_vm8 = vcmp.eq.s32.totalorder %v1480_v4, 2  ;;  %v4803_v28 = vsel %vm10429_vm5, 0, %v4801_v0  ;;  %v1549_v41 = vsel %vm1547_vm7, %v1548_v29, %v10408_v20 }
 0x27b   : > { %v8170_v23 = vadd.s32 4294967294, %v4782_v55  ;;  %v1550_v25 = vadd.s32 %v1549_v41, %v1545_v2  ;;  %v4825_v21 = vand.u32 8388607, %v4818_v57  ;;  %v4770_v38 = vadd.s32 %v10364_v30, %v10355_v24 }
 0x27c   : > { %v8831_v46 = vpop.eup %8830  ;;  %v4828_v26 = vadd.s32 1, %v8172_v27  ;;  %v939_v63 = vmul.f32 %v9649_v12, %v776_v31  ;;  %v4807_v54 = vadd.s32 3, %v4803_v28  ;;  %vm1492_vm11 = vcmp.lt.s32.totalorder %v10281_v11, 0 }
 0x27d   : > { %v8833_v49 = vpop.eup %8832  ;;  %v1486_v62 = vxor.u32 2147483648, %v8831_v46  ;;  %vm8171_vm9 = vcmp.lt.s32.totalorder %v8170_v23, 0  ;;  %v1551_v50 = vadd.s32 536870912, %v1550_v25  ;;  %v4826_v20 = vor.u32 8388608, %v4825_v21 }
 0x27e   : > { %v1483_v58 = vxor.u32 2147483648, %v8833_v49  ;;  %v4785_v43 = vsel %vm8171_vm9, 0, %v8170_v23  ;;  %vm4829_vm10 = vcmp.gt.s32.totalorder %v4828_v26, 0  ;;  %v10453_v0 = vadd.f32 %v9656_v19, %v939_v63 }
 0x27f   : > { %v1487_v59 = vsel %vm1485_vm8, %v1486_v62, %v8833_v49  ;;  %v4786_v32 = vsub.s32 32, %v4785_v43  ;;  %v4790_v51 = vsub.s32 4294967266, %v4785_v43  ;;  %v1552_v7 = vshrl.u32 %v1551_v50, 30 }
 0x280   : > { %v1484_v44 = vsel %vm1482_vm6, %v8831_v46, %v1483_v58  ;;  %v4830_v60 = vsel %vm4829_vm10, %v4828_v26, 0  ;;  %v4787_v30 = vshll.u32 %v10402_v17, %v4785_v43  ;;  %v10456_v4 = vand.u32 3, %v4807_v54 }
 0x281   : > { %v1488_v13 = vsel %vm1481_vm4, %v1484_v44, %v1487_v59  ;;  %v4788_v35 = vshrl.u32 %v4770_v38, %v4786_v32  ;;  %v4791_v52 = vadd.s32 127, %v4790_v51  ;;  %v1553_v40 = vshll.u32 %v1552_v7, 30 }
 0x282   : > { %v1489_v24 = vsel %vm1478_vm2, nan, %v1488_v13  ;;  %v4832_v39 = vand.u32 31, %v4830_v60  ;;  %v10460_v33 = vshrl.u32 %v4830_v60, 5  ;;  %v1546_v2 = vadd.s32 %v10407_v56, %v10414_v48 }
 0x283   : > { %7733 = vst [vmem:[%s10000_s14 + $0x18] sm:$0xff] %v1489_v24  ;;  %v4789_v29 = vor.u32 %v4788_v35, %v4787_v30  ;;  %v4792_v16 = vshll.u32 %v4791_v52, 23  ;;  %v10458_v55 = vsub.s32 %v1550_v25, %v1553_v40  ;;  %v1576_v27 = vsub.s32 4, %v1552_v7 }
 0x284   : > { %v4833_v31 = vsub.s32 32, %v4832_v39  ;;  %v10464_v46 = vshll.u32 %v4826_v20, 8  ;;  %v1597_v49 = vand.u32 2139095040, %v10453_v0  ;;  %v4841_v21 = vshll.u32 %v9289_v3, %v4832_v39 }
 0x285   : > { %v4793_v17 = vor.u32 4788187, %v4792_v16  ;;  %v4796_v23 = vcvt.s32.f32 %v4789_v29  ;;  %v1556_v28 = vsub.s32 0, %v10458_v55  ;;  %v4835_v56 = vshll.u32 %v9287_v61, %v4832_v39 }
 0x286   : > { %v4836_v41 = vshrl.u32 %v9288_v1, %v4833_v31  ;;  %v4839_v25 = vshrl.u32 %v9289_v3, %v4833_v31  ;;  %v4842_v26 = vshrl.u32 %v9290_v5, %v4833_v31  ;;  %v4838_v48 = vshll.u32 %v9288_v1, %v4832_v39 }
 0x287   : > { %v4794_v62 = vand.u32 2147483647, %v4793_v17  ;;  %v8045_v58 = vmin.u32 %v1556_v28, %v10458_v55  ;;  %vm4850_vm12 = vcmp.lt.s32.totalorder %v10460_v33, 1  ;;  %v4844_v59 = vshll.u32 %v9290_v5, %v4832_v39 }
 0x288   : > { %v4843_v63 = vor.u32 %v4842_v26, %v4841_v21  ;;  %v4845_v43 = vshrl.u32 %v9291_v10, %v4833_v31  ;;  %vm10480_vm13 = vcmp.le.f32.partialorder %v1490_v47, 0.7853982  ;;  %v4837_v32 = vor.u32 %v4836_v41, %v4835_v56 }
 0x289   : > { %v4797_v38 = vmul.f32 %v4796_v23, %v4794_v62  ;;  %v1558_v44 = vclz %v8045_v58  ;;  %v4840_v51 = vor.u32 %v4839_v25, %v4838_v48  ;;  %vm4851_vm14 = vcmp.lt.s32.totalorder %v10460_v33, 2 }
 0x28a   : > { %v4846_v13 = vor.u32 %v4845_v43, %v4844_v59  ;;  %v4847_v20 = vshll.u32 %v9291_v10, %v4832_v39  ;;  %v4848_v60 = vshrl.u32 %v9292_v22, %v4833_v31  ;;  %v1577_v30 = vsel %vm1492_vm11, %v1576_v27, %v1552_v7 }
 0x28b   : > { %v4798_v54 = vxor.u32 2147483648, %v4797_v38  ;;  %v8046_v24 = vadd.s32 4294967294, %v1558_v44  ;;  %v4834_v47 = vshrl.u32 %v9287_v61, %v4833_v31  ;;  %vm4853_vm15 = vcmp.lt.s32.totalorder %v10460_v33, 4 }
 0x28c   : > { %v4849_v52 = vor.u32 %v4848_v60, %v4847_v20  ;;  %vm4852_vm0 = vcmp.lt.s32.totalorder %v10460_v33, 3  ;;  %v4855_v40 = vsel %vm4853_vm15, %v4843_v63, 2102212464  ;;  %v4858_v7 = vsel %vm4850_vm12, %v4837_v32, %v4840_v51 }
 0x28d   : > { %v4799_v35 = vsel %vm4716_vm1, %v4798_v54, %v4797_v38  ;;  %vm8047_vm3 = vcmp.lt.s32.totalorder %v8046_v24, 0  ;;  %v4859_v29 = vsel %vm4853_vm15, %v4846_v13, 920167782  ;;  %v4854_v31 = vsel %vm4850_vm12, %v4834_v47, %v4837_v32  ;;  %v10531_v32 = vpop.f32.mrb[8].mxu0 }
 0x28e   : > { %v4802_v39 = vsel %vm10429_vm5, %v10234_v42, %v4799_v35  ;;  %v1561_v16 = vsel %vm8047_vm3, 0, %v8046_v24  ;;  %v4860_v17 = vsel %vm4852_vm0, %v4843_v63, %v4859_v29  ;;  %v4856_v15 = vsel %vm4852_vm0, %v4840_v51, %v4855_v40 }
 0x28f   : > { %8834 = vcosq.f32 %v4802_v39  ;;  %v1562_v27 = vsub.s32 32, %v1561_v16  ;;  %v1566_v23 = vsub.s32 4294967266, %v1561_v16  ;;  %v1563_v28 = vshll.u32 %v10458_v55, %v1561_v16 }
 0x290   : > { %8836 = vsinq.f32 %v4802_v39  ;;  %v4861_v41 = vsel %vm4851_vm14, %v4858_v7, %v4860_v17  ;;  %v4862_v62 = vsel %vm4850_vm12, %v4840_v51, %v4843_v63  ;;  %v4863_v25 = vsel %vm4853_vm15, %v4849_v52, 1326507024 }
 0x291   : > { %v1564_v21 = vshrl.u32 %v1546_v2, %v1562_v27  ;;  %v1567_v26 = vadd.s32 127, %v1566_v23  ;;  %v4864_v58 = vsel %vm4852_vm0, %v4846_v13, %v4863_v25  ;;  %v1598_v56 = vshrl.u32 %v1597_v49, 23 }
 0x292   : > { %v1579_v48 = vsel %vm10480_vm13, 0, %v1577_v30  ;;  %v4865_v55 = vsel %vm4851_vm14, %v4862_v62, %v4864_v58  ;;  %v10523_v38 = vmul.u32.u64.low %v10464_v46, %v4861_v41  ;;  %v10524_v59 = vmul.u32.u64.high %v10464_v46, %v4861_v41, %v10523_v38 }
 0x293   : > { %v1565_v63 = vor.u32 %v1564_v21, %v1563_v28  ;;  %v1568_v43 = vshll.u32 %v1567_v26, 23  ;;  %v10528_v2 = vmul.u32.u64.low %v10464_v46, %v4865_v55  ;;  %v10529_v44 = vmul.u32.u64.high %v10464_v46, %v4865_v55, %v10528_v2 }
 0x294   : > { %v4857_v49 = vsel %vm4851_vm14, %v4854_v31, %v4856_v15  ;;  %v1594_v51 = vand.u32 2147483647, %v10453_v0  ;;  %v8048_v54 = vadd.s32 4294967169, %v1598_v56  ;;  %v856_v13 = vadd.f32 %v10086_v53, %v9645_v8 }
 0x295   : > { %vm4806_vm1 = vweird.f32 %v10234_v42  ;;  %v1569_v20 = vor.u32 4788187, %v1568_v43  ;;  %vm4809_vm2 = vcmp.lt.s32.totalorder %v10456_v4, 2  ;;  %v1583_v60 = vadd.s32 3, %v1579_v48 }
 0x296   : > { %v4876_v24 = vadd.s32 1, %v10524_v59  ;;  %v1604_v30 = vadd.s32 1, %v8048_v54  ;;  %v1572_v35 = vcvt.s32.f32 %v1565_v63  ;;  %v4873_v33 = vmul.u32 %v10464_v46, %v4857_v49 }
 0x297   : > { %v1570_v47 = vand.u32 2147483647, %v1569_v20  ;;  %vm4875_vm4 = vc.u32 %v10529_v44, %v10523_v38  ;;  %v1601_v53 = vand.u32 8388607, %v1594_v51  ;;  %v971_v39 = vmul.f32 %v9649_v12, %v856_v13 }
 0x298   : > { %v4877_v40 = vsel %vm4875_vm4, %v4876_v24, %v10524_v59  ;;  %vm1605_vm5 = vcmp.gt.s32.totalorder %v1604_v30, 0  ;;  %vm4810_vm6 = vcmp.eq.s32.totalorder %v10456_v4, 0  ;;  %vm4813_vm7 = vcmp.eq.s32.totalorder %v10456_v4, 2 }
 0x299   : > { %v8835_v52 = vpop.eup %8834  ;;  %v1573_v16 = vmul.f32 %v1572_v35, %v1570_v47  ;;  %v4878_v31 = vadd.s32 %v4877_v40, %v4873_v33  ;;  %v1606_v17 = vsel %vm1605_vm5, %v1604_v30, 0  ;;  %v10550_v28 = vand.u32 3, %v1583_v60 }
 0x29a   : > { %v8837_v7 = vpop.eup %8836  ;;  %v4814_v29 = vxor.u32 2147483648, %v8835_v52  ;;  %v1608_v27 = vand.u32 31, %v1606_v17  ;;  %v1602_v25 = vor.u32 8388608, %v1601_v53  ;;  %v10553_v26 = vadd.f32 %v9656_v19, %v971_v39 }
 0x29b   : > { %v4811_v46 = vxor.u32 2147483648, %v8837_v7  ;;  %v1574_v15 = vxor.u32 2147483648, %v1573_v16  ;;  %v4879_v41 = vadd.s32 536870912, %v4878_v31  ;;  %v10559_v55 = vshrl.u32 %v1606_v17, 5 }
 0x29c   : > { %v4815_v23 = vsel %vm4813_vm7, %v4814_v29, %v8837_v7  ;;  %v1609_v21 = vsub.s32 32, %v1608_v27  ;;  %v1611_v43 = vshll.u32 %v9287_v61, %v1608_v27  ;;  %v1614_v49 = vshll.u32 %v9288_v1, %v1608_v27 }
 0x29d   : > { %v4812_v62 = vsel %vm4810_vm6, %v8835_v52, %v4811_v46  ;;  %v1575_v56 = vsel %vm1492_vm11, %v1574_v15, %v1573_v16  ;;  %v4880_v48 = vshrl.u32 %v4879_v41, 30  ;;  %v1617_v42 = vshll.u32 %v9289_v3, %v1608_v27  ;;  %v10602_v41 = vpop.f32.mrb[8].mxu1 }
 0x29e   : > { %v4816_v58 = vsel %vm4809_vm2, %v4812_v62, %v4815_v23  ;;  %v1578_v63 = vsel %vm10480_vm13, %v10281_v11, %v1575_v56  ;;  %v1612_v2 = vshrl.u32 %v9288_v1, %v1609_v21  ;;  %v1615_v54 = vshrl.u32 %v9289_v3, %v1609_v21 }
 0x29f   : > { %v4817_v59 = vsel %vm4806_vm1, nan, %v4816_v58  ;;  %8838 = vcosq.f32 %v1578_v63  ;;  %v4881_v4 = vshll.u32 %v4880_v48, 30  ;;  %v4904_v13 = vsub.s32 4, %v4880_v48 }
 0x2a0   : > { %7765 = vst [vmem:[%s10000_s14 + $0x118] sm:$0xff] %v4817_v59  ;;  %8840 = vsinq.f32 %v1578_v63  ;;  %v1618_v20 = vshrl.u32 %v9290_v5, %v1609_v21  ;;  %v1613_v50 = vor.u32 %v1612_v2, %v1611_v43  ;;  %v1620_v24 = vshll.u32 %v9290_v5, %v1608_v27 }
 0x2a1   : > { %v10573_v60 = vsub.s32 %v4878_v31, %v4881_v4  ;;  %v1621_v30 = vshrl.u32 %v9291_v10, %v1609_v21  ;;  %v1616_v47 = vor.u32 %v1615_v54, %v1614_v49  ;;  %v1623_v33 = vshll.u32 %v9291_v10, %v1608_v27 }
 0x2a2   : > { %v1619_v35 = vor.u32 %v1618_v20, %v1617_v42  ;;  %v1624_v52 = vshrl.u32 %v9292_v22, %v1609_v21  ;;  %vm1589_vm8 = vcmp.eq.s32.totalorder %v10550_v28, 2  ;;  %vm4820_vm9 = vcmp.lt.s32.totalorder %v10392_v34, 0 }
 0x2a3   : > { %v4884_v40 = vsub.s32 0, %v10573_v60  ;;  %v1622_v53 = vor.u32 %v1621_v30, %v1620_v24  ;;  %vm1586_vm10 = vcmp.eq.s32.totalorder %v10550_v28, 0  ;;  %v4874_v39 = vadd.s32 %v10523_v38, %v10529_v44 }
 0x2a4   : > { %v1625_v7 = vor.u32 %v1624_v52, %v1623_v33  ;;  %v1642_v29 = vshll.u32 %v1602_v25, 8  ;;  %v4925_v16 = vand.u32 2139095040, %v10553_v26  ;;  %vm1585_vm11 = vcmp.lt.s32.totalorder %v10550_v28, 2 }
 0x2a5   : > { %vm10589_vm12 = vcmp.le.f32.partialorder %v4818_v57, 0.7853982  ;;  %v8173_v17 = vmin.u32 %v4884_v40, %v10573_v60  ;;  %v1610_v46 = vshrl.u32 %v9287_v61, %v1609_v21  ;;  %vm1626_vm13 = vcmp.lt.s32.totalorder %v10559_v55, 1 }
 0x2a6   : > { %vm1629_vm14 = vcmp.lt.s32.totalorder %v10559_v55, 4  ;;  %vm1582_vm15 = vweird.f32 %v10281_v11  ;;  %v4905_v38 = vsel %vm4820_vm9, %v4904_v13, %v4880_v48  ;;  %v1634_v27 = vsel %vm1626_vm13, %v1613_v50, %v1616_v47 }
 0x2a7   : > { %v1631_v44 = vsel %vm1629_vm14, %v1619_v35, 2102212464  ;;  %v1635_v23 = vsel %vm1629_vm14, %v1622_v53, 920167782  ;;  %v4886_v57 = vclz %v8173_v17  ;;  %vm1627_vm0 = vcmp.lt.s32.totalorder %v10559_v55, 2 }
 0x2a8   : > { %vm1628_vm3 = vcmp.lt.s32.totalorder %v10559_v55, 3  ;;  %v1638_v15 = vsel %vm1626_vm13, %v1616_v47, %v1619_v35  ;;  %v1630_v62 = vsel %vm1626_vm13, %v1610_v46, %v1613_v50  ;;  %v1639_v21 = vsel %vm1629_vm14, %v1625_v7, 1326507024 }
 0x2a9   : > { %v1636_v25 = vsel %vm1628_vm3, %v1619_v35, %v1635_v23  ;;  %v4926_v58 = vshrl.u32 %v4925_v16, 23  ;;  %v8839_v56 = vpop.eup %8838  ;;  %v8174_v59 = vadd.s32 4294967294, %v4886_v57  ;;  %v1632_v63 = vsel %vm1628_vm3, %v1616_v47, %v1631_v44 }
 0x2aa   : > { %v1637_v48 = vsel %vm1627_vm0, %v1634_v27, %v1636_v25  ;;  %v1640_v43 = vsel %vm1628_vm3, %v1622_v53, %v1639_v21  ;;  %v8841_v2 = vpop.eup %8840  ;;  %v1590_v4 = vxor.u32 2147483648, %v8839_v56  ;;  %v4922_v47 = vand.u32 2147483647, %v10553_v26 }
 0x2ab   : > { %v1641_v49 = vsel %vm1627_vm0, %v1638_v15, %v1640_v43  ;;  %v10608_v54 = vmul.u32.u64.low %v1642_v29, %v1637_v48  ;;  %v10609_v13 = vmul.u32.u64.high %v1642_v29, %v1637_v48, %v10608_v54  ;;  %v1587_v42 = vxor.u32 2147483648, %v8841_v2 }
 0x2ac   : > { %vm8175_vm1 = vcmp.lt.s32.totalorder %v8174_v59, 0  ;;  %v10612_v20 = vmul.u32.u64.low %v1642_v29, %v1641_v49  ;;  %v10613_v50 = vmul.u32.u64.high %v1642_v29, %v1641_v49, %v10612_v20  ;;  %v1591_v24 = vsel %vm1589_vm8, %v1590_v4, %v8841_v2 }
 0x2ad   : > { %v4889_v30 = vsel %vm8175_vm1, 0, %v8174_v59  ;;  %v8176_v35 = vadd.s32 4294967169, %v4926_v58  ;;  %v1588_v33 = vsel %vm1586_vm10, %v8839_v56, %v1587_v42  ;;  %v1633_v53 = vsel %vm1627_vm0, %v1630_v62, %v1632_v63 }
 0x2ae   : > { %v4890_v52 = vsub.s32 32, %v4889_v30  ;;  %v4894_v40 = vsub.s32 4294967266, %v4889_v30  ;;  %v1592_v7 = vsel %vm1585_vm11, %v1588_v33, %v1591_v24  ;;  %v4907_v16 = vsel %vm10589_vm12, 0, %v4905_v38 }
 0x2af   : > { %v1652_v17 = vadd.s32 1, %v10609_v13  ;;  %v4932_v46 = vadd.s32 1, %v8176_v35  ;;  %v1593_v44 = vsel %vm1582_vm15, nan, %v1592_v7  ;;  %v4891_v27 = vshll.u32 %v10573_v60, %v4889_v30 }
 0x2b0   : > { %v4892_v23 = vshrl.u32 %v4874_v39, %v4890_v52  ;;  %v4895_v57 = vadd.s32 127, %v4894_v40  ;;  %7734 = vst [vmem:[%s10000_s14 + $0x20] sm:$0xff] %v1593_v44  ;;  %v1649_v15 = vmul.u32 %v1642_v29, %v1633_v53  ;;  %vm1651_vm2 = vc.u32 %v10613_v50, %v10608_v54 }
 0x2b1   : > { %v4929_v28 = vand.u32 8388607, %v4922_v47  ;;  %vm4933_vm4 = vcmp.gt.s32.totalorder %v4932_v46, 0  ;;  %v1653_v62 = vsel %vm1651_vm2, %v1652_v17, %v10609_v13  ;;  %v4911_v60 = vadd.s32 3, %v4907_v16 }
 0x2b2   : > { %v4893_v55 = vor.u32 %v4892_v23, %v4891_v27  ;;  %v4896_v38 = vshll.u32 %v4895_v57, 23  ;;  %v4934_v25 = vsel %vm4933_vm4, %v4932_v46, 0  ;;  %v1654_v11 = vadd.s32 %v1653_v62, %v1649_v15 }
 0x2b3   : > { %v4936_v21 = vand.u32 31, %v4934_v25  ;;  %v778_v29 = vadd.f32 %v10179_v18, %v9643_v6  ;;  %v4930_v48 = vor.u32 8388608, %v4929_v28  ;;  %v4935_v43 = vshrl.u32 %v4934_v25, 5 }
 0x2b4   : > { %v4897_v58 = vor.u32 4788187, %v4896_v38  ;;  %v1655_v39 = vadd.s32 536870912, %v1654_v11  ;;  %v4900_v63 = vcvt.s32.f32 %v4893_v55  ;;  %v858_v16 = vadd.f32 %v10261_v37, %v9643_v6 }
 0x2b5   : > { %v4937_v56 = vsub.s32 32, %v4936_v21  ;;  %v4948_v13 = vshll.u32 %v9290_v5, %v4936_v21  ;;  %v4939_v35 = vshll.u32 %v9287_v61, %v4936_v21  ;;  %v4942_v33 = vshll.u32 %v9288_v1, %v4936_v21 }
 0x2b6   : > { %v4898_v59 = vand.u32 2147483647, %v4897_v58  ;;  %v10638_v2 = vshrl.u32 %v1655_v39, 30  ;;  %v4945_v52 = vshll.u32 %v9289_v3, %v4936_v21  ;;  %v4951_v7 = vshll.u32 %v9291_v10, %v4936_v21 }
 0x2b7   : > { %v4940_v4 = vshrl.u32 %v9288_v1, %v4937_v56  ;;  %v4943_v49 = vshrl.u32 %v9289_v3, %v4937_v56  ;;  %v4946_v20 = vshrl.u32 %v9290_v5, %v4937_v56  ;;  %v4949_v24 = vshrl.u32 %v9291_v10, %v4937_v56 }
 0x2b8   : > { %v4901_v42 = vmul.f32 %v4900_v63, %v4898_v59  ;;  %v4952_v30 = vshrl.u32 %v9292_v22, %v4937_v56  ;;  %v1657_v18 = vshll.u32 %v10638_v2, 30  ;;  %v10657_v57 = vand.u32 3, %v4911_v60 }
 0x2b9   : > { %v4950_v53 = vor.u32 %v4949_v24, %v4948_v13  ;;  %v4941_v46 = vor.u32 %v4940_v4, %v4939_v35  ;;  %v4944_v44 = vor.u32 %v4943_v49, %v4942_v33  ;;  %v4947_v27 = vor.u32 %v4946_v20, %v4945_v52 }
 0x2ba   : > { %v4902_v40 = vxor.u32 2147483648, %v4901_v42  ;;  %v10653_v17 = vsub.s32 %v1654_v11, %v1657_v18  ;;  %v4953_v15 = vor.u32 %v4952_v30, %v4951_v7  ;;  %v940_v28 = vmul.f32 %v9647_v9, %v778_v29  ;;  %v10696_v7 = vpop.f32.mrb[9].mxu0 }
 0x2bb   : > { %vm1596_vm5 = vcmp.lt.s32.totalorder %v10453_v0, 0  ;;  %vm4957_vm6 = vcmp.lt.s32.totalorder %v4935_v43, 4  ;;  %v4970_v38 = vshll.u32 %v4930_v48, 8  ;;  %vm4954_vm7 = vcmp.lt.s32.totalorder %v4935_v43, 1 }
 0x2bc   : > { %v4903_v23 = vsel %vm4820_vm9, %v4902_v40, %v4901_v42  ;;  %v1660_v37 = vsub.s32 0, %v10653_v17  ;;  %vm4956_vm8 = vcmp.lt.s32.totalorder %v4935_v43, 3  ;;  %v4963_v62 = vsel %vm4957_vm6, %v4950_v53, 920167782 }
 0x2bd   : > { %v4906_v55 = vsel %vm10589_vm12, %v10392_v34, %v4903_v23  ;;  %v4959_v11 = vsel %vm4957_vm6, %v4947_v27, 2102212464  ;;  %v4962_v21 = vsel %vm4954_vm7, %v4941_v46, %v4944_v44  ;;  %v4938_v58 = vshrl.u32 %v9287_v61, %v4937_v56 }
 0x2be   : > { %8842 = vcosq.f32 %v4906_v55  ;;  %v8049_v25 = vmin.u32 %v1660_v37, %v10653_v17  ;;  %v4964_v31 = vsel %vm4956_vm8, %v4947_v27, %v4963_v62  ;;  %v4966_v60 = vsel %vm4954_vm7, %v4944_v44, %v4947_v27 }
 0x2bf   : > { %8844 = vsinq.f32 %v4906_v55  ;;  %v4967_v39 = vsel %vm4957_vm6, %v4953_v15, 1326507024  ;;  %v1680_v59 = vsub.s32 4, %v10638_v2  ;;  %vm4955_vm9 = vcmp.lt.s32.totalorder %v4935_v43, 2 }
 0x2c0   : > { %v1662_v29 = vclz %v8049_v25  ;;  %v10670_v63 = vadd.f32 %v9652_v14, %v940_v28  ;;  %v4958_v48 = vsel %vm4954_vm7, %v4938_v58, %v4941_v46  ;;  %v4960_v4 = vsel %vm4956_vm8, %v4944_v44, %v4959_v11 }
 0x2c1   : > { %v4965_v49 = vsel %vm4955_vm9, %v4962_v21, %v4964_v31  ;;  %v4968_v13 = vsel %vm4956_vm8, %v4950_v53, %v4967_v39  ;;  %vm4914_vm10 = vcmp.eq.s32.totalorder %v10657_v57, 0  ;;  %vm10680_vm11 = vcmp.le.f32.partialorder %v1594_v51, 0.7853982 }
 0x2c2   : > { %v8050_v42 = vadd.s32 4294967294, %v1662_v29  ;;  %v4969_v20 = vsel %vm4955_vm9, %v4966_v60, %v4968_v13  ;;  %v10674_v56 = vmul.u32.u64.low %v4970_v38, %v4965_v49  ;;  %v10675_v24 = vmul.u32.u64.high %v4970_v38, %v4965_v49, %v10674_v56 }
 0x2c3   : > { %v10684_v18 = vmul.u32.u64.low %v4970_v38, %v4969_v20  ;;  %v10685_v35 = vmul.u32.u64.high %v4970_v38, %v4969_v20, %v10684_v18  ;;  %vm4910_vm12 = vweird.f32 %v10392_v34  ;;  %vm4917_vm13 = vcmp.eq.s32.totalorder %v10657_v57, 2 }
 0x2c4   : > { %vm8051_vm14 = vcmp.lt.s32.totalorder %v8050_v42, 0  ;;  %v4961_v43 = vsel %vm4955_vm9, %v4958_v48, %v4960_v4  ;;  %v1701_v33 = vand.u32 2139095040, %v10670_v63  ;;  %v1650_v52 = vadd.s32 %v10608_v54, %v10613_v50 }
 0x2c5   : > { %v1665_v40 = vsel %vm8051_vm14, 0, %v8050_v42  ;;  %v1681_v51 = vsel %vm1596_vm5, %v1680_v59, %v10638_v2  ;;  %v972_v53 = vmul.f32 %v9647_v9, %v858_v16  ;;  %v4980_v27 = vadd.s32 1, %v10675_v24 }
 0x2c6   : > { %v1666_v46 = vsub.s32 32, %v1665_v40  ;;  %v1670_v44 = vsub.s32 4294967266, %v1665_v40  ;;  %v1698_v23 = vand.u32 2147483647, %v10670_v63  ;;  %v1667_v28 = vshll.u32 %v10653_v17, %v1665_v40 }
 0x2c7   : > { %v4977_v55 = vmul.u32 %v4970_v38, %v4961_v43  ;;  %vm4979_vm15 = vc.u32 %v10685_v35, %v10674_v56  ;;  %v1702_v54 = vshrl.u32 %v1701_v33, 23  ;;  %v1683_v11 = vsel %vm10680_vm11, 0, %v1681_v51 }
 0x2c8   : > { %v8843_v15 = vpop.eup %8842  ;;  %v1668_v2 = vshrl.u32 %v1650_v52, %v1666_v46  ;;  %v1671_v62 = vadd.s32 127, %v1670_v44  ;;  %v4981_v16 = vsel %vm4979_vm15, %v4980_v27, %v10675_v24  ;;  %v1705_v60 = vand.u32 8388607, %v1698_v23 }
 0x2c9   : > { %v8845_v50 = vpop.eup %8844  ;;  %v4918_v37 = vxor.u32 2147483648, %v8843_v15  ;;  %v4982_v21 = vadd.s32 %v4981_v16, %v4977_v55  ;;  %v8052_v58 = vadd.s32 4294967169, %v1702_v54  ;;  %vm4913_vm0 = vcmp.lt.s32.totalorder %v10657_v57, 2 }
 0x2ca   : > { %v4915_v25 = vxor.u32 2147483648, %v8845_v50  ;;  %v1669_v17 = vor.u32 %v1668_v2, %v1667_v28  ;;  %v1672_v38 = vshll.u32 %v1671_v62, 23  ;;  %v1687_v49 = vadd.s32 3, %v1683_v11 }
 0x2cb   : > { %v4919_v31 = vsel %vm4917_vm13, %v4918_v37, %v8845_v50  ;;  %v4983_v29 = vadd.s32 536870912, %v4982_v21  ;;  %v1708_v59 = vadd.s32 1, %v8052_v58  ;;  %v780_v13 = vadd.f32 %v10346_v36, %v9645_v8 }
 0x2cc   : > { %v4916_v39 = vsel %vm4914_vm10, %v8843_v15, %v4915_v25  ;;  %v1673_v4 = vor.u32 4788187, %v1672_v38  ;;  %v10719_v24 = vadd.f32 %v9652_v14, %v972_v53  ;;  %v1676_v18 = vcvt.s32.f32 %v1669_v17 }
 0x2cd   : > { %v4920_v48 = vsel %vm4913_vm0, %v4916_v39, %v4919_v31  ;;  %v10716_v20 = vshrl.u32 %v4983_v29, 30  ;;  %vm1709_vm3 = vcmp.gt.s32.totalorder %v1708_v59, 0  ;;  %v1706_v43 = vor.u32 8388608, %v1705_v60 }
 0x2ce   : > { %v4921_v42 = vsel %vm4910_vm12, nan, %v4920_v48  ;;  %v1674_v57 = vand.u32 2147483647, %v1673_v4  ;;  %v1710_v33 = vsel %vm1709_vm3, %v1708_v59, 0  ;;  %v10723_v46 = vand.u32 3, %v1687_v49 }
 0x2cf   : > { %7766 = vst [vmem:[%s10000_s14 + $0x120] sm:$0xff] %v4921_v42  ;;  %v4985_v52 = vshll.u32 %v10716_v20, 30  ;;  %v1712_v40 = vand.u32 31, %v1710_v33  ;;  %v4978_v36 = vadd.s32 %v10674_v56, %v10685_v35  ;;  %v10729_v27 = vmul.f32 %v9649_v12, %v780_v13 }
 0x2d0   : > { %v1677_v51 = vmul.f32 %v1676_v18, %v1674_v57  ;;  %v10731_v15 = vshll.u32 %v1706_v43, 8  ;;  %v5026_v28 = vand.u32 2147483647, %v10719_v24  ;;  %v5029_v55 = vand.u32 2139095040, %v10719_v24 }
 0x2d1   : > { %v10726_v34 = vsub.s32 %v4982_v21, %v4985_v52  ;;  %v1713_v44 = vsub.s32 32, %v1712_v40  ;;  %v1711_v50 = vshrl.u32 %v1710_v33, 5  ;;  %v1715_v37 = vshll.u32 %v9287_v61, %v1712_v40 }
 0x2d2   : > { %v1678_v53 = vxor.u32 2147483648, %v1677_v51  ;;  %vm4924_vm1 = vcmp.lt.s32.totalorder %v10553_v26, 0  ;;  %v1718_v2 = vshll.u32 %v9288_v1, %v1712_v40  ;;  %v1721_v21 = vshll.u32 %v9289_v3, %v1712_v40 }
 0x2d3   : > { %v4988_v54 = vsub.s32 0, %v10726_v34  ;;  %v1716_v56 = vshrl.u32 %v9288_v1, %v1713_v44  ;;  %v1719_v62 = vshrl.u32 %v9289_v3, %v1713_v44  ;;  %v1722_v16 = vshrl.u32 %v9290_v5, %v1713_v44 }
 0x2d4   : > { %v1679_v35 = vsel %vm1596_vm5, %v1678_v53, %v1677_v51  ;;  %v1724_v58 = vshll.u32 %v9290_v5, %v1712_v40  ;;  %v1725_v38 = vshrl.u32 %v9291_v10, %v1713_v44  ;;  %v5008_v39 = vsub.s32 4, %v10716_v20  ;;  %v10762_v51 = vpop.f32.mrb[9].mxu1 }
 0x2d5   : > { %v1682_v25 = vsel %vm10680_vm11, %v10453_v0, %v1679_v35  ;;  %v8177_v11 = vmin.u32 %v4988_v54, %v10726_v34  ;;  %v1717_v31 = vor.u32 %v1716_v56, %v1715_v37  ;;  %v1720_v17 = vor.u32 %v1719_v62, %v1718_v2 }
 0x2d6   : > { %8846 = vcosq.f32 %v1682_v25  ;;  %v1723_v29 = vor.u32 %v1722_v16, %v1721_v21  ;;  %v1714_v59 = vshrl.u32 %v9287_v61, %v1713_v44  ;;  %v1726_v30 = vor.u32 %v1725_v38, %v1724_v58 }
 0x2d7   : > { %8848 = vsinq.f32 %v1682_v25  ;;  %v4990_v60 = vclz %v8177_v11  ;;  %v1727_v48 = vshll.u32 %v9291_v10, %v1712_v40  ;;  %v1728_v4 = vshrl.u32 %v9292_v22, %v1713_v44 }
 0x2d8   : > { %vm1730_vm2 = vcmp.lt.s32.totalorder %v1711_v50, 1  ;;  %vm1732_vm4 = vcmp.lt.s32.totalorder %v1711_v50, 3  ;;  %v5030_v13 = vshrl.u32 %v5029_v55, 23  ;;  %vm10757_vm5 = vcmp.le.f32.partialorder %v4922_v47, 0.7853982 }
 0x2d9   : > { %v8178_v49 = vadd.s32 4294967294, %v4990_v60  ;;  %v1729_v57 = vor.u32 %v1728_v4, %v1727_v48  ;;  %vm1733_vm6 = vcmp.lt.s32.totalorder %v1711_v50, 4  ;;  %v1734_v18 = vsel %vm1730_vm2, %v1714_v59, %v1717_v31 }
 0x2da   : > { %v1738_v43 = vsel %vm1730_vm2, %v1717_v31, %v1720_v17  ;;  %vm1690_vm7 = vcmp.eq.s32.totalorder %v10723_v46, 0  ;;  %v1735_v33 = vsel %vm1733_vm6, %v1723_v29, 2102212464  ;;  %v1739_v52 = vsel %vm1733_vm6, %v1726_v30, 920167782 }
 0x2db   : > { %vm8179_vm8 = vcmp.lt.s32.totalorder %v8178_v49, 0  ;;  %v1742_v40 = vsel %vm1730_vm2, %v1720_v17, %v1723_v29  ;;  %vm1689_vm9 = vcmp.lt.s32.totalorder %v10723_v46, 2  ;;  %v1736_v47 = vsel %vm1732_vm4, %v1720_v17, %v1735_v33 }
 0x2dc   : > { %v4993_v44 = vsel %vm8179_vm8, 0, %v8178_v49  ;;  %v1740_v53 = vsel %vm1732_vm4, %v1723_v29, %v1739_v52  ;;  %v1743_v55 = vsel %vm1733_vm6, %v1729_v57, 1326507024  ;;  %vm1686_vm10 = vweird.f32 %v10453_v0 }
 0x2dd   : > { %v4994_v54 = vsub.s32 32, %v4993_v44  ;;  %v4998_v37 = vsub.s32 4294967266, %v4993_v44  ;;  %v5009_v56 = vsel %vm4924_vm1, %v5008_v39, %v10716_v20  ;;  %vm1731_vm11 = vcmp.lt.s32.totalorder %v1711_v50, 2 }
 0x2de   : > { %v4995_v35 = vshll.u32 %v10726_v34, %v4993_v44  ;;  %v1741_v2 = vsel %vm1731_vm11, %v1738_v43, %v1740_v53  ;;  %v1744_v62 = vsel %vm1732_vm4, %v1726_v30, %v1743_v55  ;;  %v8180_v16 = vadd.s32 4294967169, %v5030_v13 }
 0x2df   : > { %v4996_v25 = vshrl.u32 %v4978_v36, %v4994_v54  ;;  %v4999_v11 = vadd.s32 127, %v4998_v37  ;;  %v1737_v21 = vsel %vm1731_vm11, %v1734_v18, %v1736_v47  ;;  %v1745_v58 = vsel %vm1731_vm11, %v1742_v40, %v1744_v62 }
 0x2e0   : > { %v8847_v31 = vpop.eup %8846  ;;  %v10774_v17 = vmul.u32.u64.low %v10731_v15, %v1745_v58  ;;  %v10775_v38 = vmul.u32.u64.high %v10731_v15, %v1745_v58, %v10774_v17  ;;  %v10778_v60 = vmul.u32.u64.low %v10731_v15, %v1741_v2  ;;  %v10779_v29 = vmul.u32.u64.high %v10731_v15, %v1741_v2, %v10778_v60 }
 0x2e1   : > { %v8849_v20 = vpop.eup %8848  ;;  %v1694_v34 = vxor.u32 2147483648, %v8847_v31  ;;  %v4997_v39 = vor.u32 %v4996_v25, %v4995_v35  ;;  %v5000_v50 = vshll.u32 %v4999_v11, 23  ;;  %v5036_v59 = vadd.s32 1, %v8180_v16 }
 0x2e2   : > { %v1691_v30 = vxor.u32 2147483648, %v8849_v20  ;;  %vm1693_vm12 = vcmp.eq.s32.totalorder %v10723_v46, 2  ;;  %v5033_v36 = vand.u32 8388607, %v5026_v28  ;;  %v10787_v48 = vadd.f32 %v9656_v19, %v10729_v27 }
 0x2e3   : > { %v1695_v4 = vsel %vm1693_vm12, %v1694_v34, %v8849_v20  ;;  %v5001_v49 = vor.u32 4788187, %v5000_v50  ;;  %v5011_v13 = vsel %vm10757_vm5, 0, %v5009_v56  ;;  %vm5037_vm13 = vcmp.gt.s32.totalorder %v5036_v59, 0 }
 0x2e4   : > { %v1692_v57 = vsel %vm1690_vm7, %v8847_v31, %v1691_v30  ;;  %v1753_v18 = vmul.u32 %v10731_v15, %v1737_v21  ;;  %vm1755_vm14 = vc.u32 %v10775_v38, %v10778_v60  ;;  %v1756_v43 = vadd.s32 1, %v10779_v29 }
 0x2e5   : > { %v1696_v27 = vsel %vm1689_vm9, %v1692_v57, %v1695_v4  ;;  %v5002_v33 = vand.u32 2147483647, %v5001_v49  ;;  %v5004_v52 = vcvt.s32.f32 %v4997_v39  ;;  %v5038_v40 = vsel %vm5037_vm13, %v5036_v59, 0 }
 0x2e6   : > { %v1697_v44 = vsel %vm1686_vm10, nan, %v1696_v27  ;;  %v1757_v47 = vsel %vm1755_vm14, %v1756_v43, %v10779_v29  ;;  %v5040_v53 = vand.u32 31, %v5038_v40  ;;  %v5015_v15 = vadd.s32 3, %v5011_v13 }
 0x2e7   : > { %7735 = vst [vmem:[%s10000_s14 + $0x28] sm:$0xff] %v1697_v44  ;;  %v5005_v55 = vmul.f32 %v5004_v52, %v5002_v33  ;;  %v1758_v54 = vadd.s32 %v1757_v47, %v1753_v18  ;;  %v5034_v37 = vor.u32 8388608, %v5033_v36  ;;  %v10803_v56 = vshrl.u32 %v5038_v40, 5 }
 0x2e8   : > { %v5041_v35 = vsub.s32 32, %v5040_v53  ;;  %v5043_v46 = vshll.u32 %v9287_v61, %v5040_v53  ;;  %v1805_v2 = vand.u32 2139095040, %v10787_v48  ;;  %v5046_v0 = vshll.u32 %v9288_v1, %v5040_v53 }
 0x2e9   : > { %v5006_v62 = vxor.u32 2147483648, %v5005_v55  ;;  %v1759_v16 = vadd.s32 536870912, %v1758_v54  ;;  %v5049_v25 = vshll.u32 %v9289_v3, %v5040_v53  ;;  %v5052_v31 = vshll.u32 %v9290_v5, %v5040_v53 }
 0x2ea   : > { %v5044_v11 = vshrl.u32 %v9288_v1, %v5041_v35  ;;  %v5047_v21 = vshrl.u32 %v9289_v3, %v5041_v35  ;;  %v5050_v58 = vshrl.u32 %v9290_v5, %v5041_v35  ;;  %v5053_v20 = vshrl.u32 %v9291_v10, %v5041_v35 }
 0x2eb   : > { %v5007_v17 = vsel %vm4924_vm1, %v5006_v62, %v5005_v55  ;;  %v1760_v29 = vshrl.u32 %v1759_v16, 30  ;;  %v5056_v34 = vshrl.u32 %v9292_v22, %v5041_v35  ;;  %v5055_v30 = vshll.u32 %v9291_v10, %v5040_v53 }
 0x2ec   : > { %v5010_v39 = vsel %vm10757_vm5, %v10553_v26, %v5007_v17  ;;  %v5045_v50 = vor.u32 %v5044_v11, %v5043_v46  ;;  %v5048_v59 = vor.u32 %v5047_v21, %v5046_v0  ;;  %v5051_v4 = vor.u32 %v5050_v58, %v5049_v25 }
 0x2ed   : > { %8850 = vcosq.f32 %v5010_v39  ;;  %v1761_v36 = vshll.u32 %v1760_v29, 30  ;;  %v5054_v49 = vor.u32 %v5053_v20, %v5052_v31  ;;  %v5016_v13 = vand.u32 3, %v5015_v15 }
 0x2ee   : > { %8852 = vsinq.f32 %v5010_v39  ;;  %vm1700_vm15 = vcmp.lt.s32.totalorder %v10670_v63, 0  ;;  %v5057_v57 = vor.u32 %v5056_v34, %v5055_v30  ;;  %vm5058_vm0 = vcmp.lt.s32.totalorder %v10803_v56, 1  ;;  %v10864_v34 = vpop.f32.mrb[10].mxu0 }
 0x2ef   : > { %v10822_v18 = vsub.s32 %v1758_v54, %v1761_v36  ;;  %v10825_v43 = vshll.u32 %v5034_v37, 8  ;;  %v1806_v42 = vshrl.u32 %v1805_v2, 23  ;;  %vm10829_vm3 = vcmp.le.f32.partialorder %v1698_v23, 0.7853982 }
 0x2f0   : > { %v1784_v33 = vsub.s32 4, %v1760_v29  ;;  %v5042_v52 = vshrl.u32 %v9287_v61, %v5041_v35  ;;  %vm5061_vm1 = vcmp.lt.s32.totalorder %v10803_v56, 4  ;;  %v5066_v40 = vsel %vm5058_vm0, %v5045_v50, %v5048_v59 }
 0x2f1   : > { %v1764_v44 = vsub.s32 0, %v10822_v18  ;;  %vm5060_vm2 = vcmp.lt.s32.totalorder %v10803_v56, 3  ;;  %v5063_v47 = vsel %vm5061_vm1, %v5051_v4, 2102212464  ;;  %v5067_v53 = vsel %vm5061_vm1, %v5054_v49, 920167782 }
 0x2f2   : > { %vm5059_vm4 = vcmp.lt.s32.totalorder %v10803_v56, 2  ;;  %v5068_v23 = vsel %vm5060_vm2, %v5051_v4, %v5067_v53  ;;  %v5070_v55 = vsel %vm5058_vm0, %v5048_v59, %v5051_v4  ;;  %v5071_v15 = vsel %vm5061_vm1, %v5057_v57, 1326507024 }
 0x2f3   : > { %v8053_v54 = vmin.u32 %v1764_v44, %v10822_v18  ;;  %v5062_v37 = vsel %vm5058_vm0, %v5042_v52, %v5045_v50  ;;  %v5069_v35 = vsel %vm5059_vm4, %v5066_v40, %v5068_v23  ;;  %v5072_v46 = vsel %vm5060_vm2, %v5054_v49, %v5071_v15 }
 0x2f4   : > { %vm5014_vm5 = vweird.f32 %v10553_v26  ;;  %v5064_v2 = vsel %vm5060_vm2, %v5048_v59, %v5063_v47  ;;  %v5073_v62 = vsel %vm5059_vm4, %v5070_v55, %v5072_v46  ;;  %vm5017_vm6 = vcmp.lt.s32.totalorder %v5016_v13, 2 }
 0x2f5   : > { %v10851_v16 = vmul.u32.u64.low %v10825_v43, %v5069_v35  ;;  %v10852_v0 = vmul.u32.u64.high %v10825_v43, %v5069_v35, %v10851_v16  ;;  %v1766_v25 = vclz %v8053_v54  ;;  %v1802_v11 = vand.u32 2147483647, %v10787_v48 }
 0x2f6   : > { %v860_v21 = vadd.f32 %v10420_v45, %v9645_v8  ;;  %v1785_v58 = vsel %vm1700_vm15, %v1784_v33, %v1760_v29  ;;  %v10861_v31 = vmul.u32.u64.low %v10825_v43, %v5073_v62  ;;  %v10862_v17 = vmul.u32.u64.high %v10825_v43, %v5073_v62, %v10861_v31 }
 0x2f7   : > { %v8056_v20 = vadd.s32 4294967169, %v1806_v42  ;;  %v8851_v39 = vpop.eup %8850  ;;  %vm5018_vm7 = vcmp.eq.s32.totalorder %v5016_v13, 0  ;;  %vm5021_vm8 = vcmp.eq.s32.totalorder %v5016_v13, 2  ;;  %v8054_v50 = vadd.s32 4294967294, %v1766_v25 }
 0x2f8   : > { %v5065_v59 = vsel %vm5059_vm4, %v5062_v37, %v5064_v2  ;;  %v8853_v30 = vpop.eup %8852  ;;  %v5022_v36 = vxor.u32 2147483648, %v8851_v39  ;;  %v1754_v45 = vadd.s32 %v10778_v60, %v10775_v38  ;;  %v5084_v29 = vadd.s32 1, %v10852_v0 }
 0x2f9   : > { %v1812_v4 = vadd.s32 1, %v8056_v20  ;;  %v5019_v49 = vxor.u32 2147483648, %v8853_v30  ;;  %vm8055_vm9 = vcmp.lt.s32.totalorder %v8054_v50, 0  ;;  %v1787_v57 = vsel %vm10829_vm3, 0, %v1785_v58 }
 0x2fa   : > { %v1809_v42 = vand.u32 8388607, %v1802_v11  ;;  %v5023_v33 = vsel %vm5021_vm8, %v5022_v36, %v8853_v30  ;;  %v1769_v56 = vsel %vm8055_vm9, 0, %v8054_v50  ;;  %v5081_v52 = vmul.u32 %v10825_v43, %v5065_v59 }
 0x2fb   : > { %vm5083_vm10 = vc.u32 %v10862_v17, %v10851_v16  ;;  %v5020_v38 = vsel %vm5018_vm7, %v8851_v39, %v5019_v49  ;;  %v1770_v60 = vsub.s32 32, %v1769_v56  ;;  %v1774_v40 = vsub.s32 4294967266, %v1769_v56 }
 0x2fc   : > { %v973_v44 = vmul.f32 %v9649_v12, %v860_v21  ;;  %v5024_v47 = vsel %vm5017_vm6, %v5020_v38, %v5023_v33  ;;  %v1771_v53 = vshll.u32 %v10822_v18, %v1769_v56  ;;  %v5085_v23 = vsel %vm5083_vm10, %v5084_v29, %v10852_v0 }
 0x2fd   : > { %vm1813_vm11 = vcmp.gt.s32.totalorder %v1812_v4, 0  ;;  %v5025_v55 = vsel %vm5014_vm5, nan, %v5024_v47  ;;  %v1772_v43 = vshrl.u32 %v1754_v45, %v1770_v60  ;;  %v1775_v15 = vadd.s32 127, %v1774_v40 }
 0x2fe   : > { %v5086_v54 = vadd.s32 %v5085_v23, %v5081_v52  ;;  %7767 = vst [vmem:[%s10000_s14 + $0x128] sm:$0xff] %v5025_v55  ;;  %v1791_v37 = vadd.s32 3, %v1787_v57  ;;  %v1814_v35 = vsel %vm1813_vm11, %v1812_v4, 0  ;;  %v1810_v25 = vor.u32 8388608, %v1809_v42 }
 0x2ff   : > { %v1773_v46 = vor.u32 %v1772_v43, %v1771_v53  ;;  %v1776_v2 = vshll.u32 %v1775_v15, 23  ;;  %v1816_v13 = vand.u32 31, %v1814_v35  ;;  %v10887_v21 = vadd.f32 %v9656_v19, %v973_v44 }
 0x300   : > { %v5087_v62 = vadd.s32 536870912, %v5086_v54  ;;  %v10891_v58 = vand.u32 3, %v1791_v37  ;;  %v10894_v50 = vshll.u32 %v1810_v25, 8  ;;  %v5082_v42 = vadd.s32 %v10851_v16, %v10862_v17 }
 0x301   : > { %v1777_v18 = vor.u32 4788187, %v1776_v2  ;;  %v1817_v26 = vsub.s32 32, %v1816_v13  ;;  %v1780_v20 = vcvt.s32.f32 %v1773_v46  ;;  %v5133_v45 = vand.u32 2139095040, %v10887_v21 }
 0x302   : > { %v10889_v0 = vshrl.u32 %v5087_v62, 30  ;;  %v1819_v49 = vshll.u32 %v9287_v61, %v1816_v13  ;;  %v1815_v33 = vshrl.u32 %v1814_v35, 5  ;;  %v1822_v56 = vshll.u32 %v9288_v1, %v1816_v13 }
 0x303   : > { %v1778_v31 = vand.u32 2147483647, %v1777_v18  ;;  %v1820_v59 = vshrl.u32 %v9288_v1, %v1817_v26  ;;  %v1823_v30 = vshrl.u32 %v9289_v3, %v1817_v26  ;;  %v1826_v36 = vshrl.u32 %v9290_v5, %v1817_v26 }
 0x304   : > { %v5089_v39 = vshll.u32 %v10889_v0, 30  ;;  %v1829_v57 = vshrl.u32 %v9291_v10, %v1817_v26  ;;  %v1825_v52 = vshll.u32 %v9289_v3, %v1816_v13  ;;  %v1828_v44 = vshll.u32 %v9290_v5, %v1816_v13 }
 0x305   : > { %v1781_v29 = vmul.f32 %v1780_v20, %v1778_v31  ;;  %v1821_v40 = vor.u32 %v1820_v59, %v1819_v49  ;;  %v1824_v47 = vor.u32 %v1823_v30, %v1822_v56  ;;  %v1831_v23 = vshll.u32 %v9291_v10, %v1816_v13 }
 0x306   : > { %v10900_v4 = vsub.s32 %v5086_v54, %v5089_v39  ;;  %v1827_v53 = vor.u32 %v1826_v36, %v1825_v52  ;;  %v1832_v55 = vshrl.u32 %v9292_v22, %v1817_v26  ;;  %vm5028_vm12 = vcmp.lt.s32.totalorder %v10719_v24, 0 }
 0x307   : > { %v1782_v38 = vxor.u32 2147483648, %v1781_v29  ;;  %v1830_v43 = vor.u32 %v1829_v57, %v1828_v44  ;;  %v5134_v15 = vshrl.u32 %v5133_v45, 23  ;;  %v5112_v37 = vsub.s32 4, %v10889_v0 }
 0x308   : > { %v5092_v60 = vsub.s32 0, %v10900_v4  ;;  %v1833_v35 = vor.u32 %v1832_v55, %v1831_v23  ;;  %vm1834_vm13 = vcmp.lt.s32.totalorder %v1815_v33, 1  ;;  %v1818_v2 = vshrl.u32 %v9287_v61, %v1817_v26  ;;  %v10927_v26 = vpop.f32.mrb[10].mxu1 }
 0x309   : > { %v1783_v16 = vsel %vm1700_vm15, %v1782_v38, %v1781_v29  ;;  %vm1837_vm14 = vcmp.lt.s32.totalorder %v1815_v33, 4  ;;  %vm1835_vm15 = vcmp.lt.s32.totalorder %v1815_v33, 2  ;;  %v1842_v25 = vsel %vm1834_vm13, %v1821_v40, %v1824_v47 }
 0x30a   : > { %v8181_v17 = vmin.u32 %v5092_v60, %v10900_v4  ;;  %v1786_v54 = vsel %vm10829_vm3, %v10670_v63, %v1783_v16  ;;  %v1839_v62 = vsel %vm1837_vm14, %v1827_v53, 2102212464  ;;  %vm10923_vm0 = vcmp.le.f32.partialorder %v5026_v28, 0.7853982 }
 0x30b   : > { %8854 = vcosq.f32 %v1786_v54  ;;  %vm1836_vm3 = vcmp.lt.s32.totalorder %v1815_v33, 3  ;;  %v1843_v18 = vsel %vm1837_vm14, %v1830_v43, 920167782  ;;  %v1846_v31 = vsel %vm1834_vm13, %v1824_v47, %v1827_v53 }
 0x30c   : > { %v5094_v46 = vclz %v8181_v17  ;;  %8856 = vsinq.f32 %v1786_v54  ;;  %v1838_v20 = vsel %vm1834_vm13, %v1818_v2, %v1821_v40  ;;  %v1844_v39 = vsel %vm1836_vm3, %v1827_v53, %v1843_v18 }
 0x30d   : > { %v1847_v59 = vsel %vm1837_vm14, %v1833_v35, 1326507024  ;;  %v8184_v30 = vadd.s32 4294967169, %v5134_v15  ;;  %v1840_v36 = vsel %vm1836_vm3, %v1824_v47, %v1839_v62  ;;  %v1845_v45 = vsel %vm1835_vm15, %v1842_v25, %v1844_v39 }
 0x30e   : > { %v8182_v27 = vadd.s32 4294967294, %v5094_v46  ;;  %v1848_v29 = vsel %vm1836_vm3, %v1830_v43, %v1847_v59  ;;  %v10932_v57 = vmul.u32.u64.low %v10894_v50, %v1845_v45  ;;  %v10933_v56 = vmul.u32.u64.high %v10894_v50, %v1845_v45, %v10932_v57 }
 0x30f   : > { %v1849_v28 = vsel %vm1835_vm15, %v1846_v31, %v1848_v29  ;;  %vm1793_vm2 = vcmp.lt.s32.totalorder %v10891_v58, 2  ;;  %v5130_v60 = vand.u32 2147483647, %v10887_v21  ;;  %v5140_v40 = vadd.s32 1, %v8184_v30 }
 0x310   : > { %vm8183_vm1 = vcmp.lt.s32.totalorder %v8182_v27, 0  ;;  %vm1790_vm4 = vweird.f32 %v10670_v63  ;;  %v5113_v44 = vsel %vm5028_vm12, %v5112_v37, %v10889_v0  ;;  %v1841_v47 = vsel %vm1835_vm15, %v1838_v20, %v1840_v36 }
 0x311   : > { %v5097_v49 = vsel %vm8183_vm1, 0, %v8182_v27  ;;  %v10944_v53 = vmul.u32.u64.low %v10894_v50, %v1849_v28  ;;  %v10945_v23 = vmul.u32.u64.high %v10894_v50, %v1849_v28, %v10944_v53  ;;  %vm5141_vm5 = vcmp.gt.s32.totalorder %v5140_v40, 0 }
 0x312   : > { %v5098_v52 = vsub.s32 32, %v5097_v49  ;;  %v5102_v38 = vsub.s32 4294967266, %v5097_v49  ;;  %v5099_v55 = vshll.u32 %v10900_v4, %v5097_v49  ;;  %vm1794_vm6 = vcmp.eq.s32.totalorder %v10891_v58, 0 }
 0x313   : > { %v1860_v43 = vadd.s32 1, %v10933_v56  ;;  %v5142_v15 = vsel %vm5141_vm5, %v5140_v40, 0  ;;  %v784_v54 = vadd.f32 %v10531_v32, %v9643_v6  ;;  %v5137_v35 = vand.u32 8388607, %v5130_v60 }
 0x314   : > { %v5100_v16 = vshrl.u32 %v5082_v42, %v5098_v52  ;;  %v5103_v17 = vadd.s32 127, %v5102_v38  ;;  %v5144_v46 = vand.u32 31, %v5142_v15  ;;  %v5115_v42 = vsel %vm10923_vm0, 0, %v5113_v44 }
 0x315   : > { %v8855_v0 = vpop.eup %8854  ;;  %v1857_v62 = vmul.u32 %v10894_v50, %v1841_v47  ;;  %vm1859_vm7 = vc.u32 %v10945_v23, %v10932_v57  ;;  %vm1797_vm8 = vcmp.eq.s32.totalorder %v10891_v58, 2  ;;  %v942_v39 = vmul.f32 %v9647_v9, %v784_v54 }
 0x316   : > { %v5101_v33 = vor.u32 %v5100_v16, %v5099_v55  ;;  %v5104_v37 = vshll.u32 %v5103_v17, 23  ;;  %v8857_v2 = vpop.eup %8856  ;;  %v1798_v4 = vxor.u32 2147483648, %v8855_v0  ;;  %v1861_v27 = vsel %vm1859_vm7, %v1860_v43, %v10933_v56 }
 0x317   : > { %v1795_v25 = vxor.u32 2147483648, %v8857_v2  ;;  %v1862_v31 = vadd.s32 %v1861_v27, %v1857_v62  ;;  %v5145_v20 = vsub.s32 32, %v5144_v46  ;;  %v5119_v36 = vadd.s32 3, %v5115_v42 }
 0x318   : > { %v5105_v32 = vor.u32 4788187, %v5104_v37  ;;  %v1799_v18 = vsel %vm1797_vm8, %v1798_v4, %v8857_v2  ;;  %v5108_v50 = vcvt.s32.f32 %v5101_v33  ;;  %v5138_v49 = vor.u32 8388608, %v5137_v35 }
 0x319   : > { %v1796_v59 = vsel %vm1794_vm6, %v8855_v0, %v1795_v25  ;;  %v1863_v29 = vadd.s32 536870912, %v1862_v31  ;;  %v5148_v28 = vshrl.u32 %v9288_v1, %v5145_v20  ;;  %v5151_v38 = vshrl.u32 %v9289_v3, %v5145_v20 }
 0x31a   : > { %v5106_v30 = vand.u32 2147483647, %v5105_v32  ;;  %v1800_v45 = vsel %vm1793_vm2, %v1796_v59, %v1799_v18  ;;  %v5154_v40 = vshrl.u32 %v9290_v5, %v5145_v20  ;;  %v5147_v47 = vshll.u32 %v9287_v61, %v5144_v46 }
 0x31b   : > { %v1801_v56 = vsel %vm1790_vm4, nan, %v1800_v45  ;;  %v10972_v44 = vshrl.u32 %v1863_v29, 30  ;;  %v5150_v58 = vshll.u32 %v9288_v1, %v5144_v46  ;;  %v5157_v53 = vshrl.u32 %v9291_v10, %v5145_v20 }
 0x31c   : > { %v5109_v52 = vmul.f32 %v5108_v50, %v5106_v30  ;;  %7736 = vst [vmem:[%s10000_s14 + $0x30] sm:$0xff] %v1801_v56  ;;  %v5143_v16 = vshrl.u32 %v5142_v15, 5  ;;  %v5153_v17 = vshll.u32 %v9289_v3, %v5144_v46  ;;  %v5156_v63 = vshll.u32 %v9290_v5, %v5144_v46 }
 0x31d   : > { %v1865_v43 = vshll.u32 %v10972_v44, 30  ;;  %v5149_v54 = vor.u32 %v5148_v28, %v5147_v47  ;;  %v5152_v0 = vor.u32 %v5151_v38, %v5150_v58  ;;  %v5160_v33 = vshrl.u32 %v9292_v22, %v5145_v20 }
 0x31e   : > { %v5110_v55 = vxor.u32 2147483648, %v5109_v52  ;;  %v5155_v35 = vor.u32 %v5154_v40, %v5153_v17  ;;  %v5158_v2 = vor.u32 %v5157_v53, %v5156_v63  ;;  %v5159_v4 = vshll.u32 %v9291_v10, %v5144_v46 }
 0x31f   : > { %v10987_v42 = vand.u32 3, %v5119_v36  ;;  %v10989_v62 = vsub.s32 %v1862_v31, %v1865_v43  ;;  %v10991_v32 = vshll.u32 %v5138_v49, 8  ;;  %v10994_v27 = vadd.f32 %v9652_v14, %v942_v39 }
 0x320   : > { %v5111_v37 = vsel %vm5028_vm12, %v5110_v55, %v5109_v52  ;;  %v5161_v25 = vor.u32 %v5160_v33, %v5159_v4  ;;  %vm1804_vm9 = vcmp.lt.s32.totalorder %v10787_v48, 0  ;;  %vm5162_vm10 = vcmp.lt.s32.totalorder %v5143_v16, 1 }
 0x321   : > { %v5114_v15 = vsel %vm10923_vm0, %v10719_v24, %v5111_v37  ;;  %v1868_v46 = vsub.s32 0, %v10989_v62  ;;  %vm5165_vm11 = vcmp.lt.s32.totalorder %v5143_v16, 4  ;;  %vm5164_vm12 = vcmp.lt.s32.totalorder %v5143_v16, 3 }
 0x322   : > { %8858 = vcosq.f32 %v5114_v15  ;;  %v5167_v13 = vsel %vm5165_vm11, %v5155_v35, 2102212464  ;;  %v5170_v18 = vsel %vm5162_vm10, %v5149_v54, %v5152_v0  ;;  %v5171_v31 = vsel %vm5165_vm11, %v5158_v2, 920167782 }
 0x323   : > { %8860 = vsinq.f32 %v5114_v15  ;;  %v8057_v59 = vmin.u32 %v1868_v46, %v10989_v62  ;;  %v5146_v30 = vshrl.u32 %v9287_v61, %v5145_v20  ;;  %vm5163_vm13 = vcmp.lt.s32.totalorder %v5143_v16, 2 }
 0x324   : > { %v5172_v39 = vsel %vm5164_vm12, %v5155_v35, %v5171_v31  ;;  %v5174_v36 = vsel %vm5162_vm10, %v5152_v0, %v5155_v35  ;;  %v5175_v45 = vsel %vm5165_vm11, %v5161_v25, 1326507024  ;;  %v1909_v29 = vand.u32 2139095040, %v10994_v27 }
 0x325   : > { %v5173_v50 = vsel %vm5163_vm13, %v5170_v18, %v5172_v39  ;;  %vm11007_vm14 = vcmp.le.f32.partialorder %v1802_v11, 0.7853982  ;;  %v1870_v28 = vclz %v8057_v59  ;;  %v1888_v56 = vsub.s32 4, %v10972_v44 }
 0x326   : > { %v5166_v20 = vsel %vm5162_vm10, %v5146_v30, %v5149_v54  ;;  %v5168_v52 = vsel %vm5164_vm12, %v5152_v0, %v5167_v13  ;;  %vm5121_vm15 = vcmp.lt.s32.totalorder %v10987_v42, 2  ;;  %v5176_v38 = vsel %vm5164_vm12, %v5158_v2, %v5175_v45  ;;  %v11030_v54 = vpop.f32.mrb[11].mxu0 }
 0x327   : > { %v11017_v40 = vmul.u32.u64.low %v10991_v32, %v5173_v50  ;;  %v11018_v47 = vmul.u32.u64.high %v10991_v32, %v5173_v50, %v11017_v40  ;;  %v1910_v11 = vshrl.u32 %v1909_v29, 23  ;;  %vm5118_vm0 = vweird.f32 %v10719_v24 }
 0x328   : > { %vm5122_vm3 = vcmp.eq.s32.totalorder %v10987_v42, 0  ;;  %vm5125_vm1 = vcmp.eq.s32.totalorder %v10987_v42, 2  ;;  %v8058_v58 = vadd.s32 4294967294, %v1870_v28  ;;  %v5177_v53 = vsel %vm5163_vm13, %v5174_v36, %v5176_v38 }
 0x329   : > { %v5169_v55 = vsel %vm5163_vm13, %v5166_v20, %v5168_v52  ;;  %v11027_v17 = vmul.u32.u64.low %v10991_v32, %v5177_v53  ;;  %v11028_v63 = vmul.u32.u64.high %v10991_v32, %v5177_v53, %v11027_v17  ;;  %v8060_v43 = vadd.s32 4294967169, %v1910_v11 }
 0x32a   : > { %v1858_v0 = vadd.s32 %v10932_v57, %v10945_v23  ;;  %vm8059_vm2 = vcmp.lt.s32.totalorder %v8058_v58, 0  ;;  %v1906_v33 = vand.u32 2147483647, %v10994_v27  ;;  %v864_v37 = vadd.f32 %v10602_v41, %v9643_v6 }
 0x32b   : > { %v1873_v2 = vsel %vm8059_vm2, 0, %v8058_v58  ;;  %v1889_v16 = vsel %vm1804_vm9, %v1888_v56, %v10972_v44  ;;  %v5188_v4 = vadd.s32 1, %v11018_v47  ;;  %v1916_v15 = vadd.s32 1, %v8060_v43 }
 0x32c   : > { %v8859_v35 = vpop.eup %8858  ;;  %v1874_v13 = vsub.s32 32, %v1873_v2  ;;  %v1878_v18 = vsub.s32 4294967266, %v1873_v2  ;;  %v5185_v57 = vmul.u32 %v10991_v32, %v5169_v55  ;;  %v1875_v31 = vshll.u32 %v10989_v62, %v1873_v2 }
 0x32d   : > { %v8861_v25 = vpop.eup %8860  ;;  %v5126_v46 = vxor.u32 2147483648, %v8859_v35  ;;  %vm5187_vm4 = vc.u32 %v11028_v63, %v11017_v40  ;;  %vm1917_vm5 = vcmp.gt.s32.totalorder %v1916_v15, 0  ;;  %v1891_v32 = vsel %vm11007_vm14, 0, %v1889_v16 }
 0x32e   : > { %v5123_v23 = vxor.u32 2147483648, %v8861_v25  ;;  %v1876_v44 = vshrl.u32 %v1858_v0, %v1874_v13  ;;  %v1879_v59 = vadd.s32 127, %v1878_v18  ;;  %v5189_v30 = vsel %vm5187_vm4, %v5188_v4, %v11018_v47 }
 0x32f   : > { %v5127_v41 = vsel %vm5125_vm1, %v5126_v46, %v8861_v25  ;;  %v5190_v50 = vadd.s32 %v5189_v30, %v5185_v57  ;;  %v1918_v62 = vsel %vm1917_vm5, %v1916_v15, 0  ;;  %v1913_v28 = vand.u32 8388607, %v1906_v33 }
 0x330   : > { %v5124_v39 = vsel %vm5122_vm3, %v8859_v35, %v5123_v23  ;;  %v1877_v45 = vor.u32 %v1876_v44, %v1875_v31  ;;  %v1880_v29 = vshll.u32 %v1879_v59, 23  ;;  %v1920_v52 = vand.u32 31, %v1918_v62 }
 0x331   : > { %v5128_v36 = vsel %vm5121_vm15, %v5124_v39, %v5127_v41  ;;  %v5191_v20 = vadd.s32 536870912, %v5190_v50  ;;  %v1895_v47 = vadd.s32 3, %v1891_v32  ;;  %v974_v53 = vmul.f32 %v9647_v9, %v864_v37 }
 0x332   : > { %v5129_v56 = vsel %vm5118_vm0, nan, %v5128_v36  ;;  %v1881_v38 = vor.u32 4788187, %v1880_v29  ;;  %v1921_v58 = vsub.s32 32, %v1920_v52  ;;  %v1884_v55 = vcvt.s32.f32 %v1877_v45 }
 0x333   : > { %7768 = vst [vmem:[%s10000_s14 + $0x130] sm:$0xff] %v5129_v56  ;;  %v11059_v11 = vshrl.u32 %v5191_v20, 30  ;;  %v1914_v17 = vor.u32 8388608, %v1913_v28  ;;  %v11062_v43 = vshrl.u32 %v1918_v62, 5  ;;  %v1923_v24 = vshll.u32 %v9287_v61, %v1920_v52 }
 0x334   : > { %v1882_v42 = vand.u32 2147483647, %v1881_v38  ;;  %v1924_v35 = vshrl.u32 %v9288_v1, %v1921_v58  ;;  %v1926_v2 = vshll.u32 %v9288_v1, %v1920_v52  ;;  %v1927_v4 = vshrl.u32 %v9289_v3, %v1921_v58 }
 0x335   : > { %v5193_v0 = vshll.u32 %v11059_v11, 30  ;;  %v1930_v15 = vshrl.u32 %v9290_v5, %v1921_v58  ;;  %v1933_v37 = vshrl.u32 %v9291_v10, %v1921_v58  ;;  %v1929_v46 = vshll.u32 %v9289_v3, %v1920_v52 }
 0x336   : > { %v1885_v16 = vmul.f32 %v1884_v55, %v1882_v42  ;;  %v1932_v13 = vshll.u32 %v9290_v5, %v1920_v52  ;;  %v1936_v18 = vshrl.u32 %v9292_v22, %v1921_v58  ;;  %v11076_v23 = vand.u32 3, %v1895_v47  ;;  %v11110_v42 = vpop.f32.mrb[11].mxu1 }
 0x337   : > { %v11071_v25 = vsub.s32 %v5190_v50, %v5193_v0  ;;  %v1925_v31 = vor.u32 %v1924_v35, %v1923_v24  ;;  %v1928_v41 = vor.u32 %v1927_v4, %v1926_v2  ;;  %vm5132_vm6 = vcmp.lt.s32.totalorder %v10887_v21, 0 }
 0x338   : > { %v1886_v57 = vxor.u32 2147483648, %v1885_v16  ;;  %v1931_v59 = vor.u32 %v1930_v15, %v1929_v46  ;;  %v1934_v30 = vor.u32 %v1933_v37, %v1932_v13  ;;  %v1935_v39 = vshll.u32 %v9291_v10, %v1920_v52 }
 0x339   : > { %v5196_v44 = vsub.s32 0, %v11071_v25  ;;  %vm1938_vm7 = vcmp.lt.s32.totalorder %v11062_v43, 1  ;;  %v1954_v50 = vshll.u32 %v1914_v17, 8  ;;  %v11085_v62 = vadd.f32 %v9652_v14, %v974_v53 }
 0x33a   : > { %v1887_v32 = vsel %vm1804_vm9, %v1886_v57, %v1885_v16  ;;  %v1937_v29 = vor.u32 %v1936_v18, %v1935_v39  ;;  %vm1941_vm8 = vcmp.lt.s32.totalorder %v11062_v43, 4  ;;  %v1922_v28 = vshrl.u32 %v9287_v61, %v1921_v58 }
 0x33b   : > { %v1890_v36 = vsel %vm11007_vm14, %v10787_v48, %v1887_v32  ;;  %v8185_v45 = vmin.u32 %v5196_v44, %v11071_v25  ;;  %v1946_v56 = vsel %vm1938_vm7, %v1925_v31, %v1928_v41  ;;  %v1947_v20 = vsel %vm1941_vm8, %v1934_v30, 920167782 }
 0x33c   : > { %8862 = vcosq.f32 %v1890_v36  ;;  %vm11099_vm9 = vcmp.le.f32.partialorder %v5130_v60, 0.7853982  ;;  %vm1940_vm10 = vcmp.lt.s32.totalorder %v11062_v43, 3  ;;  %v1943_v38 = vsel %vm1941_vm8, %v1931_v59, 2102212464 }
 0x33d   : > { %8864 = vsinq.f32 %v1890_v36  ;;  %v5198_v52 = vclz %v8185_v45  ;;  %v5216_v47 = vsub.s32 4, %v11059_v11  ;;  %vm1939_vm11 = vcmp.lt.s32.totalorder %v11062_v43, 2 }
 0x33e   : > { %v1948_v58 = vsel %vm1940_vm10, %v1931_v59, %v1947_v20  ;;  %v1950_v53 = vsel %vm1938_vm7, %v1928_v41, %v1931_v59  ;;  %v1942_v55 = vsel %vm1938_vm7, %v1922_v28, %v1925_v31  ;;  %v1951_v0 = vsel %vm1941_vm8, %v1937_v29, 1326507024 }
 0x33f   : > { %v8186_v60 = vadd.s32 4294967294, %v5198_v52  ;;  %v1949_v17 = vsel %vm1939_vm11, %v1946_v56, %v1948_v58  ;;  %v1944_v24 = vsel %vm1940_vm10, %v1928_v41, %v1943_v38  ;;  %v1952_v35 = vsel %vm1940_vm10, %v1934_v30, %v1951_v0 }
 0x340   : > { %v11118_v2 = vmul.u32.u64.low %v1954_v50, %v1949_v17  ;;  %v11119_v16 = vmul.u32.u64.high %v1954_v50, %v1949_v17, %v11118_v2  ;;  %v5186_v4 = vadd.s32 %v11017_v40, %v11028_v63  ;;  %v1953_v15 = vsel %vm1939_vm11, %v1950_v53, %v1952_v35 }
 0x341   : > { %vm8187_vm12 = vcmp.lt.s32.totalorder %v8186_v60, 0  ;;  %v5237_v37 = vand.u32 2139095040, %v11085_v62  ;;  %v5217_v13 = vsel %vm5132_vm6, %v5216_v47, %v11059_v11  ;;  %vm1894_vm13 = vweird.f32 %v10787_v48 }
 0x342   : > { %v5201_v46 = vsel %vm8187_vm12, 0, %v8186_v60  ;;  %v11130_v18 = vmul.u32.u64.low %v1954_v50, %v1953_v15  ;;  %v11131_v57 = vmul.u32.u64.high %v1954_v50, %v1953_v15, %v11130_v18  ;;  %v1945_v40 = vsel %vm1939_vm11, %v1942_v55, %v1944_v24 }
 0x343   : > { %v5202_v31 = vsub.s32 32, %v5201_v46  ;;  %v5206_v41 = vsub.s32 4294967266, %v5201_v46  ;;  %v5238_v63 = vshrl.u32 %v5237_v37, 23  ;;  %vm1897_vm14 = vcmp.lt.s32.totalorder %v11076_v23, 2 }
 0x344   : > { %vm1901_vm15 = vcmp.eq.s32.totalorder %v11076_v23, 2  ;;  %v1964_v44 = vadd.s32 1, %v11119_v16  ;;  %v786_v11 = vadd.f32 %v10696_v7, %v9645_v8  ;;  %v5203_v59 = vshll.u32 %v11071_v25, %v5201_v46 }
 0x345   : > { %v5204_v30 = vshrl.u32 %v5186_v4, %v5202_v31  ;;  %v5207_v39 = vadd.s32 127, %v5206_v41  ;;  %v8188_v32 = vadd.s32 4294967169, %v5238_v63  ;;  %v5219_v43 = vsel %vm11099_vm9, 0, %v5217_v13 }
 0x346   : > { %v8863_v36 = vpop.eup %8862  ;;  %v1961_v45 = vmul.u32 %v1954_v50, %v1945_v40  ;;  %vm1963_vm0 = vc.u32 %v11131_v57, %v11118_v2  ;;  %v5234_v29 = vand.u32 2147483647, %v11085_v62  ;;  %v943_v58 = vmul.f32 %v9649_v12, %v786_v11 }
 0x347   : > { %v8865_v28 = vpop.eup %8864  ;;  %v1902_v56 = vxor.u32 2147483648, %v8863_v36  ;;  %v5205_v20 = vor.u32 %v5204_v30, %v5203_v59  ;;  %v5208_v52 = vshll.u32 %v5207_v39, 23  ;;  %v1965_v7 = vsel %vm1963_vm0, %v1964_v44, %v11119_v16 }
 0x348   : > { %v1899_v25 = vxor.u32 2147483648, %v8865_v28  ;;  %v1966_v38 = vadd.s32 %v1965_v7, %v1961_v45  ;;  %v5244_v47 = vadd.s32 1, %v8188_v32  ;;  %vm1898_vm3 = vcmp.eq.s32.totalorder %v11076_v23, 0 }
 0x349   : > { %v1903_v50 = vsel %vm1901_vm15, %v1902_v56, %v8865_v28  ;;  %v5209_v53 = vor.u32 4788187, %v5208_v52  ;;  %v5223_v60 = vadd.s32 3, %v5219_v43  ;;  %v5241_v0 = vand.u32 8388607, %v5234_v29 }
 0x34a   : > { %v1900_v55 = vsel %vm1898_vm3, %v8863_v36, %v1899_v25  ;;  %v1967_v17 = vadd.s32 536870912, %v1966_v38  ;;  %vm5245_vm1 = vcmp.gt.s32.totalorder %v5244_v47, 0  ;;  %v5212_v16 = vcvt.s32.f32 %v5205_v20 }
 0x34b   : > { %v1904_v24 = vsel %vm1897_vm14, %v1900_v55, %v1903_v50  ;;  %v5210_v35 = vand.u32 2147483647, %v5209_v53  ;;  %v5246_v4 = vsel %vm5245_vm1, %v5244_v47, 0  ;;  %v11161_v13 = vadd.f32 %v9656_v19, %v943_v58 }
 0x34c   : > { %v1905_v15 = vsel %vm1894_vm13, nan, %v1904_v24  ;;  %v11158_v37 = vshrl.u32 %v1967_v17, 30  ;;  %v5248_v46 = vand.u32 31, %v5246_v4  ;;  %v11165_v23 = vand.u32 3, %v5223_v60 }
 0x34d   : > { %7737 = vst [vmem:[%s10000_s14 + $0x38] sm:$0xff] %v1905_v15  ;;  %v5213_v18 = vmul.f32 %v5212_v16, %v5210_v35  ;;  %v5242_v63 = vor.u32 8388608, %v5241_v0  ;;  %v11169_v44 = vadd.f32 %v10762_v51, %v9645_v8  ;;  %v5247_v11 = vshrl.u32 %v5246_v4, 5 }
 0x34e   : > { %v1969_v31 = vshll.u32 %v11158_v37, 30  ;;  %v5249_v41 = vsub.s32 32, %v5248_v46  ;;  %v2013_v30 = vand.u32 2139095040, %v11161_v13  ;;  %v5251_v32 = vshll.u32 %v9287_v61, %v5248_v46 }
 0x34f   : > { %v5214_v40 = vxor.u32 2147483648, %v5213_v18  ;;  %v5254_v28 = vshll.u32 %v9288_v1, %v5248_v46  ;;  %v5257_v56 = vshll.u32 %v9289_v3, %v5248_v46  ;;  %v5260_v52 = vshll.u32 %v9290_v5, %v5248_v46 }
 0x350   : > { %v11171_v48 = vsub.s32 %v1966_v38, %v1969_v31  ;;  %v5252_v59 = vshrl.u32 %v9288_v1, %v5249_v41  ;;  %v5255_v36 = vshrl.u32 %v9289_v3, %v5249_v41  ;;  %v5258_v43 = vshrl.u32 %v9290_v5, %v5249_v41 }
 0x351   : > { %v5215_v39 = vsel %vm5132_vm6, %v5214_v40, %v5213_v18  ;;  %v5261_v7 = vshrl.u32 %v9291_v10, %v5249_v41  ;;  %v5263_v49 = vshll.u32 %v9291_v10, %v5248_v46  ;;  %v5264_v50 = vshrl.u32 %v9292_v22, %v5249_v41 }
 0x352   : > { %v5218_v51 = vsel %vm11099_vm9, %v10887_v21, %v5215_v39  ;;  %v1972_v45 = vsub.s32 0, %v11171_v48  ;;  %v5253_v20 = vor.u32 %v5252_v59, %v5251_v32  ;;  %v5256_v38 = vor.u32 %v5255_v36, %v5254_v28 }
 0x353   : > { %8866 = vcosq.f32 %v5218_v51  ;;  %v5259_v47 = vor.u32 %v5258_v43, %v5257_v56  ;;  %v5262_v58 = vor.u32 %v5261_v7, %v5260_v52  ;;  %v11191_v53 = vshll.u32 %v5242_v63, 8 }
 0x354   : > { %8868 = vsinq.f32 %v5218_v51  ;;  %v8061_v25 = vmin.u32 %v1972_v45, %v11171_v48  ;;  %v5250_v55 = vshrl.u32 %v9287_v61, %v5249_v41  ;;  %vm5266_vm2 = vcmp.lt.s32.totalorder %v5247_v11, 1 }
 0x355   : > { %v2014_v17 = vshrl.u32 %v2013_v30, 23  ;;  %v5265_v0 = vor.u32 %v5264_v50, %v5263_v49  ;;  %vm5267_vm4 = vcmp.lt.s32.totalorder %v5247_v11, 2  ;;  %vm5268_vm5 = vcmp.lt.s32.totalorder %v5247_v11, 3  ;;  %v11217_v49 = vpop.f32.mrb[12].mxu0 }
 0x356   : > { %v1974_v60 = vclz %v8061_v25  ;;  %vm5269_vm6 = vcmp.lt.s32.totalorder %v5247_v11, 4  ;;  %vm5226_vm7 = vcmp.eq.s32.totalorder %v11165_v23, 0  ;;  %v5274_v16 = vsel %vm5266_vm2, %v5253_v20, %v5256_v38 }
 0x357   : > { %v5271_v35 = vsel %vm5269_vm6, %v5259_v47, 2102212464  ;;  %v5275_v4 = vsel %vm5269_vm6, %v5262_v58, 920167782  ;;  %vm5225_vm8 = vcmp.lt.s32.totalorder %v11165_v23, 2  ;;  %v5270_v15 = vsel %vm5266_vm2, %v5250_v55, %v5253_v20 }
 0x358   : > { %v8062_v24 = vadd.s32 4294967294, %v1974_v60  ;;  %v5276_v46 = vsel %vm5268_vm5, %v5259_v47, %v5275_v4  ;;  %v5278_v18 = vsel %vm5266_vm2, %v5256_v38, %v5259_v47  ;;  %v5279_v31 = vsel %vm5269_vm6, %v5265_v0, 1326507024 }
 0x359   : > { %vm5222_vm9 = vweird.f32 %v10887_v21  ;;  %vm1908_vm10 = vcmp.lt.s32.totalorder %v10994_v27, 0  ;;  %v5272_v41 = vsel %vm5268_vm5, %v5256_v38, %v5271_v35  ;;  %v5277_v40 = vsel %vm5267_vm4, %v5274_v16, %v5276_v46 }
 0x35a   : > { %vm8063_vm11 = vcmp.lt.s32.totalorder %v8062_v24, 0  ;;  %v5280_v63 = vsel %vm5268_vm5, %v5262_v58, %v5279_v31  ;;  %v11204_v39 = vmul.u32.u64.low %v11191_v53, %v5277_v40  ;;  %v11205_v32 = vmul.u32.u64.high %v11191_v53, %v5277_v40, %v11204_v39 }
 0x35b   : > { %v1977_v59 = vsel %vm8063_vm11, 0, %v8062_v24  ;;  %v5281_v30 = vsel %vm5267_vm4, %v5278_v18, %v5280_v63  ;;  %vm5229_vm12 = vcmp.eq.s32.totalorder %v11165_v23, 2  ;;  %v1962_v36 = vadd.s32 %v11118_v2, %v11131_v57 }
 0x35c   : > { %v1978_v43 = vsub.s32 32, %v1977_v59  ;;  %v1982_v51 = vsub.s32 4294967266, %v1977_v59  ;;  %v5273_v28 = vsel %vm5267_vm4, %v5270_v15, %v5272_v41  ;;  %v8064_v52 = vadd.s32 4294967169, %v2014_v17 }
 0x35d   : > { %v8867_v45 = vpop.eup %8866  ;;  %v11213_v56 = vmul.u32.u64.low %v11191_v53, %v5281_v30  ;;  %v11214_v20 = vmul.u32.u64.high %v11191_v53, %v5281_v30, %v11213_v56  ;;  %v1979_v38 = vshll.u32 %v11171_v48, %v1977_v59  ;;  %v1992_v2 = vsub.s32 4, %v11158_v37 }
 0x35e   : > { %v8869_v7 = vpop.eup %8868  ;;  %v5230_v25 = vxor.u32 2147483648, %v8867_v45  ;;  %v1980_v47 = vshrl.u32 %v1962_v36, %v1978_v43  ;;  %v1983_v58 = vadd.s32 127, %v1982_v51  ;;  %v5292_v57 = vadd.s32 1, %v11205_v32 }
 0x35f   : > { %v5227_v50 = vxor.u32 2147483648, %v8869_v7  ;;  %v2020_v11 = vadd.s32 1, %v8064_v52  ;;  %v2010_v0 = vand.u32 2147483647, %v11161_v13  ;;  %v5289_v24 = vmul.u32 %v11191_v53, %v5273_v28 }
 0x360   : > { %v5231_v60 = vsel %vm5229_vm12, %v5230_v25, %v8869_v7  ;;  %v1981_v55 = vor.u32 %v1980_v47, %v1979_v38  ;;  %v1984_v17 = vshll.u32 %v1983_v58, 23  ;;  %vm5291_vm13 = vc.u32 %v11214_v20, %v11204_v39 }
 0x361   : > { %v5228_v48 = vsel %vm5226_vm7, %v8867_v45, %v5227_v50  ;;  %vm2021_vm14 = vcmp.gt.s32.totalorder %v2020_v11, 0  ;;  %v5293_v4 = vsel %vm5291_vm13, %v5292_v57, %v11205_v32  ;;  %v975_v15 = vmul.f32 %v9649_v12, %v11169_v44 }
 0x362   : > { %v5232_v35 = vsel %vm5225_vm8, %v5228_v48, %v5231_v60  ;;  %v1985_v16 = vor.u32 4788187, %v1984_v17  ;;  %v1993_v53 = vsel %vm1908_vm10, %v1992_v2, %v11158_v37  ;;  %v5294_v18 = vadd.s32 %v5293_v4, %v5289_v24 }
 0x363   : > { %v5233_v46 = vsel %vm5222_vm9, nan, %v5232_v35  ;;  %v2022_v31 = vsel %vm2021_vm14, %v2020_v11, 0  ;;  %v1988_v40 = vcvt.s32.f32 %v1981_v55  ;;  %vm11242_vm15 = vcmp.le.f32.partialorder %v1906_v33, 0.7853982 }
 0x364   : > { %7769 = vst [vmem:[%s10000_s14 + $0x138] sm:$0xff] %v5233_v46  ;;  %v1986_v41 = vand.u32 2147483647, %v1985_v16  ;;  %v2024_v23 = vand.u32 31, %v2022_v31  ;;  %v5295_v44 = vadd.s32 536870912, %v5294_v18  ;;  %v1995_v37 = vsel %vm11242_vm15, 0, %v1993_v53 }
 0x365   : > { %v2017_v21 = vand.u32 8388607, %v2010_v0  ;;  %v11251_v32 = vadd.f32 %v9656_v19, %v975_v15  ;;  %v2023_v43 = vshrl.u32 %v2022_v31, 5  ;;  %v1999_v48 = vadd.s32 3, %v1995_v37 }
 0x366   : > { %v1989_v59 = vmul.f32 %v1988_v40, %v1986_v41  ;;  %v2025_v30 = vsub.s32 32, %v2024_v23  ;;  %v11253_v36 = vshrl.u32 %v5295_v44, 30  ;;  %v2027_v33 = vshll.u32 %v9287_v61, %v2024_v23 }
 0x367   : > { %v2030_v51 = vshll.u32 %v9288_v1, %v2024_v23  ;;  %v2033_v52 = vshll.u32 %v9289_v3, %v2024_v23  ;;  %v2036_v38 = vshll.u32 %v9290_v5, %v2024_v23  ;;  %v2039_v2 = vshll.u32 %v9291_v10, %v2024_v23 }
 0x368   : > { %v1990_v45 = vxor.u32 2147483648, %v1989_v59  ;;  %v2028_v28 = vshrl.u32 %v9288_v1, %v2025_v30  ;;  %v2031_v56 = vshrl.u32 %v9289_v3, %v2025_v30  ;;  %v5297_v7 = vshll.u32 %v11253_v36, 30 }
 0x369   : > { %v2034_v25 = vshrl.u32 %v9290_v5, %v2025_v30  ;;  %v2037_v47 = vshrl.u32 %v9291_v10, %v2025_v30  ;;  %v2040_v57 = vshrl.u32 %v9292_v22, %v2025_v30  ;;  %v2018_v4 = vor.u32 8388608, %v2017_v21 }
 0x36a   : > { %v1991_v58 = vsel %vm1908_vm10, %v1990_v45, %v1989_v59  ;;  %v2029_v50 = vor.u32 %v2028_v28, %v2027_v33  ;;  %v11271_v60 = vsub.s32 %v5294_v18, %v5297_v7  ;;  %v2032_v55 = vor.u32 %v2031_v56, %v2030_v51 }
 0x36b   : > { %v1994_v11 = vsel %vm11242_vm15, %v10994_v27, %v1991_v58  ;;  %v2035_v17 = vor.u32 %v2034_v25, %v2033_v52  ;;  %v2038_v24 = vor.u32 %v2037_v47, %v2036_v38  ;;  %v2041_v35 = vor.u32 %v2040_v57, %v2039_v2 }
 0x36c   : > { %8870 = vcosq.f32 %v1994_v11  ;;  %v5300_v16 = vsub.s32 0, %v11271_v60  ;;  %v2026_v15 = vshrl.u32 %v9287_v61, %v2025_v30  ;;  %vm2042_vm0 = vcmp.lt.s32.totalorder %v2023_v43, 1 }
 0x36d   : > { %8872 = vsinq.f32 %v1994_v11  ;;  %vm2044_vm3 = vcmp.lt.s32.totalorder %v2023_v43, 3  ;;  %vm2045_vm1 = vcmp.lt.s32.totalorder %v2023_v43, 4  ;;  %v5341_v46 = vand.u32 2139095040, %v11251_v32 }
 0x36e   : > { %v8189_v53 = vmin.u32 %v5300_v16, %v11271_v60  ;;  %v2046_v18 = vsel %vm2042_vm0, %v2026_v15, %v2029_v50  ;;  %v2047_v31 = vsel %vm2045_vm1, %v2035_v17, 2102212464  ;;  %v2050_v41 = vsel %vm2042_vm0, %v2029_v50, %v2032_v55  ;;  %v11295_v50 = vpop.f32.mrb[12].mxu1 }
 0x36f   : > { %v2048_v40 = vsel %vm2044_vm3, %v2032_v55, %v2047_v31  ;;  %v2051_v23 = vsel %vm2045_vm1, %v2038_v24, 920167782  ;;  %v2054_v63 = vsel %vm2042_vm0, %v2032_v55, %v2035_v17  ;;  %v2055_v44 = vsel %vm2045_vm1, %v2041_v35, 1326507024 }
 0x370   : > { %v2000_v59 = vand.u32 3, %v1999_v48  ;;  %vm5236_vm2 = vcmp.lt.s32.totalorder %v11085_v62, 0  ;;  %v5302_v21 = vclz %v8189_v53  ;;  %v2058_v37 = vshll.u32 %v2018_v4, 8 }
 0x371   : > { %vm2043_vm4 = vcmp.lt.s32.totalorder %v2023_v43, 2  ;;  %v2052_v30 = vsel %vm2044_vm3, %v2035_v17, %v2051_v23  ;;  %v2056_v33 = vsel %vm2044_vm3, %v2038_v24, %v2055_v44  ;;  %v5342_v51 = vshrl.u32 %v5341_v46, 23 }
 0x372   : > { %vm1998_vm5 = vweird.f32 %v10994_v27  ;;  %v8190_v45 = vadd.s32 4294967294, %v5302_v21  ;;  %v2049_v28 = vsel %vm2043_vm4, %v2046_v18, %v2048_v40  ;;  %v2053_v56 = vsel %vm2043_vm4, %v2050_v41, %v2052_v30 }
 0x373   : > { %v2057_v52 = vsel %vm2043_vm4, %v2054_v63, %v2056_v33  ;;  %vm11284_vm6 = vcmp.le.f32.partialorder %v5234_v29, 0.7853982  ;;  %v11291_v47 = vmul.u32.u64.low %v2058_v37, %v2053_v56  ;;  %v11292_v58 = vmul.u32.u64.high %v2058_v37, %v2053_v56, %v11291_v47 }
 0x374   : > { %v11288_v25 = vmul.u32.u64.low %v2058_v37, %v2057_v52  ;;  %v11289_v38 = vmul.u32.u64.high %v2058_v37, %v2057_v52, %v11288_v25  ;;  %vm2002_vm7 = vcmp.eq.s32.totalorder %v2000_v59, 0  ;;  %vm2005_vm8 = vcmp.eq.s32.totalorder %v2000_v59, 2 }
 0x375   : > { %vm8191_vm9 = vcmp.lt.s32.totalorder %v8190_v45, 0  ;;  %v8192_v43 = vadd.s32 4294967169, %v5342_v51  ;;  %v5290_v29 = vadd.s32 %v11204_v39, %v11214_v20  ;;  %v5320_v11 = vsub.s32 4, %v11253_v36 }
 0x376   : > { %v8871_v2 = vpop.eup %8870  ;;  %v5305_v57 = vsel %vm8191_vm9, 0, %v8190_v45  ;;  %v5338_v55 = vand.u32 2147483647, %v11251_v32  ;;  %v2065_v16 = vmul.u32 %v2058_v37, %v2049_v28  ;;  %vm2067_vm10 = vc.u32 %v11289_v38, %v11291_v47 }
 0x377   : > { %v8873_v17 = vpop.eup %8872  ;;  %v2006_v48 = vxor.u32 2147483648, %v8871_v2  ;;  %v5306_v24 = vsub.s32 32, %v5305_v57  ;;  %v5310_v35 = vsub.s32 4294967266, %v5305_v57  ;;  %v5307_v15 = vshll.u32 %v11271_v60, %v5305_v57 }
 0x378   : > { %v2003_v4 = vxor.u32 2147483648, %v8873_v17  ;;  %v2068_v46 = vadd.s32 1, %v11292_v58  ;;  %v5348_v18 = vadd.s32 1, %v8192_v43  ;;  %vm2001_vm11 = vcmp.lt.s32.totalorder %v2000_v59, 2 }
 0x379   : > { %v2007_v39 = vsel %vm2005_vm8, %v2006_v48, %v8873_v17  ;;  %v5308_v20 = vshrl.u32 %v5290_v29, %v5306_v24  ;;  %v5311_v53 = vadd.s32 127, %v5310_v35  ;;  %v5321_v41 = vsel %vm5236_vm2, %v5320_v11, %v11253_v36 }
 0x37a   : > { %v2004_v31 = vsel %vm2002_vm7, %v8871_v2, %v2003_v4  ;;  %v2069_v60 = vsel %vm2067_vm10, %v2068_v46, %v11292_v58  ;;  %v5345_v37 = vand.u32 8388607, %v5338_v55  ;;  %vm5349_vm12 = vcmp.gt.s32.totalorder %v5348_v18, 0 }
 0x37b   : > { %v2008_v40 = vsel %vm2001_vm11, %v2004_v31, %v2007_v39  ;;  %v5309_v23 = vor.u32 %v5308_v20, %v5307_v15  ;;  %v5312_v63 = vshll.u32 %v5311_v53, 23  ;;  %v2070_v44 = vadd.s32 %v2069_v60, %v2065_v16 }
 0x37c   : > { %v2009_v21 = vsel %vm1998_vm5, nan, %v2008_v40  ;;  %v788_v59 = vadd.f32 %v10864_v34, %v9643_v6  ;;  %v5323_v36 = vsel %vm11284_vm6, 0, %v5321_v41  ;;  %v5350_v51 = vsel %vm5349_vm12, %v5348_v18, 0 }
 0x37d   : > { %7738 = vst [vmem:[%s10000_s14 + $0x40] sm:$0xff] %v2009_v21  ;;  %v5313_v30 = vor.u32 4788187, %v5312_v63  ;;  %v2071_v33 = vadd.s32 536870912, %v2070_v44  ;;  %v5352_v45 = vand.u32 31, %v5350_v51  ;;  %v5316_v56 = vcvt.s32.f32 %v5309_v23 }
 0x37e   : > { %v5327_v27 = vadd.s32 3, %v5323_v36  ;;  %v944_v58 = vmul.f32 %v9647_v9, %v788_v59  ;;  %v5346_v34 = vor.u32 8388608, %v5345_v37  ;;  %v5351_v15 = vshrl.u32 %v5350_v51, 5 }
 0x37f   : > { %v5314_v28 = vand.u32 2147483647, %v5313_v30  ;;  %v11320_v52 = vshrl.u32 %v2071_v33, 30  ;;  %v5353_v25 = vsub.s32 32, %v5352_v45  ;;  %v5355_v29 = vshll.u32 %v9287_v61, %v5352_v45 }
 0x380   : > { %v5358_v11 = vshll.u32 %v9288_v1, %v5352_v45  ;;  %v5361_v16 = vshll.u32 %v9289_v3, %v5352_v45  ;;  %v5364_v39 = vshll.u32 %v9290_v5, %v5352_v45  ;;  %v11335_v20 = vadd.f32 %v9652_v14, %v944_v58 }
 0x381   : > { %v5317_v43 = vmul.f32 %v5316_v56, %v5314_v28  ;;  %v2073_v2 = vshll.u32 %v11320_v52, 30  ;;  %v5356_v57 = vshrl.u32 %v9288_v1, %v5353_v25  ;;  %v5359_v17 = vshrl.u32 %v9289_v3, %v5353_v25 }
 0x382   : > { %v5362_v48 = vshrl.u32 %v9290_v5, %v5353_v25  ;;  %v5365_v4 = vshrl.u32 %v9291_v10, %v5353_v25  ;;  %v5367_v23 = vshll.u32 %v9291_v10, %v5352_v45  ;;  %v5368_v63 = vshrl.u32 %v9292_v22, %v5353_v25 }
 0x383   : > { %v5318_v24 = vxor.u32 2147483648, %v5317_v43  ;;  %v11329_v35 = vsub.s32 %v2070_v44, %v2073_v2  ;;  %v5357_v46 = vor.u32 %v5356_v57, %v5355_v29  ;;  %v5360_v31 = vor.u32 %v5359_v17, %v5358_v11  ;;  %v11364_v11 = vpop.f32.mrb[13].mxu0 }
 0x384   : > { %v5363_v41 = vor.u32 %v5362_v48, %v5361_v16  ;;  %v5366_v40 = vor.u32 %v5365_v4, %v5364_v39  ;;  %v11345_v44 = vand.u32 3, %v5327_v27  ;;  %v5369_v37 = vor.u32 %v5368_v63, %v5367_v23 }
 0x385   : > { %v5319_v53 = vsel %vm5236_vm2, %v5318_v24, %v5317_v43  ;;  %v2076_v18 = vsub.s32 0, %v11329_v35  ;;  %v11348_v59 = vshll.u32 %v5346_v34, 8  ;;  %v2117_v30 = vand.u32 2139095040, %v11335_v20 }
 0x386   : > { %v5322_v60 = vsel %vm11284_vm6, %v11085_v62, %v5319_v53  ;;  %v5354_v7 = vshrl.u32 %v9287_v61, %v5353_v25  ;;  %vm5370_vm13 = vcmp.lt.s32.totalorder %v5351_v15, 1  ;;  %vm5373_vm14 = vcmp.lt.s32.totalorder %v5351_v15, 4 }
 0x387   : > { %8874 = vcosq.f32 %v5322_v60  ;;  %v8065_v21 = vmin.u32 %v2076_v18, %v11329_v35  ;;  %vm5372_vm15 = vcmp.lt.s32.totalorder %v5351_v15, 3  ;;  %v5375_v33 = vsel %vm5373_vm14, %v5363_v41, 2102212464 }
 0x388   : > { %8876 = vsinq.f32 %v5322_v60  ;;  %v5378_v51 = vsel %vm5370_vm13, %v5357_v46, %v5360_v31  ;;  %v5379_v45 = vsel %vm5373_vm14, %v5366_v40, 920167782  ;;  %vm5371_vm0 = vcmp.lt.s32.totalorder %v5351_v15, 2 }
 0x389   : > { %v2078_v36 = vclz %v8065_v21  ;;  %v5380_v56 = vsel %vm5372_vm15, %v5363_v41, %v5379_v45  ;;  %v5382_v27 = vsel %vm5370_vm13, %v5360_v31, %v5363_v41  ;;  %vm5330_vm3 = vcmp.eq.s32.totalorder %v11345_v44, 0 }
 0x38a   : > { %vm2012_vm1 = vcmp.lt.s32.totalorder %v11161_v13, 0  ;;  %v5374_v58 = vsel %vm5370_vm13, %v5354_v7, %v5357_v46  ;;  %v5376_v43 = vsel %vm5372_vm15, %v5360_v31, %v5375_v33  ;;  %v5381_v25 = vsel %vm5371_vm0, %v5378_v51, %v5380_v56 }
 0x38b   : > { %v8066_v28 = vadd.s32 4294967294, %v2078_v36  ;;  %v5383_v2 = vsel %vm5373_vm14, %v5369_v37, 1326507024  ;;  %vm5329_vm2 = vcmp.lt.s32.totalorder %v11345_v44, 2  ;;  %vm5326_vm5 = vweird.f32 %v11085_v62 }
 0x38c   : > { %v5384_v34 = vsel %vm5372_vm15, %v5366_v40, %v5383_v2  ;;  %v11360_v29 = vmul.u32.u64.low %v11348_v59, %v5381_v25  ;;  %v11361_v57 = vmul.u32.u64.high %v11348_v59, %v5381_v25, %v11360_v29  ;;  %v2118_v24 = vshrl.u32 %v2117_v30, 23 }
 0x38d   : > { %vm8067_vm4 = vcmp.lt.s32.totalorder %v8066_v28, 0  ;;  %v5385_v48 = vsel %vm5371_vm0, %v5382_v27, %v5384_v34  ;;  %v868_v16 = vadd.f32 %v10927_v26, %v9643_v6  ;;  %v2066_v4 = vadd.s32 %v11291_v47, %v11289_v38 }
 0x38e   : > { %v2081_v17 = vsel %vm8067_vm4, 0, %v8066_v28  ;;  %v2096_v53 = vsub.s32 4, %v11320_v52  ;;  %v5377_v18 = vsel %vm5371_vm0, %v5374_v58, %v5376_v43  ;;  %v8068_v60 = vadd.s32 4294967169, %v2118_v24 }
 0x38f   : > { %v2082_v46 = vsub.s32 32, %v2081_v17  ;;  %v2086_v39 = vsub.s32 4294967266, %v2081_v17  ;;  %v11375_v31 = vmul.u32.u64.low %v11348_v59, %v5385_v48  ;;  %v11376_v41 = vmul.u32.u64.high %v11348_v59, %v5385_v48, %v11375_v31 }
 0x390   : > { %v2083_v23 = vshll.u32 %v11329_v35, %v2081_v17  ;;  %v5396_v26 = vadd.s32 1, %v11361_v57  ;;  %vm5333_vm6 = vcmp.eq.s32.totalorder %v11345_v44, 2  ;;  %v2124_v47 = vadd.s32 1, %v8068_v60 }
 0x391   : > { %v8875_v40 = vpop.eup %8874  ;;  %v2084_v63 = vshrl.u32 %v2066_v4, %v2082_v46  ;;  %v2087_v21 = vadd.s32 127, %v2086_v39  ;;  %v976_v15 = vmul.f32 %v9647_v9, %v868_v16  ;;  %v2114_v33 = vand.u32 2147483647, %v11335_v20 }
 0x392   : > { %v8877_v37 = vpop.eup %8876  ;;  %v5334_v38 = vxor.u32 2147483648, %v8875_v40  ;;  %v5393_v35 = vmul.u32 %v11348_v59, %v5377_v18  ;;  %vm5395_vm7 = vc.u32 %v11376_v41, %v11360_v29  ;;  %vm2125_vm8 = vcmp.gt.s32.totalorder %v2124_v47, 0 }
 0x393   : > { %v5331_v30 = vxor.u32 2147483648, %v8877_v37  ;;  %v2085_v36 = vor.u32 %v2084_v63, %v2083_v23  ;;  %v2088_v7 = vshll.u32 %v2087_v21, 23  ;;  %v2097_v56 = vsel %vm2012_vm1, %v2096_v53, %v11320_v52 }
 0x394   : > { %v5335_v51 = vsel %vm5333_vm6, %v5334_v38, %v8877_v37  ;;  %v5397_v27 = vsel %vm5395_vm7, %v5396_v26, %v11361_v57  ;;  %vm11396_vm9 = vcmp.le.f32.partialorder %v2010_v0, 0.7853982  ;;  %v2126_v25 = vsel %vm2125_vm8, %v2124_v47, 0 }
 0x395   : > { %v5332_v45 = vsel %vm5330_vm3, %v8875_v40, %v5331_v30  ;;  %v2089_v28 = vor.u32 4788187, %v2088_v7  ;;  %v5398_v43 = vadd.s32 %v5397_v27, %v5393_v35  ;;  %v2092_v17 = vcvt.s32.f32 %v2085_v36 }
 0x396   : > { %v5336_v58 = vsel %vm5329_vm2, %v5332_v45, %v5335_v51  ;;  %v2128_v48 = vand.u32 31, %v2126_v25  ;;  %v2099_v52 = vsel %vm11396_vm9, 0, %v2097_v56  ;;  %v2121_v0 = vand.u32 8388607, %v2114_v33 }
 0x397   : > { %v5337_v2 = vsel %vm5326_vm5, nan, %v5336_v58  ;;  %v2090_v34 = vand.u32 2147483647, %v2089_v28  ;;  %v5399_v44 = vadd.s32 536870912, %v5398_v43  ;;  %v11408_v16 = vadd.f32 %v9652_v14, %v976_v15 }
 0x398   : > { %7770 = vst [vmem:[%s10000_s14 + $0x140] sm:$0xff] %v5337_v2  ;;  %v2129_v24 = vsub.s32 32, %v2128_v48  ;;  %v2127_v62 = vshrl.u32 %v2126_v25, 5  ;;  %v2131_v46 = vshll.u32 %v9287_v61, %v2128_v48  ;;  %v2134_v39 = vshll.u32 %v9288_v1, %v2128_v48 }
 0x399   : > { %v2093_v57 = vmul.f32 %v2092_v17, %v2090_v34  ;;  %v11410_v4 = vshrl.u32 %v5399_v44, 30  ;;  %v2137_v60 = vshll.u32 %v9289_v3, %v2128_v48  ;;  %v2140_v63 = vshll.u32 %v9290_v5, %v2128_v48 }
 0x39a   : > { %v2132_v18 = vshrl.u32 %v9288_v1, %v2129_v24  ;;  %v2135_v31 = vshrl.u32 %v9289_v3, %v2129_v24  ;;  %v2138_v23 = vshrl.u32 %v9290_v5, %v2129_v24  ;;  %v2141_v21 = vshrl.u32 %v9291_v10, %v2129_v24 }
 0x39b   : > { %v2094_v53 = vxor.u32 2147483648, %v2093_v57  ;;  %v5401_v40 = vshll.u32 %v11410_v4, 30  ;;  %v2143_v38 = vshll.u32 %v9291_v10, %v2128_v48  ;;  %v2144_v47 = vshrl.u32 %v9292_v22, %v2129_v24 }
 0x39c   : > { %v2133_v37 = vor.u32 %v2132_v18, %v2131_v46  ;;  %v2136_v36 = vor.u32 %v2135_v31, %v2134_v39  ;;  %v2139_v7 = vor.u32 %v2138_v23, %v2137_v60  ;;  %v2103_v51 = vadd.s32 3, %v2099_v52 }
 0x39d   : > { %v2095_v26 = vsel %vm2012_vm1, %v2094_v53, %v2093_v57  ;;  %v11428_v30 = vsub.s32 %v5398_v43, %v5401_v40  ;;  %v2142_v35 = vor.u32 %v2141_v21, %v2140_v63  ;;  %v2145_v45 = vor.u32 %v2144_v47, %v2143_v38  ;;  %v11439_v40 = vpop.f32.mrb[13].mxu1 }
 0x39e   : > { %v2098_v15 = vsel %vm11396_vm9, %v11161_v13, %v2095_v26  ;;  %v2122_v56 = vor.u32 8388608, %v2121_v0  ;;  %v2130_v27 = vshrl.u32 %v9287_v61, %v2129_v24  ;;  %vm2146_vm10 = vcmp.lt.s32.totalorder %v2127_v62, 1 }
 0x39f   : > { %8878 = vcosq.f32 %v2098_v15  ;;  %v5404_v28 = vsub.s32 0, %v11428_v30  ;;  %vm2148_vm11 = vcmp.lt.s32.totalorder %v2127_v62, 3  ;;  %vm2149_vm12 = vcmp.lt.s32.totalorder %v2127_v62, 4 }
 0x3a0   : > { %8880 = vsinq.f32 %v2098_v15  ;;  %v5445_v58 = vand.u32 2139095040, %v11408_v16  ;;  %v2150_v43 = vsel %vm2146_vm10, %v2130_v27, %v2133_v37  ;;  %v2151_v25 = vsel %vm2149_vm12, %v2139_v7, 2102212464 }
 0x3a1   : > { %v8193_v59 = vmin.u32 %v5404_v28, %v11428_v30  ;;  %v2154_v2 = vsel %vm2146_vm10, %v2133_v37, %v2136_v36  ;;  %v2152_v34 = vsel %vm2148_vm11, %v2136_v36, %v2151_v25  ;;  %v2155_v17 = vsel %vm2149_vm12, %v2142_v35, 920167782 }
 0x3a2   : > { %v2158_v48 = vsel %vm2146_vm10, %v2136_v36, %v2139_v7  ;;  %v2159_v52 = vsel %vm2149_vm12, %v2145_v45, 1326507024  ;;  %v2104_v44 = vand.u32 3, %v2103_v51  ;;  %vm5340_vm13 = vcmp.lt.s32.totalorder %v11251_v32, 0 }
 0x3a3   : > { %v5406_v57 = vclz %v8193_v59  ;;  %v2162_v0 = vshll.u32 %v2122_v56, 8  ;;  %vm2147_vm14 = vcmp.lt.s32.totalorder %v2127_v62, 2  ;;  %v2156_v24 = vsel %vm2148_vm11, %v2139_v7, %v2155_v17 }
 0x3a4   : > { %v2160_v46 = vsel %vm2148_vm11, %v2142_v35, %v2159_v52  ;;  %v5446_v39 = vshrl.u32 %v5445_v58, 23  ;;  %vm2102_vm15 = vweird.f32 %v11161_v13  ;;  %v2153_v18 = vsel %vm2147_vm14, %v2150_v43, %v2152_v34 }
 0x3a5   : > { %v8194_v53 = vadd.s32 4294967294, %v5406_v57  ;;  %v2157_v31 = vsel %vm2147_vm14, %v2154_v2, %v2156_v24  ;;  %v2161_v60 = vsel %vm2147_vm14, %v2158_v48, %v2160_v46  ;;  %vm11443_vm0 = vcmp.le.f32.partialorder %v5338_v55, 0.7853982 }
 0x3a6   : > { %v11447_v63 = vmul.u32.u64.low %v2162_v0, %v2161_v60  ;;  %v11448_v21 = vmul.u32.u64.high %v2162_v0, %v2161_v60, %v11447_v63  ;;  %v11450_v62 = vmul.u32.u64.low %v2162_v0, %v2157_v31  ;;  %v11451_v26 = vmul.u32.u64.high %v2162_v0, %v2157_v31, %v11450_v62 }
 0x3a7   : > { %vm2106_vm3 = vcmp.eq.s32.totalorder %v2104_v44, 0  ;;  %vm2109_vm1 = vcmp.eq.s32.totalorder %v2104_v44, 2  ;;  %vm8195_vm2 = vcmp.lt.s32.totalorder %v8194_v53, 0  ;;  %v8196_v37 = vadd.s32 4294967169, %v5446_v39 }
 0x3a8   : > { %v5394_v47 = vadd.s32 %v11360_v29, %v11376_v41  ;;  %v5409_v15 = vsel %vm8195_vm2, 0, %v8194_v53  ;;  %v5424_v55 = vsub.s32 4, %v11410_v4  ;;  %v5442_v36 = vand.u32 2147483647, %v11408_v16 }
 0x3a9   : > { %v8879_v38 = vpop.eup %8878  ;;  %v5410_v35 = vsub.s32 32, %v5409_v15  ;;  %v5414_v45 = vsub.s32 4294967266, %v5409_v15  ;;  %v2169_v28 = vmul.u32 %v2162_v0, %v2153_v18  ;;  %v5411_v27 = vshll.u32 %v11428_v30, %v5409_v15 }
 0x3aa   : > { %v8881_v7 = vpop.eup %8880  ;;  %v2110_v51 = vxor.u32 2147483648, %v8879_v38  ;;  %vm2171_vm4 = vc.u32 %v11448_v21, %v11450_v62  ;;  %v2172_v58 = vadd.s32 1, %v11451_v26  ;;  %v5452_v43 = vadd.s32 1, %v8196_v37 }
 0x3ab   : > { %v2107_v56 = vxor.u32 2147483648, %v8881_v7  ;;  %v5412_v41 = vshrl.u32 %v5394_v47, %v5410_v35  ;;  %v5415_v59 = vadd.s32 127, %v5414_v45  ;;  %vm2105_vm5 = vcmp.lt.s32.totalorder %v2104_v44, 2 }
 0x3ac   : > { %v2111_v29 = vsel %vm2109_vm1, %v2110_v51, %v8881_v7  ;;  %v5425_v2 = vsel %vm5340_vm13, %v5424_v55, %v11410_v4  ;;  %v2173_v30 = vsel %vm2171_vm4, %v2172_v58, %v11451_v26  ;;  %v5449_v0 = vand.u32 8388607, %v5442_v36 }
 0x3ad   : > { %v2108_v25 = vsel %vm2106_vm3, %v8879_v38, %v2107_v56  ;;  %v5413_v17 = vor.u32 %v5412_v41, %v5411_v27  ;;  %v5416_v48 = vshll.u32 %v5415_v59, 23  ;;  %v2174_v52 = vadd.s32 %v2173_v30, %v2169_v28 }
 0x3ae   : > { %v2112_v34 = vsel %vm2105_vm5, %v2108_v25, %v2111_v29  ;;  %vm5453_vm6 = vcmp.gt.s32.totalorder %v5452_v43, 0  ;;  %v790_v44 = vadd.f32 %v11030_v54, %v9645_v8  ;;  %v5427_v4 = vsel %vm11443_vm0, 0, %v5425_v2 }
 0x3af   : > { %v2113_v57 = vsel %vm2102_vm15, nan, %v2112_v34  ;;  %v5417_v24 = vor.u32 4788187, %v5416_v48  ;;  %v2175_v46 = vadd.s32 536870912, %v2174_v52  ;;  %v5454_v39 = vsel %vm5453_vm6, %v5452_v43, 0 }
 0x3b0   : > { %7739 = vst [vmem:[%s10000_s14 + $0x48] sm:$0xff] %v2113_v57  ;;  %v5456_v53 = vand.u32 31, %v5454_v39  ;;  %v5420_v31 = vcvt.s32.f32 %v5413_v17  ;;  %v5431_v13 = vadd.s32 3, %v5427_v4  ;;  %v945_v26 = vmul.f32 %v9649_v12, %v790_v44 }
 0x3b1   : > { %v5418_v18 = vand.u32 2147483647, %v5417_v24  ;;  %v11477_v60 = vshrl.u32 %v2175_v46, 30  ;;  %v11482_v37 = vadd.f32 %v11110_v42, %v9645_v8  ;;  %v5450_v47 = vor.u32 8388608, %v5449_v0 }
 0x3b2   : > { %v5457_v63 = vsub.s32 32, %v5456_v53  ;;  %v5459_v15 = vshll.u32 %v9287_v61, %v5456_v53  ;;  %v5462_v7 = vshll.u32 %v9288_v1, %v5456_v53  ;;  %v5465_v42 = vshll.u32 %v9289_v3, %v5456_v53 }
 0x3b3   : > { %v5421_v54 = vmul.f32 %v5420_v31, %v5418_v18  ;;  %v2177_v38 = vshll.u32 %v11477_v60, 30  ;;  %v5455_v27 = vshrl.u32 %v5454_v39, 5  ;;  %v5468_v29 = vshll.u32 %v9290_v5, %v5456_v53  ;;  %v11514_v18 = vpop.f32.mrb[14].mxu0 }
 0x3b4   : > { %v5460_v55 = vshrl.u32 %v9288_v1, %v5457_v63  ;;  %v5463_v51 = vshrl.u32 %v9289_v3, %v5457_v63  ;;  %v5466_v35 = vshrl.u32 %v9290_v5, %v5457_v63  ;;  %v5469_v56 = vshrl.u32 %v9291_v10, %v5457_v63 }
 0x3b5   : > { %v5422_v45 = vxor.u32 2147483648, %v5421_v54  ;;  %v11490_v28 = vsub.s32 %v2174_v52, %v2177_v38  ;;  %v11496_v41 = vadd.f32 %v9656_v19, %v945_v26  ;;  %v5471_v17 = vshll.u32 %v9291_v10, %v5456_v53 }
 0x3b6   : > { %v5461_v58 = vor.u32 %v5460_v55, %v5459_v15  ;;  %v5464_v25 = vor.u32 %v5463_v51, %v5462_v7  ;;  %v5467_v2 = vor.u32 %v5466_v35, %v5465_v42  ;;  %v5470_v34 = vor.u32 %v5469_v56, %v5468_v29 }
 0x3b7   : > { %v5423_v59 = vsel %vm5340_vm13, %v5422_v45, %v5421_v54  ;;  %v2180_v43 = vsub.s32 0, %v11490_v28  ;;  %v5472_v48 = vshrl.u32 %v9292_v22, %v5457_v63  ;;  %v11506_v52 = vand.u32 3, %v5431_v13 }
 0x3b8   : > { %v5426_v30 = vsel %vm11443_vm0, %v11251_v32, %v5423_v59  ;;  %v11509_v0 = vshll.u32 %v5450_v47, 8  ;;  %v5458_v44 = vshrl.u32 %v9287_v61, %v5457_v63  ;;  %v2221_v4 = vand.u32 2139095040, %v11496_v41 }
 0x3b9   : > { %8882 = vcosq.f32 %v5426_v30  ;;  %v8069_v57 = vmin.u32 %v2180_v43, %v11490_v28  ;;  %v5473_v24 = vor.u32 %v5472_v48, %v5471_v17  ;;  %vm2116_vm7 = vcmp.lt.s32.totalorder %v11335_v20, 0 }
 0x3ba   : > { %8884 = vsinq.f32 %v5426_v30  ;;  %vm5474_vm8 = vcmp.lt.s32.totalorder %v5455_v27, 1  ;;  %vm5475_vm9 = vcmp.lt.s32.totalorder %v5455_v27, 2  ;;  %vm5477_vm10 = vcmp.lt.s32.totalorder %v5455_v27, 4 }
 0x3bb   : > { %v2182_v23 = vclz %v8069_v57  ;;  %vm5476_vm11 = vcmp.lt.s32.totalorder %v5455_v27, 3  ;;  %v5479_v46 = vsel %vm5477_vm10, %v5467_v2, 2102212464  ;;  %v5482_v39 = vsel %vm5474_vm8, %v5461_v58, %v5464_v25 }
 0x3bc   : > { %v5483_v53 = vsel %vm5477_vm10, %v5470_v34, 920167782  ;;  %v5478_v13 = vsel %vm5474_vm8, %v5458_v44, %v5461_v58  ;;  %v5486_v63 = vsel %vm5474_vm8, %v5464_v25, %v5467_v2  ;;  %vm11519_vm12 = vcmp.le.f32.partialorder %v2114_v33, 0.7853982 }
 0x3bd   : > { %v8070_v31 = vadd.s32 4294967294, %v2182_v23  ;;  %v5484_v26 = vsel %vm5476_vm11, %v5467_v2, %v5483_v53  ;;  %v5480_v38 = vsel %vm5476_vm11, %v5464_v25, %v5479_v46  ;;  %v5487_v15 = vsel %vm5477_vm10, %v5473_v24, 1326507024 }
 0x3be   : > { %v5485_v47 = vsel %vm5475_vm9, %v5482_v39, %v5484_v26  ;;  %v2222_v55 = vshrl.u32 %v2221_v4, 23  ;;  %vm5433_vm13 = vcmp.lt.s32.totalorder %v11506_v52, 2  ;;  %v5488_v7 = vsel %vm5476_vm11, %v5470_v34, %v5487_v15 }
 0x3bf   : > { %vm8071_vm14 = vcmp.lt.s32.totalorder %v8070_v31, 0  ;;  %v11528_v51 = vmul.u32.u64.low %v11509_v0, %v5485_v47  ;;  %v11529_v35 = vmul.u32.u64.high %v11509_v0, %v5485_v47, %v11528_v51  ;;  %vm5430_vm15 = vweird.f32 %v11251_v32 }
 0x3c0   : > { %v2185_v33 = vsel %vm8071_vm14, 0, %v8070_v31  ;;  %v2200_v45 = vsub.s32 4, %v11477_v60  ;;  %v5489_v42 = vsel %vm5475_vm9, %v5486_v63, %v5488_v7  ;;  %v8072_v56 = vadd.s32 4294967169, %v2222_v55 }
 0x3c1   : > { %vm5437_vm0 = vcmp.eq.s32.totalorder %v11506_v52, 2  ;;  %v2170_v58 = vadd.s32 %v11450_v62, %v11448_v21  ;;  %v2186_v29 = vsub.s32 32, %v2185_v33  ;;  %v2190_v59 = vsub.s32 4294967266, %v2185_v33 }
 0x3c2   : > { %v5481_v43 = vsel %vm5475_vm9, %v5478_v13, %v5480_v38  ;;  %v11540_v25 = vmul.u32.u64.low %v11509_v0, %v5489_v42  ;;  %v11541_v2 = vmul.u32.u64.high %v11509_v0, %v5489_v42, %v11540_v25  ;;  %v2228_v30 = vadd.s32 1, %v8072_v56 }
 0x3c3   : > { %v8883_v34 = vpop.eup %8882  ;;  %v2187_v17 = vshll.u32 %v11490_v28, %v2185_v33  ;;  %v2188_v48 = vshrl.u32 %v2170_v58, %v2186_v29  ;;  %v2191_v57 = vadd.s32 127, %v2190_v59  ;;  %v5500_v44 = vadd.s32 1, %v11529_v35 }
 0x3c4   : > { %v8885_v24 = vpop.eup %8884  ;;  %v5438_v4 = vxor.u32 2147483648, %v8883_v34  ;;  %v2201_v21 = vsel %vm2116_vm7, %v2200_v45, %v11477_v60  ;;  %v2218_v62 = vand.u32 2147483647, %v11496_v41  ;;  %vm2229_vm3 = vcmp.gt.s32.totalorder %v2228_v30, 0 }
 0x3c5   : > { %v5435_v27 = vxor.u32 2147483648, %v8885_v24  ;;  %v2189_v23 = vor.u32 %v2188_v48, %v2187_v17  ;;  %v2192_v46 = vshll.u32 %v2191_v57, 23  ;;  %v2230_v39 = vsel %vm2229_vm3, %v2228_v30, 0 }
 0x3c6   : > { %vm5434_vm1 = vcmp.eq.s32.totalorder %v11506_v52, 0  ;;  %v5439_v28 = vsel %vm5437_vm0, %v5438_v4, %v8885_v24  ;;  %v5497_v53 = vmul.u32 %v11509_v0, %v5481_v43  ;;  %vm5499_vm2 = vc.u32 %v11541_v2, %v11528_v51 }
 0x3c7   : > { %v5436_v31 = vsel %vm5434_vm1, %v8883_v34, %v5435_v27  ;;  %v2193_v60 = vor.u32 4788187, %v2192_v46  ;;  %v2203_v13 = vsel %vm11519_vm12, 0, %v2201_v21  ;;  %v5501_v26 = vsel %vm5499_vm2, %v5500_v44, %v11529_v35 }
 0x3c8   : > { %v5440_v63 = vsel %vm5433_vm13, %v5436_v31, %v5439_v28  ;;  %v5502_v38 = vadd.s32 %v5501_v26, %v5497_v53  ;;  %v2232_v47 = vand.u32 31, %v2230_v39  ;;  %v977_v15 = vmul.f32 %v9649_v12, %v11482_v37 }
 0x3c9   : > { %v5441_v0 = vsel %vm5430_vm15, nan, %v5440_v63  ;;  %v2194_v55 = vand.u32 2147483647, %v2193_v60  ;;  %v2196_v7 = vcvt.s32.f32 %v2189_v23  ;;  %v2225_v33 = vand.u32 8388607, %v2218_v62 }
 0x3ca   : > { %7771 = vst [vmem:[%s10000_s14 + $0x148] sm:$0xff] %v5441_v0  ;;  %v2207_v45 = vadd.s32 3, %v2203_v13  ;;  %v5503_v42 = vadd.s32 536870912, %v5502_v38  ;;  %v11567_v35 = vshrl.u32 %v2230_v39, 5  ;;  %v2233_v52 = vsub.s32 32, %v2232_v47 }
 0x3cb   : > { %v2197_v56 = vmul.f32 %v2196_v7, %v2194_v55  ;;  %v2235_v58 = vshll.u32 %v9287_v61, %v2232_v47  ;;  %v2238_v29 = vshll.u32 %v9288_v1, %v2232_v47  ;;  %v2241_v37 = vshll.u32 %v9289_v3, %v2232_v47 }
 0x3cc   : > { %v5504_v32 = vshrl.u32 %v5503_v42, 30  ;;  %v2236_v59 = vshrl.u32 %v9288_v1, %v2233_v52  ;;  %v2239_v43 = vshrl.u32 %v9289_v3, %v2233_v52  ;;  %v2244_v25 = vshll.u32 %v9290_v5, %v2232_v47 }
 0x3cd   : > { %v2198_v30 = vxor.u32 2147483648, %v2197_v56  ;;  %v2242_v34 = vshrl.u32 %v9290_v5, %v2233_v52  ;;  %v2245_v17 = vshrl.u32 %v9291_v10, %v2233_v52  ;;  %v2248_v48 = vshrl.u32 %v9292_v22, %v2233_v52 }
 0x3ce   : > { %v5505_v57 = vshll.u32 %v5504_v32, 30  ;;  %v2226_v44 = vor.u32 8388608, %v2225_v33  ;;  %v2237_v24 = vor.u32 %v2236_v59, %v2235_v58  ;;  %v2247_v4 = vshll.u32 %v9291_v10, %v2232_v47 }
 0x3cf   : > { %v2199_v21 = vsel %vm2116_vm7, %v2198_v30, %v2197_v56  ;;  %vm5444_vm4 = vcmp.lt.s32.totalorder %v11408_v16, 0  ;;  %v2240_v27 = vor.u32 %v2239_v43, %v2238_v29  ;;  %v2243_v23 = vor.u32 %v2242_v34, %v2241_v37 }
 0x3d0   : > { %v2246_v46 = vor.u32 %v2245_v17, %v2244_v25  ;;  %v2202_v39 = vsel %vm11519_vm12, %v11335_v20, %v2199_v21  ;;  %v11585_v28 = vsub.s32 %v5502_v38, %v5505_v57  ;;  %v2249_v53 = vor.u32 %v2248_v48, %v2247_v4 }
 0x3d1   : > { %v11588_v31 = vadd.f32 %v9656_v19, %v977_v15  ;;  %8886 = vcosq.f32 %v2202_v39  ;;  %vm2250_vm5 = vcmp.lt.s32.totalorder %v11567_v35, 1  ;;  %vm2251_vm6 = vcmp.lt.s32.totalorder %v11567_v35, 2 }
 0x3d2   : > { %vm2252_vm7 = vcmp.lt.s32.totalorder %v11567_v35, 3  ;;  %8888 = vsinq.f32 %v2202_v39  ;;  %vm11595_vm8 = vcmp.le.f32.partialorder %v5442_v36, 0.7853982  ;;  %v5508_v54 = vsub.s32 0, %v11585_v28 }
 0x3d3   : > { %v2234_v13 = vshrl.u32 %v9287_v61, %v2233_v52  ;;  %vm2253_vm9 = vcmp.lt.s32.totalorder %v11567_v35, 4  ;;  %v5528_v26 = vsub.s32 4, %v5504_v32  ;;  %v2258_v38 = vsel %vm2250_vm5, %v2237_v24, %v2240_v27 }
 0x3d4   : > { %v2255_v63 = vsel %vm2253_vm9, %v2243_v23, 2102212464  ;;  %v2259_v47 = vsel %vm2253_vm9, %v2246_v46, 920167782  ;;  %v8197_v15 = vmin.u32 %v5508_v54, %v11585_v28  ;;  %v2262_v0 = vsel %vm2250_vm5, %v2240_v27, %v2243_v23 }
 0x3d5   : > { %v2260_v36 = vsel %vm2252_vm7, %v2243_v23, %v2259_v47  ;;  %v2263_v55 = vsel %vm2253_vm9, %v2249_v53, 1326507024  ;;  %v2208_v7 = vand.u32 3, %v2207_v45  ;;  %v2266_v52 = vshll.u32 %v2226_v44, 8  ;;  %v11634_v44 = vpop.f32.mrb[14].mxu1 }
 0x3d6   : > { %v2261_v33 = vsel %vm2251_vm6, %v2258_v38, %v2260_v36  ;;  %v2264_v42 = vsel %vm2252_vm7, %v2246_v46, %v2263_v55  ;;  %v5510_v56 = vclz %v8197_v15  ;;  %v2254_v58 = vsel %vm2250_vm5, %v2234_v13, %v2237_v24 }
 0x3d7   : > { %v2256_v29 = vsel %vm2252_vm7, %v2240_v27, %v2255_v63  ;;  %v794_v37 = vadd.f32 %v11217_v49, %v9643_v6  ;;  %v2265_v45 = vsel %vm2251_vm6, %v2262_v0, %v2264_v42  ;;  %v5549_v25 = vand.u32 2139095040, %v11588_v31 }
 0x3d8   : > { %v11621_v59 = vmul.u32.u64.low %v2266_v52, %v2261_v33  ;;  %v11622_v43 = vmul.u32.u64.high %v2266_v52, %v2261_v33, %v11621_v59  ;;  %vm2206_vm10 = vweird.f32 %v11335_v20  ;;  %v8198_v30 = vadd.s32 4294967294, %v5510_v56 }
 0x3d9   : > { %v5529_v34 = vsel %vm5444_vm4, %v5528_v26, %v5504_v32  ;;  %v11629_v17 = vmul.u32.u64.low %v2266_v52, %v2265_v45  ;;  %v11630_v48 = vmul.u32.u64.high %v2266_v52, %v2265_v45, %v11629_v17  ;;  %vm2209_vm11 = vcmp.lt.s32.totalorder %v2208_v7, 2 }
 0x3da   : > { %vm2210_vm12 = vcmp.eq.s32.totalorder %v2208_v7, 0  ;;  %v2257_v49 = vsel %vm2251_vm6, %v2254_v58, %v2256_v29  ;;  %v5550_v57 = vshrl.u32 %v5549_v25, 23  ;;  %vm2213_vm13 = vcmp.eq.s32.totalorder %v2208_v7, 2 }
 0x3db   : > { %v5498_v24 = vadd.s32 %v11528_v51, %v11541_v2  ;;  %vm8199_vm14 = vcmp.lt.s32.totalorder %v8198_v30, 0  ;;  %v5546_v4 = vand.u32 2147483647, %v11588_v31  ;;  %v8887_v21 = vpop.eup %8886  ;;  %v5531_v27 = vsel %vm11595_vm8, 0, %v5529_v34 }
 0x3dc   : > { %v5513_v32 = vsel %vm8199_vm14, 0, %v8198_v30  ;;  %v2276_v23 = vadd.s32 1, %v11622_v43  ;;  %v8200_v46 = vadd.s32 4294967169, %v5550_v57  ;;  %v8889_v35 = vpop.eup %8888  ;;  %v2214_v39 = vxor.u32 2147483648, %v8887_v21 }
 0x3dd   : > { %v5514_v53 = vsub.s32 32, %v5513_v32  ;;  %v5518_v54 = vsub.s32 4294967266, %v5513_v32  ;;  %v2273_v13 = vmul.u32 %v2266_v52, %v2257_v49  ;;  %v2211_v26 = vxor.u32 2147483648, %v8889_v35 }
 0x3de   : > { %v5515_v63 = vshll.u32 %v11585_v28, %v5513_v32  ;;  %vm2275_vm15 = vc.u32 %v11630_v48, %v11621_v59  ;;  %v5556_v51 = vadd.s32 1, %v8200_v46  ;;  %v2215_v2 = vsel %vm2213_vm13, %v2214_v39, %v8889_v35 }
 0x3df   : > { %v5516_v38 = vshrl.u32 %v5498_v24, %v5514_v53  ;;  %v5519_v47 = vadd.s32 127, %v5518_v54  ;;  %v2277_v15 = vsel %vm2275_vm15, %v2276_v23, %v11622_v43  ;;  %v2212_v36 = vsel %vm2210_vm12, %v8887_v21, %v2211_v26 }
 0x3e0   : > { %v5535_v0 = vadd.s32 3, %v5531_v27  ;;  %v2278_v55 = vadd.s32 %v2277_v15, %v2273_v13  ;;  %vm5557_vm0 = vcmp.gt.s32.totalorder %v5556_v51, 0  ;;  %v2216_v33 = vsel %vm2209_vm11, %v2212_v36, %v2215_v2 }
 0x3e1   : > { %v5517_v42 = vor.u32 %v5516_v38, %v5515_v63  ;;  %v5520_v28 = vshll.u32 %v5519_v47, 23  ;;  %v5558_v52 = vsel %vm5557_vm0, %v5556_v51, 0  ;;  %v2217_v56 = vsel %vm2206_vm10, nan, %v2216_v33 }
 0x3e2   : > { %v2279_v58 = vadd.s32 536870912, %v2278_v55  ;;  %v5553_v29 = vand.u32 8388607, %v5546_v4  ;;  %v5560_v45 = vand.u32 31, %v5558_v52  ;;  %7740 = vst [vmem:[%s10000_s14 + $0x50] sm:$0xff] %v2217_v56  ;;  %v11658_v7 = vadd.f32 %v11295_v50, %v9643_v6 }
 0x3e3   : > { %v5521_v43 = vor.u32 4788187, %v5520_v28  ;;  %v5524_v17 = vcvt.s32.f32 %v5517_v42  ;;  %v11660_v49 = vand.u32 3, %v5535_v0  ;;  %v946_v20 = vmul.f32 %v9647_v9, %v794_v37 }
 0x3e4   : > { %v11654_v25 = vshrl.u32 %v2279_v58, 30  ;;  %v5561_v30 = vsub.s32 32, %v5560_v45  ;;  %v5554_v24 = vor.u32 8388608, %v5553_v29  ;;  %v5563_v21 = vshll.u32 %v9287_v61, %v5560_v45 }
 0x3e5   : > { %v5522_v34 = vand.u32 2147483647, %v5521_v43  ;;  %v5566_v39 = vshll.u32 %v9288_v1, %v5560_v45  ;;  %v5569_v37 = vshll.u32 %v9289_v3, %v5560_v45  ;;  %v5559_v13 = vshrl.u32 %v5558_v52, 5 }
 0x3e6   : > { %v2281_v57 = vshll.u32 %v11654_v25, 30  ;;  %v5564_v32 = vshrl.u32 %v9288_v1, %v5561_v30  ;;  %v5567_v23 = vshrl.u32 %v9289_v3, %v5561_v30  ;;  %v5570_v46 = vshrl.u32 %v9290_v5, %v5561_v30 }
 0x3e7   : > { %v5525_v27 = vmul.f32 %v5524_v17, %v5522_v34  ;;  %v5573_v50 = vshrl.u32 %v9291_v10, %v5561_v30  ;;  %v5576_v53 = vshrl.u32 %v9292_v22, %v5561_v30  ;;  %v5572_v26 = vshll.u32 %v9290_v5, %v5560_v45 }
 0x3e8   : > { %v11669_v35 = vsub.s32 %v2278_v55, %v2281_v57  ;;  %v5575_v63 = vshll.u32 %v9291_v10, %v5560_v45  ;;  %v5565_v2 = vor.u32 %v5564_v32, %v5563_v21  ;;  %v5568_v38 = vor.u32 %v5567_v23, %v5566_v39 }
 0x3e9   : > { %v5526_v54 = vxor.u32 2147483648, %v5525_v27  ;;  %v5571_v47 = vor.u32 %v5570_v46, %v5569_v37  ;;  %vm2220_vm3 = vcmp.lt.s32.totalorder %v11496_v41, 0  ;;  %v2274_v36 = vadd.s32 %v11621_v59, %v11630_v48 }
 0x3ea   : > { %v2284_v51 = vsub.s32 0, %v11669_v35  ;;  %v5574_v0 = vor.u32 %v5573_v50, %v5572_v26  ;;  %v11683_v55 = vadd.f32 %v9652_v14, %v946_v20  ;;  %v5577_v28 = vor.u32 %v5576_v53, %v5575_v63 }
 0x3eb   : > { %v5527_v15 = vsel %vm5444_vm4, %v5526_v54, %v5525_v27  ;;  %v5594_v52 = vshll.u32 %v5554_v24, 8  ;;  %v2304_v56 = vsub.s32 4, %v11654_v25  ;;  %vm5578_vm1 = vcmp.lt.s32.totalorder %v5559_v13, 1 }
 0x3ec   : > { %v5530_v33 = vsel %vm11595_vm8, %v11408_v16, %v5527_v15  ;;  %v8073_v42 = vmin.u32 %v2284_v51, %v11669_v35  ;;  %vm5581_vm2 = vcmp.lt.s32.totalorder %v5559_v13, 4  ;;  %vm11692_vm4 = vcmp.le.f32.partialorder %v2218_v62, 0.7853982 }
 0x3ed   : > { %8890 = vcosq.f32 %v5530_v33  ;;  %v5583_v58 = vsel %vm5581_vm2, %v5571_v47, 2102212464  ;;  %v5586_v60 = vsel %vm5578_vm1, %v5565_v2, %v5568_v38  ;;  %v5562_v29 = vshrl.u32 %v9287_v61, %v5561_v30  ;;  %v11703_v30 = vpop.f32.mrb[15].mxu0 }
 0x3ee   : > { %8892 = vsinq.f32 %v5530_v33  ;;  %v2286_v48 = vclz %v8073_v42  ;;  %vm5580_vm5 = vcmp.lt.s32.totalorder %v5559_v13, 3  ;;  %v5587_v45 = vsel %vm5581_vm2, %v5574_v0, 920167782 }
 0x3ef   : > { %v5590_v43 = vsel %vm5578_vm1, %v5568_v38, %v5571_v47  ;;  %vm5579_vm6 = vcmp.lt.s32.totalorder %v5559_v13, 2  ;;  %v5588_v17 = vsel %vm5580_vm5, %v5571_v47, %v5587_v45  ;;  %v5591_v20 = vsel %vm5581_vm2, %v5577_v28, 1326507024 }
 0x3f0   : > { %v8074_v34 = vadd.s32 4294967294, %v2286_v48  ;;  %v5582_v57 = vsel %vm5578_vm1, %v5562_v29, %v5565_v2  ;;  %v5584_v24 = vsel %vm5580_vm5, %v5568_v38, %v5583_v58  ;;  %v5589_v21 = vsel %vm5579_vm6, %v5586_v60, %v5588_v17 }
 0x3f1   : > { %v5592_v62 = vsel %vm5580_vm5, %v5574_v0, %v5591_v20  ;;  %v11699_v27 = vmul.u32.u64.low %v5594_v52, %v5589_v21  ;;  %v11700_v23 = vmul.u32.u64.high %v5594_v52, %v5589_v21, %v11699_v27  ;;  %v2325_v37 = vand.u32 2139095040, %v11683_v55 }
 0x3f2   : > { %vm8075_vm7 = vcmp.lt.s32.totalorder %v8074_v34, 0  ;;  %v5593_v32 = vsel %vm5579_vm6, %v5590_v43, %v5592_v62  ;;  %vm5534_vm8 = vweird.f32 %v11408_v16  ;;  %v2305_v26 = vsel %vm2220_vm3, %v2304_v56, %v11654_v25 }
 0x3f3   : > { %v2289_v46 = vsel %vm8075_vm7, 0, %v8074_v34  ;;  %v11705_v50 = vmul.u32.u64.low %v5594_v52, %v5593_v32  ;;  %v11706_v39 = vmul.u32.u64.high %v5594_v52, %v5593_v32, %v11705_v50  ;;  %v5585_v63 = vsel %vm5579_vm6, %v5582_v57, %v5584_v24 }
 0x3f4   : > { %v2290_v53 = vsub.s32 32, %v2289_v46  ;;  %v2294_v54 = vsub.s32 4294967266, %v2289_v46  ;;  %vm5537_vm9 = vcmp.lt.s32.totalorder %v11660_v49, 2  ;;  %vm5541_vm10 = vcmp.eq.s32.totalorder %v11660_v49, 2 }
 0x3f5   : > { %v2322_v51 = vand.u32 2147483647, %v11683_v55  ;;  %v2326_v2 = vshrl.u32 %v2325_v37, 23  ;;  %v2291_v38 = vshll.u32 %v11669_v35, %v2289_v46  ;;  %v5604_v0 = vadd.s32 1, %v11700_v23 }
 0x3f6   : > { %v2292_v47 = vshrl.u32 %v2274_v36, %v2290_v53  ;;  %v2295_v15 = vadd.s32 127, %v2294_v54  ;;  %v2307_v42 = vsel %vm11692_vm4, 0, %v2305_v26  ;;  %v5601_v25 = vmul.u32 %v5594_v52, %v5585_v63 }
 0x3f7   : > { %v8891_v33 = vpop.eup %8890  ;;  %vm5603_vm11 = vc.u32 %v11706_v39, %v11699_v27  ;;  %v8076_v13 = vadd.s32 4294967169, %v2326_v2  ;;  %v978_v45 = vmul.f32 %v9647_v9, %v11658_v7  ;;  %vm5538_vm12 = vcmp.eq.s32.totalorder %v11660_v49, 0 }
 0x3f8   : > { %v8893_v28 = vpop.eup %8892  ;;  %v5542_v56 = vxor.u32 2147483648, %v8891_v33  ;;  %v2293_v48 = vor.u32 %v2292_v47, %v2291_v38  ;;  %v2296_v58 = vshll.u32 %v2295_v15, 23  ;;  %v5605_v60 = vsel %vm5603_vm11, %v5604_v0, %v11700_v23 }
 0x3f9   : > { %v5539_v35 = vxor.u32 2147483648, %v8893_v28  ;;  %v5606_v36 = vadd.s32 %v5605_v60, %v5601_v25  ;;  %v2332_v29 = vadd.s32 1, %v8076_v13  ;;  %v2311_v34 = vadd.s32 3, %v2307_v42 }
 0x3fa   : > { %v5543_v52 = vsel %vm5541_vm10, %v5542_v56, %v8893_v28  ;;  %v2297_v43 = vor.u32 4788187, %v2296_v58  ;;  %v2329_v57 = vand.u32 8388607, %v2322_v51  ;;  %v2300_v62 = vcvt.s32.f32 %v2293_v48 }
 0x3fb   : > { %v5540_v17 = vsel %vm5538_vm12, %v8891_v33, %v5539_v35  ;;  %v5607_v20 = vadd.s32 536870912, %v5606_v36  ;;  %vm2333_vm13 = vcmp.gt.s32.totalorder %v2332_v29, 0  ;;  %v11738_v50 = vadd.f32 %v9652_v14, %v978_v45 }
 0x3fc   : > { %v5544_v24 = vsel %vm5537_vm9, %v5540_v17, %v5543_v52  ;;  %v2298_v21 = vand.u32 2147483647, %v2297_v43  ;;  %v2334_v7 = vsel %vm2333_vm13, %v2332_v29, 0  ;;  %v11742_v49 = vand.u32 3, %v2311_v34 }
 0x3fd   : > { %v5545_v32 = vsel %vm5534_vm8, nan, %v5544_v24  ;;  %v11735_v23 = vshrl.u32 %v5607_v20, 30  ;;  %v2336_v46 = vand.u32 31, %v2334_v7  ;;  %v2330_v63 = vor.u32 8388608, %v2329_v57 }
 0x3fe   : > { %7772 = vst [vmem:[%s10000_s14 + $0x150] sm:$0xff] %v5545_v32  ;;  %v2301_v37 = vmul.f32 %v2300_v62, %v2298_v21  ;;  %v11746_v2 = vadd.f32 %v11364_v11, %v9645_v8  ;;  %v2335_v38 = vshrl.u32 %v2334_v7, 5  ;;  %v5653_v15 = vand.u32 2139095040, %v11738_v50  ;;  %v11775_v32 = vpop.f32.mrb[15].mxu1 }
 0x3ff   : > { %v5609_v53 = vshll.u32 %v11735_v23, 30  ;;  %v2337_v54 = vsub.s32 32, %v2336_v46  ;;  %v2339_v33 = vshll.u32 %v9287_v61, %v2336_v46  ;;  %v2342_v28 = vshll.u32 %v9288_v1, %v2336_v46 }
 0x400   : > { %v2302_v26 = vxor.u32 2147483648, %v2301_v37  ;;  %v2345_v56 = vshll.u32 %v9289_v3, %v2336_v46  ;;  %v2348_v58 = vshll.u32 %v9290_v5, %v2336_v46  ;;  %v2351_v59 = vshll.u32 %v9291_v10, %v2336_v46 }
 0x401   : > { %v11748_v16 = vsub.s32 %v5606_v36, %v5609_v53  ;;  %v2340_v47 = vshrl.u32 %v9288_v1, %v2337_v54  ;;  %v2343_v42 = vshrl.u32 %v9289_v3, %v2337_v54  ;;  %v2346_v25 = vshrl.u32 %v9290_v5, %v2337_v54 }
 0x402   : > { %v2303_v0 = vsel %vm2220_vm3, %v2302_v26, %v2301_v37  ;;  %v2349_v60 = vshrl.u32 %v9291_v10, %v2337_v54  ;;  %v2352_v52 = vshrl.u32 %v9292_v22, %v2337_v54  ;;  %v11768_v43 = vshll.u32 %v2330_v63, 8 }
 0x403   : > { %v2306_v11 = vsel %vm11692_vm4, %v11496_v41, %v2303_v0  ;;  %v5612_v13 = vsub.s32 0, %v11748_v16  ;;  %v2341_v48 = vor.u32 %v2340_v47, %v2339_v33  ;;  %v2344_v36 = vor.u32 %v2343_v42, %v2342_v28 }
 0x404   : > { %8894 = vcosq.f32 %v2306_v11  ;;  %v2347_v29 = vor.u32 %v2346_v25, %v2345_v56  ;;  %v2350_v45 = vor.u32 %v2349_v60, %v2348_v58  ;;  %v2338_v17 = vshrl.u32 %v9287_v61, %v2337_v54 }
 0x405   : > { %8896 = vsinq.f32 %v2306_v11  ;;  %v8201_v35 = vmin.u32 %v5612_v13, %v11748_v16  ;;  %vm2354_vm14 = vcmp.lt.s32.totalorder %v2335_v38, 1  ;;  %v5654_v20 = vshrl.u32 %v5653_v15, 23 }
 0x406   : > { %vm2317_vm15 = vcmp.eq.s32.totalorder %v11742_v49, 2  ;;  %vm5548_vm0 = vcmp.lt.s32.totalorder %v11588_v31, 0  ;;  %v2353_v57 = vor.u32 %v2352_v52, %v2351_v59  ;;  %vm2355_vm3 = vcmp.lt.s32.totalorder %v2335_v38, 2 }
 0x407   : > { %v5614_v34 = vclz %v8201_v35  ;;  %vm2356_vm1 = vcmp.lt.s32.totalorder %v2335_v38, 3  ;;  %vm2357_vm2 = vcmp.lt.s32.totalorder %v2335_v38, 4  ;;  %vm2314_vm4 = vcmp.eq.s32.totalorder %v11742_v49, 0 }
 0x408   : > { %v2359_v21 = vsel %vm2357_vm2, %v2347_v29, 2102212464  ;;  %v2362_v62 = vsel %vm2354_vm14, %v2341_v48, %v2344_v36  ;;  %v2363_v7 = vsel %vm2357_vm2, %v2350_v45, 920167782  ;;  %vm2313_vm5 = vcmp.lt.s32.totalorder %v11742_v49, 2 }
 0x409   : > { %v8202_v24 = vadd.s32 4294967294, %v5614_v34  ;;  %v2358_v46 = vsel %vm2354_vm14, %v2338_v17, %v2341_v48  ;;  %v2364_v37 = vsel %vm2356_vm1, %v2347_v29, %v2363_v7  ;;  %v2366_v53 = vsel %vm2354_vm14, %v2344_v36, %v2347_v29 }
 0x40a   : > { %v2367_v54 = vsel %vm2357_vm2, %v2353_v57, 1326507024  ;;  %vm2310_vm6 = vweird.f32 %v11496_v41  ;;  %vm11784_vm7 = vcmp.le.f32.partialorder %v5546_v4, 0.7853982  ;;  %v2360_v63 = vsel %vm2356_vm1, %v2344_v36, %v2359_v21 }
 0x40b   : > { %vm8203_vm8 = vcmp.lt.s32.totalorder %v8202_v24, 0  ;;  %v2365_v47 = vsel %vm2355_vm3, %v2362_v62, %v2364_v37  ;;  %v2368_v15 = vsel %vm2356_vm1, %v2350_v45, %v2367_v54  ;;  %v5602_v4 = vadd.s32 %v11699_v27, %v11706_v39 }
 0x40c   : > { %v5617_v0 = vsel %vm8203_vm8, 0, %v8202_v24  ;;  %v2369_v33 = vsel %vm2355_vm3, %v2366_v53, %v2368_v15  ;;  %v11793_v42 = vmul.u32.u64.low %v11768_v43, %v2365_v47  ;;  %v11794_v25 = vmul.u32.u64.high %v11768_v43, %v2365_v47, %v11793_v42 }
 0x40d   : > { %v5618_v11 = vsub.s32 32, %v5617_v0  ;;  %v5622_v13 = vsub.s32 4294967266, %v5617_v0  ;;  %v5632_v28 = vsub.s32 4, %v11735_v23  ;;  %v2361_v48 = vsel %vm2355_vm3, %v2358_v46, %v2360_v63 }
 0x40e   : > { %v8895_v56 = vpop.eup %8894  ;;  %v11802_v58 = vmul.u32.u64.low %v11768_v43, %v2369_v33  ;;  %v11803_v60 = vmul.u32.u64.high %v11768_v43, %v2369_v33, %v11802_v58  ;;  %v8204_v35 = vadd.s32 4294967169, %v5654_v20  ;;  %v5619_v45 = vshll.u32 %v11748_v16, %v5617_v0 }
 0x40f   : > { %v8897_v36 = vpop.eup %8896  ;;  %v2318_v29 = vxor.u32 2147483648, %v8895_v56  ;;  %v5620_v59 = vshrl.u32 %v5602_v4, %v5618_v11  ;;  %v5623_v52 = vadd.s32 127, %v5622_v13  ;;  %v2380_v27 = vadd.s32 1, %v11794_v25 }
 0x410   : > { %v2315_v34 = vxor.u32 2147483648, %v8897_v36  ;;  %v5650_v39 = vand.u32 2147483647, %v11738_v50  ;;  %v5660_v17 = vadd.s32 1, %v8204_v35  ;;  %v5633_v20 = vsel %vm5548_vm0, %v5632_v28, %v11735_v23 }
 0x411   : > { %v2319_v38 = vsel %vm2317_vm15, %v2318_v29, %v8897_v36  ;;  %v5621_v57 = vor.u32 %v5620_v59, %v5619_v45  ;;  %v5624_v24 = vshll.u32 %v5623_v52, 23  ;;  %v2377_v21 = vmul.u32 %v11768_v43, %v2361_v48 }
 0x412   : > { %v2316_v16 = vsel %vm2314_vm4, %v8895_v56, %v2315_v34  ;;  %vm2379_vm9 = vc.u32 %v11803_v60, %v11793_v42  ;;  %vm5661_vm10 = vcmp.gt.s32.totalorder %v5660_v17, 0  ;;  %v947_v37 = vmul.f32 %v9649_v12, %v11746_v2 }
 0x413   : > { %v2320_v62 = vsel %vm2313_vm5, %v2316_v16, %v2319_v38  ;;  %v5625_v7 = vor.u32 4788187, %v5624_v24  ;;  %v2381_v46 = vsel %vm2379_vm9, %v2380_v27, %v11794_v25  ;;  %v5635_v53 = vsel %vm11784_vm7, 0, %v5633_v20 }
 0x414   : > { %v2321_v23 = vsel %vm2310_vm6, nan, %v2320_v62  ;;  %v2382_v43 = vadd.s32 %v2381_v46, %v2377_v21  ;;  %v5662_v54 = vsel %vm5661_vm10, %v5660_v17, 0  ;;  %v5628_v47 = vcvt.s32.f32 %v5621_v57 }
 0x415   : > { %7741 = vst [vmem:[%s10000_s14 + $0x58] sm:$0xff] %v2321_v23  ;;  %v5626_v63 = vand.u32 2147483647, %v5625_v7  ;;  %v5664_v15 = vand.u32 31, %v5662_v54  ;;  %v5657_v0 = vand.u32 8388607, %v5650_v39  ;;  %v11832_v33 = vadd.f32 %v11439_v40, %v9645_v8 }
 0x416   : > { %v2383_v49 = vadd.s32 536870912, %v2382_v43  ;;  %v5639_v41 = vadd.s32 3, %v5635_v53  ;;  %v11835_v4 = vadd.f32 %v9656_v19, %v947_v37  ;;  %v5663_v13 = vshrl.u32 %v5662_v54, 5 }
 0x417   : > { %v5629_v2 = vmul.f32 %v5628_v47, %v5626_v63  ;;  %v5665_v25 = vsub.s32 32, %v5664_v15  ;;  %v5667_v28 = vshll.u32 %v9287_v61, %v5664_v15  ;;  %v5670_v56 = vshll.u32 %v9288_v1, %v5664_v15 }
 0x418   : > { %v2384_v11 = vshrl.u32 %v2383_v49, 30  ;;  %vm2324_vm11 = vcmp.lt.s32.totalorder %v11683_v55, 0  ;;  %v5673_v35 = vshll.u32 %v9289_v3, %v5664_v15  ;;  %v5676_v45 = vshll.u32 %v9290_v5, %v5664_v15 }
 0x419   : > { %v5630_v48 = vxor.u32 2147483648, %v5629_v2  ;;  %v5668_v58 = vshrl.u32 %v9288_v1, %v5665_v25  ;;  %v5671_v40 = vshrl.u32 %v9289_v3, %v5665_v25  ;;  %v5674_v29 = vshrl.u32 %v9290_v5, %v5665_v25 }
 0x41a   : > { %v2385_v36 = vshll.u32 %v2384_v11, 30  ;;  %v5677_v59 = vshrl.u32 %v9291_v10, %v5665_v25  ;;  %v5679_v27 = vshll.u32 %v9291_v10, %v5664_v15  ;;  %v5680_v17 = vshrl.u32 %v9292_v22, %v5665_v25 }
 0x41b   : > { %v5631_v52 = vsel %vm5548_vm0, %v5630_v48, %v5629_v2  ;;  %v5669_v34 = vor.u32 %v5668_v58, %v5667_v28  ;;  %v5672_v24 = vor.u32 %v5671_v40, %v5670_v56  ;;  %v5675_v20 = vor.u32 %v5674_v29, %v5673_v35 }
 0x41c   : > { %v5634_v38 = vsel %vm11784_vm7, %v11588_v31, %v5631_v52  ;;  %v11853_v57 = vsub.s32 %v2382_v43, %v2385_v36  ;;  %v5658_v16 = vor.u32 8388608, %v5657_v0  ;;  %v5678_v21 = vor.u32 %v5677_v59, %v5676_v45 }
 0x41d   : > { %8898 = vcosq.f32 %v5634_v38  ;;  %v5681_v62 = vor.u32 %v5680_v17, %v5679_v27  ;;  %vm11857_vm12 = vcmp.le.f32.partialorder %v2322_v51, 0.7853982  ;;  %v2408_v37 = vsub.s32 4, %v2384_v11 }
 0x41e   : > { %8900 = vsinq.f32 %v5634_v38  ;;  %v2388_v46 = vsub.s32 0, %v11853_v57  ;;  %v5666_v26 = vshrl.u32 %v9287_v61, %v5665_v25  ;;  %vm5682_vm13 = vcmp.lt.s32.totalorder %v5663_v13, 1 }
 0x41f   : > { %vm5684_vm14 = vcmp.lt.s32.totalorder %v5663_v13, 3  ;;  %vm5685_vm15 = vcmp.lt.s32.totalorder %v5663_v13, 4  ;;  %v2429_v23 = vand.u32 2139095040, %v11835_v4  ;;  %v5690_v63 = vsel %vm5682_vm13, %v5669_v34, %v5672_v24 }
 0x420   : > { %v8077_v53 = vmin.u32 %v2388_v46, %v11853_v57  ;;  %v5686_v43 = vsel %vm5682_vm13, %v5666_v26, %v5669_v34  ;;  %v5687_v54 = vsel %vm5685_vm15, %v5675_v20, 2102212464  ;;  %v5691_v47 = vsel %vm5685_vm15, %v5678_v21, 920167782 }
 0x421   : > { %v5688_v51 = vsel %vm5684_vm14, %v5672_v24, %v5687_v54  ;;  %v5694_v15 = vsel %vm5682_vm13, %v5672_v24, %v5675_v20  ;;  %v5695_v49 = vsel %vm5685_vm15, %v5681_v62, 1326507024  ;;  %v5640_v0 = vand.u32 3, %v5639_v41 }
 0x422   : > { %v2390_v2 = vclz %v8077_v53  ;;  %v2409_v25 = vsel %vm2324_vm11, %v2408_v37, %v2384_v11  ;;  %v5698_v28 = vshll.u32 %v5658_v16, 8  ;;  %vm5683_vm0 = vcmp.lt.s32.totalorder %v5663_v13, 2 }
 0x423   : > { %v5692_v56 = vsel %vm5684_vm14, %v5675_v20, %v5691_v47  ;;  %v5696_v48 = vsel %vm5684_vm14, %v5678_v21, %v5695_v49  ;;  %v2430_v58 = vshrl.u32 %v2429_v23, 23  ;;  %v5689_v35 = vsel %vm5683_vm0, %v5686_v43, %v5688_v51 }
 0x424   : > { %v8078_v40 = vadd.s32 4294967294, %v2390_v2  ;;  %v5693_v36 = vsel %vm5683_vm0, %v5690_v63, %v5692_v56  ;;  %v5697_v29 = vsel %vm5683_vm0, %v5694_v15, %v5696_v48  ;;  %vm5642_vm3 = vcmp.eq.s32.totalorder %v5640_v0, 0  ;;  %v11890_v63 = vpop.f32.mrb[16].mxu0 }
 0x425   : > { %v11870_v45 = vmul.u32.u64.low %v5698_v28, %v5697_v29  ;;  %v11871_v59 = vmul.u32.u64.high %v5698_v28, %v5697_v29, %v11870_v45  ;;  %v11873_v52 = vmul.u32.u64.low %v5698_v28, %v5693_v36  ;;  %v11874_v41 = vmul.u32.u64.high %v5698_v28, %v5693_v36, %v11873_v52 }
 0x426   : > { %vm5645_vm1 = vcmp.eq.s32.totalorder %v5640_v0, 2  ;;  %vm8079_vm2 = vcmp.lt.s32.totalorder %v8078_v40, 0  ;;  %v8080_v11 = vadd.s32 4294967169, %v2430_v58  ;;  %v2378_v13 = vadd.s32 %v11793_v42, %v11803_v60 }
 0x427   : > { %v8899_v34 = vpop.eup %8898  ;;  %v2393_v27 = vsel %vm8079_vm2, 0, %v8078_v40  ;;  %v2411_v17 = vsel %vm11857_vm12, 0, %v2409_v25  ;;  %v2426_v38 = vand.u32 2147483647, %v11835_v4  ;;  %v5705_v62 = vmul.u32 %v5698_v28, %v5689_v35 }
 0x428   : > { %v8901_v24 = vpop.eup %8900  ;;  %v5646_v20 = vxor.u32 2147483648, %v8899_v34  ;;  %v2394_v16 = vsub.s32 32, %v2393_v27  ;;  %v2398_v21 = vsub.s32 4294967266, %v2393_v27  ;;  %v2395_v37 = vshll.u32 %v11853_v57, %v2393_v27 }
 0x429   : > { %v5643_v46 = vxor.u32 2147483648, %v8901_v24  ;;  %vm5707_vm4 = vc.u32 %v11871_v59, %v11873_v52  ;;  %v5708_v26 = vadd.s32 1, %v11874_v41  ;;  %v2436_v53 = vadd.s32 1, %v8080_v11 }
 0x42a   : > { %v5647_v42 = vsel %vm5645_vm1, %v5646_v20, %v8901_v24  ;;  %v2396_v60 = vshrl.u32 %v2378_v13, %v2394_v16  ;;  %v2399_v23 = vadd.s32 127, %v2398_v21  ;;  %vm5638_vm5 = vweird.f32 %v11588_v31 }
 0x42b   : > { %vm5641_vm6 = vcmp.lt.s32.totalorder %v5640_v0, 2  ;;  %v5644_v43 = vsel %vm5642_vm3, %v8899_v34, %v5643_v46  ;;  %v5709_v54 = vsel %vm5707_vm4, %v5708_v26, %v11874_v41  ;;  %v2415_v2 = vadd.s32 3, %v2411_v17 }
 0x42c   : > { %v5648_v57 = vsel %vm5641_vm6, %v5644_v43, %v5647_v42  ;;  %v2397_v51 = vor.u32 %v2396_v60, %v2395_v37  ;;  %v2400_v47 = vshll.u32 %v2399_v23, 23  ;;  %v5710_v15 = vadd.s32 %v5709_v54, %v5705_v62 }
 0x42d   : > { %v5649_v49 = vsel %vm5638_vm5, nan, %v5648_v57  ;;  %v2433_v25 = vand.u32 8388607, %v2426_v38  ;;  %vm2437_vm7 = vcmp.gt.s32.totalorder %v2436_v53, 0  ;;  %v979_v0 = vmul.f32 %v9649_v12, %v11832_v33 }
 0x42e   : > { %7773 = vst [vmem:[%s10000_s14 + $0x158] sm:$0xff] %v5649_v49  ;;  %v2401_v28 = vor.u32 4788187, %v2400_v47  ;;  %v5711_v31 = vadd.s32 536870912, %v5710_v15  ;;  %v2438_v56 = vsel %vm2437_vm7, %v2436_v53, 0  ;;  %v2404_v40 = vcvt.s32.f32 %v2397_v51 }
 0x42f   : > { %v2440_v48 = vand.u32 31, %v2438_v56  ;;  %v11897_v36 = vand.u32 3, %v2415_v2  ;;  %vm5652_vm8 = vcmp.lt.s32.totalorder %v11738_v50, 0  ;;  %v2434_v29 = vor.u32 8388608, %v2433_v25 }
 0x430   : > { %v2402_v58 = vand.u32 2147483647, %v2401_v28  ;;  %v5712_v35 = vshrl.u32 %v5711_v31, 30  ;;  %v11902_v13 = vadd.f32 %v9656_v19, %v979_v0  ;;  %v2439_v37 = vshrl.u32 %v2438_v56, 5 }
 0x431   : > { %v2441_v45 = vsub.s32 32, %v2440_v48  ;;  %v2443_v34 = vshll.u32 %v9287_v61, %v2440_v48  ;;  %v2446_v33 = vshll.u32 %v9288_v1, %v2440_v48  ;;  %v2449_v21 = vshll.u32 %v9289_v3, %v2440_v48 }
 0x432   : > { %v2405_v41 = vmul.f32 %v2404_v40, %v2402_v58  ;;  %v5713_v11 = vshll.u32 %v5712_v35, 30  ;;  %v5736_v46 = vsub.s32 4, %v5712_v35  ;;  %v2452_v42 = vshll.u32 %v9290_v5, %v2440_v48 }
 0x433   : > { %v2444_v27 = vshrl.u32 %v9288_v1, %v2441_v45  ;;  %v2447_v17 = vshrl.u32 %v9289_v3, %v2441_v45  ;;  %v2450_v24 = vshrl.u32 %v9290_v5, %v2441_v45  ;;  %v2453_v62 = vshrl.u32 %v9291_v10, %v2441_v45 }
 0x434   : > { %v2406_v20 = vxor.u32 2147483648, %v2405_v41  ;;  %v11908_v16 = vsub.s32 %v5710_v15, %v5713_v11  ;;  %vm11921_vm9 = vcmp.le.f32.partialorder %v5650_v39, 0.7853982  ;;  %v2455_v47 = vshll.u32 %v9291_v10, %v2440_v48 }
 0x435   : > { %v2445_v26 = vor.u32 %v2444_v27, %v2443_v34  ;;  %v2448_v53 = vor.u32 %v2447_v17, %v2446_v33  ;;  %v2451_v43 = vor.u32 %v2450_v24, %v2449_v21  ;;  %v2454_v51 = vor.u32 %v2453_v62, %v2452_v42  ;;  %v11939_v27 = vpop.f32.mrb[16].mxu1 }
 0x436   : > { %v2407_v60 = vsel %vm2324_vm11, %v2406_v20, %v2405_v41  ;;  %v5716_v23 = vsub.s32 0, %v11908_v16  ;;  %v2456_v15 = vshrl.u32 %v9292_v22, %v2441_v45  ;;  %v11928_v2 = vshll.u32 %v2434_v29, 8 }
 0x437   : > { %v2410_v54 = vsel %vm11857_vm12, %v11683_v55, %v2407_v60  ;;  %v5757_v25 = vand.u32 2139095040, %v11902_v13  ;;  %v5737_v7 = vsel %vm5652_vm8, %v5736_v46, %v5712_v35  ;;  %v2442_v39 = vshrl.u32 %v9287_v61, %v2441_v45 }
 0x438   : > { %8902 = vcosq.f32 %v2410_v54  ;;  %v8205_v49 = vmin.u32 %v5716_v23, %v11908_v16  ;;  %v2457_v28 = vor.u32 %v2456_v15, %v2455_v47  ;;  %vm2458_vm10 = vcmp.lt.s32.totalorder %v2439_v37, 1 }
 0x439   : > { %8904 = vsinq.f32 %v2410_v54  ;;  %vm2459_vm11 = vcmp.lt.s32.totalorder %v2439_v37, 2  ;;  %vm2461_vm12 = vcmp.lt.s32.totalorder %v2439_v37, 4  ;;  %vm2460_vm13 = vcmp.lt.s32.totalorder %v2439_v37, 3 }
 0x43a   : > { %v5718_v31 = vclz %v8205_v49  ;;  %v2463_v56 = vsel %vm2461_vm12, %v2451_v43, 2102212464  ;;  %v2466_v0 = vsel %vm2458_vm10, %v2445_v26, %v2448_v53  ;;  %v2467_v48 = vsel %vm2461_vm12, %v2454_v51, 920167782 }
 0x43b   : > { %vm2421_vm14 = vcmp.eq.s32.totalorder %v11897_v36, 2  ;;  %v2462_v40 = vsel %vm2458_vm10, %v2442_v39, %v2445_v26  ;;  %v2468_v29 = vsel %vm2460_vm13, %v2451_v43, %v2467_v48  ;;  %v2470_v41 = vsel %vm2458_vm10, %v2448_v53, %v2451_v43 }
 0x43c   : > { %v8206_v58 = vadd.s32 4294967294, %v5718_v31  ;;  %vm2418_vm15 = vcmp.eq.s32.totalorder %v11897_v36, 0  ;;  %v2464_v35 = vsel %vm2460_vm13, %v2448_v53, %v2463_v56  ;;  %v2469_v45 = vsel %vm2459_vm11, %v2466_v0, %v2468_v29 }
 0x43d   : > { %v2471_v11 = vsel %vm2461_vm12, %v2457_v28, 1326507024  ;;  %v5758_v34 = vshrl.u32 %v5757_v25, 23  ;;  %v11943_v17 = vmul.u32.u64.low %v11928_v2, %v2469_v45  ;;  %v11944_v24 = vmul.u32.u64.high %v11928_v2, %v2469_v45, %v11943_v17 }
 0x43e   : > { %vm8207_vm0 = vcmp.lt.s32.totalorder %v8206_v58, 0  ;;  %v2472_v33 = vsel %vm2460_vm13, %v2454_v51, %v2471_v11  ;;  %vm2414_vm3 = vweird.f32 %v11683_v55  ;;  %v5754_v62 = vand.u32 2147483647, %v11902_v13 }
 0x43f   : > { %v5721_v20 = vsel %vm8207_vm0, 0, %v8206_v58  ;;  %v2473_v21 = vsel %vm2459_vm11, %v2470_v41, %v2472_v33  ;;  %v8208_v46 = vadd.s32 4294967169, %v5758_v34  ;;  %v5706_v26 = vadd.s32 %v11873_v52, %v11871_v59 }
 0x440   : > { %v5722_v42 = vsub.s32 32, %v5721_v20  ;;  %v5726_v60 = vsub.s32 4294967266, %v5721_v20  ;;  %v5739_v23 = vsel %vm11921_vm9, 0, %v5737_v7  ;;  %v2465_v53 = vsel %vm2459_vm11, %v2462_v40, %v2464_v35 }
 0x441   : > { %v11956_v43 = vmul.u32.u64.low %v11928_v2, %v2473_v21  ;;  %v11957_v54 = vmul.u32.u64.high %v11928_v2, %v2473_v21, %v11956_v43  ;;  %v5764_v51 = vadd.s32 1, %v8208_v46  ;;  %v5723_v15 = vshll.u32 %v11908_v16, %v5721_v20 }
 0x442   : > { %v8903_v47 = vpop.eup %8902  ;;  %v5724_v49 = vshrl.u32 %v5706_v26, %v5722_v42  ;;  %v5727_v25 = vadd.s32 127, %v5726_v60  ;;  %v2484_v39 = vadd.s32 1, %v11944_v24  ;;  %v5743_v28 = vadd.s32 3, %v5739_v23 }
 0x443   : > { %v8905_v59 = vpop.eup %8904  ;;  %v2422_v52 = vxor.u32 2147483648, %v8903_v47  ;;  %v5761_v7 = vand.u32 8388607, %v5754_v62  ;;  %vm5765_vm1 = vcmp.gt.s32.totalorder %v5764_v51, 0  ;;  %v2481_v16 = vmul.u32 %v11928_v2, %v2465_v53 }
 0x444   : > { %v2419_v37 = vxor.u32 2147483648, %v8905_v59  ;;  %v5725_v31 = vor.u32 %v5724_v49, %v5723_v15  ;;  %v5728_v56 = vshll.u32 %v5727_v25, 23  ;;  %v5766_v0 = vsel %vm5765_vm1, %v5764_v51, 0 }
 0x445   : > { %v2423_v48 = vsel %vm2421_vm14, %v2422_v52, %v8905_v59  ;;  %vm2483_vm2 = vc.u32 %v11957_v54, %v11943_v17  ;;  %v798_v58 = vadd.f32 %v11514_v18, %v9643_v6  ;;  %vm2417_vm4 = vcmp.lt.s32.totalorder %v11897_v36, 2 }
 0x446   : > { %v2420_v40 = vsel %vm2418_vm15, %v8903_v47, %v2419_v37  ;;  %v5729_v29 = vor.u32 4788187, %v5728_v56  ;;  %v2485_v41 = vsel %vm2483_vm2, %v2484_v39, %v11944_v24  ;;  %v11974_v45 = vand.u32 3, %v5743_v28 }
 0x447   : > { %v2424_v35 = vsel %vm2417_vm4, %v2420_v40, %v2423_v48  ;;  %v2486_v11 = vadd.s32 %v2485_v41, %v2481_v16  ;;  %v5768_v34 = vand.u32 31, %v5766_v0  ;;  %v5732_v20 = vcvt.s32.f32 %v5725_v31 }
 0x448   : > { %v2425_v2 = vsel %vm2414_vm3, nan, %v2424_v35  ;;  %v5730_v33 = vand.u32 2147483647, %v5729_v29  ;;  %v5762_v21 = vor.u32 8388608, %v5761_v7  ;;  %v5767_v46 = vshrl.u32 %v5766_v0, 5 }
 0x449   : > { %7742 = vst [vmem:[%s10000_s14 + $0x60] sm:$0xff] %v2425_v2  ;;  %v2487_v18 = vadd.s32 536870912, %v2486_v11  ;;  %v5769_v26 = vsub.s32 32, %v5768_v34  ;;  %v948_v36 = vmul.f32 %v9647_v9, %v798_v58  ;;  %v5771_v24 = vshll.u32 %v9287_v61, %v5768_v34 }
 0x44a   : > { %v5733_v42 = vmul.f32 %v5732_v20, %v5730_v33  ;;  %v5774_v60 = vshll.u32 %v9288_v1, %v5768_v34  ;;  %v5777_v23 = vshll.u32 %v9289_v3, %v5768_v34  ;;  %v5780_v51 = vshll.u32 %v9290_v5, %v5768_v34 }
 0x44b   : > { %v2488_v53 = vshrl.u32 %v2487_v18, 30  ;;  %v5772_v55 = vshrl.u32 %v9288_v1, %v5769_v26  ;;  %v5775_v43 = vshrl.u32 %v9289_v3, %v5769_v26  ;;  %v5778_v15 = vshrl.u32 %v9290_v5, %v5769_v26 }
 0x44c   : > { %v5734_v47 = vxor.u32 2147483648, %v5733_v42  ;;  %v5781_v49 = vshrl.u32 %v9291_v10, %v5769_v26  ;;  %v5784_v25 = vshrl.u32 %v9292_v22, %v5769_v26  ;;  %v5783_v52 = vshll.u32 %v9291_v10, %v5768_v34 }
 0x44d   : > { %v2489_v39 = vshll.u32 %v2488_v53, 30  ;;  %v5773_v59 = vor.u32 %v5772_v55, %v5771_v24  ;;  %v11990_v28 = vshll.u32 %v5762_v21, 8  ;;  %v5776_v37 = vor.u32 %v5775_v43, %v5774_v60 }
 0x44e   : > { %v5735_v7 = vsel %vm5652_vm8, %v5734_v47, %v5733_v42  ;;  %v5779_v31 = vor.u32 %v5778_v15, %v5777_v23  ;;  %v5782_v56 = vor.u32 %v5781_v49, %v5780_v51  ;;  %v5785_v16 = vor.u32 %v5784_v25, %v5783_v52 }
 0x44f   : > { %v5738_v0 = vsel %vm11921_vm9, %v11738_v50, %v5735_v7  ;;  %v11997_v48 = vsub.s32 %v2486_v11, %v2489_v39  ;;  %v12000_v58 = vadd.f32 %v9652_v14, %v948_v36  ;;  %vm5786_vm5 = vcmp.lt.s32.totalorder %v5767_v46, 1  ;;  %v12031_v39 = vpop.f32.mrb[17].mxu0 }
 0x450   : > { %8906 = vcosq.f32 %v5738_v0  ;;  %vm5787_vm6 = vcmp.lt.s32.totalorder %v5767_v46, 2  ;;  %vm5789_vm7 = vcmp.lt.s32.totalorder %v5767_v46, 4  ;;  %vm5788_vm8 = vcmp.lt.s32.totalorder %v5767_v46, 3 }
 0x451   : > { %8908 = vsinq.f32 %v5738_v0  ;;  %v2492_v40 = vsub.s32 0, %v11997_v48  ;;  %v5791_v29 = vsel %vm5789_vm7, %v5779_v31, 2102212464  ;;  %v2512_v41 = vsub.s32 4, %v2488_v53 }
 0x452   : > { %v5770_v35 = vshrl.u32 %v9287_v61, %v5769_v26  ;;  %v5794_v57 = vsel %vm5786_vm5, %v5773_v59, %v5776_v37  ;;  %v5795_v34 = vsel %vm5789_vm7, %v5782_v56, 920167782  ;;  %v5798_v33 = vsel %vm5786_vm5, %v5776_v37, %v5779_v31 }
 0x453   : > { %v8081_v11 = vmin.u32 %v2492_v40, %v11997_v48  ;;  %v5796_v2 = vsel %vm5788_vm8, %v5779_v31, %v5795_v34  ;;  %v5799_v20 = vsel %vm5789_vm7, %v5785_v16, 1326507024  ;;  %v5792_v18 = vsel %vm5788_vm8, %v5776_v37, %v5791_v29 }
 0x454   : > { %v5790_v21 = vsel %vm5786_vm5, %v5770_v35, %v5773_v59  ;;  %v5797_v36 = vsel %vm5787_vm6, %v5794_v57, %v5796_v2  ;;  %v5800_v42 = vsel %vm5788_vm8, %v5782_v56, %v5799_v20  ;;  %vm2428_vm9 = vcmp.lt.s32.totalorder %v11835_v4, 0 }
 0x455   : > { %v2494_v24 = vclz %v8081_v11  ;;  %v2513_v60 = vsel %vm2428_vm9, %v2512_v41, %v2488_v53  ;;  %v5801_v26 = vsel %vm5787_vm6, %v5798_v33, %v5800_v42  ;;  %vm5742_vm10 = vweird.f32 %v11738_v50 }
 0x456   : > { %v12011_v23 = vmul.u32.u64.low %v11990_v28, %v5797_v36  ;;  %v12012_v55 = vmul.u32.u64.high %v11990_v28, %v5797_v36, %v12011_v23  ;;  %v5793_v51 = vsel %vm5787_vm6, %v5790_v21, %v5792_v18  ;;  %vm5746_vm11 = vcmp.eq.s32.totalorder %v11974_v45, 0 }
 0x457   : > { %v8082_v43 = vadd.s32 4294967294, %v2494_v24  ;;  %v12018_v47 = vmul.u32.u64.low %v11990_v28, %v5801_v26  ;;  %v12019_v15 = vmul.u32.u64.high %v11990_v28, %v5801_v26, %v12018_v47  ;;  %vm12024_vm12 = vcmp.le.f32.partialorder %v2426_v38, 0.7853982 }
 0x458   : > { %v2533_v49 = vand.u32 2139095040, %v12000_v58  ;;  %v878_v25 = vadd.f32 %v11634_v44, %v9643_v6  ;;  %vm5749_vm13 = vcmp.eq.s32.totalorder %v11974_v45, 2  ;;  %v2482_v46 = vadd.s32 %v11943_v17, %v11957_v54 }
 0x459   : > { %vm8083_vm14 = vcmp.lt.s32.totalorder %v8082_v43, 0  ;;  %v2515_v59 = vsel %vm12024_vm12, 0, %v2513_v60  ;;  %v5809_v7 = vmul.u32 %v11990_v28, %v5793_v51  ;;  %v5812_v37 = vadd.s32 1, %v12012_v55 }
 0x45a   : > { %v8907_v38 = vpop.eup %8906  ;;  %v2497_v52 = vsel %vm8083_vm14, 0, %v8082_v43  ;;  %v2534_v31 = vshrl.u32 %v2533_v49, 23  ;;  %v2530_v40 = vand.u32 2147483647, %v12000_v58  ;;  %vm5811_vm15 = vc.u32 %v12019_v15, %v12011_v23 }
 0x45b   : > { %v8909_v56 = vpop.eup %8908  ;;  %v5750_v44 = vxor.u32 2147483648, %v8907_v38  ;;  %v2498_v0 = vsub.s32 32, %v2497_v52  ;;  %v2502_v16 = vsub.s32 4294967266, %v2497_v52  ;;  %v2499_v17 = vshll.u32 %v11997_v48, %v2497_v52 }
 0x45c   : > { %v5747_v29 = vxor.u32 2147483648, %v8909_v56  ;;  %v8084_v54 = vadd.s32 4294967169, %v2534_v31  ;;  %v5813_v57 = vsel %vm5811_vm15, %v5812_v37, %v12012_v55  ;;  %vm5745_vm0 = vcmp.lt.s32.totalorder %v11974_v45, 2 }
 0x45d   : > { %v5751_v41 = vsel %vm5749_vm13, %v5750_v44, %v8909_v56  ;;  %v2500_v28 = vshrl.u32 %v2482_v46, %v2498_v0  ;;  %v2503_v35 = vadd.s32 127, %v2502_v16  ;;  %v5814_v11 = vadd.s32 %v5813_v57, %v5809_v7 }
 0x45e   : > { %v5748_v34 = vsel %vm5746_vm11, %v8907_v38, %v5747_v29  ;;  %v2540_v2 = vadd.s32 1, %v8084_v54  ;;  %v800_v21 = vadd.f32 %v11703_v30, %v9645_v8  ;;  %v2519_v36 = vadd.s32 3, %v2515_v59 }
 0x45f   : > { %v5752_v48 = vsel %vm5745_vm0, %v5748_v34, %v5751_v41  ;;  %v2501_v33 = vor.u32 %v2500_v28, %v2499_v17  ;;  %v2504_v20 = vshll.u32 %v2503_v35, 23  ;;  %v5815_v42 = vadd.s32 536870912, %v5814_v11 }
 0x460   : > { %v5753_v18 = vsel %vm5742_vm10, nan, %v5752_v48  ;;  %vm2541_vm3 = vcmp.gt.s32.totalorder %v2540_v2, 0  ;;  %v2537_v45 = vand.u32 8388607, %v2530_v40  ;;  %v980_v26 = vmul.f32 %v9647_v9, %v878_v25 }
 0x461   : > { %7774 = vst [vmem:[%s10000_s14 + $0x160] sm:$0xff] %v5753_v18  ;;  %v2505_v24 = vor.u32 4788187, %v2504_v20  ;;  %v2542_v60 = vsel %vm2541_vm3, %v2540_v2, 0  ;;  %v5816_v55 = vshrl.u32 %v5815_v42, 30  ;;  %v2508_v47 = vcvt.s32.f32 %v2501_v33 }
 0x462   : > { %v2544_v43 = vand.u32 31, %v2542_v60  ;;  %v12058_v49 = vand.u32 3, %v2519_v36  ;;  %vm5756_vm1 = vcmp.lt.s32.totalorder %v11902_v13, 0  ;;  %v2538_v59 = vor.u32 8388608, %v2537_v45 }
 0x463   : > { %v2506_v51 = vand.u32 2147483647, %v2505_v24  ;;  %v5817_v30 = vshll.u32 %v5816_v55, 30  ;;  %v12062_v38 = vadd.f32 %v9652_v14, %v980_v26  ;;  %v12065_v52 = vmul.f32 %v9649_v12, %v800_v21 }
 0x464   : > { %v2545_v50 = vsub.s32 32, %v2544_v43  ;;  %v5810_v25 = vadd.s32 %v12011_v23, %v12019_v15  ;;  %v12071_v37 = vshrl.u32 %v2542_v60, 5  ;;  %v2547_v44 = vshll.u32 %v9287_v61, %v2544_v43  ;;  %v12103_v60 = vpop.f32.mrb[17].mxu1 }
 0x465   : > { %v2509_v46 = vmul.f32 %v2508_v47, %v2506_v51  ;;  %v12069_v7 = vsub.s32 %v5814_v11, %v5817_v30  ;;  %v2550_v17 = vshll.u32 %v9288_v1, %v2544_v43  ;;  %v2553_v54 = vshll.u32 %v9289_v3, %v2544_v43 }
 0x466   : > { %v2548_v31 = vshrl.u32 %v9288_v1, %v2545_v50  ;;  %v2551_v0 = vshrl.u32 %v9289_v3, %v2545_v50  ;;  %v2554_v16 = vshrl.u32 %v9290_v5, %v2545_v50  ;;  %v2557_v23 = vshrl.u32 %v9291_v10, %v2545_v50 }
 0x467   : > { %v2510_v56 = vxor.u32 2147483648, %v2509_v46  ;;  %v5820_v29 = vsub.s32 0, %v12069_v7  ;;  %v5840_v41 = vsub.s32 4, %v5816_v55  ;;  %v2556_v35 = vshll.u32 %v9290_v5, %v2544_v43 }
 0x468   : > { %v2549_v28 = vor.u32 %v2548_v31, %v2547_v44  ;;  %v2552_v11 = vor.u32 %v2551_v0, %v2550_v17  ;;  %v2555_v2 = vor.u32 %v2554_v16, %v2553_v54  ;;  %v2559_v33 = vshll.u32 %v9291_v10, %v2544_v43 }
 0x469   : > { %v2511_v15 = vsel %vm2428_vm9, %v2510_v56, %v2509_v46  ;;  %v8209_v34 = vmin.u32 %v5820_v29, %v12069_v7  ;;  %v2558_v48 = vor.u32 %v2557_v23, %v2556_v35  ;;  %v2560_v20 = vshrl.u32 %v9292_v22, %v2545_v50 }
 0x46a   : > { %v2514_v57 = vsel %vm12024_vm12, %v11835_v4, %v2511_v15  ;;  %vm12092_vm2 = vcmp.le.f32.partialorder %v5754_v62, 0.7853982  ;;  %v12096_v53 = vshll.u32 %v2538_v59, 8  ;;  %v5861_v36 = vand.u32 2139095040, %v12062_v38 }
 0x46b   : > { %8910 = vcosq.f32 %v2514_v57  ;;  %v5822_v18 = vclz %v8209_v34  ;;  %v5841_v42 = vsel %vm5756_vm1, %v5840_v41, %v5816_v55  ;;  %v2546_v24 = vshrl.u32 %v9287_v61, %v2545_v50 }
 0x46c   : > { %8912 = vsinq.f32 %v2514_v57  ;;  %v2561_v45 = vor.u32 %v2560_v20, %v2559_v33  ;;  %vm2562_vm4 = vcmp.lt.s32.totalorder %v12071_v37, 1  ;;  %vm2564_vm5 = vcmp.lt.s32.totalorder %v12071_v37, 3 }
 0x46d   : > { %v8210_v26 = vadd.s32 4294967294, %v5822_v18  ;;  %vm2565_vm6 = vcmp.lt.s32.totalorder %v12071_v37, 4  ;;  %v2570_v62 = vsel %vm2562_vm4, %v2549_v28, %v2552_v11  ;;  %v2574_v55 = vsel %vm2562_vm4, %v2552_v11, %v2555_v2 }
 0x46e   : > { %v2567_v43 = vsel %vm2565_vm6, %v2555_v2, 2102212464  ;;  %v2571_v51 = vsel %vm2565_vm6, %v2558_v48, 920167782  ;;  %v2575_v47 = vsel %vm2565_vm6, %v2561_v45, 1326507024  ;;  %v2566_v59 = vsel %vm2562_vm4, %v2546_v24, %v2549_v28 }
 0x46f   : > { %vm2522_vm7 = vcmp.eq.s32.totalorder %v12058_v49, 0  ;;  %vm8211_vm8 = vcmp.lt.s32.totalorder %v8210_v26, 0  ;;  %vm2563_vm9 = vcmp.lt.s32.totalorder %v12071_v37, 2  ;;  %v2572_v30 = vsel %vm2564_vm5, %v2555_v2, %v2571_v51 }
 0x470   : > { %v2576_v50 = vsel %vm2564_vm5, %v2558_v48, %v2575_v47  ;;  %vm2521_vm10 = vcmp.lt.s32.totalorder %v12058_v49, 2  ;;  %v5825_v46 = vsel %vm8211_vm8, 0, %v8210_v26  ;;  %v2573_v31 = vsel %vm2563_vm9, %v2570_v62, %v2572_v30 }
 0x471   : > { %v2577_v56 = vsel %vm2563_vm9, %v2574_v55, %v2576_v50  ;;  %vm2518_vm11 = vweird.f32 %v11835_v4  ;;  %v5826_v44 = vsub.s32 32, %v5825_v46  ;;  %v5830_v0 = vsub.s32 4294967266, %v5825_v46 }
 0x472   : > { %v2568_v16 = vsel %vm2564_vm5, %v2552_v11, %v2567_v43  ;;  %v5862_v29 = vshrl.u32 %v5861_v36, 23  ;;  %v12128_v17 = vmul.u32.u64.low %v12096_v53, %v2577_v56  ;;  %v12129_v54 = vmul.u32.u64.high %v12096_v53, %v2577_v56, %v12128_v17 }
 0x473   : > { %v12132_v23 = vmul.u32.u64.low %v12096_v53, %v2573_v31  ;;  %v12133_v15 = vmul.u32.u64.high %v12096_v53, %v2573_v31, %v12132_v23  ;;  %v5827_v41 = vshll.u32 %v12069_v7, %v5825_v46  ;;  %v5828_v28 = vshrl.u32 %v5810_v25, %v5826_v44 }
 0x474   : > { %v5831_v35 = vadd.s32 127, %v5830_v0  ;;  %v8212_v57 = vadd.s32 4294967169, %v5862_v29  ;;  %vm2525_vm12 = vcmp.eq.s32.totalorder %v12058_v49, 2  ;;  %v5843_v11 = vsel %vm12092_vm2, 0, %v5841_v42 }
 0x475   : > { %v8911_v34 = vpop.eup %8910  ;;  %v2569_v2 = vsel %vm2563_vm9, %v2566_v59, %v2568_v16  ;;  %v5858_v48 = vand.u32 2147483647, %v12062_v38  ;;  %v5829_v18 = vor.u32 %v5828_v28, %v5827_v41  ;;  %vm2587_vm13 = vc.u32 %v12129_v54, %v12132_v23 }
 0x476   : > { %v8913_v33 = vpop.eup %8912  ;;  %v2526_v20 = vxor.u32 2147483648, %v8911_v34  ;;  %v5832_v36 = vshll.u32 %v5831_v35, 23  ;;  %v5868_v24 = vadd.s32 1, %v8212_v57  ;;  %v2588_v25 = vadd.s32 1, %v12133_v15 }
 0x477   : > { %v2523_v7 = vxor.u32 2147483648, %v8913_v33  ;;  %v12148_v42 = vadd.f32 %v9656_v19, %v12065_v52  ;;  %v2585_v26 = vmul.u32 %v12096_v53, %v2569_v2  ;;  %v5847_v43 = vadd.s32 3, %v5843_v11 }
 0x478   : > { %v2527_v37 = vsel %vm2525_vm12, %v2526_v20, %v8913_v33  ;;  %v5833_v45 = vor.u32 4788187, %v5832_v36  ;;  %vm5869_vm14 = vcmp.gt.s32.totalorder %v5868_v24, 0  ;;  %v2589_v51 = vsel %vm2587_vm13, %v2588_v25, %v12133_v15 }
 0x479   : > { %v2524_v62 = vsel %vm2522_vm7, %v8911_v34, %v2523_v7  ;;  %v5870_v55 = vsel %vm5869_vm14, %v5868_v24, 0  ;;  %v5836_v50 = vcvt.s32.f32 %v5829_v18  ;;  %v2590_v46 = vadd.s32 %v2589_v51, %v2585_v26 }
 0x47a   : > { %v2528_v47 = vsel %vm2521_vm10, %v2524_v62, %v2527_v37  ;;  %v5834_v30 = vand.u32 2147483647, %v5833_v45  ;;  %v5872_v59 = vand.u32 31, %v5870_v55  ;;  %v5865_v56 = vand.u32 8388607, %v5858_v48 }
 0x47b   : > { %v2529_v52 = vsel %vm2518_vm11, nan, %v2528_v47  ;;  %v2591_v31 = vadd.s32 536870912, %v2590_v46  ;;  %v12163_v44 = vadd.f32 %v11775_v32, %v9645_v8  ;;  %v12165_v0 = vand.u32 3, %v5847_v43 }
 0x47c   : > { %7743 = vst [vmem:[%s10000_s14 + $0x68] sm:$0xff] %v2529_v52  ;;  %v5837_v53 = vmul.f32 %v5836_v50, %v5834_v30  ;;  %v5871_v49 = vshrl.u32 %v5870_v55, 5  ;;  %v5873_v16 = vsub.s32 32, %v5872_v59  ;;  %v2637_v29 = vand.u32 2139095040, %v12148_v42 }
 0x47d   : > { %v12168_v4 = vshrl.u32 %v2591_v31, 30  ;;  %v5875_v15 = vshll.u32 %v9287_v61, %v5872_v59  ;;  %v5878_v41 = vshll.u32 %v9288_v1, %v5872_v59  ;;  %v5881_v32 = vshll.u32 %v9289_v3, %v5872_v59 }
 0x47e   : > { %v5838_v17 = vxor.u32 2147483648, %v5837_v53  ;;  %v5876_v28 = vshrl.u32 %v9288_v1, %v5873_v16  ;;  %v5879_v35 = vshrl.u32 %v9289_v3, %v5873_v16  ;;  %v5882_v57 = vshrl.u32 %v9290_v5, %v5873_v16 }
 0x47f   : > { %v2593_v11 = vshll.u32 %v12168_v4, 30  ;;  %v5884_v2 = vshll.u32 %v9290_v5, %v5872_v59  ;;  %v5885_v33 = vshrl.u32 %v9291_v10, %v5873_v16  ;;  %v5866_v25 = vor.u32 8388608, %v5865_v56 }
 0x480   : > { %v5839_v34 = vsel %vm5756_vm1, %v5838_v17, %v5837_v53  ;;  %v5877_v18 = vor.u32 %v5876_v28, %v5875_v15  ;;  %v5880_v36 = vor.u32 %v5879_v35, %v5878_v41  ;;  %v5883_v24 = vor.u32 %v5882_v57, %v5881_v32  ;;  %v12212_v32 = vpop.f32.mrb[18].mxu0 }
 0x481   : > { %v5842_v20 = vsel %vm12092_vm2, %v11902_v13, %v5839_v34  ;;  %v12184_v7 = vsub.s32 %v2590_v46, %v2593_v11  ;;  %v5886_v37 = vor.u32 %v5885_v33, %v5884_v2  ;;  %v5887_v45 = vshll.u32 %v9291_v10, %v5872_v59 }
 0x482   : > { %8914 = vcosq.f32 %v5842_v20  ;;  %v5888_v26 = vshrl.u32 %v9292_v22, %v5873_v16  ;;  %v2638_v62 = vshrl.u32 %v2637_v29, 23  ;;  %vm2532_vm15 = vcmp.lt.s32.totalorder %v12000_v58, 0 }
 0x483   : > { %8916 = vsinq.f32 %v5842_v20  ;;  %v2596_v43 = vsub.s32 0, %v12184_v7  ;;  %vm5890_vm0 = vcmp.lt.s32.totalorder %v5871_v49, 1  ;;  %vm5892_vm3 = vcmp.lt.s32.totalorder %v5871_v49, 3 }
 0x484   : > { %vm5893_vm1 = vcmp.lt.s32.totalorder %v5871_v49, 4  ;;  %v5889_v21 = vor.u32 %v5888_v26, %v5887_v45  ;;  %v5898_v55 = vsel %vm5890_vm0, %v5877_v18, %v5880_v36  ;;  %v5874_v50 = vshrl.u32 %v9287_v61, %v5873_v16 }
 0x485   : > { %v5895_v51 = vsel %vm5893_vm1, %v5883_v24, 2102212464  ;;  %v5899_v47 = vsel %vm5893_vm1, %v5886_v37, 920167782  ;;  %v8085_v30 = vmin.u32 %v2596_v43, %v12184_v7  ;;  %vm5891_vm2 = vcmp.lt.s32.totalorder %v5871_v49, 2 }
 0x486   : > { %v5900_v46 = vsel %vm5892_vm3, %v5883_v24, %v5899_v47  ;;  %v5902_v59 = vsel %vm5890_vm0, %v5880_v36, %v5883_v24  ;;  %v5903_v53 = vsel %vm5893_vm1, %v5889_v21, 1326507024  ;;  %v5906_v31 = vshll.u32 %v5866_v25, 8 }
 0x487   : > { %v5901_v52 = vsel %vm5891_vm2, %v5898_v55, %v5900_v46  ;;  %vm5849_vm4 = vcmp.lt.s32.totalorder %v12165_v0, 2  ;;  %vm12199_vm5 = vcmp.le.f32.partialorder %v2530_v40, 0.7853982  ;;  %v2598_v29 = vclz %v8085_v30 }
 0x488   : > { %v5894_v16 = vsel %vm5890_vm0, %v5874_v50, %v5877_v18  ;;  %v5896_v17 = vsel %vm5892_vm3, %v5880_v36, %v5895_v51  ;;  %vm5846_vm6 = vweird.f32 %v11902_v13  ;;  %v2616_v15 = vsub.s32 4, %v12168_v4 }
 0x489   : > { %v5904_v41 = vsel %vm5892_vm3, %v5886_v37, %v5903_v53  ;;  %v12208_v28 = vmul.u32.u64.low %v5906_v31, %v5901_v52  ;;  %v12209_v35 = vmul.u32.u64.high %v5906_v31, %v5901_v52, %v12208_v28  ;;  %vm5850_vm7 = vcmp.eq.s32.totalorder %v12165_v0, 0 }
 0x48a   : > { %v8086_v40 = vadd.s32 4294967294, %v2598_v29  ;;  %v5905_v57 = vsel %vm5891_vm2, %v5902_v59, %v5904_v41  ;;  %v8088_v34 = vadd.s32 4294967169, %v2638_v62  ;;  %vm5853_vm8 = vcmp.eq.s32.totalorder %v12165_v0, 2 }
 0x48b   : > { %v5897_v11 = vsel %vm5891_vm2, %v5894_v16, %v5896_v17  ;;  %v12218_v2 = vmul.u32.u64.low %v5906_v31, %v5905_v57  ;;  %v12219_v33 = vmul.u32.u64.high %v5906_v31, %v5905_v57, %v12218_v2  ;;  %v2586_v18 = vadd.s32 %v12132_v23, %v12129_v54 }
 0x48c   : > { %v8915_v20 = vpop.eup %8914  ;;  %vm8087_vm9 = vcmp.lt.s32.totalorder %v8086_v40, 0  ;;  %v2634_v36 = vand.u32 2147483647, %v12148_v42  ;;  %v2644_v24 = vadd.s32 1, %v8088_v34  ;;  %v2617_v26 = vsel %vm2532_vm15, %v2616_v15, %v12168_v4 }
 0x48d   : > { %v8917_v25 = vpop.eup %8916  ;;  %v5854_v37 = vxor.u32 2147483648, %v8915_v20  ;;  %v2601_v45 = vsel %vm8087_vm9, 0, %v8086_v40  ;;  %v5916_v49 = vadd.s32 1, %v12209_v35  ;;  %v5913_v51 = vmul.u32 %v5906_v31, %v5897_v11 }
 0x48e   : > { %v5851_v62 = vxor.u32 2147483648, %v8917_v25  ;;  %v2602_v43 = vsub.s32 32, %v2601_v45  ;;  %v2606_v21 = vsub.s32 4294967266, %v2601_v45  ;;  %v2603_v23 = vshll.u32 %v12184_v7, %v2601_v45 }
 0x48f   : > { %v5855_v54 = vsel %vm5853_vm8, %v5854_v37, %v8917_v25  ;;  %vm5915_vm10 = vc.u32 %v12219_v33, %v12208_v28  ;;  %vm2645_vm11 = vcmp.gt.s32.totalorder %v2644_v24, 0  ;;  %v2619_v46 = vsel %vm12199_vm5, 0, %v2617_v26 }
 0x490   : > { %v5852_v55 = vsel %vm5850_vm7, %v8915_v20, %v5851_v62  ;;  %v2604_v4 = vshrl.u32 %v2586_v18, %v2602_v43  ;;  %v2607_v47 = vadd.s32 127, %v2606_v21  ;;  %v5917_v30 = vsel %vm5915_vm10, %v5916_v49, %v12209_v35 }
 0x491   : > { %v5856_v50 = vsel %vm5849_vm4, %v5852_v55, %v5855_v54  ;;  %v5918_v52 = vadd.s32 %v5917_v30, %v5913_v51  ;;  %v2646_v59 = vsel %vm2645_vm11, %v2644_v24, 0  ;;  %v2641_v29 = vand.u32 8388607, %v2634_v36 }
 0x492   : > { %v5857_v7 = vsel %vm5846_vm6, nan, %v5856_v50  ;;  %v2605_v53 = vor.u32 %v2604_v4, %v2603_v23  ;;  %v2608_v31 = vshll.u32 %v2607_v47, 23  ;;  %v2648_v17 = vand.u32 31, %v2646_v59 }
 0x493   : > { %7775 = vst [vmem:[%s10000_s14 + $0x168] sm:$0xff] %v5857_v7  ;;  %v5919_v16 = vadd.s32 536870912, %v5918_v52  ;;  %v12247_v0 = vadd.f32 %v11890_v63, %v9643_v6  ;;  %v2623_v41 = vadd.s32 3, %v2619_v46  ;;  %v981_v13 = vmul.f32 %v9649_v12, %v12163_v44 }
 0x494   : > { %v2609_v15 = vor.u32 4788187, %v2608_v31  ;;  %v2649_v40 = vsub.s32 32, %v2648_v17  ;;  %v2612_v34 = vcvt.s32.f32 %v2605_v53  ;;  %v2642_v11 = vor.u32 8388608, %v2641_v29 }
 0x495   : > { %v5920_v35 = vshrl.u32 %v5919_v16, 30  ;;  %v12251_v2 = vshrl.u32 %v2646_v59, 5  ;;  %v2651_v18 = vshll.u32 %v9287_v61, %v2648_v17  ;;  %v2654_v25 = vshll.u32 %v9288_v1, %v2648_v17 }
 0x496   : > { %v2610_v57 = vand.u32 2147483647, %v2609_v15  ;;  %v2652_v24 = vshrl.u32 %v9288_v1, %v2649_v40  ;;  %v2655_v37 = vshrl.u32 %v9289_v3, %v2649_v40  ;;  %v2658_v45 = vshrl.u32 %v9290_v5, %v2649_v40 }
 0x497   : > { %v5921_v20 = vshll.u32 %v5920_v35, 30  ;;  %v2661_v26 = vshrl.u32 %v9291_v10, %v2649_v40  ;;  %v2657_v49 = vshll.u32 %v9289_v3, %v2648_v17  ;;  %v2660_v62 = vshll.u32 %v9290_v5, %v2648_v17 }
 0x498   : > { %v2613_v63 = vmul.f32 %v2612_v34, %v2610_v57  ;;  %v2664_v43 = vshrl.u32 %v9292_v22, %v2649_v40  ;;  %v12264_v51 = vand.u32 3, %v2623_v41  ;;  %v2653_v54 = vor.u32 %v2652_v24, %v2651_v18 }
 0x499   : > { %v12259_v44 = vsub.s32 %v5918_v52, %v5921_v20  ;;  %v2656_v23 = vor.u32 %v2655_v37, %v2654_v25  ;;  %vm5860_vm12 = vcmp.lt.s32.totalorder %v12062_v38, 0  ;;  %v2659_v4 = vor.u32 %v2658_v45, %v2657_v49 }
 0x49a   : > { %v2614_v21 = vxor.u32 2147483648, %v2613_v63  ;;  %v2662_v47 = vor.u32 %v2661_v26, %v2660_v62  ;;  %v2663_v30 = vshll.u32 %v9291_v10, %v2648_v17  ;;  %vm2666_vm13 = vcmp.lt.s32.totalorder %v12251_v2, 1 }
 0x49b   : > { %v5924_v55 = vsub.s32 0, %v12259_v44  ;;  %v2682_v46 = vshll.u32 %v2642_v11, 8  ;;  %v12273_v52 = vadd.f32 %v9656_v19, %v981_v13  ;;  %vm2669_vm14 = vcmp.lt.s32.totalorder %v12251_v2, 4 }
 0x49c   : > { %v2615_v50 = vsel %vm2532_vm15, %v2614_v21, %v2613_v63  ;;  %v2665_v53 = vor.u32 %v2664_v43, %v2663_v30  ;;  %v2650_v31 = vshrl.u32 %v9287_v61, %v2649_v40  ;;  %v2674_v29 = vsel %vm2666_vm13, %v2653_v54, %v2656_v23  ;;  %v12311_v21 = vpop.f32.mrb[18].mxu1 }
 0x49d   : > { %v2618_v59 = vsel %vm12199_vm5, %v12000_v58, %v2615_v50  ;;  %v8213_v7 = vmin.u32 %v5924_v55, %v12259_v44  ;;  %v2675_v16 = vsel %vm2669_vm14, %v2662_v47, 920167782  ;;  %vm2668_vm15 = vcmp.lt.s32.totalorder %v12251_v2, 3 }
 0x49e   : > { %8918 = vcosq.f32 %v2618_v59  ;;  %v2671_v56 = vsel %vm2669_vm14, %v2659_v4, 2102212464  ;;  %v5944_v15 = vsub.s32 4, %v5920_v35  ;;  %vm2667_vm0 = vcmp.lt.s32.totalorder %v12251_v2, 2 }
 0x49f   : > { %8920 = vsinq.f32 %v2618_v59  ;;  %v5926_v17 = vclz %v8213_v7  ;;  %v2676_v41 = vsel %vm2668_vm15, %v2659_v4, %v2675_v16  ;;  %v2678_v40 = vsel %vm2666_vm13, %v2656_v23, %v2659_v4 }
 0x4a0   : > { %v2670_v57 = vsel %vm2666_vm13, %v2650_v31, %v2653_v54  ;;  %v2677_v34 = vsel %vm2667_vm0, %v2674_v29, %v2676_v41  ;;  %v2679_v11 = vsel %vm2669_vm14, %v2665_v53, 1326507024  ;;  %v2672_v20 = vsel %vm2668_vm15, %v2656_v23, %v2671_v56 }
 0x4a1   : > { %v8214_v13 = vadd.s32 4294967294, %v5926_v17  ;;  %v2680_v18 = vsel %vm2668_vm15, %v2662_v47, %v2679_v11  ;;  %v12297_v24 = vmul.u32.u64.low %v2682_v46, %v2677_v34  ;;  %v12298_v25 = vmul.u32.u64.high %v2682_v46, %v2677_v34, %v12297_v24 }
 0x4a2   : > { %v5914_v63 = vadd.s32 %v12208_v28, %v12219_v33  ;;  %v2681_v37 = vsel %vm2667_vm0, %v2678_v40, %v2680_v18  ;;  %v5965_v45 = vand.u32 2139095040, %v12273_v52  ;;  %v5945_v49 = vsel %vm5860_vm12, %v5944_v15, %v5920_v35 }
 0x4a3   : > { %vm8215_vm3 = vcmp.lt.s32.totalorder %v8214_v13, 0  ;;  %v12308_v62 = vmul.u32.u64.low %v2682_v46, %v2681_v37  ;;  %v12309_v43 = vmul.u32.u64.high %v2682_v46, %v2681_v37, %v12308_v62  ;;  %vm2622_vm1 = vweird.f32 %v12000_v58 }
 0x4a4   : > { %v5929_v26 = vsel %vm8215_vm3, 0, %v8214_v13  ;;  %v2673_v28 = vsel %vm2667_vm0, %v2670_v57, %v2672_v20  ;;  %v5966_v33 = vshrl.u32 %v5965_v45, 23  ;;  %vm2625_vm2 = vcmp.lt.s32.totalorder %v12264_v51, 2 }
 0x4a5   : > { %v5930_v54 = vsub.s32 32, %v5929_v26  ;;  %v5934_v23 = vsub.s32 4294967266, %v5929_v26  ;;  %vm2629_vm4 = vcmp.eq.s32.totalorder %v12264_v51, 2  ;;  %vm12320_vm5 = vcmp.le.f32.partialorder %v5858_v48, 0.7853982 }
 0x4a6   : > { %v2692_v55 = vadd.s32 1, %v12298_v25  ;;  %v5931_v4 = vshll.u32 %v12259_v44, %v5929_v26  ;;  %v8216_v50 = vadd.s32 4294967169, %v5966_v33  ;;  %v5947_v59 = vsel %vm12320_vm5, 0, %v5945_v49 }
 0x4a7   : > { %v5932_v47 = vshrl.u32 %v5914_v63, %v5930_v54  ;;  %v5935_v30 = vadd.s32 127, %v5934_v23  ;;  %v2689_v7 = vmul.u32 %v2682_v46, %v2673_v28  ;;  %vm2691_vm6 = vc.u32 %v12309_v43, %v12297_v24 }
 0x4a8   : > { %v8919_v2 = vpop.eup %8918  ;;  %v5962_v48 = vand.u32 2147483647, %v12273_v52  ;;  %v2693_v17 = vsel %vm2691_vm6, %v2692_v55, %v12298_v25  ;;  %v5972_v15 = vadd.s32 1, %v8216_v50  ;;  %v950_v41 = vmul.f32 %v9647_v9, %v12247_v0 }
 0x4a9   : > { %v8921_v53 = vpop.eup %8920  ;;  %v2630_v31 = vxor.u32 2147483648, %v8919_v2  ;;  %v5933_v29 = vor.u32 %v5932_v47, %v5931_v4  ;;  %v5936_v16 = vshll.u32 %v5935_v30, 23  ;;  %v2694_v56 = vadd.s32 %v2693_v17, %v2689_v7 }
 0x4aa   : > { %v2627_v44 = vxor.u32 2147483648, %v8921_v53  ;;  %vm2626_vm7 = vcmp.eq.s32.totalorder %v12264_v51, 0  ;;  %v5951_v13 = vadd.s32 3, %v5947_v59  ;;  %v5969_v11 = vand.u32 8388607, %v5962_v48 }
 0x4ab   : > { %v2631_v46 = vsel %vm2629_vm4, %v2630_v31, %v8921_v53  ;;  %v5937_v40 = vor.u32 4788187, %v5936_v16  ;;  %v2695_v34 = vadd.s32 536870912, %v2694_v56  ;;  %vm5973_vm8 = vcmp.gt.s32.totalorder %v5972_v15, 0 }
 0x4ac   : > { %v2628_v57 = vsel %vm2626_vm7, %v8919_v2, %v2627_v44  ;;  %v5940_v25 = vcvt.s32.f32 %v5933_v29  ;;  %v5974_v0 = vsel %vm5973_vm8, %v5972_v15, 0  ;;  %v12346_v26 = vadd.f32 %v9652_v14, %v950_v41 }
 0x4ad   : > { %v2632_v20 = vsel %vm2625_vm2, %v2628_v57, %v2631_v46  ;;  %v5938_v18 = vand.u32 2147483647, %v5937_v40  ;;  %v12343_v37 = vshrl.u32 %v2695_v34, 30  ;;  %v5976_v45 = vand.u32 31, %v5974_v0 }
 0x4ae   : > { %v2633_v63 = vsel %vm2622_vm1, nan, %v2632_v20  ;;  %v12350_v51 = vand.u32 3, %v5951_v13  ;;  %v5970_v28 = vor.u32 8388608, %v5969_v11  ;;  %v12354_v33 = vadd.f32 %v11939_v27, %v9643_v6 }
 0x4af   : > { %7744 = vst [vmem:[%s10000_s14 + $0x70] sm:$0xff] %v2633_v63  ;;  %v5941_v49 = vmul.f32 %v5940_v25, %v5938_v18  ;;  %v2697_v62 = vshll.u32 %v12343_v37, 30  ;;  %v5977_v54 = vsub.s32 32, %v5976_v45  ;;  %v5975_v55 = vshrl.u32 %v5974_v0, 5 }
 0x4b0   : > { %v2741_v47 = vand.u32 2139095040, %v12346_v26  ;;  %v5979_v50 = vshll.u32 %v9287_v61, %v5976_v45  ;;  %v5982_v53 = vshll.u32 %v9288_v1, %v5976_v45  ;;  %v5985_v31 = vshll.u32 %v9289_v3, %v5976_v45 }
 0x4b1   : > { %v5942_v23 = vxor.u32 2147483648, %v5941_v49  ;;  %v12356_v58 = vsub.s32 %v2694_v56, %v2697_v62  ;;  %v5980_v4 = vshrl.u32 %v9288_v1, %v5977_v54  ;;  %v5983_v2 = vshrl.u32 %v9289_v3, %v5977_v54 }
 0x4b2   : > { %v5986_v59 = vshrl.u32 %v9290_v5, %v5977_v54  ;;  %v5988_v16 = vshll.u32 %v9290_v5, %v5976_v45  ;;  %v5989_v17 = vshrl.u32 %v9291_v10, %v5977_v54  ;;  %v5991_v35 = vshll.u32 %v9291_v10, %v5976_v45 }
 0x4b3   : > { %v5943_v30 = vsel %vm5860_vm12, %v5942_v23, %v5941_v49  ;;  %v2700_v7 = vsub.s32 0, %v12356_v58  ;;  %v5981_v29 = vor.u32 %v5980_v4, %v5979_v50  ;;  %v5984_v56 = vor.u32 %v5983_v2, %v5982_v53  ;;  %v12387_v4 = vpop.f32.mrb[19].mxu0 }
 0x4b4   : > { %v5946_v27 = vsel %vm12320_vm5, %v12062_v38, %v5943_v30  ;;  %v5987_v15 = vor.u32 %v5986_v59, %v5985_v31  ;;  %v5990_v41 = vor.u32 %v5989_v17, %v5988_v16  ;;  %v5992_v46 = vshrl.u32 %v9292_v22, %v5977_v54 }
 0x4b5   : > { %8922 = vcosq.f32 %v5946_v27  ;;  %v8089_v44 = vmin.u32 %v2700_v7, %v12356_v58  ;;  %v12376_v40 = vshll.u32 %v5970_v28, 8  ;;  %v5978_v57 = vshrl.u32 %v9287_v61, %v5977_v54 }
 0x4b6   : > { %8924 = vsinq.f32 %v5946_v27  ;;  %vm5994_vm9 = vcmp.lt.s32.totalorder %v5975_v55, 1  ;;  %v2742_v34 = vshrl.u32 %v2741_v47, 23  ;;  %v5993_v11 = vor.u32 %v5992_v46, %v5991_v35 }
 0x4b7   : > { %v2702_v13 = vclz %v8089_v44  ;;  %vm5995_vm10 = vcmp.lt.s32.totalorder %v5975_v55, 2  ;;  %vm5996_vm11 = vcmp.lt.s32.totalorder %v5975_v55, 3  ;;  %vm5997_vm12 = vcmp.lt.s32.totalorder %v5975_v55, 4 }
 0x4b8   : > { %vm5954_vm13 = vcmp.eq.s32.totalorder %v12350_v51, 0  ;;  %v5999_v18 = vsel %vm5997_vm12, %v5987_v15, 2102212464  ;;  %v6002_v25 = vsel %vm5994_vm9, %v5981_v29, %v5984_v56  ;;  %v6003_v0 = vsel %vm5997_vm12, %v5990_v41, 920167782 }
 0x4b9   : > { %v8090_v20 = vadd.s32 4294967294, %v2702_v13  ;;  %vm5953_vm14 = vcmp.lt.s32.totalorder %v12350_v51, 2  ;;  %v5998_v63 = vsel %vm5994_vm9, %v5978_v57, %v5981_v29  ;;  %v6004_v45 = vsel %vm5996_vm11, %v5987_v15, %v6003_v0 }
 0x4ba   : > { %v6006_v49 = vsel %vm5994_vm9, %v5984_v56, %v5987_v15  ;;  %v6007_v62 = vsel %vm5997_vm12, %v5993_v11, 1326507024  ;;  %vm5950_vm15 = vweird.f32 %v12062_v38  ;;  %vm2636_vm0 = vcmp.lt.s32.totalorder %v12148_v42, 0 }
 0x4bb   : > { %vm8091_vm3 = vcmp.lt.s32.totalorder %v8090_v20, 0  ;;  %v6000_v54 = vsel %vm5996_vm11, %v5984_v56, %v5999_v18  ;;  %v6005_v23 = vsel %vm5995_vm10, %v6002_v25, %v6004_v45  ;;  %v6008_v28 = vsel %vm5996_vm11, %v5990_v41, %v6007_v62 }
 0x4bc   : > { %v2705_v47 = vsel %vm8091_vm3, 0, %v8090_v20  ;;  %v6009_v30 = vsel %vm5995_vm10, %v6006_v49, %v6008_v28  ;;  %v12391_v50 = vmul.u32.u64.low %v12376_v40, %v6005_v23  ;;  %v12392_v2 = vmul.u32.u64.high %v12376_v40, %v6005_v23, %v12391_v50 }
 0x4bd   : > { %vm5957_vm1 = vcmp.eq.s32.totalorder %v12350_v51, 2  ;;  %v2690_v59 = vadd.s32 %v12297_v24, %v12309_v43  ;;  %v2706_v27 = vsub.s32 32, %v2705_v47  ;;  %v2710_v7 = vsub.s32 4294967266, %v2705_v47 }
 0x4be   : > { %v6001_v31 = vsel %vm5995_vm10, %v5998_v63, %v6000_v54  ;;  %v12400_v29 = vmul.u32.u64.low %v12376_v40, %v6009_v30  ;;  %v12401_v16 = vmul.u32.u64.high %v12376_v40, %v6009_v30, %v12400_v29  ;;  %v8092_v17 = vadd.s32 4294967169, %v2742_v34 }
 0x4bf   : > { %v8923_v53 = vpop.eup %8922  ;;  %v2707_v15 = vshll.u32 %v12356_v58, %v2705_v47  ;;  %v2708_v41 = vshrl.u32 %v2690_v59, %v2706_v27  ;;  %v2711_v35 = vadd.s32 127, %v2710_v7  ;;  %v2720_v13 = vsub.s32 4, %v12343_v37 }
 0x4c0   : > { %v8925_v44 = vpop.eup %8924  ;;  %v5958_v56 = vxor.u32 2147483648, %v8923_v53  ;;  %v6020_v24 = vadd.s32 1, %v12392_v2  ;;  %v2748_v43 = vadd.s32 1, %v8092_v17  ;;  %v2738_v34 = vand.u32 2147483647, %v12346_v26 }
 0x4c1   : > { %v5955_v46 = vxor.u32 2147483648, %v8925_v44  ;;  %v2709_v57 = vor.u32 %v2708_v41, %v2707_v15  ;;  %v2712_v11 = vshll.u32 %v2711_v35, 23  ;;  %v6017_v58 = vmul.u32 %v12376_v40, %v6001_v31 }
 0x4c2   : > { %v5959_v55 = vsel %vm5957_vm1, %v5958_v56, %v8925_v44  ;;  %vm6019_vm2 = vc.u32 %v12401_v16, %v12391_v50  ;;  %vm2749_vm4 = vcmp.gt.s32.totalorder %v2748_v43, 0  ;;  %v982_v63 = vmul.f32 %v9647_v9, %v12354_v33 }
 0x4c3   : > { %v5956_v20 = vsel %vm5954_vm13, %v8923_v53, %v5955_v46  ;;  %v2713_v25 = vor.u32 4788187, %v2712_v11  ;;  %v6021_v0 = vsel %vm6019_vm2, %v6020_v24, %v12392_v2  ;;  %v2721_v40 = vsel %vm2636_vm0, %v2720_v13, %v12343_v37 }
 0x4c4   : > { %v5960_v18 = vsel %vm5953_vm14, %v5956_v20, %v5959_v55  ;;  %v6022_v49 = vadd.s32 %v6021_v0, %v6017_v58  ;;  %v2750_v62 = vsel %vm2749_vm4, %v2748_v43, 0  ;;  %v2716_v23 = vcvt.s32.f32 %v2709_v57 }
 0x4c5   : > { %v5961_v45 = vsel %vm5950_vm15, nan, %v5960_v18  ;;  %v2714_v54 = vand.u32 2147483647, %v2713_v25  ;;  %v2752_v51 = vand.u32 31, %v2750_v62  ;;  %vm12427_vm5 = vcmp.le.f32.partialorder %v2634_v36, 0.7853982 }
 0x4c6   : > { %7776 = vst [vmem:[%s10000_s14 + $0x170] sm:$0xff] %v5961_v45  ;;  %v6023_v33 = vadd.s32 536870912, %v6022_v49  ;;  %v2745_v38 = vand.u32 8388607, %v2738_v34  ;;  %v2723_v37 = vsel %vm12427_vm5, 0, %v2721_v40  ;;  %v12436_v2 = vadd.f32 %v9652_v14, %v982_v63 }
 0x4c7   : > { %v2717_v47 = vmul.f32 %v2716_v23, %v2714_v54  ;;  %v2753_v30 = vsub.s32 32, %v2752_v51  ;;  %v2751_v27 = vshrl.u32 %v2750_v62, 5  ;;  %v2755_v36 = vshll.u32 %v9287_v61, %v2752_v51 }
 0x4c8   : > { %v12438_v59 = vshrl.u32 %v6023_v33, 30  ;;  %v2758_v7 = vshll.u32 %v9288_v1, %v2752_v51  ;;  %v2761_v17 = vshll.u32 %v9289_v3, %v2752_v51  ;;  %v2764_v15 = vshll.u32 %v9290_v5, %v2752_v51 }
 0x4c9   : > { %v2718_v53 = vxor.u32 2147483648, %v2717_v47  ;;  %v2756_v31 = vshrl.u32 %v9288_v1, %v2753_v30  ;;  %v2759_v29 = vshrl.u32 %v9289_v3, %v2753_v30  ;;  %v2762_v56 = vshrl.u32 %v9290_v5, %v2753_v30 }
 0x4ca   : > { %v6025_v44 = vshll.u32 %v12438_v59, 30  ;;  %v2765_v41 = vshrl.u32 %v9291_v10, %v2753_v30  ;;  %v2767_v13 = vshll.u32 %v9291_v10, %v2752_v51  ;;  %v2768_v24 = vshrl.u32 %v9292_v22, %v2753_v30 }
 0x4cb   : > { %v2719_v35 = vsel %vm2636_vm0, %v2718_v53, %v2717_v47  ;;  %v2757_v46 = vor.u32 %v2756_v31, %v2755_v36  ;;  %v2760_v57 = vor.u32 %v2759_v29, %v2758_v7  ;;  %v2763_v11 = vor.u32 %v2762_v56, %v2761_v17 }
 0x4cc   : > { %v2722_v43 = vsel %vm12427_vm5, %v12148_v42, %v2719_v35  ;;  %v12456_v55 = vsub.s32 %v6022_v49, %v6025_v44  ;;  %v2746_v20 = vor.u32 8388608, %v2745_v38  ;;  %v2766_v58 = vor.u32 %v2765_v41, %v2764_v15  ;;  %v12467_v44 = vpop.f32.mrb[19].mxu1 }
 0x4cd   : > { %8926 = vcosq.f32 %v2722_v43  ;;  %v2769_v18 = vor.u32 %v2768_v24, %v2767_v13  ;;  %v2727_v25 = vadd.s32 3, %v2723_v37  ;;  %v2754_v63 = vshrl.u32 %v9287_v61, %v2753_v30 }
 0x4ce   : > { %8928 = vsinq.f32 %v2722_v43  ;;  %v6028_v0 = vsub.s32 0, %v12456_v55  ;;  %vm2770_vm6 = vcmp.lt.s32.totalorder %v2751_v27, 1  ;;  %vm2772_vm7 = vcmp.lt.s32.totalorder %v2751_v27, 3 }
 0x4cf   : > { %vm2773_vm8 = vcmp.lt.s32.totalorder %v2751_v27, 4  ;;  %v6069_v45 = vand.u32 2139095040, %v12436_v2  ;;  %v2774_v49 = vsel %vm2770_vm6, %v2754_v63, %v2757_v46  ;;  %v2778_v54 = vsel %vm2770_vm6, %v2757_v46, %v2760_v57 }
 0x4d0   : > { %v8217_v40 = vmin.u32 %v6028_v0, %v12456_v55  ;;  %v2775_v62 = vsel %vm2773_vm8, %v2763_v11, 2102212464  ;;  %v2779_v51 = vsel %vm2773_vm8, %v2766_v58, 920167782  ;;  %v2782_v28 = vsel %vm2770_vm6, %v2760_v57, %v2763_v11 }
 0x4d1   : > { %v2776_v23 = vsel %vm2772_vm7, %v2760_v57, %v2775_v62  ;;  %v2783_v33 = vsel %vm2773_vm8, %v2769_v18, 1326507024  ;;  %v2728_v38 = vand.u32 3, %v2727_v25  ;;  %vm5964_vm9 = vcmp.lt.s32.totalorder %v12273_v52, 0 }
 0x4d2   : > { %v6030_v47 = vclz %v8217_v40  ;;  %v2786_v37 = vshll.u32 %v2746_v20, 8  ;;  %vm2771_vm10 = vcmp.lt.s32.totalorder %v2751_v27, 2  ;;  %v2780_v30 = vsel %vm2772_vm7, %v2763_v11, %v2779_v51 }
 0x4d3   : > { %v2784_v36 = vsel %vm2772_vm7, %v2766_v58, %v2783_v33  ;;  %v6070_v7 = vshrl.u32 %v6069_v45, 23  ;;  %vm2726_vm11 = vweird.f32 %v12148_v42  ;;  %v2777_v31 = vsel %vm2771_vm10, %v2774_v49, %v2776_v23 }
 0x4d4   : > { %v8218_v53 = vadd.s32 4294967294, %v6030_v47  ;;  %v2781_v29 = vsel %vm2771_vm10, %v2778_v54, %v2780_v30  ;;  %v2785_v17 = vsel %vm2771_vm10, %v2782_v28, %v2784_v36  ;;  %vm12471_vm12 = vcmp.le.f32.partialorder %v5962_v48, 0.7853982 }
 0x4d5   : > { %v12475_v15 = vmul.u32.u64.low %v2786_v37, %v2785_v17  ;;  %v12476_v41 = vmul.u32.u64.high %v2786_v37, %v2785_v17, %v12475_v15  ;;  %v12478_v27 = vmul.u32.u64.low %v2786_v37, %v2781_v29  ;;  %v12479_v35 = vmul.u32.u64.high %v2786_v37, %v2781_v29, %v12478_v27 }
 0x4d6   : > { %vm2730_vm13 = vcmp.eq.s32.totalorder %v2728_v38, 0  ;;  %vm2733_vm14 = vcmp.eq.s32.totalorder %v2728_v38, 2  ;;  %vm8219_vm15 = vcmp.lt.s32.totalorder %v8218_v53, 0  ;;  %v8220_v46 = vadd.s32 4294967169, %v6070_v7 }
 0x4d7   : > { %v8927_v13 = vpop.eup %8926  ;;  %v6018_v24 = vadd.s32 %v12391_v50, %v12401_v16  ;;  %v6033_v43 = vsel %vm8219_vm15, 0, %v8218_v53  ;;  %v6048_v48 = vsub.s32 4, %v12438_v59  ;;  %v6066_v57 = vand.u32 2147483647, %v12436_v2 }
 0x4d8   : > { %v8929_v11 = vpop.eup %8928  ;;  %v2734_v20 = vxor.u32 2147483648, %v8927_v13  ;;  %v6034_v58 = vsub.s32 32, %v6033_v43  ;;  %v6038_v18 = vsub.s32 4294967266, %v6033_v43  ;;  %v2793_v25 = vmul.u32 %v2786_v37, %v2777_v31 }
 0x4d9   : > { %v2731_v0 = vxor.u32 2147483648, %v8929_v11  ;;  %v6035_v63 = vshll.u32 %v12456_v55, %v6033_v43  ;;  %vm2795_vm0 = vc.u32 %v12476_v41, %v12478_v27  ;;  %v2796_v45 = vadd.s32 1, %v12479_v35 }
 0x4da   : > { %v2735_v50 = vsel %vm2733_vm14, %v2734_v20, %v8929_v11  ;;  %v6036_v16 = vshrl.u32 %v6018_v24, %v6034_v58  ;;  %v6039_v40 = vadd.s32 127, %v6038_v18  ;;  %v6076_v49 = vadd.s32 1, %v8220_v46 }
 0x4db   : > { %vm2729_vm3 = vcmp.lt.s32.totalorder %v2728_v38, 2  ;;  %v2732_v62 = vsel %vm2730_vm13, %v8927_v13, %v2731_v0  ;;  %v6049_v54 = vsel %vm5964_vm9, %v6048_v48, %v12438_v59  ;;  %v2797_v55 = vsel %vm2795_vm0, %v2796_v45, %v12479_v35 }
 0x4dc   : > { %v2736_v23 = vsel %vm2729_vm3, %v2732_v62, %v2735_v50  ;;  %v6037_v51 = vor.u32 %v6036_v16, %v6035_v63  ;;  %v6040_v28 = vshll.u32 %v6039_v40, 23  ;;  %v2798_v33 = vadd.s32 %v2797_v55, %v2793_v25 }
 0x4dd   : > { %v2737_v47 = vsel %vm2726_vm11, nan, %v2736_v23  ;;  %v6073_v37 = vand.u32 8388607, %v6066_v57  ;;  %vm6077_vm1 = vcmp.gt.s32.totalorder %v6076_v49, 0  ;;  %v806_v38 = vadd.f32 %v12031_v39, %v9645_v8 }
 0x4de   : > { %7745 = vst [vmem:[%s10000_s14 + $0x78] sm:$0xff] %v2737_v47  ;;  %v6041_v30 = vor.u32 4788187, %v6040_v28  ;;  %v6051_v59 = vsel %vm12471_vm12, 0, %v6049_v54  ;;  %v2799_v36 = vadd.s32 536870912, %v2798_v33  ;;  %v6078_v7 = vsel %vm6077_vm1, %v6076_v49, 0 }
 0x4df   : > { %v6080_v53 = vand.u32 31, %v6078_v7  ;;  %v6044_v29 = vcvt.s32.f32 %v6037_v51  ;;  %v6055_v42 = vadd.s32 3, %v6051_v59  ;;  %v951_v35 = vmul.f32 %v9649_v12, %v806_v38 }
 0x4e0   : > { %v6042_v31 = vand.u32 2147483647, %v6041_v30  ;;  %v12505_v17 = vshrl.u32 %v2799_v36, 30  ;;  %v6074_v39 = vor.u32 8388608, %v6073_v37  ;;  %v6079_v63 = vshrl.u32 %v6078_v7, 5 }
 0x4e1   : > { %v6081_v15 = vsub.s32 32, %v6080_v53  ;;  %v6083_v24 = vshll.u32 %v9287_v61, %v6080_v53  ;;  %v6086_v48 = vshll.u32 %v9288_v1, %v6080_v53  ;;  %v6089_v25 = vshll.u32 %v9289_v3, %v6080_v53 }
 0x4e2   : > { %v6045_v46 = vmul.f32 %v6044_v29, %v6042_v31  ;;  %v2801_v13 = vshll.u32 %v12505_v17, 30  ;;  %v6092_v50 = vshll.u32 %v9290_v5, %v6080_v53  ;;  %v12520_v16 = vadd.f32 %v9656_v19, %v951_v35 }
 0x4e3   : > { %v6084_v43 = vshrl.u32 %v9288_v1, %v6081_v15  ;;  %v6087_v11 = vshrl.u32 %v9289_v3, %v6081_v15  ;;  %v6090_v20 = vshrl.u32 %v9290_v5, %v6081_v15  ;;  %v6093_v0 = vshrl.u32 %v9291_v10, %v6081_v15 }
 0x4e4   : > { %v6046_v58 = vxor.u32 2147483648, %v6045_v46  ;;  %v12514_v18 = vsub.s32 %v2798_v33, %v2801_v13  ;;  %v6095_v51 = vshll.u32 %v9291_v10, %v6080_v53  ;;  %v6096_v28 = vshrl.u32 %v9292_v22, %v6081_v15 }
 0x4e5   : > { %v6085_v45 = vor.u32 %v6084_v43, %v6083_v24  ;;  %v6088_v62 = vor.u32 %v6087_v11, %v6086_v48  ;;  %v6091_v54 = vor.u32 %v6090_v20, %v6089_v25  ;;  %v6094_v23 = vor.u32 %v6093_v0, %v6092_v50  ;;  %v12558_v0 = vpop.f32.mrb[20].mxu0 }
 0x4e6   : > { %v6047_v40 = vsel %vm5964_vm9, %v6046_v58, %v6045_v46  ;;  %v2804_v49 = vsub.s32 0, %v12514_v18  ;;  %v12530_v33 = vand.u32 3, %v6055_v42  ;;  %v12533_v37 = vshll.u32 %v6074_v39, 8 }
 0x4e7   : > { %v6050_v55 = vsel %vm12471_vm12, %v12273_v52, %v6047_v40  ;;  %v6082_v38 = vshrl.u32 %v9287_v61, %v6081_v15  ;;  %v6097_v30 = vor.u32 %v6096_v28, %v6095_v51  ;;  %v2845_v59 = vand.u32 2139095040, %v12520_v16 }
 0x4e8   : > { %8930 = vcosq.f32 %v6050_v55  ;;  %v8093_v47 = vmin.u32 %v2804_v49, %v12514_v18  ;;  %vm2740_vm2 = vcmp.lt.s32.totalorder %v12346_v26, 0  ;;  %vm6098_vm4 = vcmp.lt.s32.totalorder %v6079_v63, 1 }
 0x4e9   : > { %8932 = vsinq.f32 %v6050_v55  ;;  %vm6099_vm5 = vcmp.lt.s32.totalorder %v6079_v63, 2  ;;  %vm6101_vm6 = vcmp.lt.s32.totalorder %v6079_v63, 4  ;;  %vm6100_vm7 = vcmp.lt.s32.totalorder %v6079_v63, 3 }
 0x4ea   : > { %v2806_v56 = vclz %v8093_v47  ;;  %v6103_v36 = vsel %vm6101_vm6, %v6091_v54, 2102212464  ;;  %v6106_v7 = vsel %vm6098_vm4, %v6085_v45, %v6088_v62  ;;  %v6107_v53 = vsel %vm6101_vm6, %v6094_v23, 920167782 }
 0x4eb   : > { %vm6061_vm8 = vcmp.eq.s32.totalorder %v12530_v33, 2  ;;  %v6102_v29 = vsel %vm6098_vm4, %v6082_v38, %v6085_v45  ;;  %v6108_v42 = vsel %vm6100_vm7, %v6091_v54, %v6107_v53  ;;  %v6110_v15 = vsel %vm6098_vm4, %v6088_v62, %v6091_v54 }
 0x4ec   : > { %v8094_v31 = vadd.s32 4294967294, %v2806_v56  ;;  %vm12542_vm9 = vcmp.le.f32.partialorder %v2738_v34, 0.7853982  ;;  %v6104_v46 = vsel %vm6100_vm7, %v6088_v62, %v6103_v36  ;;  %v6109_v13 = vsel %vm6099_vm5, %v6106_v7, %v6108_v42 }
 0x4ed   : > { %v6111_v39 = vsel %vm6101_vm6, %v6097_v30, 1326507024  ;;  %v2846_v24 = vshrl.u32 %v2845_v59, 23  ;;  %vm6057_vm10 = vcmp.lt.s32.totalorder %v12530_v33, 2  ;;  %vm6054_vm12 = vweird.f32 %v12273_v52 }
 0x4ee   : > { %vm8095_vm11 = vcmp.lt.s32.totalorder %v8094_v31, 0  ;;  %v6112_v43 = vsel %vm6100_vm7, %v6094_v23, %v6111_v39  ;;  %v12551_v48 = vmul.u32.u64.low %v12533_v37, %v6109_v13  ;;  %v12552_v11 = vmul.u32.u64.high %v12533_v37, %v6109_v13, %v12551_v48 }
 0x4ef   : > { %v2809_v34 = vsel %vm8095_vm11, 0, %v8094_v31  ;;  %v2824_v20 = vsub.s32 4, %v12505_v17  ;;  %v6113_v58 = vsel %vm6099_vm5, %v6110_v15, %v6112_v43  ;;  %v8096_v25 = vadd.s32 4294967169, %v2846_v24 }
 0x4f0   : > { %v2794_v45 = vadd.s32 %v12478_v27, %v12476_v41  ;;  %v2810_v50 = vsub.s32 32, %v2809_v34  ;;  %v2814_v40 = vsub.s32 4294967266, %v2809_v34  ;;  %v886_v49 = vadd.f32 %v12103_v60, %v9645_v8 }
 0x4f1   : > { %v6105_v62 = vsel %vm6099_vm5, %v6102_v29, %v6104_v46  ;;  %v12566_v54 = vmul.u32.u64.low %v12533_v37, %v6113_v58  ;;  %v12567_v55 = vmul.u32.u64.high %v12533_v37, %v6113_v58, %v12566_v54  ;;  %v2852_v23 = vadd.s32 1, %v8096_v25 }
 0x4f2   : > { %v8931_v51 = vpop.eup %8930  ;;  %v2811_v28 = vshll.u32 %v12514_v18, %v2809_v34  ;;  %v2812_v47 = vshrl.u32 %v2794_v45, %v2810_v50  ;;  %v2815_v38 = vadd.s32 127, %v2814_v40  ;;  %v6124_v30 = vadd.s32 1, %v12552_v11 }
 0x4f3   : > { %v8933_v41 = vpop.eup %8932  ;;  %v6062_v27 = vxor.u32 2147483648, %v8931_v51  ;;  %v2825_v60 = vsel %vm2740_vm2, %v2824_v20, %v12505_v17  ;;  %v2842_v63 = vand.u32 2147483647, %v12520_v16  ;;  %vm2853_vm13 = vcmp.gt.s32.totalorder %v2852_v23, 0 }
 0x4f4   : > { %v6059_v59 = vxor.u32 2147483648, %v8933_v41  ;;  %v2813_v56 = vor.u32 %v2812_v47, %v2811_v28  ;;  %v2816_v36 = vshll.u32 %v2815_v38, 23  ;;  %v2854_v7 = vsel %vm2853_vm13, %v2852_v23, 0 }
 0x4f5   : > { %vm6058_vm14 = vcmp.eq.s32.totalorder %v12530_v33, 0  ;;  %v6063_v18 = vsel %vm6061_vm8, %v6062_v27, %v8933_v41  ;;  %v6121_v53 = vmul.u32 %v12533_v37, %v6105_v62  ;;  %vm6123_vm15 = vc.u32 %v12567_v55, %v12551_v48 }
 0x4f6   : > { %v6060_v31 = vsel %vm6058_vm14, %v8931_v51, %v6059_v59  ;;  %v2817_v17 = vor.u32 4788187, %v2816_v36  ;;  %v2827_v29 = vsel %vm12542_vm9, 0, %v2825_v60  ;;  %v6125_v42 = vsel %vm6123_vm15, %v6124_v30, %v12552_v11 }
 0x4f7   : > { %v6064_v15 = vsel %vm6057_vm10, %v6060_v31, %v6063_v18  ;;  %v6126_v46 = vadd.s32 %v6125_v42, %v6121_v53  ;;  %v2849_v13 = vand.u32 8388607, %v2842_v63  ;;  %v2856_v39 = vand.u32 31, %v2854_v7 }
 0x4f8   : > { %v6065_v37 = vsel %vm6054_vm12, nan, %v6064_v15  ;;  %v2818_v24 = vand.u32 2147483647, %v2817_v17  ;;  %v2820_v43 = vcvt.s32.f32 %v2813_v56  ;;  %v983_v34 = vmul.f32 %v9649_v12, %v886_v49 }
 0x4f9   : > { %7777 = vst [vmem:[%s10000_s14 + $0x178] sm:$0xff] %v6065_v37  ;;  %v2831_v20 = vadd.s32 3, %v2827_v29  ;;  %v6127_v58 = vadd.s32 536870912, %v6126_v46  ;;  %v12592_v25 = vshrl.u32 %v2854_v7, 5  ;;  %v2857_v11 = vsub.s32 32, %v2856_v39 }
 0x4fa   : > { %v2821_v33 = vmul.f32 %v2820_v43, %v2818_v24  ;;  %v2859_v45 = vshll.u32 %v9287_v61, %v2856_v39  ;;  %v2862_v50 = vshll.u32 %v9288_v1, %v2856_v39  ;;  %v2865_v40 = vshll.u32 %v9289_v3, %v2856_v39 }
 0x4fb   : > { %v6128_v62 = vshrl.u32 %v6127_v58, 30  ;;  %v2860_v52 = vshrl.u32 %v9288_v1, %v2857_v11  ;;  %v2863_v54 = vshrl.u32 %v9289_v3, %v2857_v11  ;;  %v2868_v49 = vshll.u32 %v9290_v5, %v2856_v39 }
 0x4fc   : > { %v2822_v23 = vxor.u32 2147483648, %v2821_v33  ;;  %v2866_v51 = vshrl.u32 %v9290_v5, %v2857_v11  ;;  %v2869_v28 = vshrl.u32 %v9291_v10, %v2857_v11  ;;  %v2872_v47 = vshrl.u32 %v9292_v22, %v2857_v11 }
 0x4fd   : > { %v6129_v38 = vshll.u32 %v6128_v62, 30  ;;  %v2850_v30 = vor.u32 8388608, %v2849_v13  ;;  %v2861_v41 = vor.u32 %v2860_v52, %v2859_v45  ;;  %v2871_v27 = vshll.u32 %v9291_v10, %v2856_v39 }
 0x4fe   : > { %v2823_v60 = vsel %vm2740_vm2, %v2822_v23, %v2821_v33  ;;  %vm6068_vm0 = vcmp.lt.s32.totalorder %v12436_v2, 0  ;;  %v2864_v59 = vor.u32 %v2863_v54, %v2862_v50  ;;  %v2867_v56 = vor.u32 %v2866_v51, %v2865_v40 }
 0x4ff   : > { %v2870_v36 = vor.u32 %v2869_v28, %v2868_v49  ;;  %v2826_v7 = vsel %vm12542_vm9, %v12346_v26, %v2823_v60  ;;  %v12610_v18 = vsub.s32 %v6126_v46, %v6129_v38  ;;  %v2873_v53 = vor.u32 %v2872_v47, %v2871_v27 }
 0x500   : > { %v12613_v31 = vadd.f32 %v9656_v19, %v983_v34  ;;  %8934 = vcosq.f32 %v2826_v7  ;;  %vm2874_vm3 = vcmp.lt.s32.totalorder %v12592_v25, 1  ;;  %vm2875_vm1 = vcmp.lt.s32.totalorder %v12592_v25, 2 }
 0x501   : > { %vm2876_vm2 = vcmp.lt.s32.totalorder %v12592_v25, 3  ;;  %8936 = vsinq.f32 %v2826_v7  ;;  %vm12620_vm4 = vcmp.le.f32.partialorder %v6066_v57, 0.7853982  ;;  %v6132_v35 = vsub.s32 0, %v12610_v18 }
 0x502   : > { %v2858_v29 = vshrl.u32 %v9287_v61, %v2857_v11  ;;  %vm2877_vm5 = vcmp.lt.s32.totalorder %v12592_v25, 4  ;;  %v6152_v42 = vsub.s32 4, %v6128_v62  ;;  %v2882_v46 = vsel %vm2874_vm3, %v2861_v41, %v2864_v59 }
 0x503   : > { %v2879_v15 = vsel %vm2877_vm5, %v2867_v56, 2102212464  ;;  %v2883_v13 = vsel %vm2877_vm5, %v2870_v36, 920167782  ;;  %v8221_v39 = vmin.u32 %v6132_v35, %v12610_v18  ;;  %v2886_v37 = vsel %vm2874_vm3, %v2864_v59, %v2867_v56 }
 0x504   : > { %v2884_v57 = vsel %vm2876_vm2, %v2867_v56, %v2883_v13  ;;  %v2887_v24 = vsel %vm2877_vm5, %v2873_v53, 1326507024  ;;  %v2832_v43 = vand.u32 3, %v2831_v20  ;;  %v2890_v11 = vshll.u32 %v2850_v30, 8  ;;  %v12659_v30 = vpop.f32.mrb[20].mxu1 }
 0x505   : > { %v2885_v34 = vsel %vm2875_vm1, %v2882_v46, %v2884_v57  ;;  %v2888_v58 = vsel %vm2876_vm2, %v2870_v36, %v2887_v24  ;;  %v6134_v33 = vclz %v8221_v39  ;;  %v2878_v45 = vsel %vm2874_vm3, %v2858_v29, %v2861_v41 }
 0x506   : > { %v2880_v50 = vsel %vm2876_vm2, %v2864_v59, %v2879_v15  ;;  %v808_v40 = vadd.f32 %v12212_v32, %v9643_v6  ;;  %v2889_v20 = vsel %vm2875_vm1, %v2886_v37, %v2888_v58  ;;  %v6173_v49 = vand.u32 2139095040, %v12613_v31 }
 0x507   : > { %v12646_v52 = vmul.u32.u64.low %v2890_v11, %v2885_v34  ;;  %v12647_v54 = vmul.u32.u64.high %v2890_v11, %v2885_v34, %v12646_v52  ;;  %vm2830_vm6 = vweird.f32 %v12346_v26  ;;  %v8222_v23 = vadd.s32 4294967294, %v6134_v33 }
 0x508   : > { %v6153_v51 = vsel %vm6068_vm0, %v6152_v42, %v6128_v62  ;;  %v12654_v28 = vmul.u32.u64.low %v2890_v11, %v2889_v20  ;;  %v12655_v47 = vmul.u32.u64.high %v2890_v11, %v2889_v20, %v12654_v28  ;;  %vm2833_vm7 = vcmp.lt.s32.totalorder %v2832_v43, 2 }
 0x509   : > { %vm2834_vm8 = vcmp.eq.s32.totalorder %v2832_v43, 0  ;;  %v2881_v32 = vsel %vm2875_vm1, %v2878_v45, %v2880_v50  ;;  %v6174_v38 = vshrl.u32 %v6173_v49, 23  ;;  %vm2837_vm9 = vcmp.eq.s32.totalorder %v2832_v43, 2 }
 0x50a   : > { %v6122_v41 = vadd.s32 %v12551_v48, %v12567_v55  ;;  %vm8223_vm10 = vcmp.lt.s32.totalorder %v8222_v23, 0  ;;  %v6170_v27 = vand.u32 2147483647, %v12613_v31  ;;  %v8935_v60 = vpop.eup %8934  ;;  %v6155_v59 = vsel %vm12620_vm4, 0, %v6153_v51 }
 0x50b   : > { %v6137_v62 = vsel %vm8223_vm10, 0, %v8222_v23  ;;  %v2900_v56 = vadd.s32 1, %v12647_v54  ;;  %v8224_v36 = vadd.s32 4294967169, %v6174_v38  ;;  %v8937_v25 = vpop.eup %8936  ;;  %v2838_v7 = vxor.u32 2147483648, %v8935_v60 }
 0x50c   : > { %v6138_v53 = vsub.s32 32, %v6137_v62  ;;  %v6142_v35 = vsub.s32 4294967266, %v6137_v62  ;;  %v2897_v29 = vmul.u32 %v2890_v11, %v2881_v32  ;;  %v2835_v42 = vxor.u32 2147483648, %v8937_v25 }
 0x50d   : > { %v6139_v15 = vshll.u32 %v12610_v18, %v6137_v62  ;;  %vm2899_vm11 = vc.u32 %v12655_v47, %v12646_v52  ;;  %v6180_v48 = vadd.s32 1, %v8224_v36  ;;  %v2839_v55 = vsel %vm2837_vm9, %v2838_v7, %v8937_v25 }
 0x50e   : > { %v6140_v46 = vshrl.u32 %v6122_v41, %v6138_v53  ;;  %v6143_v13 = vadd.s32 127, %v6142_v35  ;;  %v2901_v39 = vsel %vm2899_vm11, %v2900_v56, %v12647_v54  ;;  %v2836_v57 = vsel %vm2834_vm8, %v8935_v60, %v2835_v42 }
 0x50f   : > { %v6159_v37 = vadd.s32 3, %v6155_v59  ;;  %v2902_v24 = vadd.s32 %v2901_v39, %v2897_v29  ;;  %vm6181_vm12 = vcmp.gt.s32.totalorder %v6180_v48, 0  ;;  %v2840_v34 = vsel %vm2833_vm7, %v2836_v57, %v2839_v55 }
 0x510   : > { %v6141_v58 = vor.u32 %v6140_v46, %v6139_v15  ;;  %v6144_v18 = vshll.u32 %v6143_v13, 23  ;;  %v6182_v11 = vsel %vm6181_vm12, %v6180_v48, 0  ;;  %v2841_v33 = vsel %vm2830_vm6, nan, %v2840_v34 }
 0x511   : > { %v2903_v45 = vadd.s32 536870912, %v2902_v24  ;;  %v6177_v50 = vand.u32 8388607, %v6170_v27  ;;  %v6184_v20 = vand.u32 31, %v6182_v11  ;;  %7746 = vst [vmem:[%s10000_s14 + $0x80] sm:$0xff] %v2841_v33  ;;  %v12683_v43 = vadd.f32 %v12311_v21, %v9643_v6 }
 0x512   : > { %v6145_v54 = vor.u32 4788187, %v6144_v18  ;;  %v6148_v28 = vcvt.s32.f32 %v6141_v58  ;;  %v12685_v32 = vand.u32 3, %v6159_v37  ;;  %v952_v26 = vmul.f32 %v9647_v9, %v808_v40 }
 0x513   : > { %v12679_v49 = vshrl.u32 %v2903_v45, 30  ;;  %v6185_v23 = vsub.s32 32, %v6184_v20  ;;  %v6178_v41 = vor.u32 8388608, %v6177_v50  ;;  %v6187_v60 = vshll.u32 %v9287_v61, %v6184_v20 }
 0x514   : > { %v6146_v51 = vand.u32 2147483647, %v6145_v54  ;;  %v6190_v7 = vshll.u32 %v9288_v1, %v6184_v20  ;;  %v6193_v40 = vshll.u32 %v9289_v3, %v6184_v20  ;;  %v6183_v29 = vshrl.u32 %v6182_v11, 5 }
 0x515   : > { %v2905_v38 = vshll.u32 %v12679_v49, 30  ;;  %v6188_v62 = vshrl.u32 %v9288_v1, %v6185_v23  ;;  %v6191_v56 = vshrl.u32 %v9289_v3, %v6185_v23  ;;  %v6194_v36 = vshrl.u32 %v9290_v5, %v6185_v23 }
 0x516   : > { %v6149_v59 = vmul.f32 %v6148_v28, %v6146_v51  ;;  %v6197_v21 = vshrl.u32 %v9291_v10, %v6185_v23  ;;  %v6200_v53 = vshrl.u32 %v9292_v22, %v6185_v23  ;;  %v6196_v42 = vshll.u32 %v9290_v5, %v6184_v20 }
 0x517   : > { %v12694_v25 = vsub.s32 %v2902_v24, %v2905_v38  ;;  %v6199_v15 = vshll.u32 %v9291_v10, %v6184_v20  ;;  %v6189_v55 = vor.u32 %v6188_v62, %v6187_v60  ;;  %v6192_v46 = vor.u32 %v6191_v56, %v6190_v7 }
 0x518   : > { %v6150_v35 = vxor.u32 2147483648, %v6149_v59  ;;  %v6195_v13 = vor.u32 %v6194_v36, %v6193_v40  ;;  %vm2844_vm13 = vcmp.lt.s32.totalorder %v12520_v16, 0  ;;  %v2898_v57 = vadd.s32 %v12646_v52, %v12655_v47 }
 0x519   : > { %v2908_v48 = vsub.s32 0, %v12694_v25  ;;  %v6198_v37 = vor.u32 %v6197_v21, %v6196_v42  ;;  %v12708_v24 = vadd.f32 %v9652_v14, %v952_v26  ;;  %v6201_v18 = vor.u32 %v6200_v53, %v6199_v15 }
 0x51a   : > { %v6151_v39 = vsel %vm6068_vm0, %v6150_v35, %v6149_v59  ;;  %v6218_v11 = vshll.u32 %v6178_v41, 8  ;;  %v2928_v33 = vsub.s32 4, %v12679_v49  ;;  %vm6202_vm14 = vcmp.lt.s32.totalorder %v6183_v29, 1 }
 0x51b   : > { %v6154_v34 = vsel %vm12620_vm4, %v12436_v2, %v6151_v39  ;;  %v8097_v58 = vmin.u32 %v2908_v48, %v12694_v25  ;;  %vm6205_vm15 = vcmp.lt.s32.totalorder %v6183_v29, 4  ;;  %vm12717_vm0 = vcmp.le.f32.partialorder %v2842_v63, 0.7853982 }
 0x51c   : > { %8938 = vcosq.f32 %v6154_v34  ;;  %v6207_v45 = vsel %vm6205_vm15, %v6195_v13, 2102212464  ;;  %v6210_v17 = vsel %vm6202_vm14, %v6189_v55, %v6192_v46  ;;  %v6186_v50 = vshrl.u32 %v9287_v61, %v6185_v23  ;;  %v12728_v23 = vpop.f32.mrb[21].mxu0 }
 0x51d   : > { %8940 = vsinq.f32 %v6154_v34  ;;  %v2910_v47 = vclz %v8097_v58  ;;  %vm6204_vm3 = vcmp.lt.s32.totalorder %v6183_v29, 3  ;;  %v6211_v20 = vsel %vm6205_vm15, %v6198_v37, 920167782 }
 0x51e   : > { %v6214_v54 = vsel %vm6202_vm14, %v6192_v46, %v6195_v13  ;;  %vm6203_vm1 = vcmp.lt.s32.totalorder %v6183_v29, 2  ;;  %v6212_v28 = vsel %vm6204_vm3, %v6195_v13, %v6211_v20  ;;  %v6215_v26 = vsel %vm6205_vm15, %v6201_v18, 1326507024 }
 0x51f   : > { %v8098_v51 = vadd.s32 4294967294, %v2910_v47  ;;  %v6206_v38 = vsel %vm6202_vm14, %v6186_v50, %v6189_v55  ;;  %v6208_v41 = vsel %vm6204_vm3, %v6192_v46, %v6207_v45  ;;  %v6213_v60 = vsel %vm6203_vm1, %v6210_v17, %v6212_v28 }
 0x520   : > { %v6216_v63 = vsel %vm6204_vm3, %v6198_v37, %v6215_v26  ;;  %v12724_v59 = vmul.u32.u64.low %v6218_v11, %v6213_v60  ;;  %v12725_v56 = vmul.u32.u64.high %v6218_v11, %v6213_v60, %v12724_v59  ;;  %v2949_v40 = vand.u32 2139095040, %v12708_v24 }
 0x521   : > { %vm8099_vm2 = vcmp.lt.s32.totalorder %v8098_v51, 0  ;;  %v6217_v62 = vsel %vm6203_vm1, %v6214_v54, %v6216_v63  ;;  %vm6158_vm4 = vweird.f32 %v12436_v2  ;;  %v2929_v42 = vsel %vm2844_vm13, %v2928_v33, %v12679_v49 }
 0x522   : > { %v2913_v36 = vsel %vm8099_vm2, 0, %v8098_v51  ;;  %v12730_v21 = vmul.u32.u64.low %v6218_v11, %v6217_v62  ;;  %v12731_v7 = vmul.u32.u64.high %v6218_v11, %v6217_v62, %v12730_v21  ;;  %v6209_v15 = vsel %vm6203_vm1, %v6206_v38, %v6208_v41 }
 0x523   : > { %v2914_v53 = vsub.s32 32, %v2913_v36  ;;  %v2918_v35 = vsub.s32 4294967266, %v2913_v36  ;;  %vm6161_vm5 = vcmp.lt.s32.totalorder %v12685_v32, 2  ;;  %vm6165_vm6 = vcmp.eq.s32.totalorder %v12685_v32, 2 }
 0x524   : > { %v2946_v48 = vand.u32 2147483647, %v12708_v24  ;;  %v2950_v55 = vshrl.u32 %v2949_v40, 23  ;;  %v2915_v46 = vshll.u32 %v12694_v25, %v2913_v36  ;;  %v6228_v37 = vadd.s32 1, %v12725_v56 }
 0x525   : > { %v2916_v13 = vshrl.u32 %v2898_v57, %v2914_v53  ;;  %v2919_v39 = vadd.s32 127, %v2918_v35  ;;  %v2931_v58 = vsel %vm12717_vm0, 0, %v2929_v42  ;;  %v6225_v49 = vmul.u32 %v6218_v11, %v6209_v15 }
 0x526   : > { %v8939_v34 = vpop.eup %8938  ;;  %vm6227_vm7 = vc.u32 %v12731_v7, %v12724_v59  ;;  %v8100_v29 = vadd.s32 4294967169, %v2950_v55  ;;  %v984_v20 = vmul.f32 %v9647_v9, %v12683_v43  ;;  %vm6162_vm8 = vcmp.eq.s32.totalorder %v12685_v32, 0 }
 0x527   : > { %v8941_v18 = vpop.eup %8940  ;;  %v6166_v33 = vxor.u32 2147483648, %v8939_v34  ;;  %v2917_v47 = vor.u32 %v2916_v13, %v2915_v46  ;;  %v2920_v45 = vshll.u32 %v2919_v39, 23  ;;  %v6229_v17 = vsel %vm6227_vm7, %v6228_v37, %v12725_v56 }
 0x528   : > { %v6163_v25 = vxor.u32 2147483648, %v8941_v18  ;;  %v6230_v57 = vadd.s32 %v6229_v17, %v6225_v49  ;;  %v2956_v50 = vadd.s32 1, %v8100_v29  ;;  %v2935_v51 = vadd.s32 3, %v2931_v58 }
 0x529   : > { %v6167_v11 = vsel %vm6165_vm6, %v6166_v33, %v8941_v18  ;;  %v2921_v54 = vor.u32 4788187, %v2920_v45  ;;  %v2953_v38 = vand.u32 8388607, %v2946_v48  ;;  %v2924_v63 = vcvt.s32.f32 %v2917_v47 }
 0x52a   : > { %v6164_v28 = vsel %vm6162_vm8, %v8939_v34, %v6163_v25  ;;  %v6231_v26 = vadd.s32 536870912, %v6230_v57  ;;  %vm2957_vm9 = vcmp.gt.s32.totalorder %v2956_v50, 0  ;;  %v12763_v21 = vadd.f32 %v9652_v14, %v984_v20 }
 0x52b   : > { %v6168_v41 = vsel %vm6161_vm5, %v6164_v28, %v6167_v11  ;;  %v2922_v60 = vand.u32 2147483647, %v2921_v54  ;;  %v2958_v43 = vsel %vm2957_vm9, %v2956_v50, 0  ;;  %v12767_v32 = vand.u32 3, %v2935_v51 }
 0x52c   : > { %v6169_v62 = vsel %vm6158_vm4, nan, %v6168_v41  ;;  %v12760_v56 = vshrl.u32 %v6231_v26, 30  ;;  %v2960_v36 = vand.u32 31, %v2958_v43  ;;  %v2954_v15 = vor.u32 8388608, %v2953_v38 }
 0x52d   : > { %7778 = vst [vmem:[%s10000_s14 + $0x180] sm:$0xff] %v6169_v62  ;;  %v2925_v40 = vmul.f32 %v2924_v63, %v2922_v60  ;;  %v12771_v55 = vadd.f32 %v12387_v4, %v9645_v8  ;;  %v2959_v46 = vshrl.u32 %v2958_v43, 5  ;;  %v6277_v39 = vand.u32 2139095040, %v12763_v21  ;;  %v12800_v62 = vpop.f32.mrb[21].mxu1 }
 0x52e   : > { %v6233_v53 = vshll.u32 %v12760_v56, 30  ;;  %v2961_v35 = vsub.s32 32, %v2960_v36  ;;  %v2963_v34 = vshll.u32 %v9287_v61, %v2960_v36  ;;  %v2966_v18 = vshll.u32 %v9288_v1, %v2960_v36 }
 0x52f   : > { %v2926_v42 = vxor.u32 2147483648, %v2925_v40  ;;  %v2969_v33 = vshll.u32 %v9289_v3, %v2960_v36  ;;  %v2972_v45 = vshll.u32 %v9290_v5, %v2960_v36  ;;  %v2975_v52 = vshll.u32 %v9291_v10, %v2960_v36 }
 0x530   : > { %v12773_v2 = vsub.s32 %v6230_v57, %v6233_v53  ;;  %v2964_v13 = vshrl.u32 %v9288_v1, %v2961_v35  ;;  %v2967_v58 = vshrl.u32 %v9289_v3, %v2961_v35  ;;  %v2970_v49 = vshrl.u32 %v9290_v5, %v2961_v35 }
 0x531   : > { %v2927_v37 = vsel %vm2844_vm13, %v2926_v42, %v2925_v40  ;;  %v2973_v17 = vshrl.u32 %v9291_v10, %v2961_v35  ;;  %v2976_v11 = vshrl.u32 %v9292_v22, %v2961_v35  ;;  %v12793_v54 = vshll.u32 %v2954_v15, 8 }
 0x532   : > { %v2930_v4 = vsel %vm12717_vm0, %v12520_v16, %v2927_v37  ;;  %v6236_v29 = vsub.s32 0, %v12773_v2  ;;  %v2965_v47 = vor.u32 %v2964_v13, %v2963_v34  ;;  %v2968_v57 = vor.u32 %v2967_v58, %v2966_v18 }
 0x533   : > { %8942 = vcosq.f32 %v2930_v4  ;;  %v2971_v50 = vor.u32 %v2970_v49, %v2969_v33  ;;  %v2974_v20 = vor.u32 %v2973_v17, %v2972_v45  ;;  %v2962_v28 = vshrl.u32 %v9287_v61, %v2961_v35 }
 0x534   : > { %8944 = vsinq.f32 %v2930_v4  ;;  %v8225_v25 = vmin.u32 %v6236_v29, %v12773_v2  ;;  %vm2978_vm10 = vcmp.lt.s32.totalorder %v2959_v46, 1  ;;  %v6278_v26 = vshrl.u32 %v6277_v39, 23 }
 0x535   : > { %vm2941_vm11 = vcmp.eq.s32.totalorder %v12767_v32, 2  ;;  %vm6172_vm12 = vcmp.lt.s32.totalorder %v12613_v31, 0  ;;  %v2977_v38 = vor.u32 %v2976_v11, %v2975_v52  ;;  %vm2979_vm13 = vcmp.lt.s32.totalorder %v2959_v46, 2 }
 0x536   : > { %v6238_v51 = vclz %v8225_v25  ;;  %vm2980_vm14 = vcmp.lt.s32.totalorder %v2959_v46, 3  ;;  %vm2981_vm15 = vcmp.lt.s32.totalorder %v2959_v46, 4  ;;  %vm2938_vm0 = vcmp.eq.s32.totalorder %v12767_v32, 0 }
 0x537   : > { %v2983_v60 = vsel %vm2981_vm15, %v2971_v50, 2102212464  ;;  %v2986_v63 = vsel %vm2978_vm10, %v2965_v47, %v2968_v57  ;;  %v2987_v43 = vsel %vm2981_vm15, %v2974_v20, 920167782  ;;  %vm2937_vm3 = vcmp.lt.s32.totalorder %v12767_v32, 2 }
 0x538   : > { %v8226_v41 = vadd.s32 4294967294, %v6238_v51  ;;  %v2982_v36 = vsel %vm2978_vm10, %v2962_v28, %v2965_v47  ;;  %v2988_v40 = vsel %vm2980_vm14, %v2971_v50, %v2987_v43  ;;  %v2990_v53 = vsel %vm2978_vm10, %v2968_v57, %v2971_v50 }
 0x539   : > { %v2991_v35 = vsel %vm2981_vm15, %v2977_v38, 1326507024  ;;  %vm2934_vm1 = vweird.f32 %v12520_v16  ;;  %vm12809_vm2 = vcmp.le.f32.partialorder %v6170_v27, 0.7853982  ;;  %v2984_v15 = vsel %vm2980_vm14, %v2968_v57, %v2983_v60 }
 0x53a   : > { %vm8227_vm4 = vcmp.lt.s32.totalorder %v8226_v41, 0  ;;  %v2989_v13 = vsel %vm2979_vm13, %v2986_v63, %v2988_v40  ;;  %v2992_v39 = vsel %vm2980_vm14, %v2974_v20, %v2991_v35  ;;  %v6226_v27 = vadd.s32 %v12724_v59, %v12731_v7 }
 0x53b   : > { %v6241_v37 = vsel %vm8227_vm4, 0, %v8226_v41  ;;  %v2993_v34 = vsel %vm2979_vm13, %v2990_v53, %v2992_v39  ;;  %v12818_v58 = vmul.u32.u64.low %v12793_v54, %v2989_v13  ;;  %v12819_v49 = vmul.u32.u64.high %v12793_v54, %v2989_v13, %v12818_v58 }
 0x53c   : > { %v6242_v4 = vsub.s32 32, %v6241_v37  ;;  %v6246_v29 = vsub.s32 4294967266, %v6241_v37  ;;  %v6256_v18 = vsub.s32 4, %v12760_v56  ;;  %v2985_v47 = vsel %vm2979_vm13, %v2982_v36, %v2984_v15 }
 0x53d   : > { %v8943_v33 = vpop.eup %8942  ;;  %v12827_v45 = vmul.u32.u64.low %v12793_v54, %v2993_v34  ;;  %v12828_v17 = vmul.u32.u64.high %v12793_v54, %v2993_v34, %v12827_v45  ;;  %v8228_v25 = vadd.s32 4294967169, %v6278_v26  ;;  %v6243_v20 = vshll.u32 %v12773_v2, %v6241_v37 }
 0x53e   : > { %v8945_v57 = vpop.eup %8944  ;;  %v2942_v50 = vxor.u32 2147483648, %v8943_v33  ;;  %v6244_v52 = vshrl.u32 %v6226_v27, %v6242_v4  ;;  %v6247_v11 = vadd.s32 127, %v6246_v29  ;;  %v3004_v59 = vadd.s32 1, %v12819_v49 }
 0x53f   : > { %v2939_v51 = vxor.u32 2147483648, %v8945_v57  ;;  %v6274_v7 = vand.u32 2147483647, %v12763_v21  ;;  %v6284_v28 = vadd.s32 1, %v8228_v25  ;;  %v6257_v26 = vsel %vm6172_vm12, %v6256_v18, %v12760_v56 }
 0x540   : > { %v2943_v46 = vsel %vm2941_vm11, %v2942_v50, %v8945_v57  ;;  %v6245_v38 = vor.u32 %v6244_v52, %v6243_v20  ;;  %v6248_v41 = vshll.u32 %v6247_v11, 23  ;;  %v3001_v60 = vmul.u32 %v12793_v54, %v2985_v47 }
 0x541   : > { %v2940_v2 = vsel %vm2938_vm0, %v8943_v33, %v2939_v51  ;;  %vm3003_vm5 = vc.u32 %v12828_v17, %v12818_v58  ;;  %vm6285_vm6 = vcmp.gt.s32.totalorder %v6284_v28, 0  ;;  %v953_v40 = vmul.f32 %v9649_v12, %v12771_v55 }
 0x542   : > { %v2944_v63 = vsel %vm2937_vm3, %v2940_v2, %v2943_v46  ;;  %v6249_v43 = vor.u32 4788187, %v6248_v41  ;;  %v3005_v36 = vsel %vm3003_vm5, %v3004_v59, %v12819_v49  ;;  %v6259_v53 = vsel %vm12809_vm2, 0, %v6257_v26 }
 0x543   : > { %v2945_v56 = vsel %vm2934_vm1, nan, %v2944_v63  ;;  %v3006_v54 = vadd.s32 %v3005_v36, %v3001_v60  ;;  %v6286_v35 = vsel %vm6285_vm6, %v6284_v28, 0  ;;  %v6252_v13 = vcvt.s32.f32 %v6245_v38 }
 0x544   : > { %7747 = vst [vmem:[%s10000_s14 + $0x88] sm:$0xff] %v2945_v56  ;;  %v6250_v15 = vand.u32 2147483647, %v6249_v43  ;;  %v6288_v39 = vand.u32 31, %v6286_v35  ;;  %v6281_v37 = vand.u32 8388607, %v6274_v7  ;;  %v12857_v34 = vadd.f32 %v12467_v44, %v9645_v8 }
 0x545   : > { %v3007_v32 = vadd.s32 536870912, %v3006_v54  ;;  %v6263_v16 = vadd.s32 3, %v6259_v53  ;;  %v12860_v27 = vadd.f32 %v9656_v19, %v953_v40  ;;  %v6287_v29 = vshrl.u32 %v6286_v35, 5 }
 0x546   : > { %v6253_v55 = vmul.f32 %v6252_v13, %v6250_v15  ;;  %v6289_v49 = vsub.s32 32, %v6288_v39  ;;  %v6291_v18 = vshll.u32 %v9287_v61, %v6288_v39  ;;  %v6294_v33 = vshll.u32 %v9288_v1, %v6288_v39 }
 0x547   : > { %v3008_v4 = vshrl.u32 %v3007_v32, 30  ;;  %vm2948_vm7 = vcmp.lt.s32.totalorder %v12708_v24, 0  ;;  %v6297_v25 = vshll.u32 %v9289_v3, %v6288_v39  ;;  %v6300_v20 = vshll.u32 %v9290_v5, %v6288_v39 }
 0x548   : > { %v6254_v47 = vxor.u32 2147483648, %v6253_v55  ;;  %v6292_v45 = vshrl.u32 %v9288_v1, %v6289_v49  ;;  %v6295_v44 = vshrl.u32 %v9289_v3, %v6289_v49  ;;  %v6298_v50 = vshrl.u32 %v9290_v5, %v6289_v49 }
 0x549   : > { %v3009_v57 = vshll.u32 %v3008_v4, 30  ;;  %v6301_v52 = vshrl.u32 %v9291_v10, %v6289_v49  ;;  %v6303_v59 = vshll.u32 %v9291_v10, %v6288_v39  ;;  %v6304_v28 = vshrl.u32 %v9292_v22, %v6289_v49 }
 0x54a   : > { %v6255_v11 = vsel %vm6172_vm12, %v6254_v47, %v6253_v55  ;;  %v6293_v51 = vor.u32 %v6292_v45, %v6291_v18  ;;  %v6296_v41 = vor.u32 %v6295_v44, %v6294_v33  ;;  %v6299_v26 = vor.u32 %v6298_v50, %v6297_v25 }
 0x54b   : > { %v6258_v46 = vsel %vm12809_vm2, %v12613_v31, %v6255_v11  ;;  %v12878_v38 = vsub.s32 %v3006_v54, %v3009_v57  ;;  %v6282_v2 = vor.u32 8388608, %v6281_v37  ;;  %v6302_v60 = vor.u32 %v6301_v52, %v6300_v20 }
 0x54c   : > { %8946 = vcosq.f32 %v6258_v46  ;;  %v6305_v63 = vor.u32 %v6304_v28, %v6303_v59  ;;  %vm12882_vm8 = vcmp.le.f32.partialorder %v2946_v48, 0.7853982  ;;  %v3032_v40 = vsub.s32 4, %v3008_v4 }
 0x54d   : > { %8948 = vsinq.f32 %v6258_v46  ;;  %v3012_v36 = vsub.s32 0, %v12878_v38  ;;  %v6290_v42 = vshrl.u32 %v9287_v61, %v6289_v49  ;;  %vm6306_vm9 = vcmp.lt.s32.totalorder %v6287_v29, 1 }
 0x54e   : > { %vm6308_vm10 = vcmp.lt.s32.totalorder %v6287_v29, 3  ;;  %vm6309_vm11 = vcmp.lt.s32.totalorder %v6287_v29, 4  ;;  %v3053_v56 = vand.u32 2139095040, %v12860_v27  ;;  %v6314_v15 = vsel %vm6306_vm9, %v6293_v51, %v6296_v41 }
 0x54f   : > { %v8101_v53 = vmin.u32 %v3012_v36, %v12878_v38  ;;  %v6310_v54 = vsel %vm6306_vm9, %v6290_v42, %v6293_v51  ;;  %v6311_v35 = vsel %vm6309_vm11, %v6299_v26, 2102212464  ;;  %v6315_v13 = vsel %vm6309_vm11, %v6302_v60, 920167782 }
 0x550   : > { %v6312_v48 = vsel %vm6308_vm10, %v6296_v41, %v6311_v35  ;;  %v6318_v39 = vsel %vm6306_vm9, %v6296_v41, %v6299_v26  ;;  %v6319_v32 = vsel %vm6309_vm11, %v6305_v63, 1326507024  ;;  %v6264_v37 = vand.u32 3, %v6263_v16  ;;  %v12907_v41 = vpop.f32.mrb[22].mxu0 }
 0x551   : > { %v3014_v55 = vclz %v8101_v53  ;;  %v3033_v49 = vsel %vm2948_vm7, %v3032_v40, %v3008_v4  ;;  %v6322_v18 = vshll.u32 %v6282_v2, 8  ;;  %vm6307_vm12 = vcmp.lt.s32.totalorder %v6287_v29, 2 }
 0x552   : > { %v6316_v33 = vsel %vm6308_vm10, %v6299_v26, %v6315_v13  ;;  %v6320_v47 = vsel %vm6308_vm10, %v6302_v60, %v6319_v32  ;;  %v3054_v45 = vshrl.u32 %v3053_v56, 23  ;;  %v6313_v25 = vsel %vm6307_vm12, %v6310_v54, %v6312_v48 }
 0x553   : > { %v8102_v44 = vadd.s32 4294967294, %v3014_v55  ;;  %v6317_v57 = vsel %vm6307_vm12, %v6314_v15, %v6316_v33  ;;  %v6321_v50 = vsel %vm6307_vm12, %v6318_v39, %v6320_v47  ;;  %vm6266_vm13 = vcmp.eq.s32.totalorder %v6264_v37, 0 }
 0x554   : > { %v12895_v20 = vmul.u32.u64.low %v6322_v18, %v6321_v50  ;;  %v12896_v52 = vmul.u32.u64.high %v6322_v18, %v6321_v50, %v12895_v20  ;;  %v12898_v11 = vmul.u32.u64.low %v6322_v18, %v6317_v57  ;;  %v12899_v16 = vmul.u32.u64.high %v6322_v18, %v6317_v57, %v12898_v11 }
 0x555   : > { %vm6269_vm14 = vcmp.eq.s32.totalorder %v6264_v37, 2  ;;  %vm8103_vm15 = vcmp.lt.s32.totalorder %v8102_v44, 0  ;;  %v8104_v4 = vadd.s32 4294967169, %v3054_v45  ;;  %v3002_v29 = vadd.s32 %v12818_v58, %v12828_v17 }
 0x556   : > { %v8947_v51 = vpop.eup %8946  ;;  %v3017_v59 = vsel %vm8103_vm15, 0, %v8102_v44  ;;  %v3035_v28 = vsel %vm12882_vm8, 0, %v3033_v49  ;;  %v3050_v46 = vand.u32 2147483647, %v12860_v27  ;;  %v6329_v36 = vmul.u32 %v6322_v18, %v6313_v25 }
 0x557   : > { %v8949_v26 = vpop.eup %8948  ;;  %v6270_v2 = vxor.u32 2147483648, %v8947_v51  ;;  %v3018_v60 = vsub.s32 32, %v3017_v59  ;;  %v3022_v63 = vsub.s32 4294967266, %v3017_v59  ;;  %v3019_v42 = vshll.u32 %v12878_v38, %v3017_v59 }
 0x558   : > { %v6267_v40 = vxor.u32 2147483648, %v8949_v26  ;;  %vm6331_vm0 = vc.u32 %v12896_v52, %v12898_v11  ;;  %v6332_v58 = vadd.s32 1, %v12899_v16  ;;  %v3060_v54 = vadd.s32 1, %v8104_v4 }
 0x559   : > { %v6271_v17 = vsel %vm6269_vm14, %v6270_v2, %v8949_v26  ;;  %v3020_v56 = vshrl.u32 %v3002_v29, %v3018_v60  ;;  %v3023_v53 = vadd.s32 127, %v3022_v63  ;;  %vm6262_vm3 = vweird.f32 %v12613_v31 }
 0x55a   : > { %vm6265_vm1 = vcmp.lt.s32.totalorder %v6264_v37, 2  ;;  %v6268_v35 = vsel %vm6266_vm13, %v8947_v51, %v6267_v40  ;;  %v6333_v15 = vsel %vm6331_vm0, %v6332_v58, %v12899_v16  ;;  %v3039_v55 = vadd.s32 3, %v3035_v28 }
 0x55b   : > { %v6272_v48 = vsel %vm6265_vm1, %v6268_v35, %v6271_v17  ;;  %v3021_v38 = vor.u32 %v3020_v56, %v3019_v42  ;;  %v3024_v13 = vshll.u32 %v3023_v53, 23  ;;  %v6334_v39 = vadd.s32 %v6333_v15, %v6329_v36 }
 0x55c   : > { %v6273_v32 = vsel %vm6262_vm3, nan, %v6272_v48  ;;  %v3057_v49 = vand.u32 8388607, %v3050_v46  ;;  %vm3061_vm2 = vcmp.gt.s32.totalorder %v3060_v54, 0  ;;  %v985_v31 = vmul.f32 %v9649_v12, %v12857_v34 }
 0x55d   : > { %7779 = vst [vmem:[%s10000_s14 + $0x188] sm:$0xff] %v6273_v32  ;;  %v3025_v18 = vor.u32 4788187, %v3024_v13  ;;  %v6335_v33 = vadd.s32 536870912, %v6334_v39  ;;  %v3062_v47 = vsel %vm3061_vm2, %v3060_v54, 0  ;;  %v3028_v44 = vcvt.s32.f32 %v3021_v38 }
 0x55e   : > { %v3064_v37 = vand.u32 31, %v3062_v47  ;;  %v12922_v57 = vand.u32 3, %v3039_v55  ;;  %vm6276_vm4 = vcmp.lt.s32.totalorder %v12763_v21, 0  ;;  %v3058_v50 = vor.u32 8388608, %v3057_v49 }
 0x55f   : > { %v3026_v45 = vand.u32 2147483647, %v3025_v18  ;;  %v6336_v25 = vshrl.u32 %v6335_v33, 30  ;;  %v12927_v29 = vadd.f32 %v9656_v19, %v985_v31  ;;  %v3063_v42 = vshrl.u32 %v3062_v47, 5 }
 0x560   : > { %v3065_v20 = vsub.s32 32, %v3064_v37  ;;  %v3067_v51 = vshll.u32 %v9287_v61, %v3064_v37  ;;  %v3070_v34 = vshll.u32 %v9288_v1, %v3064_v37  ;;  %v3073_v63 = vshll.u32 %v9289_v3, %v3064_v37 }
 0x561   : > { %v3029_v16 = vmul.f32 %v3028_v44, %v3026_v45  ;;  %v6337_v4 = vshll.u32 %v6336_v25, 30  ;;  %v6360_v40 = vsub.s32 4, %v6336_v25  ;;  %v3076_v17 = vshll.u32 %v9290_v5, %v3064_v37 }
 0x562   : > { %v3068_v59 = vshrl.u32 %v9288_v1, %v3065_v20  ;;  %v3071_v28 = vshrl.u32 %v9289_v3, %v3065_v20  ;;  %v3074_v26 = vshrl.u32 %v9290_v5, %v3065_v20  ;;  %v3077_v36 = vshrl.u32 %v9291_v10, %v3065_v20 }
 0x563   : > { %v3030_v2 = vxor.u32 2147483648, %v3029_v16  ;;  %v12933_v60 = vsub.s32 %v6334_v39, %v6337_v4  ;;  %vm12946_vm5 = vcmp.le.f32.partialorder %v6274_v7, 0.7853982  ;;  %v3079_v13 = vshll.u32 %v9291_v10, %v3064_v37 }
 0x564   : > { %v3069_v58 = vor.u32 %v3068_v59, %v3067_v51  ;;  %v3072_v54 = vor.u32 %v3071_v28, %v3070_v34  ;;  %v3075_v35 = vor.u32 %v3074_v26, %v3073_v63  ;;  %v3078_v38 = vor.u32 %v3077_v36, %v3076_v17  ;;  %v12964_v59 = vpop.f32.mrb[22].mxu1 }
 0x565   : > { %v3031_v56 = vsel %vm2948_vm7, %v3030_v2, %v3029_v16  ;;  %v6340_v53 = vsub.s32 0, %v12933_v60  ;;  %v3080_v39 = vshrl.u32 %v9292_v22, %v3065_v20  ;;  %v12953_v55 = vshll.u32 %v3058_v50, 8 }
 0x566   : > { %v3034_v15 = vsel %vm12882_vm8, %v12708_v24, %v3031_v56  ;;  %v6381_v49 = vand.u32 2139095040, %v12927_v29  ;;  %v6361_v43 = vsel %vm6276_vm4, %v6360_v40, %v6336_v25  ;;  %v3066_v7 = vshrl.u32 %v9287_v61, %v3065_v20 }
 0x567   : > { %8950 = vcosq.f32 %v3034_v15  ;;  %v8229_v32 = vmin.u32 %v6340_v53, %v12933_v60  ;;  %v3081_v18 = vor.u32 %v3080_v39, %v3079_v13  ;;  %vm3082_vm6 = vcmp.lt.s32.totalorder %v3063_v42, 1 }
 0x568   : > { %8952 = vsinq.f32 %v3034_v15  ;;  %vm3083_vm7 = vcmp.lt.s32.totalorder %v3063_v42, 2  ;;  %vm3085_vm8 = vcmp.lt.s32.totalorder %v3063_v42, 4  ;;  %vm3084_vm9 = vcmp.lt.s32.totalorder %v3063_v42, 3 }
 0x569   : > { %v6342_v33 = vclz %v8229_v32  ;;  %v3087_v47 = vsel %vm3085_vm8, %v3075_v35, 2102212464  ;;  %v3090_v31 = vsel %vm3082_vm6, %v3069_v58, %v3072_v54  ;;  %v3091_v37 = vsel %vm3085_vm8, %v3078_v38, 920167782 }
 0x56a   : > { %vm3045_vm10 = vcmp.eq.s32.totalorder %v12922_v57, 2  ;;  %v3086_v44 = vsel %vm3082_vm6, %v3066_v7, %v3069_v58  ;;  %v3092_v50 = vsel %vm3084_vm9, %v3075_v35, %v3091_v37  ;;  %v3094_v16 = vsel %vm3082_vm6, %v3072_v54, %v3075_v35 }
 0x56b   : > { %v8230_v45 = vadd.s32 4294967294, %v6342_v33  ;;  %vm3042_vm11 = vcmp.eq.s32.totalorder %v12922_v57, 0  ;;  %v3088_v25 = vsel %vm3084_vm9, %v3072_v54, %v3087_v47  ;;  %v3093_v20 = vsel %vm3083_vm7, %v3090_v31, %v3092_v50 }
 0x56c   : > { %v3095_v4 = vsel %vm3085_vm8, %v3081_v18, 1326507024  ;;  %v6382_v51 = vshrl.u32 %v6381_v49, 23  ;;  %v12968_v28 = vmul.u32.u64.low %v12953_v55, %v3093_v20  ;;  %v12969_v26 = vmul.u32.u64.high %v12953_v55, %v3093_v20, %v12968_v28 }
 0x56d   : > { %vm8231_vm12 = vcmp.lt.s32.totalorder %v8230_v45, 0  ;;  %v3096_v34 = vsel %vm3084_vm9, %v3078_v38, %v3095_v4  ;;  %vm3038_vm13 = vweird.f32 %v12708_v24  ;;  %v6378_v36 = vand.u32 2147483647, %v12927_v29 }
 0x56e   : > { %v6345_v2 = vsel %vm8231_vm12, 0, %v8230_v45  ;;  %v3097_v63 = vsel %vm3083_vm7, %v3094_v16, %v3096_v34  ;;  %v8232_v40 = vadd.s32 4294967169, %v6382_v51  ;;  %v6330_v58 = vadd.s32 %v12898_v11, %v12896_v52 }
 0x56f   : > { %v6346_v17 = vsub.s32 32, %v6345_v2  ;;  %v6350_v56 = vsub.s32 4294967266, %v6345_v2  ;;  %v6363_v53 = vsel %vm12946_vm5, 0, %v6361_v43  ;;  %v3089_v54 = vsel %vm3083_vm7, %v3086_v44, %v3088_v25 }
 0x570   : > { %v12981_v35 = vmul.u32.u64.low %v12953_v55, %v3097_v63  ;;  %v12982_v15 = vmul.u32.u64.high %v12953_v55, %v3097_v63, %v12981_v35  ;;  %v6388_v38 = vadd.s32 1, %v8232_v40  ;;  %v6347_v39 = vshll.u32 %v12933_v60, %v6345_v2 }
 0x571   : > { %v8951_v13 = vpop.eup %8950  ;;  %v6348_v32 = vshrl.u32 %v6330_v58, %v6346_v17  ;;  %v6351_v49 = vadd.s32 127, %v6350_v56  ;;  %v3108_v7 = vadd.s32 1, %v12969_v26  ;;  %v6367_v18 = vadd.s32 3, %v6363_v53 }
 0x572   : > { %v8953_v52 = vpop.eup %8952  ;;  %v3046_v11 = vxor.u32 2147483648, %v8951_v13  ;;  %v6385_v43 = vand.u32 8388607, %v6378_v36  ;;  %vm6389_vm14 = vcmp.gt.s32.totalorder %v6388_v38, 0  ;;  %v3105_v60 = vmul.u32 %v12953_v55, %v3089_v54 }
 0x573   : > { %v3043_v42 = vxor.u32 2147483648, %v8953_v52  ;;  %v6349_v33 = vor.u32 %v6348_v32, %v6347_v39  ;;  %v6352_v47 = vshll.u32 %v6351_v49, 23  ;;  %v6390_v31 = vsel %vm6389_vm14, %v6388_v38, 0 }
 0x574   : > { %v3047_v37 = vsel %vm3045_vm10, %v3046_v11, %v8953_v52  ;;  %vm3107_vm15 = vc.u32 %v12982_v15, %v12968_v28  ;;  %v814_v45 = vadd.f32 %v12558_v0, %v9643_v6  ;;  %vm3041_vm0 = vcmp.lt.s32.totalorder %v12922_v57, 2 }
 0x575   : > { %v3044_v44 = vsel %vm3042_vm11, %v8951_v13, %v3043_v42  ;;  %v6353_v50 = vor.u32 4788187, %v6352_v47  ;;  %v3109_v16 = vsel %vm3107_vm15, %v3108_v7, %v12969_v26  ;;  %v12999_v20 = vand.u32 3, %v6367_v18 }
 0x576   : > { %v3048_v25 = vsel %vm3041_vm0, %v3044_v44, %v3047_v37  ;;  %v3110_v4 = vadd.s32 %v3109_v16, %v3105_v60  ;;  %v6392_v51 = vand.u32 31, %v6390_v31  ;;  %v6356_v2 = vcvt.s32.f32 %v6349_v33 }
 0x577   : > { %v3049_v55 = vsel %vm3038_vm13, nan, %v3048_v25  ;;  %v6354_v34 = vand.u32 2147483647, %v6353_v50  ;;  %v6386_v63 = vor.u32 8388608, %v6385_v43  ;;  %v6391_v40 = vshrl.u32 %v6390_v31, 5 }
 0x578   : > { %7748 = vst [vmem:[%s10000_s14 + $0x90] sm:$0xff] %v3049_v55  ;;  %v3111_v0 = vadd.s32 536870912, %v3110_v4  ;;  %v6393_v58 = vsub.s32 32, %v6392_v51  ;;  %v954_v57 = vmul.f32 %v9647_v9, %v814_v45  ;;  %v6395_v26 = vshll.u32 %v9287_v61, %v6392_v51 }
 0x579   : > { %v6357_v17 = vmul.f32 %v6356_v2, %v6354_v34  ;;  %v6398_v56 = vshll.u32 %v9288_v1, %v6392_v51  ;;  %v6401_v53 = vshll.u32 %v9289_v3, %v6392_v51  ;;  %v6404_v38 = vshll.u32 %v9290_v5, %v6392_v51 }
 0x57a   : > { %v3112_v54 = vshrl.u32 %v3111_v0, 30  ;;  %v6396_v24 = vshrl.u32 %v9288_v1, %v6393_v58  ;;  %v6399_v35 = vshrl.u32 %v9289_v3, %v6393_v58  ;;  %v6402_v39 = vshrl.u32 %v9290_v5, %v6393_v58 }
 0x57b   : > { %v6358_v13 = vxor.u32 2147483648, %v6357_v17  ;;  %v6405_v32 = vshrl.u32 %v9291_v10, %v6393_v58  ;;  %v6408_v49 = vshrl.u32 %v9292_v22, %v6393_v58  ;;  %v6407_v11 = vshll.u32 %v9291_v10, %v6392_v51 }
 0x57c   : > { %v3113_v7 = vshll.u32 %v3112_v54, 30  ;;  %v6397_v52 = vor.u32 %v6396_v24, %v6395_v26  ;;  %v13015_v18 = vshll.u32 %v6386_v63, 8  ;;  %v6400_v42 = vor.u32 %v6399_v35, %v6398_v56 }
 0x57d   : > { %v6359_v43 = vsel %vm6276_vm4, %v6358_v13, %v6357_v17  ;;  %v6403_v33 = vor.u32 %v6402_v39, %v6401_v53  ;;  %v6406_v47 = vor.u32 %v6405_v32, %v6404_v38  ;;  %v6409_v60 = vor.u32 %v6408_v49, %v6407_v11 }
 0x57e   : > { %v6362_v31 = vsel %vm12946_vm5, %v12763_v21, %v6359_v43  ;;  %v13022_v37 = vsub.s32 %v3110_v4, %v3113_v7  ;;  %v13025_v45 = vadd.f32 %v9652_v14, %v954_v57  ;;  %vm6410_vm3 = vcmp.lt.s32.totalorder %v6391_v40, 1  ;;  %v13056_v7 = vpop.f32.mrb[23].mxu0 }
 0x57f   : > { %8954 = vcosq.f32 %v6362_v31  ;;  %vm6411_vm1 = vcmp.lt.s32.totalorder %v6391_v40, 2  ;;  %vm6413_vm2 = vcmp.lt.s32.totalorder %v6391_v40, 4  ;;  %vm6412_vm4 = vcmp.lt.s32.totalorder %v6391_v40, 3 }
 0x580   : > { %8956 = vsinq.f32 %v6362_v31  ;;  %v3116_v44 = vsub.s32 0, %v13022_v37  ;;  %v6415_v50 = vsel %vm6413_vm2, %v6403_v33, 2102212464  ;;  %v3136_v16 = vsub.s32 4, %v3112_v54 }
 0x581   : > { %v6394_v25 = vshrl.u32 %v9287_v61, %v6393_v58  ;;  %v6418_v48 = vsel %vm6410_vm3, %v6397_v52, %v6400_v42  ;;  %v6419_v51 = vsel %vm6413_vm2, %v6406_v47, 920167782  ;;  %v6422_v34 = vsel %vm6410_vm3, %v6400_v42, %v6403_v33 }
 0x582   : > { %v8105_v4 = vmin.u32 %v3116_v44, %v13022_v37  ;;  %v6420_v55 = vsel %vm6412_vm4, %v6403_v33, %v6419_v51  ;;  %v6423_v2 = vsel %vm6413_vm2, %v6409_v60, 1326507024  ;;  %v6416_v0 = vsel %vm6412_vm4, %v6400_v42, %v6415_v50 }
 0x583   : > { %v6414_v63 = vsel %vm6410_vm3, %v6394_v25, %v6397_v52  ;;  %v6421_v57 = vsel %vm6411_vm1, %v6418_v48, %v6420_v55  ;;  %v6424_v17 = vsel %vm6412_vm4, %v6406_v47, %v6423_v2  ;;  %vm3052_vm5 = vcmp.lt.s32.totalorder %v12860_v27, 0 }
 0x584   : > { %v3118_v26 = vclz %v8105_v4  ;;  %v3137_v56 = vsel %vm3052_vm5, %v3136_v16, %v3112_v54  ;;  %v6425_v58 = vsel %vm6411_vm1, %v6422_v34, %v6424_v17  ;;  %vm6366_vm6 = vweird.f32 %v12763_v21 }
 0x585   : > { %v13036_v53 = vmul.u32.u64.low %v13015_v18, %v6421_v57  ;;  %v13037_v24 = vmul.u32.u64.high %v13015_v18, %v6421_v57, %v13036_v53  ;;  %v6417_v38 = vsel %vm6411_vm1, %v6414_v63, %v6416_v0  ;;  %vm6370_vm7 = vcmp.eq.s32.totalorder %v12999_v20, 0 }
 0x586   : > { %v8106_v35 = vadd.s32 4294967294, %v3118_v26  ;;  %v13043_v13 = vmul.u32.u64.low %v13015_v18, %v6425_v58  ;;  %v13044_v39 = vmul.u32.u64.high %v13015_v18, %v6425_v58, %v13043_v13  ;;  %vm13049_vm8 = vcmp.le.f32.partialorder %v3050_v46, 0.7853982 }
 0x587   : > { %v3157_v32 = vand.u32 2139095040, %v13025_v45  ;;  %v894_v49 = vadd.f32 %v12659_v30, %v9643_v6  ;;  %vm6373_vm9 = vcmp.eq.s32.totalorder %v12999_v20, 2  ;;  %v3106_v40 = vadd.s32 %v12968_v28, %v12982_v15 }
 0x588   : > { %vm8107_vm10 = vcmp.lt.s32.totalorder %v8106_v35, 0  ;;  %v3139_v52 = vsel %vm13049_vm8, 0, %v3137_v56  ;;  %v6433_v43 = vmul.u32 %v13015_v18, %v6417_v38  ;;  %v6436_v42 = vadd.s32 1, %v13037_v24 }
 0x589   : > { %v8955_v46 = vpop.eup %8954  ;;  %v3121_v11 = vsel %vm8107_vm10, 0, %v8106_v35  ;;  %v3158_v33 = vshrl.u32 %v3157_v32, 23  ;;  %v3154_v44 = vand.u32 2147483647, %v13025_v45  ;;  %vm6435_vm11 = vc.u32 %v13044_v39, %v13036_v53 }
 0x58a   : > { %v8957_v47 = vpop.eup %8956  ;;  %v6374_v30 = vxor.u32 2147483648, %v8955_v46  ;;  %v3122_v31 = vsub.s32 32, %v3121_v11  ;;  %v3126_v60 = vsub.s32 4294967266, %v3121_v11  ;;  %v3123_v28 = vshll.u32 %v13022_v37, %v3121_v11 }
 0x58b   : > { %v6371_v50 = vxor.u32 2147483648, %v8957_v47  ;;  %v8108_v15 = vadd.s32 4294967169, %v3158_v33  ;;  %v6437_v48 = vsel %vm6435_vm11, %v6436_v42, %v13037_v24  ;;  %vm6369_vm12 = vcmp.lt.s32.totalorder %v12999_v20, 2 }
 0x58c   : > { %v6375_v16 = vsel %vm6373_vm9, %v6374_v30, %v8957_v47  ;;  %v3124_v18 = vshrl.u32 %v3106_v40, %v3122_v31  ;;  %v3127_v25 = vadd.s32 127, %v3126_v60  ;;  %v6438_v4 = vadd.s32 %v6437_v48, %v6433_v43 }
 0x58d   : > { %v6372_v51 = vsel %vm6370_vm7, %v8955_v46, %v6371_v50  ;;  %v3164_v55 = vadd.s32 1, %v8108_v15  ;;  %v816_v63 = vadd.f32 %v12728_v23, %v9645_v8  ;;  %v3143_v57 = vadd.s32 3, %v3139_v52 }
 0x58e   : > { %v6376_v37 = vsel %vm6369_vm12, %v6372_v51, %v6375_v16  ;;  %v3125_v34 = vor.u32 %v3124_v18, %v3123_v28  ;;  %v3128_v2 = vshll.u32 %v3127_v25, 23  ;;  %v6439_v17 = vadd.s32 536870912, %v6438_v4 }
 0x58f   : > { %v6377_v0 = vsel %vm6366_vm6, nan, %v6376_v37  ;;  %vm3165_vm13 = vcmp.gt.s32.totalorder %v3164_v55, 0  ;;  %v3161_v20 = vand.u32 8388607, %v3154_v44  ;;  %v986_v58 = vmul.f32 %v9647_v9, %v894_v49 }
 0x590   : > { %7780 = vst [vmem:[%s10000_s14 + $0x190] sm:$0xff] %v6377_v0  ;;  %v3129_v26 = vor.u32 4788187, %v3128_v2  ;;  %v3166_v56 = vsel %vm3165_vm13, %v3164_v55, 0  ;;  %v6440_v24 = vshrl.u32 %v6439_v17, 30  ;;  %v3132_v13 = vcvt.s32.f32 %v3125_v34 }
 0x591   : > { %v3168_v35 = vand.u32 31, %v3166_v56  ;;  %v13083_v32 = vand.u32 3, %v3143_v57  ;;  %vm6380_vm14 = vcmp.lt.s32.totalorder %v12927_v29, 0  ;;  %v3162_v52 = vor.u32 8388608, %v3161_v20 }
 0x592   : > { %v3130_v38 = vand.u32 2147483647, %v3129_v26  ;;  %v6441_v23 = vshll.u32 %v6440_v24, 30  ;;  %v13087_v46 = vadd.f32 %v9652_v14, %v986_v58  ;;  %v13090_v11 = vmul.f32 %v9649_v12, %v816_v63 }
 0x593   : > { %v3169_v21 = vsub.s32 32, %v3168_v35  ;;  %v6434_v49 = vadd.s32 %v13036_v53, %v13044_v39  ;;  %v13096_v42 = vshrl.u32 %v3166_v56, 5  ;;  %v3171_v30 = vshll.u32 %v9287_v61, %v3168_v35  ;;  %v13128_v56 = vpop.f32.mrb[23].mxu1 }
 0x594   : > { %v3133_v40 = vmul.f32 %v3132_v13, %v3130_v38  ;;  %v13094_v43 = vsub.s32 %v6438_v4, %v6441_v23  ;;  %v3174_v28 = vshll.u32 %v9288_v1, %v3168_v35  ;;  %v3177_v15 = vshll.u32 %v9289_v3, %v3168_v35 }
 0x595   : > { %v3172_v33 = vshrl.u32 %v9288_v1, %v3169_v21  ;;  %v3175_v31 = vshrl.u32 %v9289_v3, %v3169_v21  ;;  %v3178_v60 = vshrl.u32 %v9290_v5, %v3169_v21  ;;  %v3181_v53 = vshrl.u32 %v9291_v10, %v3169_v21 }
 0x596   : > { %v3134_v47 = vxor.u32 2147483648, %v3133_v40  ;;  %v6444_v50 = vsub.s32 0, %v13094_v43  ;;  %v6464_v16 = vsub.s32 4, %v6440_v24  ;;  %v3180_v25 = vshll.u32 %v9290_v5, %v3168_v35 }
 0x597   : > { %v3173_v18 = vor.u32 %v3172_v33, %v3171_v30  ;;  %v3176_v4 = vor.u32 %v3175_v31, %v3174_v28  ;;  %v3179_v55 = vor.u32 %v3178_v60, %v3177_v15  ;;  %v3183_v34 = vshll.u32 %v9291_v10, %v3168_v35 }
 0x598   : > { %v3135_v39 = vsel %vm3052_vm5, %v3134_v47, %v3133_v40  ;;  %v8233_v51 = vmin.u32 %v6444_v50, %v13094_v43  ;;  %v3182_v37 = vor.u32 %v3181_v53, %v3180_v25  ;;  %v3184_v2 = vshrl.u32 %v9292_v22, %v3169_v21 }
 0x599   : > { %v3138_v48 = vsel %vm13049_vm8, %v12860_v27, %v3135_v39  ;;  %vm13117_vm15 = vcmp.le.f32.partialorder %v6378_v36, 0.7853982  ;;  %v13121_v54 = vshll.u32 %v3162_v52, 8  ;;  %v6485_v57 = vand.u32 2139095040, %v13087_v46 }
 0x59a   : > { %8958 = vcosq.f32 %v3138_v48  ;;  %v6446_v0 = vclz %v8233_v51  ;;  %v6465_v17 = vsel %vm6380_vm14, %v6464_v16, %v6440_v24  ;;  %v3170_v26 = vshrl.u32 %v9287_v61, %v3169_v21 }
 0x59b   : > { %8960 = vsinq.f32 %v3138_v48  ;;  %v3185_v20 = vor.u32 %v3184_v2, %v3183_v34  ;;  %vm3186_vm0 = vcmp.lt.s32.totalorder %v13096_v42, 1  ;;  %vm3188_vm3 = vcmp.lt.s32.totalorder %v13096_v42, 3 }
 0x59c   : > { %v8234_v58 = vadd.s32 4294967294, %v6446_v0  ;;  %vm3189_vm1 = vcmp.lt.s32.totalorder %v13096_v42, 4  ;;  %v3194_v36 = vsel %vm3186_vm0, %v3173_v18, %v3176_v4  ;;  %v3198_v24 = vsel %vm3186_vm0, %v3176_v4, %v3179_v55 }
 0x59d   : > { %v3191_v35 = vsel %vm3189_vm1, %v3179_v55, 2102212464  ;;  %v3195_v38 = vsel %vm3189_vm1, %v3182_v37, 920167782  ;;  %v3199_v13 = vsel %vm3189_vm1, %v3185_v20, 1326507024  ;;  %v3190_v52 = vsel %vm3186_vm0, %v3170_v26, %v3173_v18 }
 0x59e   : > { %vm3146_vm2 = vcmp.eq.s32.totalorder %v13083_v32, 0  ;;  %vm8235_vm4 = vcmp.lt.s32.totalorder %v8234_v58, 0  ;;  %vm3187_vm5 = vcmp.lt.s32.totalorder %v13096_v42, 2  ;;  %v3196_v23 = vsel %vm3188_vm3, %v3179_v55, %v3195_v38 }
 0x59f   : > { %v3200_v21 = vsel %vm3188_vm3, %v3182_v37, %v3199_v13  ;;  %vm3145_vm6 = vcmp.lt.s32.totalorder %v13083_v32, 2  ;;  %v6449_v40 = vsel %vm8235_vm4, 0, %v8234_v58  ;;  %v3197_v33 = vsel %vm3187_vm5, %v3194_v36, %v3196_v23 }
 0x5a0   : > { %v3201_v47 = vsel %vm3187_vm5, %v3198_v24, %v3200_v21  ;;  %vm3142_vm7 = vweird.f32 %v12860_v27  ;;  %v6450_v30 = vsub.s32 32, %v6449_v40  ;;  %v6454_v31 = vsub.s32 4294967266, %v6449_v40 }
 0x5a1   : > { %v3192_v60 = vsel %vm3188_vm3, %v3176_v4, %v3191_v35  ;;  %v6486_v50 = vshrl.u32 %v6485_v57, 23  ;;  %v13153_v28 = vmul.u32.u64.low %v13121_v54, %v3201_v47  ;;  %v13154_v15 = vmul.u32.u64.high %v13121_v54, %v3201_v47, %v13153_v28 }
 0x5a2   : > { %v13157_v53 = vmul.u32.u64.low %v13121_v54, %v3197_v33  ;;  %v13158_v39 = vmul.u32.u64.high %v13121_v54, %v3197_v33, %v13157_v53  ;;  %v6451_v16 = vshll.u32 %v13094_v43, %v6449_v40  ;;  %v6452_v18 = vshrl.u32 %v6434_v49, %v6450_v30 }
 0x5a3   : > { %v6455_v25 = vadd.s32 127, %v6454_v31  ;;  %v8236_v48 = vadd.s32 4294967169, %v6486_v50  ;;  %vm3149_vm8 = vcmp.eq.s32.totalorder %v13083_v32, 2  ;;  %v6467_v4 = vsel %vm13117_vm15, 0, %v6465_v17 }
 0x5a4   : > { %v8959_v51 = vpop.eup %8958  ;;  %v3193_v55 = vsel %vm3187_vm5, %v3190_v52, %v3192_v60  ;;  %v6482_v37 = vand.u32 2147483647, %v13087_v46  ;;  %v6453_v0 = vor.u32 %v6452_v18, %v6451_v16  ;;  %vm3211_vm9 = vc.u32 %v13154_v15, %v13157_v53 }
 0x5a5   : > { %v8961_v34 = vpop.eup %8960  ;;  %v3150_v2 = vxor.u32 2147483648, %v8959_v51  ;;  %v6456_v57 = vshll.u32 %v6455_v25, 23  ;;  %v6492_v26 = vadd.s32 1, %v8236_v48  ;;  %v3212_v49 = vadd.s32 1, %v13158_v39 }
 0x5a6   : > { %v3147_v43 = vxor.u32 2147483648, %v8961_v34  ;;  %v13173_v17 = vadd.f32 %v9656_v19, %v13090_v11  ;;  %v3209_v58 = vmul.u32 %v13121_v54, %v3193_v55  ;;  %v6471_v35 = vadd.s32 3, %v6467_v4 }
 0x5a7   : > { %v3151_v42 = vsel %vm3149_vm8, %v3150_v2, %v8961_v34  ;;  %v6457_v20 = vor.u32 4788187, %v6456_v57  ;;  %vm6493_vm10 = vcmp.gt.s32.totalorder %v6492_v26, 0  ;;  %v3213_v38 = vsel %vm3211_vm9, %v3212_v49, %v13158_v39 }
 0x5a8   : > { %v3148_v36 = vsel %vm3146_vm2, %v8959_v51, %v3147_v43  ;;  %v6494_v24 = vsel %vm6493_vm10, %v6492_v26, 0  ;;  %v6460_v21 = vcvt.s32.f32 %v6453_v0  ;;  %v3214_v40 = vadd.s32 %v3213_v38, %v3209_v58 }
 0x5a9   : > { %v3152_v13 = vsel %vm3145_vm6, %v3148_v36, %v3151_v42  ;;  %v6458_v23 = vand.u32 2147483647, %v6457_v20  ;;  %v6496_v52 = vand.u32 31, %v6494_v24  ;;  %v6489_v47 = vand.u32 8388607, %v6482_v37 }
 0x5aa   : > { %v3153_v11 = vsel %vm3142_vm7, nan, %v3152_v13  ;;  %v3215_v33 = vadd.s32 536870912, %v3214_v40  ;;  %v13188_v30 = vadd.f32 %v12800_v62, %v9645_v8  ;;  %v13190_v31 = vand.u32 3, %v6471_v35 }
 0x5ab   : > { %7749 = vst [vmem:[%s10000_s14 + $0x98] sm:$0xff] %v3153_v11  ;;  %v6461_v54 = vmul.f32 %v6460_v21, %v6458_v23  ;;  %v6495_v32 = vshrl.u32 %v6494_v24, 5  ;;  %v6497_v60 = vsub.s32 32, %v6496_v52  ;;  %v3261_v50 = vand.u32 2139095040, %v13173_v17 }
 0x5ac   : > { %v13193_v27 = vshrl.u32 %v3215_v33, 30  ;;  %v6499_v39 = vshll.u32 %v9287_v61, %v6496_v52  ;;  %v6502_v16 = vshll.u32 %v9288_v1, %v6496_v52  ;;  %v6505_v62 = vshll.u32 %v9289_v3, %v6496_v52 }
 0x5ad   : > { %v6462_v28 = vxor.u32 2147483648, %v6461_v54  ;;  %v6500_v18 = vshrl.u32 %v9288_v1, %v6497_v60  ;;  %v6503_v25 = vshrl.u32 %v9289_v3, %v6497_v60  ;;  %v6506_v48 = vshrl.u32 %v9290_v5, %v6497_v60 }
 0x5ae   : > { %v3217_v4 = vshll.u32 %v13193_v27, 30  ;;  %v6508_v55 = vshll.u32 %v9290_v5, %v6496_v52  ;;  %v6509_v34 = vshrl.u32 %v9291_v10, %v6497_v60  ;;  %v6490_v49 = vor.u32 8388608, %v6489_v47 }
 0x5af   : > { %v6463_v51 = vsel %vm6380_vm14, %v6462_v28, %v6461_v54  ;;  %v6501_v0 = vor.u32 %v6500_v18, %v6499_v39  ;;  %v6504_v57 = vor.u32 %v6503_v25, %v6502_v16  ;;  %v6507_v26 = vor.u32 %v6506_v48, %v6505_v62 }
 0x5b0   : > { %v6466_v2 = vsel %vm13117_vm15, %v12927_v29, %v6463_v51  ;;  %v13209_v43 = vsub.s32 %v3214_v40, %v3217_v4  ;;  %v6510_v42 = vor.u32 %v6509_v34, %v6508_v55  ;;  %v6511_v20 = vshll.u32 %v9291_v10, %v6496_v52 }
 0x5b1   : > { %8962 = vcosq.f32 %v6466_v2  ;;  %v6512_v58 = vshrl.u32 %v9292_v22, %v6497_v60  ;;  %v3262_v36 = vshrl.u32 %v3261_v50, 23  ;;  %vm3156_vm11 = vcmp.lt.s32.totalorder %v13025_v45, 0 }
 0x5b2   : > { %8964 = vsinq.f32 %v6466_v2  ;;  %v3220_v35 = vsub.s32 0, %v13209_v43  ;;  %vm6514_vm12 = vcmp.lt.s32.totalorder %v6495_v32, 1  ;;  %vm6516_vm13 = vcmp.lt.s32.totalorder %v6495_v32, 3 }
 0x5b3   : > { %vm6517_vm14 = vcmp.lt.s32.totalorder %v6495_v32, 4  ;;  %v6513_v63 = vor.u32 %v6512_v58, %v6511_v20  ;;  %v6522_v24 = vsel %vm6514_vm12, %v6501_v0, %v6504_v57  ;;  %v6498_v21 = vshrl.u32 %v9287_v61, %v6497_v60  ;;  %v13251_v58 = vpop.f32.mrb[24].mxu0 }
 0x5b4   : > { %v6519_v38 = vsel %vm6517_vm14, %v6507_v26, 2102212464  ;;  %v6523_v13 = vsel %vm6517_vm14, %v6510_v42, 920167782  ;;  %v8109_v23 = vmin.u32 %v3220_v35, %v13209_v43  ;;  %vm6515_vm15 = vcmp.lt.s32.totalorder %v6495_v32, 2 }
 0x5b5   : > { %v6524_v40 = vsel %vm6516_vm13, %v6507_v26, %v6523_v13  ;;  %v6526_v52 = vsel %vm6514_vm12, %v6504_v57, %v6507_v26  ;;  %v6527_v54 = vsel %vm6517_vm14, %v6513_v63, 1326507024  ;;  %v6530_v33 = vshll.u32 %v6490_v49, 8 }
 0x5b6   : > { %v6525_v11 = vsel %vm6515_vm15, %v6522_v24, %v6524_v40  ;;  %vm6473_vm0 = vcmp.lt.s32.totalorder %v13190_v31, 2  ;;  %vm13224_vm3 = vcmp.le.f32.partialorder %v3154_v44, 0.7853982  ;;  %v3222_v50 = vclz %v8109_v23 }
 0x5b7   : > { %v6518_v60 = vsel %vm6514_vm12, %v6498_v21, %v6501_v0  ;;  %v6520_v28 = vsel %vm6516_vm13, %v6504_v57, %v6519_v38  ;;  %vm6470_vm1 = vweird.f32 %v12927_v29  ;;  %v3240_v39 = vsub.s32 4, %v13193_v27 }
 0x5b8   : > { %v6528_v16 = vsel %vm6516_vm13, %v6510_v42, %v6527_v54  ;;  %v13233_v18 = vmul.u32.u64.low %v6530_v33, %v6525_v11  ;;  %v13234_v25 = vmul.u32.u64.high %v6530_v33, %v6525_v11, %v13233_v18  ;;  %vm6474_vm2 = vcmp.eq.s32.totalorder %v13190_v31, 0 }
 0x5b9   : > { %v8110_v44 = vadd.s32 4294967294, %v3222_v50  ;;  %v6529_v62 = vsel %vm6515_vm15, %v6526_v52, %v6528_v16  ;;  %v8112_v48 = vadd.s32 4294967169, %v3262_v36  ;;  %vm6477_vm4 = vcmp.eq.s32.totalorder %v13190_v31, 2 }
 0x5ba   : > { %v6521_v51 = vsel %vm6515_vm15, %v6518_v60, %v6520_v28  ;;  %v13241_v4 = vmul.u32.u64.low %v6530_v33, %v6529_v62  ;;  %v13242_v55 = vmul.u32.u64.high %v6530_v33, %v6529_v62, %v13241_v4  ;;  %v3210_v2 = vadd.s32 %v13157_v53, %v13154_v15 }
 0x5bb   : > { %v8963_v34 = vpop.eup %8962  ;;  %vm8111_vm5 = vcmp.lt.s32.totalorder %v8110_v44, 0  ;;  %v3258_v0 = vand.u32 2147483647, %v13173_v17  ;;  %v3268_v57 = vadd.s32 1, %v8112_v48  ;;  %v3241_v20 = vsel %vm3156_vm11, %v3240_v39, %v13193_v27 }
 0x5bc   : > { %v8965_v26 = vpop.eup %8964  ;;  %v6478_v49 = vxor.u32 2147483648, %v8963_v34  ;;  %v3225_v42 = vsel %vm8111_vm5, 0, %v8110_v44  ;;  %v6540_v32 = vadd.s32 1, %v13234_v25  ;;  %v6537_v38 = vmul.u32 %v6530_v33, %v6521_v51 }
 0x5bd   : > { %v6475_v36 = vxor.u32 2147483648, %v8965_v26  ;;  %v3226_v35 = vsub.s32 32, %v3225_v42  ;;  %v3230_v63 = vsub.s32 4294967266, %v3225_v42  ;;  %v3227_v53 = vshll.u32 %v13209_v43, %v3225_v42 }
 0x5be   : > { %v6479_v15 = vsel %vm6477_vm4, %v6478_v49, %v8965_v26  ;;  %vm6539_vm6 = vc.u32 %v13242_v55, %v13233_v18  ;;  %vm3269_vm7 = vcmp.gt.s32.totalorder %v3268_v57, 0  ;;  %v3243_v40 = vsel %vm13224_vm3, 0, %v3241_v20 }
 0x5bf   : > { %v6476_v27 = vsel %vm6474_vm2, %v8963_v34, %v6475_v36  ;;  %v3228_v24 = vshrl.u32 %v3210_v2, %v3226_v35  ;;  %v3231_v13 = vadd.s32 127, %v3230_v63  ;;  %v6541_v23 = vsel %vm6539_vm6, %v6540_v32, %v13234_v25 }
 0x5c0   : > { %v6480_v21 = vsel %vm6473_vm0, %v6476_v27, %v6479_v15  ;;  %v6542_v11 = vadd.s32 %v6541_v23, %v6537_v38  ;;  %v3270_v52 = vsel %vm3269_vm7, %v3268_v57, 0  ;;  %v3265_v50 = vand.u32 8388607, %v3258_v0 }
 0x5c1   : > { %v6481_v43 = vsel %vm6470_vm1, nan, %v6480_v21  ;;  %v3229_v54 = vor.u32 %v3228_v24, %v3227_v53  ;;  %v3232_v33 = vshll.u32 %v3231_v13, 23  ;;  %v3272_v28 = vand.u32 31, %v3270_v52 }
 0x5c2   : > { %7781 = vst [vmem:[%s10000_s14 + $0x198] sm:$0xff] %v6481_v43  ;;  %v6543_v60 = vadd.s32 536870912, %v6542_v11  ;;  %v13272_v31 = vadd.f32 %v12907_v41, %v9643_v6  ;;  %v3247_v16 = vadd.s32 3, %v3243_v40  ;;  %v987_v29 = vmul.f32 %v9649_v12, %v13188_v30 }
 0x5c3   : > { %v3233_v39 = vor.u32 4788187, %v3232_v33  ;;  %v3273_v44 = vsub.s32 32, %v3272_v28  ;;  %v3236_v48 = vcvt.s32.f32 %v3229_v54  ;;  %v3266_v51 = vor.u32 8388608, %v3265_v50 }
 0x5c4   : > { %v6544_v25 = vshrl.u32 %v6543_v60, 30  ;;  %v13276_v4 = vshrl.u32 %v3270_v52, 5  ;;  %v3275_v2 = vshll.u32 %v9287_v61, %v3272_v28  ;;  %v3278_v26 = vshll.u32 %v9288_v1, %v3272_v28 }
 0x5c5   : > { %v3234_v62 = vand.u32 2147483647, %v3233_v39  ;;  %v3276_v57 = vshrl.u32 %v9288_v1, %v3273_v44  ;;  %v3279_v49 = vshrl.u32 %v9289_v3, %v3273_v44  ;;  %v3282_v42 = vshrl.u32 %v9290_v5, %v3273_v44 }
 0x5c6   : > { %v6545_v34 = vshll.u32 %v6544_v25, 30  ;;  %v3285_v20 = vshrl.u32 %v9291_v10, %v3273_v44  ;;  %v3281_v32 = vshll.u32 %v9289_v3, %v3272_v28  ;;  %v3284_v36 = vshll.u32 %v9290_v5, %v3272_v28 }
 0x5c7   : > { %v3237_v41 = vmul.f32 %v3236_v48, %v3234_v62  ;;  %v3288_v35 = vshrl.u32 %v9292_v22, %v3273_v44  ;;  %v13289_v38 = vand.u32 3, %v3247_v16  ;;  %v3277_v15 = vor.u32 %v3276_v57, %v3275_v2 }
 0x5c8   : > { %v13284_v30 = vsub.s32 %v6542_v11, %v6545_v34  ;;  %v3280_v53 = vor.u32 %v3279_v49, %v3278_v26  ;;  %vm6484_vm8 = vcmp.lt.s32.totalorder %v13087_v46, 0  ;;  %v3283_v24 = vor.u32 %v3282_v42, %v3281_v32 }
 0x5c9   : > { %v3238_v63 = vxor.u32 2147483648, %v3237_v41  ;;  %v3286_v13 = vor.u32 %v3285_v20, %v3284_v36  ;;  %v3287_v23 = vshll.u32 %v9291_v10, %v3272_v28  ;;  %vm3290_vm9 = vcmp.lt.s32.totalorder %v13276_v4, 1 }
 0x5ca   : > { %v6548_v27 = vsub.s32 0, %v13284_v30  ;;  %v3306_v40 = vshll.u32 %v3266_v51, 8  ;;  %v13298_v11 = vadd.f32 %v9656_v19, %v987_v29  ;;  %vm3293_vm10 = vcmp.lt.s32.totalorder %v13276_v4, 4 }
 0x5cb   : > { %v3239_v21 = vsel %vm3156_vm11, %v3238_v63, %v3237_v41  ;;  %v3289_v54 = vor.u32 %v3288_v35, %v3287_v23  ;;  %v3274_v33 = vshrl.u32 %v9287_v61, %v3273_v44  ;;  %v3298_v50 = vsel %vm3290_vm9, %v3277_v15, %v3280_v53  ;;  %v13336_v63 = vpop.f32.mrb[24].mxu1 }
 0x5cc   : > { %v3242_v52 = vsel %vm13224_vm3, %v13025_v45, %v3239_v21  ;;  %v8237_v43 = vmin.u32 %v6548_v27, %v13284_v30  ;;  %v3299_v60 = vsel %vm3293_vm10, %v3286_v13, 920167782  ;;  %vm3292_vm11 = vcmp.lt.s32.totalorder %v13276_v4, 3 }
 0x5cd   : > { %8966 = vcosq.f32 %v3242_v52  ;;  %v3295_v47 = vsel %vm3293_vm10, %v3283_v24, 2102212464  ;;  %v6568_v39 = vsub.s32 4, %v6544_v25  ;;  %vm3291_vm12 = vcmp.lt.s32.totalorder %v13276_v4, 2 }
 0x5ce   : > { %8968 = vsinq.f32 %v3242_v52  ;;  %v6550_v28 = vclz %v8237_v43  ;;  %v3300_v16 = vsel %vm3292_vm11, %v3283_v24, %v3299_v60  ;;  %v3302_v44 = vsel %vm3290_vm9, %v3280_v53, %v3283_v24 }
 0x5cf   : > { %v3294_v62 = vsel %vm3290_vm9, %v3274_v33, %v3277_v15  ;;  %v3301_v48 = vsel %vm3291_vm12, %v3298_v50, %v3300_v16  ;;  %v3303_v51 = vsel %vm3293_vm10, %v3289_v54, 1326507024  ;;  %v3296_v34 = vsel %vm3292_vm11, %v3280_v53, %v3295_v47 }
 0x5d0   : > { %v8238_v29 = vadd.s32 4294967294, %v6550_v28  ;;  %v3304_v2 = vsel %vm3292_vm11, %v3286_v13, %v3303_v51  ;;  %v13322_v57 = vmul.u32.u64.low %v3306_v40, %v3301_v48  ;;  %v13323_v26 = vmul.u32.u64.high %v3306_v40, %v3301_v48, %v13322_v57 }
 0x5d1   : > { %v6538_v41 = vadd.s32 %v13233_v18, %v13242_v55  ;;  %v3305_v49 = vsel %vm3291_vm12, %v3302_v44, %v3304_v2  ;;  %v6589_v42 = vand.u32 2139095040, %v13298_v11  ;;  %v6569_v32 = vsel %vm6484_vm8, %v6568_v39, %v6544_v25 }
 0x5d2   : > { %vm8239_vm13 = vcmp.lt.s32.totalorder %v8238_v29, 0  ;;  %v13333_v36 = vmul.u32.u64.low %v3306_v40, %v3305_v49  ;;  %v13334_v35 = vmul.u32.u64.high %v3306_v40, %v3305_v49, %v13333_v36  ;;  %vm3246_vm14 = vweird.f32 %v13025_v45 }
 0x5d3   : > { %v6553_v20 = vsel %vm8239_vm13, 0, %v8238_v29  ;;  %v3297_v18 = vsel %vm3291_vm12, %v3294_v62, %v3296_v34  ;;  %v6590_v55 = vshrl.u32 %v6589_v42, 23  ;;  %vm3249_vm15 = vcmp.lt.s32.totalorder %v13289_v38, 2 }
 0x5d4   : > { %v6554_v15 = vsub.s32 32, %v6553_v20  ;;  %v6558_v53 = vsub.s32 4294967266, %v6553_v20  ;;  %vm3253_vm0 = vcmp.eq.s32.totalorder %v13289_v38, 2  ;;  %vm13345_vm3 = vcmp.le.f32.partialorder %v6482_v37, 0.7853982 }
 0x5d5   : > { %v3316_v27 = vadd.s32 1, %v13323_v26  ;;  %v6555_v24 = vshll.u32 %v13284_v30, %v6553_v20  ;;  %v8240_v21 = vadd.s32 4294967169, %v6590_v55  ;;  %v6571_v52 = vsel %vm13345_vm3, 0, %v6569_v32 }
 0x5d6   : > { %v6556_v13 = vshrl.u32 %v6538_v41, %v6554_v15  ;;  %v6559_v23 = vadd.s32 127, %v6558_v53  ;;  %v3313_v43 = vmul.u32 %v3306_v40, %v3297_v18  ;;  %vm3315_vm1 = vc.u32 %v13334_v35, %v13322_v57 }
 0x5d7   : > { %v8967_v4 = vpop.eup %8966  ;;  %v6586_v37 = vand.u32 2147483647, %v13298_v11  ;;  %v3317_v28 = vsel %vm3315_vm1, %v3316_v27, %v13323_v26  ;;  %v6596_v39 = vadd.s32 1, %v8240_v21  ;;  %v956_v16 = vmul.f32 %v9647_v9, %v13272_v31 }
 0x5d8   : > { %v8969_v54 = vpop.eup %8968  ;;  %v3254_v33 = vxor.u32 2147483648, %v8967_v4  ;;  %v6557_v50 = vor.u32 %v6556_v13, %v6555_v24  ;;  %v6560_v60 = vshll.u32 %v6559_v23, 23  ;;  %v3318_v47 = vadd.s32 %v3317_v28, %v3313_v43 }
 0x5d9   : > { %v3251_v30 = vxor.u32 2147483648, %v8969_v54  ;;  %vm3250_vm2 = vcmp.eq.s32.totalorder %v13289_v38, 0  ;;  %v6575_v29 = vadd.s32 3, %v6571_v52  ;;  %v6593_v51 = vand.u32 8388607, %v6586_v37 }
 0x5da   : > { %v3255_v40 = vsel %vm3253_vm0, %v3254_v33, %v8969_v54  ;;  %v6561_v44 = vor.u32 4788187, %v6560_v60  ;;  %v3319_v48 = vadd.s32 536870912, %v3318_v47  ;;  %vm6597_vm4 = vcmp.gt.s32.totalorder %v6596_v39, 0 }
 0x5db   : > { %v3252_v62 = vsel %vm3250_vm2, %v8967_v4, %v3251_v30  ;;  %v6564_v26 = vcvt.s32.f32 %v6557_v50  ;;  %v6598_v31 = vsel %vm6597_vm4, %v6596_v39, 0  ;;  %v13371_v20 = vadd.f32 %v9652_v14, %v956_v16 }
 0x5dc   : > { %v3256_v34 = vsel %vm3249_vm15, %v3252_v62, %v3255_v40  ;;  %v6562_v2 = vand.u32 2147483647, %v6561_v44  ;;  %v13368_v49 = vshrl.u32 %v3319_v48, 30  ;;  %v6600_v42 = vand.u32 31, %v6598_v31 }
 0x5dd   : > { %v3257_v41 = vsel %vm3246_vm14, nan, %v3256_v34  ;;  %v13375_v38 = vand.u32 3, %v6575_v29  ;;  %v6594_v18 = vor.u32 8388608, %v6593_v51  ;;  %v13379_v55 = vadd.f32 %v12964_v59, %v9643_v6 }
 0x5de   : > { %7750 = vst [vmem:[%s10000_s14 + $0xa0] sm:$0xff] %v3257_v41  ;;  %v6565_v32 = vmul.f32 %v6564_v26, %v6562_v2  ;;  %v3321_v36 = vshll.u32 %v13368_v49, 30  ;;  %v6601_v15 = vsub.s32 32, %v6600_v42  ;;  %v6599_v27 = vshrl.u32 %v6598_v31, 5 }
 0x5df   : > { %v3365_v13 = vand.u32 2139095040, %v13371_v20  ;;  %v6603_v21 = vshll.u32 %v9287_v61, %v6600_v42  ;;  %v6606_v54 = vshll.u32 %v9288_v1, %v6600_v42  ;;  %v6609_v33 = vshll.u32 %v9289_v3, %v6600_v42 }
 0x5e0   : > { %v6566_v53 = vxor.u32 2147483648, %v6565_v32  ;;  %v13381_v45 = vsub.s32 %v3318_v47, %v3321_v36  ;;  %v6604_v24 = vshrl.u32 %v9288_v1, %v6601_v15  ;;  %v6607_v4 = vshrl.u32 %v9289_v3, %v6601_v15 }
 0x5e1   : > { %v6610_v52 = vshrl.u32 %v9290_v5, %v6601_v15  ;;  %v6612_v60 = vshll.u32 %v9290_v5, %v6600_v42  ;;  %v6613_v28 = vshrl.u32 %v9291_v10, %v6601_v15  ;;  %v6615_v25 = vshll.u32 %v9291_v10, %v6600_v42 }
 0x5e2   : > { %v6567_v23 = vsel %vm6484_vm8, %v6566_v53, %v6565_v32  ;;  %v3324_v43 = vsub.s32 0, %v13381_v45  ;;  %v6605_v50 = vor.u32 %v6604_v24, %v6603_v21  ;;  %v6608_v47 = vor.u32 %v6607_v4, %v6606_v54  ;;  %v13412_v24 = vpop.f32.mrb[25].mxu0 }
 0x5e3   : > { %v6570_v59 = vsel %vm13345_vm3, %v13087_v46, %v6567_v23  ;;  %v6611_v39 = vor.u32 %v6610_v52, %v6609_v33  ;;  %v6614_v16 = vor.u32 %v6613_v28, %v6612_v60  ;;  %v6616_v40 = vshrl.u32 %v9292_v22, %v6601_v15 }
 0x5e4   : > { %8970 = vcosq.f32 %v6570_v59  ;;  %v8113_v30 = vmin.u32 %v3324_v43, %v13381_v45  ;;  %v13401_v44 = vshll.u32 %v6594_v18, 8  ;;  %v6602_v62 = vshrl.u32 %v9287_v61, %v6601_v15 }
 0x5e5   : > { %8972 = vsinq.f32 %v6570_v59  ;;  %vm6618_vm5 = vcmp.lt.s32.totalorder %v6599_v27, 1  ;;  %v3366_v48 = vshrl.u32 %v3365_v13, 23  ;;  %v6617_v51 = vor.u32 %v6616_v40, %v6615_v25 }
 0x5e6   : > { %v3326_v29 = vclz %v8113_v30  ;;  %vm6619_vm6 = vcmp.lt.s32.totalorder %v6599_v27, 2  ;;  %vm6620_vm7 = vcmp.lt.s32.totalorder %v6599_v27, 3  ;;  %vm6621_vm8 = vcmp.lt.s32.totalorder %v6599_v27, 4 }
 0x5e7   : > { %vm6578_vm9 = vcmp.eq.s32.totalorder %v13375_v38, 0  ;;  %v6623_v2 = vsel %vm6621_vm8, %v6611_v39, 2102212464  ;;  %v6626_v26 = vsel %vm6618_vm5, %v6605_v50, %v6608_v47  ;;  %v6627_v31 = vsel %vm6621_vm8, %v6614_v16, 920167782 }
 0x5e8   : > { %v8114_v34 = vadd.s32 4294967294, %v3326_v29  ;;  %vm6577_vm10 = vcmp.lt.s32.totalorder %v13375_v38, 2  ;;  %v6622_v41 = vsel %vm6618_vm5, %v6602_v62, %v6605_v50  ;;  %v6628_v42 = vsel %vm6620_vm7, %v6611_v39, %v6627_v31 }
 0x5e9   : > { %v6630_v32 = vsel %vm6618_vm5, %v6608_v47, %v6611_v39  ;;  %v6631_v36 = vsel %vm6621_vm8, %v6617_v51, 1326507024  ;;  %vm6574_vm11 = vweird.f32 %v13087_v46  ;;  %vm3260_vm12 = vcmp.lt.s32.totalorder %v13173_v17, 0 }
 0x5ea   : > { %vm8115_vm13 = vcmp.lt.s32.totalorder %v8114_v34, 0  ;;  %v6624_v15 = vsel %vm6620_vm7, %v6608_v47, %v6623_v2  ;;  %v6629_v53 = vsel %vm6619_vm6, %v6626_v26, %v6628_v42  ;;  %v6632_v18 = vsel %vm6620_vm7, %v6614_v16, %v6631_v36 }
 0x5eb   : > { %v3329_v13 = vsel %vm8115_vm13, 0, %v8114_v34  ;;  %v6633_v23 = vsel %vm6619_vm6, %v6630_v32, %v6632_v18  ;;  %v13416_v21 = vmul.u32.u64.low %v13401_v44, %v6629_v53  ;;  %v13417_v4 = vmul.u32.u64.high %v13401_v44, %v6629_v53, %v13416_v21 }
 0x5ec   : > { %vm6581_vm14 = vcmp.eq.s32.totalorder %v13375_v38, 2  ;;  %v3314_v52 = vadd.s32 %v13322_v57, %v13334_v35  ;;  %v3330_v59 = vsub.s32 32, %v3329_v13  ;;  %v3334_v43 = vsub.s32 4294967266, %v3329_v13 }
 0x5ed   : > { %v6625_v33 = vsel %vm6619_vm6, %v6622_v41, %v6624_v15  ;;  %v13425_v50 = vmul.u32.u64.low %v13401_v44, %v6633_v23  ;;  %v13426_v60 = vmul.u32.u64.high %v13401_v44, %v6633_v23, %v13425_v50  ;;  %v8116_v28 = vadd.s32 4294967169, %v3366_v48 }
 0x5ee   : > { %v8971_v54 = vpop.eup %8970  ;;  %v3331_v39 = vshll.u32 %v13381_v45, %v3329_v13  ;;  %v3332_v16 = vshrl.u32 %v3314_v52, %v3330_v59  ;;  %v3335_v25 = vadd.s32 127, %v3334_v43  ;;  %v3344_v29 = vsub.s32 4, %v13368_v49 }
 0x5ef   : > { %v8973_v30 = vpop.eup %8972  ;;  %v6582_v47 = vxor.u32 2147483648, %v8971_v54  ;;  %v6644_v57 = vadd.s32 1, %v13417_v4  ;;  %v3372_v35 = vadd.s32 1, %v8116_v28  ;;  %v3362_v48 = vand.u32 2147483647, %v13371_v20 }
 0x5f0   : > { %v6579_v40 = vxor.u32 2147483648, %v8973_v30  ;;  %v3333_v62 = vor.u32 %v3332_v16, %v3331_v39  ;;  %v3336_v51 = vshll.u32 %v3335_v25, 23  ;;  %v6641_v45 = vmul.u32 %v13401_v44, %v6625_v33 }
 0x5f1   : > { %v6583_v27 = vsel %vm6581_vm14, %v6582_v47, %v8973_v30  ;;  %vm6643_vm15 = vc.u32 %v13426_v60, %v13416_v21  ;;  %vm3373_vm0 = vcmp.gt.s32.totalorder %v3372_v35, 0  ;;  %v988_v41 = vmul.f32 %v9647_v9, %v13379_v55 }
 0x5f2   : > { %v6580_v34 = vsel %vm6578_vm9, %v8971_v54, %v6579_v40  ;;  %v3337_v26 = vor.u32 4788187, %v3336_v51  ;;  %v6645_v31 = vsel %vm6643_vm15, %v6644_v57, %v13417_v4  ;;  %v3345_v44 = vsel %vm3260_vm12, %v3344_v29, %v13368_v49 }
 0x5f3   : > { %v6584_v2 = vsel %vm6577_vm10, %v6580_v34, %v6583_v27  ;;  %v6646_v32 = vadd.s32 %v6645_v31, %v6641_v45  ;;  %v3374_v36 = vsel %vm3373_vm0, %v3372_v35, 0  ;;  %v3340_v53 = vcvt.s32.f32 %v3333_v62 }
 0x5f4   : > { %v6585_v42 = vsel %vm6574_vm11, nan, %v6584_v2  ;;  %v3338_v15 = vand.u32 2147483647, %v3337_v26  ;;  %v3376_v38 = vand.u32 31, %v3374_v36  ;;  %vm13452_vm3 = vcmp.le.f32.partialorder %v3258_v0, 0.7853982 }
 0x5f5   : > { %7782 = vst [vmem:[%s10000_s14 + $0x1a0] sm:$0xff] %v6585_v42  ;;  %v6647_v55 = vadd.s32 536870912, %v6646_v32  ;;  %v3369_v46 = vand.u32 8388607, %v3362_v48  ;;  %v3347_v49 = vsel %vm13452_vm3, 0, %v3345_v44  ;;  %v13461_v4 = vadd.f32 %v9652_v14, %v988_v41 }
 0x5f6   : > { %v3341_v13 = vmul.f32 %v3340_v53, %v3338_v15  ;;  %v3377_v23 = vsub.s32 32, %v3376_v38  ;;  %v3375_v59 = vshrl.u32 %v3374_v36, 5  ;;  %v3379_v0 = vshll.u32 %v9287_v61, %v3376_v38 }
 0x5f7   : > { %v13463_v52 = vshrl.u32 %v6647_v55, 30  ;;  %v3382_v43 = vshll.u32 %v9288_v1, %v3376_v38  ;;  %v3385_v28 = vshll.u32 %v9289_v3, %v3376_v38  ;;  %v3388_v39 = vshll.u32 %v9290_v5, %v3376_v38 }
 0x5f8   : > { %v3342_v54 = vxor.u32 2147483648, %v3341_v13  ;;  %v3380_v33 = vshrl.u32 %v9288_v1, %v3377_v23  ;;  %v3383_v50 = vshrl.u32 %v9289_v3, %v3377_v23  ;;  %v3386_v47 = vshrl.u32 %v9290_v5, %v3377_v23 }
 0x5f9   : > { %v6649_v30 = vshll.u32 %v13463_v52, 30  ;;  %v3389_v16 = vshrl.u32 %v9291_v10, %v3377_v23  ;;  %v3391_v29 = vshll.u32 %v9291_v10, %v3376_v38  ;;  %v3392_v57 = vshrl.u32 %v9292_v22, %v3377_v23 }
 0x5fa   : > { %v3343_v25 = vsel %vm3260_vm12, %v3342_v54, %v3341_v13  ;;  %v3381_v40 = vor.u32 %v3380_v33, %v3379_v0  ;;  %v3384_v62 = vor.u32 %v3383_v50, %v3382_v43  ;;  %v3387_v51 = vor.u32 %v3386_v47, %v3385_v28 }
 0x5fb   : > { %v3346_v35 = vsel %vm13452_vm3, %v13173_v17, %v3343_v25  ;;  %v13481_v27 = vsub.s32 %v6646_v32, %v6649_v30  ;;  %v3370_v34 = vor.u32 8388608, %v3369_v46  ;;  %v3390_v45 = vor.u32 %v3389_v16, %v3388_v39  ;;  %v13492_v30 = vpop.f32.mrb[25].mxu1 }
 0x5fc   : > { %8974 = vcosq.f32 %v3346_v35  ;;  %v3393_v2 = vor.u32 %v3392_v57, %v3391_v29  ;;  %v3351_v26 = vadd.s32 3, %v3347_v49  ;;  %v3378_v41 = vshrl.u32 %v9287_v61, %v3377_v23 }
 0x5fd   : > { %8976 = vsinq.f32 %v3346_v35  ;;  %v6652_v31 = vsub.s32 0, %v13481_v27  ;;  %vm3394_vm1 = vcmp.lt.s32.totalorder %v3375_v59, 1  ;;  %vm3396_vm2 = vcmp.lt.s32.totalorder %v3375_v59, 3 }
 0x5fe   : > { %vm3397_vm4 = vcmp.lt.s32.totalorder %v3375_v59, 4  ;;  %v6693_v42 = vand.u32 2139095040, %v13461_v4  ;;  %v3398_v32 = vsel %vm3394_vm1, %v3378_v41, %v3381_v40  ;;  %v3402_v15 = vsel %vm3394_vm1, %v3381_v40, %v3384_v62 }
 0x5ff   : > { %v8241_v44 = vmin.u32 %v6652_v31, %v13481_v27  ;;  %v3399_v36 = vsel %vm3397_vm4, %v3387_v51, 2102212464  ;;  %v3403_v38 = vsel %vm3397_vm4, %v3390_v45, 920167782  ;;  %v3406_v18 = vsel %vm3394_vm1, %v3384_v62, %v3387_v51 }
 0x600   : > { %v3400_v53 = vsel %vm3396_vm2, %v3384_v62, %v3399_v36  ;;  %v3407_v55 = vsel %vm3397_vm4, %v3393_v2, 1326507024  ;;  %v3352_v46 = vand.u32 3, %v3351_v26  ;;  %vm6588_vm5 = vcmp.lt.s32.totalorder %v13298_v11, 0 }
 0x601   : > { %v6654_v13 = vclz %v8241_v44  ;;  %v3410_v49 = vshll.u32 %v3370_v34, 8  ;;  %vm3395_vm6 = vcmp.lt.s32.totalorder %v3375_v59, 2  ;;  %v3404_v23 = vsel %vm3396_vm2, %v3387_v51, %v3403_v38 }
 0x602   : > { %v3408_v0 = vsel %vm3396_vm2, %v3390_v45, %v3407_v55  ;;  %v6694_v43 = vshrl.u32 %v6693_v42, 23  ;;  %vm3350_vm7 = vweird.f32 %v13173_v17  ;;  %v3401_v33 = vsel %vm3395_vm6, %v3398_v32, %v3400_v53 }
 0x603   : > { %v8242_v54 = vadd.s32 4294967294, %v6654_v13  ;;  %v3405_v50 = vsel %vm3395_vm6, %v3402_v15, %v3404_v23  ;;  %v3409_v28 = vsel %vm3395_vm6, %v3406_v18, %v3408_v0  ;;  %vm13496_vm8 = vcmp.le.f32.partialorder %v6586_v37, 0.7853982 }
 0x604   : > { %v13500_v39 = vmul.u32.u64.low %v3410_v49, %v3409_v28  ;;  %v13501_v16 = vmul.u32.u64.high %v3410_v49, %v3409_v28, %v13500_v39  ;;  %v13503_v59 = vmul.u32.u64.low %v3410_v49, %v3405_v50  ;;  %v13504_v25 = vmul.u32.u64.high %v3410_v49, %v3405_v50, %v13503_v59 }
 0x605   : > { %vm3354_vm9 = vcmp.eq.s32.totalorder %v3352_v46, 0  ;;  %vm3357_vm10 = vcmp.eq.s32.totalorder %v3352_v46, 2  ;;  %vm8243_vm11 = vcmp.lt.s32.totalorder %v8242_v54, 0  ;;  %v8244_v40 = vadd.s32 4294967169, %v6694_v43 }
 0x606   : > { %v8975_v29 = vpop.eup %8974  ;;  %v6642_v57 = vadd.s32 %v13416_v21, %v13426_v60  ;;  %v6657_v35 = vsel %vm8243_vm11, 0, %v8242_v54  ;;  %v6672_v37 = vsub.s32 4, %v13463_v52  ;;  %v6690_v62 = vand.u32 2147483647, %v13461_v4 }
 0x607   : > { %v8977_v51 = vpop.eup %8976  ;;  %v3358_v34 = vxor.u32 2147483648, %v8975_v29  ;;  %v6658_v45 = vsub.s32 32, %v6657_v35  ;;  %v6662_v2 = vsub.s32 4294967266, %v6657_v35  ;;  %v3417_v26 = vmul.u32 %v3410_v49, %v3401_v33 }
 0x608   : > { %v3355_v31 = vxor.u32 2147483648, %v8977_v51  ;;  %v6659_v41 = vshll.u32 %v13481_v27, %v6657_v35  ;;  %vm3419_vm12 = vc.u32 %v13501_v16, %v13503_v59  ;;  %v3420_v42 = vadd.s32 1, %v13504_v25 }
 0x609   : > { %v3359_v21 = vsel %vm3357_vm10, %v3358_v34, %v8977_v51  ;;  %v6660_v60 = vshrl.u32 %v6642_v57, %v6658_v45  ;;  %v6663_v44 = vadd.s32 127, %v6662_v2  ;;  %v6700_v32 = vadd.s32 1, %v8244_v40 }
 0x60a   : > { %vm3353_vm13 = vcmp.lt.s32.totalorder %v3352_v46, 2  ;;  %v3356_v36 = vsel %vm3354_vm9, %v8975_v29, %v3355_v31  ;;  %v6673_v15 = vsel %vm6588_vm5, %v6672_v37, %v13463_v52  ;;  %v3421_v27 = vsel %vm3419_vm12, %v3420_v42, %v13504_v25 }
 0x60b   : > { %v3360_v53 = vsel %vm3353_vm13, %v3356_v36, %v3359_v21  ;;  %v6661_v38 = vor.u32 %v6660_v60, %v6659_v41  ;;  %v6664_v18 = vshll.u32 %v6663_v44, 23  ;;  %v3422_v55 = vadd.s32 %v3421_v27, %v3417_v26 }
 0x60c   : > { %v3361_v13 = vsel %vm3350_vm7, nan, %v3360_v53  ;;  %v6697_v49 = vand.u32 8388607, %v6690_v62  ;;  %vm6701_vm14 = vcmp.gt.s32.totalorder %v6700_v32, 0  ;;  %v820_v46 = vadd.f32 %v13056_v7, %v9645_v8 }
 0x60d   : > { %7751 = vst [vmem:[%s10000_s14 + $0xa8] sm:$0xff] %v3361_v13  ;;  %v6665_v23 = vor.u32 4788187, %v6664_v18  ;;  %v6675_v52 = vsel %vm13496_vm8, 0, %v6673_v15  ;;  %v3423_v0 = vadd.s32 536870912, %v3422_v55  ;;  %v6702_v43 = vsel %vm6701_vm14, %v6700_v32, 0 }
 0x60e   : > { %v6704_v54 = vand.u32 31, %v6702_v43  ;;  %v6668_v50 = vcvt.s32.f32 %v6661_v38  ;;  %v6679_v17 = vadd.s32 3, %v6675_v52  ;;  %v957_v25 = vmul.f32 %v9649_v12, %v820_v46 }
 0x60f   : > { %v6666_v33 = vand.u32 2147483647, %v6665_v23  ;;  %v13530_v28 = vshrl.u32 %v3423_v0, 30  ;;  %v6698_v7 = vor.u32 8388608, %v6697_v49  ;;  %v6703_v41 = vshrl.u32 %v6702_v43, 5 }
 0x610   : > { %v6705_v39 = vsub.s32 32, %v6704_v54  ;;  %v6707_v57 = vshll.u32 %v9287_v61, %v6704_v54  ;;  %v6710_v37 = vshll.u32 %v9288_v1, %v6704_v54  ;;  %v6713_v26 = vshll.u32 %v9289_v3, %v6704_v54 }
 0x611   : > { %v6669_v40 = vmul.f32 %v6668_v50, %v6666_v33  ;;  %v3425_v29 = vshll.u32 %v13530_v28, 30  ;;  %v6716_v21 = vshll.u32 %v9290_v5, %v6704_v54  ;;  %v13545_v60 = vadd.f32 %v9656_v19, %v957_v25  ;;  %v13563_v33 = vpop.f32.mrb[26].mxu0 }
 0x612   : > { %v6708_v35 = vshrl.u32 %v9288_v1, %v6705_v39  ;;  %v6711_v51 = vshrl.u32 %v9289_v3, %v6705_v39  ;;  %v6714_v34 = vshrl.u32 %v9290_v5, %v6705_v39  ;;  %v6717_v31 = vshrl.u32 %v9291_v10, %v6705_v39 }
 0x613   : > { %v6670_v45 = vxor.u32 2147483648, %v6669_v40  ;;  %v13539_v2 = vsub.s32 %v3422_v55, %v3425_v29  ;;  %v6719_v38 = vshll.u32 %v9291_v10, %v6704_v54  ;;  %v6720_v18 = vshrl.u32 %v9292_v22, %v6705_v39 }
 0x614   : > { %v6709_v42 = vor.u32 %v6708_v35, %v6707_v57  ;;  %v6712_v36 = vor.u32 %v6711_v51, %v6710_v37  ;;  %v6715_v15 = vor.u32 %v6714_v34, %v6713_v26  ;;  %v6718_v53 = vor.u32 %v6717_v31, %v6716_v21 }
 0x615   : > { %v6671_v44 = vsel %vm6588_vm5, %v6670_v45, %v6669_v40  ;;  %v3428_v32 = vsub.s32 0, %v13539_v2  ;;  %v13555_v55 = vand.u32 3, %v6679_v17  ;;  %v13558_v49 = vshll.u32 %v6698_v7, 8 }
 0x616   : > { %v6674_v27 = vsel %vm13496_vm8, %v13298_v11, %v6671_v44  ;;  %v6706_v46 = vshrl.u32 %v9287_v61, %v6705_v39  ;;  %v6721_v23 = vor.u32 %v6720_v18, %v6719_v38  ;;  %v3469_v52 = vand.u32 2139095040, %v13545_v60 }
 0x617   : > { %8978 = vcosq.f32 %v6674_v27  ;;  %v8117_v13 = vmin.u32 %v3428_v32, %v13539_v2  ;;  %vm3364_vm15 = vcmp.lt.s32.totalorder %v13371_v20, 0  ;;  %vm6722_vm0 = vcmp.lt.s32.totalorder %v6703_v41, 1 }
 0x618   : > { %8980 = vsinq.f32 %v6674_v27  ;;  %vm6723_vm3 = vcmp.lt.s32.totalorder %v6703_v41, 2  ;;  %vm6725_vm1 = vcmp.lt.s32.totalorder %v6703_v41, 4  ;;  %vm6724_vm2 = vcmp.lt.s32.totalorder %v6703_v41, 3 }
 0x619   : > { %v3430_v47 = vclz %v8117_v13  ;;  %v6727_v0 = vsel %vm6725_vm1, %v6715_v15, 2102212464  ;;  %v6730_v43 = vsel %vm6722_vm0, %v6709_v42, %v6712_v36  ;;  %v6731_v54 = vsel %vm6725_vm1, %v6718_v53, 920167782 }
 0x61a   : > { %vm6685_vm4 = vcmp.eq.s32.totalorder %v13555_v55, 2  ;;  %v6726_v17 = vsel %vm6722_vm0, %v6706_v46, %v6709_v42  ;;  %v6732_v39 = vsel %vm6724_vm2, %v6715_v15, %v6731_v54  ;;  %v6734_v25 = vsel %vm6722_vm0, %v6712_v36, %v6715_v15 }
 0x61b   : > { %v8118_v50 = vadd.s32 4294967294, %v3430_v47  ;;  %vm13569_vm5 = vcmp.le.f32.partialorder %v3362_v48, 0.7853982  ;;  %v6728_v29 = vsel %vm6724_vm2, %v6712_v36, %v6727_v0  ;;  %v6733_v7 = vsel %vm6723_vm3, %v6730_v43, %v6732_v39 }
 0x61c   : > { %v6735_v57 = vsel %vm6725_vm1, %v6721_v23, 1326507024  ;;  %v3470_v35 = vshrl.u32 %v3469_v52, 23  ;;  %vm6681_vm6 = vcmp.lt.s32.totalorder %v13555_v55, 2  ;;  %vm6678_vm8 = vweird.f32 %v13298_v11 }
 0x61d   : > { %vm8119_vm7 = vcmp.lt.s32.totalorder %v8118_v50, 0  ;;  %v6736_v37 = vsel %vm6724_vm2, %v6718_v53, %v6735_v57  ;;  %v13578_v51 = vmul.u32.u64.low %v13558_v49, %v6733_v7  ;;  %v13579_v34 = vmul.u32.u64.high %v13558_v49, %v6733_v7, %v13578_v51 }
 0x61e   : > { %v3433_v48 = vsel %vm8119_vm7, 0, %v8118_v50  ;;  %v3448_v45 = vsub.s32 4, %v13530_v28  ;;  %v6737_v26 = vsel %vm6723_vm3, %v6734_v25, %v6736_v37  ;;  %v8120_v31 = vadd.s32 4294967169, %v3470_v35 }
 0x61f   : > { %v3418_v42 = vadd.s32 %v13503_v59, %v13501_v16  ;;  %v3434_v21 = vsub.s32 32, %v3433_v48  ;;  %v3438_v44 = vsub.s32 4294967266, %v3433_v48  ;;  %v900_v32 = vadd.f32 %v13128_v56, %v9645_v8 }
 0x620   : > { %v6729_v36 = vsel %vm6723_vm3, %v6726_v17, %v6728_v29  ;;  %v13591_v15 = vmul.u32.u64.low %v13558_v49, %v6737_v26  ;;  %v13592_v27 = vmul.u32.u64.high %v13558_v49, %v6737_v26, %v13591_v15  ;;  %v3476_v53 = vadd.s32 1, %v8120_v31 }
 0x621   : > { %v8979_v38 = vpop.eup %8978  ;;  %v3435_v18 = vshll.u32 %v13539_v2, %v3433_v48  ;;  %v3436_v13 = vshrl.u32 %v3418_v42, %v3434_v21  ;;  %v3439_v46 = vadd.s32 127, %v3438_v44  ;;  %v6748_v23 = vadd.s32 1, %v13579_v34 }
 0x622   : > { %v8981_v16 = vpop.eup %8980  ;;  %v6686_v59 = vxor.u32 2147483648, %v8979_v38  ;;  %v3449_v56 = vsel %vm3364_vm15, %v3448_v45, %v13530_v28  ;;  %v3466_v41 = vand.u32 2147483647, %v13545_v60  ;;  %vm3477_vm9 = vcmp.gt.s32.totalorder %v3476_v53, 0 }
 0x623   : > { %v6683_v52 = vxor.u32 2147483648, %v8981_v16  ;;  %v3437_v47 = vor.u32 %v3436_v13, %v3435_v18  ;;  %v3440_v0 = vshll.u32 %v3439_v46, 23  ;;  %v3478_v43 = vsel %vm3477_vm9, %v3476_v53, 0 }
 0x624   : > { %vm6682_vm10 = vcmp.eq.s32.totalorder %v13555_v55, 0  ;;  %v6687_v2 = vsel %vm6685_vm4, %v6686_v59, %v8981_v16  ;;  %v6745_v54 = vmul.u32 %v13558_v49, %v6729_v36  ;;  %vm6747_vm11 = vc.u32 %v13592_v27, %v13578_v51 }
 0x625   : > { %v6684_v50 = vsel %vm6682_vm10, %v8979_v38, %v6683_v52  ;;  %v3441_v28 = vor.u32 4788187, %v3440_v0  ;;  %v3451_v17 = vsel %vm13569_vm5, 0, %v3449_v56  ;;  %v6749_v39 = vsel %vm6747_vm11, %v6748_v23, %v13579_v34 }
 0x626   : > { %v6688_v25 = vsel %vm6681_vm6, %v6684_v50, %v6687_v2  ;;  %v6750_v29 = vadd.s32 %v6749_v39, %v6745_v54  ;;  %v3473_v7 = vand.u32 8388607, %v3466_v41  ;;  %v3480_v57 = vand.u32 31, %v3478_v43 }
 0x627   : > { %v6689_v49 = vsel %vm6678_vm8, nan, %v6688_v25  ;;  %v3442_v35 = vand.u32 2147483647, %v3441_v28  ;;  %v3444_v37 = vcvt.s32.f32 %v3437_v47  ;;  %v989_v48 = vmul.f32 %v9649_v12, %v900_v32 }
 0x628   : > { %7783 = vst [vmem:[%s10000_s14 + $0x1a8] sm:$0xff] %v6689_v49  ;;  %v3455_v45 = vadd.s32 3, %v3451_v17  ;;  %v6751_v26 = vadd.s32 536870912, %v6750_v29  ;;  %v13617_v31 = vshrl.u32 %v3478_v43, 5  ;;  %v3481_v34 = vsub.s32 32, %v3480_v57 }
 0x629   : > { %v3445_v55 = vmul.f32 %v3444_v37, %v3442_v35  ;;  %v3483_v42 = vshll.u32 %v9287_v61, %v3480_v57  ;;  %v3486_v21 = vshll.u32 %v9288_v1, %v3480_v57  ;;  %v3489_v44 = vshll.u32 %v9289_v3, %v3480_v57 }
 0x62a   : > { %v6752_v36 = vshrl.u32 %v6751_v26, 30  ;;  %v3484_v11 = vshrl.u32 %v9288_v1, %v3481_v34  ;;  %v3487_v15 = vshrl.u32 %v9289_v3, %v3481_v34  ;;  %v3492_v32 = vshll.u32 %v9290_v5, %v3480_v57 }
 0x62b   : > { %v3446_v53 = vxor.u32 2147483648, %v3445_v55  ;;  %v3490_v38 = vshrl.u32 %v9290_v5, %v3481_v34  ;;  %v3493_v18 = vshrl.u32 %v9291_v10, %v3481_v34  ;;  %v3496_v13 = vshrl.u32 %v9292_v22, %v3481_v34 }
 0x62c   : > { %v6753_v46 = vshll.u32 %v6752_v36, 30  ;;  %v3474_v23 = vor.u32 8388608, %v3473_v7  ;;  %v3485_v16 = vor.u32 %v3484_v11, %v3483_v42  ;;  %v3495_v59 = vshll.u32 %v9291_v10, %v3480_v57 }
 0x62d   : > { %v3447_v56 = vsel %vm3364_vm15, %v3446_v53, %v3445_v55  ;;  %vm6692_vm12 = vcmp.lt.s32.totalorder %v13461_v4, 0  ;;  %v3488_v52 = vor.u32 %v3487_v15, %v3486_v21  ;;  %v3491_v47 = vor.u32 %v3490_v38, %v3489_v44 }
 0x62e   : > { %v3494_v0 = vor.u32 %v3493_v18, %v3492_v32  ;;  %v3450_v43 = vsel %vm13569_vm5, %v13371_v20, %v3447_v56  ;;  %v13635_v2 = vsub.s32 %v6750_v29, %v6753_v46  ;;  %v3497_v54 = vor.u32 %v3496_v13, %v3495_v59 }
 0x62f   : > { %v13638_v50 = vadd.f32 %v9656_v19, %v989_v48  ;;  %8982 = vcosq.f32 %v3450_v43  ;;  %vm3498_vm13 = vcmp.lt.s32.totalorder %v13617_v31, 1  ;;  %vm3499_vm14 = vcmp.lt.s32.totalorder %v13617_v31, 2 }
 0x630   : > { %vm3500_vm15 = vcmp.lt.s32.totalorder %v13617_v31, 3  ;;  %8984 = vsinq.f32 %v3450_v43  ;;  %vm13645_vm0 = vcmp.le.f32.partialorder %v6690_v62, 0.7853982  ;;  %v6756_v40 = vsub.s32 0, %v13635_v2 }
 0x631   : > { %v3482_v17 = vshrl.u32 %v9287_v61, %v3481_v34  ;;  %vm3501_vm3 = vcmp.lt.s32.totalorder %v13617_v31, 4  ;;  %v6776_v39 = vsub.s32 4, %v6752_v36  ;;  %v3506_v29 = vsel %vm3498_vm13, %v3485_v16, %v3488_v52 }
 0x632   : > { %v3503_v25 = vsel %vm3501_vm3, %v3491_v47, 2102212464  ;;  %v3507_v7 = vsel %vm3501_vm3, %v3494_v0, 920167782  ;;  %v8245_v57 = vmin.u32 %v6756_v40, %v13635_v2  ;;  %v3510_v49 = vsel %vm3498_vm13, %v3488_v52, %v3491_v47 }
 0x633   : > { %v3508_v62 = vsel %vm3500_vm15, %v3491_v47, %v3507_v7  ;;  %v3511_v35 = vsel %vm3501_vm3, %v3497_v54, 1326507024  ;;  %v3456_v37 = vand.u32 3, %v3455_v45  ;;  %v3514_v34 = vshll.u32 %v3474_v23, 8  ;;  %v13684_v23 = vpop.f32.mrb[26].mxu1 }
 0x634   : > { %v3509_v48 = vsel %vm3499_vm14, %v3506_v29, %v3508_v62  ;;  %v3512_v26 = vsel %vm3500_vm15, %v3494_v0, %v3511_v35  ;;  %v6758_v55 = vclz %v8245_v57  ;;  %v3502_v42 = vsel %vm3498_vm13, %v3482_v17, %v3485_v16 }
 0x635   : > { %v3504_v21 = vsel %vm3500_vm15, %v3488_v52, %v3503_v25  ;;  %v824_v44 = vadd.f32 %v13251_v58, %v9643_v6  ;;  %v3513_v45 = vsel %vm3499_vm14, %v3510_v49, %v3512_v26  ;;  %v6797_v32 = vand.u32 2139095040, %v13638_v50 }
 0x636   : > { %v13671_v11 = vmul.u32.u64.low %v3514_v34, %v3509_v48  ;;  %v13672_v15 = vmul.u32.u64.high %v3514_v34, %v3509_v48, %v13671_v11  ;;  %vm3454_vm1 = vweird.f32 %v13371_v20  ;;  %v8246_v53 = vadd.s32 4294967294, %v6758_v55 }
 0x637   : > { %v6777_v38 = vsel %vm6692_vm12, %v6776_v39, %v6752_v36  ;;  %v13679_v18 = vmul.u32.u64.low %v3514_v34, %v3513_v45  ;;  %v13680_v13 = vmul.u32.u64.high %v3514_v34, %v3513_v45, %v13679_v18  ;;  %vm3457_vm2 = vcmp.lt.s32.totalorder %v3456_v37, 2 }
 0x638   : > { %vm3458_vm4 = vcmp.eq.s32.totalorder %v3456_v37, 0  ;;  %v3505_v58 = vsel %vm3499_vm14, %v3502_v42, %v3504_v21  ;;  %v6798_v46 = vshrl.u32 %v6797_v32, 23  ;;  %vm3461_vm5 = vcmp.eq.s32.totalorder %v3456_v37, 2 }
 0x639   : > { %v6746_v16 = vadd.s32 %v13578_v51, %v13592_v27  ;;  %vm8247_vm6 = vcmp.lt.s32.totalorder %v8246_v53, 0  ;;  %v6794_v59 = vand.u32 2147483647, %v13638_v50  ;;  %v8983_v56 = vpop.eup %8982  ;;  %v6779_v52 = vsel %vm13645_vm0, 0, %v6777_v38 }
 0x63a   : > { %v6761_v36 = vsel %vm8247_vm6, 0, %v8246_v53  ;;  %v3524_v47 = vadd.s32 1, %v13672_v15  ;;  %v8248_v0 = vadd.s32 4294967169, %v6798_v46  ;;  %v8985_v31 = vpop.eup %8984  ;;  %v3462_v43 = vxor.u32 2147483648, %v8983_v56 }
 0x63b   : > { %v6762_v54 = vsub.s32 32, %v6761_v36  ;;  %v6766_v40 = vsub.s32 4294967266, %v6761_v36  ;;  %v3521_v17 = vmul.u32 %v3514_v34, %v3505_v58  ;;  %v3459_v39 = vxor.u32 2147483648, %v8985_v31 }
 0x63c   : > { %v6763_v25 = vshll.u32 %v13635_v2, %v6761_v36  ;;  %vm3523_vm7 = vc.u32 %v13680_v13, %v13671_v11  ;;  %v6804_v51 = vadd.s32 1, %v8248_v0  ;;  %v3463_v27 = vsel %vm3461_vm5, %v3462_v43, %v8985_v31 }
 0x63d   : > { %v6764_v29 = vshrl.u32 %v6746_v16, %v6762_v54  ;;  %v6767_v7 = vadd.s32 127, %v6766_v40  ;;  %v3525_v57 = vsel %vm3523_vm7, %v3524_v47, %v13672_v15  ;;  %v3460_v62 = vsel %vm3458_vm4, %v8983_v56, %v3459_v39 }
 0x63e   : > { %v6783_v49 = vadd.s32 3, %v6779_v52  ;;  %v3526_v35 = vadd.s32 %v3525_v57, %v3521_v17  ;;  %vm6805_vm8 = vcmp.gt.s32.totalorder %v6804_v51, 0  ;;  %v3464_v48 = vsel %vm3457_vm2, %v3460_v62, %v3463_v27 }
 0x63f   : > { %v6765_v26 = vor.u32 %v6764_v29, %v6763_v25  ;;  %v6768_v2 = vshll.u32 %v6767_v7, 23  ;;  %v6806_v34 = vsel %vm6805_vm8, %v6804_v51, 0  ;;  %v3465_v55 = vsel %vm3454_vm1, nan, %v3464_v48 }
 0x640   : > { %v3527_v42 = vadd.s32 536870912, %v3526_v35  ;;  %v6801_v21 = vand.u32 8388607, %v6794_v59  ;;  %v6808_v45 = vand.u32 31, %v6806_v34  ;;  %7752 = vst [vmem:[%s10000_s14 + $0xb0] sm:$0xff] %v3465_v55  ;;  %v13708_v37 = vadd.f32 %v13336_v63, %v9643_v6 }
 0x641   : > { %v6769_v15 = vor.u32 4788187, %v6768_v2  ;;  %v6772_v18 = vcvt.s32.f32 %v6765_v26  ;;  %v13710_v58 = vand.u32 3, %v6783_v49  ;;  %v958_v20 = vmul.f32 %v9647_v9, %v824_v44 }
 0x642   : > { %v13704_v32 = vshrl.u32 %v3527_v42, 30  ;;  %v6809_v53 = vsub.s32 32, %v6808_v45  ;;  %v6802_v16 = vor.u32 8388608, %v6801_v21  ;;  %v6811_v56 = vshll.u32 %v9287_v61, %v6808_v45 }
 0x643   : > { %v6770_v38 = vand.u32 2147483647, %v6769_v15  ;;  %v6814_v43 = vshll.u32 %v9288_v1, %v6808_v45  ;;  %v6817_v44 = vshll.u32 %v9289_v3, %v6808_v45  ;;  %v6807_v17 = vshrl.u32 %v6806_v34, 5 }
 0x644   : > { %v3529_v46 = vshll.u32 %v13704_v32, 30  ;;  %v6812_v36 = vshrl.u32 %v9288_v1, %v6809_v53  ;;  %v6815_v47 = vshrl.u32 %v9289_v3, %v6809_v53  ;;  %v6818_v0 = vshrl.u32 %v9290_v5, %v6809_v53 }
 0x645   : > { %v6773_v52 = vmul.f32 %v6772_v18, %v6770_v38  ;;  %v6821_v63 = vshrl.u32 %v9291_v10, %v6809_v53  ;;  %v6824_v54 = vshrl.u32 %v9292_v22, %v6809_v53  ;;  %v6820_v39 = vshll.u32 %v9290_v5, %v6808_v45 }
 0x646   : > { %v13719_v31 = vsub.s32 %v3526_v35, %v3529_v46  ;;  %v6823_v25 = vshll.u32 %v9291_v10, %v6808_v45  ;;  %v6813_v27 = vor.u32 %v6812_v36, %v6811_v56  ;;  %v6816_v29 = vor.u32 %v6815_v47, %v6814_v43 }
 0x647   : > { %v6774_v40 = vxor.u32 2147483648, %v6773_v52  ;;  %v6819_v7 = vor.u32 %v6818_v0, %v6817_v44  ;;  %vm3468_vm9 = vcmp.lt.s32.totalorder %v13545_v60, 0  ;;  %v3522_v62 = vadd.s32 %v13671_v11, %v13680_v13 }
 0x648   : > { %v3532_v51 = vsub.s32 0, %v13719_v31  ;;  %v6822_v49 = vor.u32 %v6821_v63, %v6820_v39  ;;  %v13733_v35 = vadd.f32 %v9652_v14, %v958_v20  ;;  %v6825_v2 = vor.u32 %v6824_v54, %v6823_v25 }
 0x649   : > { %v6775_v57 = vsel %vm6692_vm12, %v6774_v40, %v6773_v52  ;;  %v6842_v34 = vshll.u32 %v6802_v16, 8  ;;  %v3552_v55 = vsub.s32 4, %v13704_v32  ;;  %vm6826_vm10 = vcmp.lt.s32.totalorder %v6807_v17, 1 }
 0x64a   : > { %v6778_v48 = vsel %vm13645_vm0, %v13461_v4, %v6775_v57  ;;  %v8121_v26 = vmin.u32 %v3532_v51, %v13719_v31  ;;  %vm6829_vm11 = vcmp.lt.s32.totalorder %v6807_v17, 4  ;;  %vm13742_vm12 = vcmp.le.f32.partialorder %v3466_v41, 0.7853982 }
 0x64b   : > { %8986 = vcosq.f32 %v6778_v48  ;;  %v6831_v42 = vsel %vm6829_vm11, %v6819_v7, 2102212464  ;;  %v6834_v28 = vsel %vm6826_vm10, %v6813_v27, %v6816_v29  ;;  %v6810_v21 = vshrl.u32 %v9287_v61, %v6809_v53  ;;  %v13753_v53 = vpop.f32.mrb[27].mxu0 }
 0x64c   : > { %8988 = vsinq.f32 %v6778_v48  ;;  %v3534_v13 = vclz %v8121_v26  ;;  %vm6828_vm13 = vcmp.lt.s32.totalorder %v6807_v17, 3  ;;  %v6835_v45 = vsel %vm6829_vm11, %v6822_v49, 920167782 }
 0x64d   : > { %v6838_v15 = vsel %vm6826_vm10, %v6816_v29, %v6819_v7  ;;  %vm6827_vm14 = vcmp.lt.s32.totalorder %v6807_v17, 2  ;;  %v6836_v18 = vsel %vm6828_vm13, %v6819_v7, %v6835_v45  ;;  %v6839_v20 = vsel %vm6829_vm11, %v6825_v2, 1326507024 }
 0x64e   : > { %v8122_v38 = vadd.s32 4294967294, %v3534_v13  ;;  %v6830_v46 = vsel %vm6826_vm10, %v6810_v21, %v6813_v27  ;;  %v6832_v16 = vsel %vm6828_vm13, %v6816_v29, %v6831_v42  ;;  %v6837_v56 = vsel %vm6827_vm14, %v6834_v28, %v6836_v18 }
 0x64f   : > { %v6840_v41 = vsel %vm6828_vm13, %v6822_v49, %v6839_v20  ;;  %v13749_v52 = vmul.u32.u64.low %v6842_v34, %v6837_v56  ;;  %v13750_v47 = vmul.u32.u64.high %v6842_v34, %v6837_v56, %v13749_v52  ;;  %v3573_v44 = vand.u32 2139095040, %v13733_v35 }
 0x650   : > { %vm8123_vm15 = vcmp.lt.s32.totalorder %v8122_v38, 0  ;;  %v6841_v36 = vsel %vm6827_vm14, %v6838_v15, %v6840_v41  ;;  %vm6782_vm0 = vweird.f32 %v13461_v4  ;;  %v3553_v39 = vsel %vm3468_vm9, %v3552_v55, %v13704_v32 }
 0x651   : > { %v3537_v0 = vsel %vm8123_vm15, 0, %v8122_v38  ;;  %v13755_v63 = vmul.u32.u64.low %v6842_v34, %v6841_v36  ;;  %v13756_v43 = vmul.u32.u64.high %v6842_v34, %v6841_v36, %v13755_v63  ;;  %v6833_v25 = vsel %vm6827_vm14, %v6830_v46, %v6832_v16 }
 0x652   : > { %v3538_v54 = vsub.s32 32, %v3537_v0  ;;  %v3542_v40 = vsub.s32 4294967266, %v3537_v0  ;;  %vm6785_vm3 = vcmp.lt.s32.totalorder %v13710_v58, 2  ;;  %vm6789_vm1 = vcmp.eq.s32.totalorder %v13710_v58, 2 }
 0x653   : > { %v3570_v51 = vand.u32 2147483647, %v13733_v35  ;;  %v3574_v27 = vshrl.u32 %v3573_v44, 23  ;;  %v3539_v29 = vshll.u32 %v13719_v31, %v3537_v0  ;;  %v6852_v49 = vadd.s32 1, %v13750_v47 }
 0x654   : > { %v3540_v7 = vshrl.u32 %v3522_v62, %v3538_v54  ;;  %v3543_v57 = vadd.s32 127, %v3542_v40  ;;  %v3555_v26 = vsel %vm13742_vm12, 0, %v3553_v39  ;;  %v6849_v32 = vmul.u32 %v6842_v34, %v6833_v25 }
 0x655   : > { %v8987_v48 = vpop.eup %8986  ;;  %vm6851_vm2 = vc.u32 %v13756_v43, %v13749_v52  ;;  %v8124_v17 = vadd.s32 4294967169, %v3574_v27  ;;  %v990_v45 = vmul.f32 %v9647_v9, %v13708_v37  ;;  %vm6786_vm4 = vcmp.eq.s32.totalorder %v13710_v58, 0 }
 0x656   : > { %v8989_v2 = vpop.eup %8988  ;;  %v6790_v55 = vxor.u32 2147483648, %v8987_v48  ;;  %v3541_v13 = vor.u32 %v3540_v7, %v3539_v29  ;;  %v3544_v42 = vshll.u32 %v3543_v57, 23  ;;  %v6853_v28 = vsel %vm6851_vm2, %v6852_v49, %v13750_v47 }
 0x657   : > { %v6787_v31 = vxor.u32 2147483648, %v8989_v2  ;;  %v6854_v62 = vadd.s32 %v6853_v28, %v6849_v32  ;;  %v3580_v21 = vadd.s32 1, %v8124_v17  ;;  %v3559_v38 = vadd.s32 3, %v3555_v26 }
 0x658   : > { %v6791_v34 = vsel %vm6789_vm1, %v6790_v55, %v8989_v2  ;;  %v3545_v15 = vor.u32 4788187, %v3544_v42  ;;  %v3577_v46 = vand.u32 8388607, %v3570_v51  ;;  %v3548_v41 = vcvt.s32.f32 %v3541_v13 }
 0x659   : > { %v6788_v18 = vsel %vm6786_vm4, %v8987_v48, %v6787_v31  ;;  %v6855_v20 = vadd.s32 536870912, %v6854_v62  ;;  %vm3581_vm5 = vcmp.gt.s32.totalorder %v3580_v21, 0  ;;  %v13788_v63 = vadd.f32 %v9652_v14, %v990_v45 }
 0x65a   : > { %v6792_v16 = vsel %vm6785_vm3, %v6788_v18, %v6791_v34  ;;  %v3546_v56 = vand.u32 2147483647, %v3545_v15  ;;  %v3582_v37 = vsel %vm3581_vm5, %v3580_v21, 0  ;;  %v13792_v58 = vand.u32 3, %v3559_v38 }
 0x65b   : > { %v6793_v36 = vsel %vm6782_vm0, nan, %v6792_v16  ;;  %v13785_v47 = vshrl.u32 %v6855_v20, 30  ;;  %v3584_v0 = vand.u32 31, %v3582_v37  ;;  %v3578_v25 = vor.u32 8388608, %v3577_v46 }
 0x65c   : > { %7784 = vst [vmem:[%s10000_s14 + $0x1b0] sm:$0xff] %v6793_v36  ;;  %v3549_v44 = vmul.f32 %v3548_v41, %v3546_v56  ;;  %v13796_v27 = vadd.f32 %v13412_v24, %v9645_v8  ;;  %v3583_v29 = vshrl.u32 %v3582_v37, 5  ;;  %v6901_v57 = vand.u32 2139095040, %v13788_v63  ;;  %v13825_v36 = vpop.f32.mrb[27].mxu1 }
 0x65d   : > { %v6857_v54 = vshll.u32 %v13785_v47, 30  ;;  %v3585_v40 = vsub.s32 32, %v3584_v0  ;;  %v3587_v48 = vshll.u32 %v9287_v61, %v3584_v0  ;;  %v3590_v2 = vshll.u32 %v9288_v1, %v3584_v0 }
 0x65e   : > { %v3550_v39 = vxor.u32 2147483648, %v3549_v44  ;;  %v3593_v55 = vshll.u32 %v9289_v3, %v3584_v0  ;;  %v3596_v42 = vshll.u32 %v9290_v5, %v3584_v0  ;;  %v3599_v11 = vshll.u32 %v9291_v10, %v3584_v0 }
 0x65f   : > { %v13798_v4 = vsub.s32 %v6854_v62, %v6857_v54  ;;  %v3588_v7 = vshrl.u32 %v9288_v1, %v3585_v40  ;;  %v3591_v26 = vshrl.u32 %v9289_v3, %v3585_v40  ;;  %v3594_v32 = vshrl.u32 %v9290_v5, %v3585_v40 }
 0x660   : > { %v3551_v49 = vsel %vm3468_vm9, %v3550_v39, %v3549_v44  ;;  %v3597_v28 = vshrl.u32 %v9291_v10, %v3585_v40  ;;  %v3600_v34 = vshrl.u32 %v9292_v22, %v3585_v40  ;;  %v13818_v15 = vshll.u32 %v3578_v25, 8 }
 0x661   : > { %v3554_v24 = vsel %vm13742_vm12, %v13545_v60, %v3551_v49  ;;  %v6860_v17 = vsub.s32 0, %v13798_v4  ;;  %v3589_v13 = vor.u32 %v3588_v7, %v3587_v48  ;;  %v3592_v62 = vor.u32 %v3591_v26, %v3590_v2 }
 0x662   : > { %8990 = vcosq.f32 %v3554_v24  ;;  %v3595_v21 = vor.u32 %v3594_v32, %v3593_v55  ;;  %v3598_v45 = vor.u32 %v3597_v28, %v3596_v42  ;;  %v3586_v18 = vshrl.u32 %v9287_v61, %v3585_v40 }
 0x663   : > { %8992 = vsinq.f32 %v3554_v24  ;;  %v8249_v31 = vmin.u32 %v6860_v17, %v13798_v4  ;;  %vm3602_vm6 = vcmp.lt.s32.totalorder %v3583_v29, 1  ;;  %v6902_v20 = vshrl.u32 %v6901_v57, 23 }
 0x664   : > { %vm3565_vm7 = vcmp.eq.s32.totalorder %v13792_v58, 2  ;;  %vm6796_vm8 = vcmp.lt.s32.totalorder %v13638_v50, 0  ;;  %v3601_v46 = vor.u32 %v3600_v34, %v3599_v11  ;;  %vm3603_vm9 = vcmp.lt.s32.totalorder %v3583_v29, 2 }
 0x665   : > { %v6862_v38 = vclz %v8249_v31  ;;  %vm3604_vm10 = vcmp.lt.s32.totalorder %v3583_v29, 3  ;;  %vm3605_vm11 = vcmp.lt.s32.totalorder %v3583_v29, 4  ;;  %vm3562_vm12 = vcmp.eq.s32.totalorder %v13792_v58, 0 }
 0x666   : > { %v3607_v56 = vsel %vm3605_vm11, %v3595_v21, 2102212464  ;;  %v3610_v41 = vsel %vm3602_vm6, %v3589_v13, %v3592_v62  ;;  %v3611_v37 = vsel %vm3605_vm11, %v3598_v45, 920167782  ;;  %vm3561_vm13 = vcmp.lt.s32.totalorder %v13792_v58, 2 }
 0x667   : > { %v8250_v16 = vadd.s32 4294967294, %v6862_v38  ;;  %v3606_v0 = vsel %vm3602_vm6, %v3586_v18, %v3589_v13  ;;  %v3612_v44 = vsel %vm3604_vm10, %v3595_v21, %v3611_v37  ;;  %v3614_v54 = vsel %vm3602_vm6, %v3592_v62, %v3595_v21 }
 0x668   : > { %v3615_v40 = vsel %vm3605_vm11, %v3601_v46, 1326507024  ;;  %vm3558_vm14 = vweird.f32 %v13545_v60  ;;  %vm13834_vm15 = vcmp.le.f32.partialorder %v6794_v59, 0.7853982  ;;  %v3608_v25 = vsel %vm3604_vm10, %v3592_v62, %v3607_v56 }
 0x669   : > { %vm8251_vm0 = vcmp.lt.s32.totalorder %v8250_v16, 0  ;;  %v3613_v7 = vsel %vm3603_vm9, %v3610_v41, %v3612_v44  ;;  %v3616_v57 = vsel %vm3604_vm10, %v3598_v45, %v3615_v40  ;;  %v6850_v59 = vadd.s32 %v13749_v52, %v13756_v43 }
 0x66a   : > { %v6865_v49 = vsel %vm8251_vm0, 0, %v8250_v16  ;;  %v3617_v48 = vsel %vm3603_vm9, %v3614_v54, %v3616_v57  ;;  %v13843_v26 = vmul.u32.u64.low %v13818_v15, %v3613_v7  ;;  %v13844_v32 = vmul.u32.u64.high %v13818_v15, %v3613_v7, %v13843_v26 }
 0x66b   : > { %v6866_v24 = vsub.s32 32, %v6865_v49  ;;  %v6870_v17 = vsub.s32 4294967266, %v6865_v49  ;;  %v6880_v2 = vsub.s32 4, %v13785_v47  ;;  %v3609_v13 = vsel %vm3603_vm9, %v3606_v0, %v3608_v25 }
 0x66c   : > { %v8991_v55 = vpop.eup %8990  ;;  %v13852_v42 = vmul.u32.u64.low %v13818_v15, %v3617_v48  ;;  %v13853_v28 = vmul.u32.u64.high %v13818_v15, %v3617_v48, %v13852_v42  ;;  %v8252_v31 = vadd.s32 4294967169, %v6902_v20  ;;  %v6867_v45 = vshll.u32 %v13798_v4, %v6865_v49 }
 0x66d   : > { %v8993_v62 = vpop.eup %8992  ;;  %v3566_v21 = vxor.u32 2147483648, %v8991_v55  ;;  %v6868_v11 = vshrl.u32 %v6850_v59, %v6866_v24  ;;  %v6871_v34 = vadd.s32 127, %v6870_v17  ;;  %v3628_v52 = vadd.s32 1, %v13844_v32 }
 0x66e   : > { %v3563_v38 = vxor.u32 2147483648, %v8993_v62  ;;  %v6898_v43 = vand.u32 2147483647, %v13788_v63  ;;  %v6908_v18 = vadd.s32 1, %v8252_v31  ;;  %v6881_v20 = vsel %vm6796_vm8, %v6880_v2, %v13785_v47 }
 0x66f   : > { %v3567_v29 = vsel %vm3565_vm7, %v3566_v21, %v8993_v62  ;;  %v6869_v46 = vor.u32 %v6868_v11, %v6867_v45  ;;  %v6872_v16 = vshll.u32 %v6871_v34, 23  ;;  %v3625_v56 = vmul.u32 %v13818_v15, %v3609_v13 }
 0x670   : > { %v3564_v4 = vsel %vm3562_vm12, %v8991_v55, %v3563_v38  ;;  %vm3627_vm3 = vc.u32 %v13853_v28, %v13843_v26  ;;  %vm6909_vm1 = vcmp.gt.s32.totalorder %v6908_v18, 0  ;;  %v959_v44 = vmul.f32 %v9649_v12, %v13796_v27 }
 0x671   : > { %v3568_v41 = vsel %vm3561_vm13, %v3564_v4, %v3567_v29  ;;  %v6873_v37 = vor.u32 4788187, %v6872_v16  ;;  %v3629_v0 = vsel %vm3627_vm3, %v3628_v52, %v13844_v32  ;;  %v6883_v54 = vsel %vm13834_vm15, 0, %v6881_v20 }
 0x672   : > { %v3569_v47 = vsel %vm3558_vm14, nan, %v3568_v41  ;;  %v3630_v15 = vadd.s32 %v3629_v0, %v3625_v56  ;;  %v6910_v40 = vsel %vm6909_vm1, %v6908_v18, 0  ;;  %v6876_v7 = vcvt.s32.f32 %v6869_v46 }
 0x673   : > { %7753 = vst [vmem:[%s10000_s14 + $0xb8] sm:$0xff] %v3569_v47  ;;  %v6874_v25 = vand.u32 2147483647, %v6873_v37  ;;  %v6912_v57 = vand.u32 31, %v6910_v40  ;;  %v6905_v49 = vand.u32 8388607, %v6898_v43  ;;  %v13882_v48 = vadd.f32 %v13492_v30, %v9645_v8 }
 0x674   : > { %v3631_v58 = vadd.s32 536870912, %v3630_v15  ;;  %v6887_v60 = vadd.s32 3, %v6883_v54  ;;  %v13885_v59 = vadd.f32 %v9656_v19, %v959_v44  ;;  %v6911_v17 = vshrl.u32 %v6910_v40, 5 }
 0x675   : > { %v6877_v27 = vmul.f32 %v6876_v7, %v6874_v25  ;;  %v6913_v32 = vsub.s32 32, %v6912_v57  ;;  %v6915_v2 = vshll.u32 %v9287_v61, %v6912_v57  ;;  %v6918_v55 = vshll.u32 %v9288_v1, %v6912_v57 }
 0x676   : > { %v3632_v24 = vshrl.u32 %v3631_v58, 30  ;;  %vm3572_vm2 = vcmp.lt.s32.totalorder %v13733_v35, 0  ;;  %v6921_v31 = vshll.u32 %v9289_v3, %v6912_v57  ;;  %v6924_v45 = vshll.u32 %v9290_v5, %v6912_v57 }
 0x677   : > { %v6878_v13 = vxor.u32 2147483648, %v6877_v27  ;;  %v6916_v42 = vshrl.u32 %v9288_v1, %v6913_v32  ;;  %v6919_v30 = vshrl.u32 %v9289_v3, %v6913_v32  ;;  %v6922_v21 = vshrl.u32 %v9290_v5, %v6913_v32 }
 0x678   : > { %v3633_v62 = vshll.u32 %v3632_v24, 30  ;;  %v6925_v11 = vshrl.u32 %v9291_v10, %v6913_v32  ;;  %v6927_v52 = vshll.u32 %v9291_v10, %v6912_v57  ;;  %v6928_v18 = vshrl.u32 %v9292_v22, %v6913_v32 }
 0x679   : > { %v6879_v34 = vsel %vm6796_vm8, %v6878_v13, %v6877_v27  ;;  %v6917_v38 = vor.u32 %v6916_v42, %v6915_v2  ;;  %v6920_v16 = vor.u32 %v6919_v30, %v6918_v55  ;;  %v6923_v20 = vor.u32 %v6922_v21, %v6921_v31 }
 0x67a   : > { %v6882_v29 = vsel %vm13834_vm15, %v13638_v50, %v6879_v34  ;;  %v13903_v46 = vsub.s32 %v3630_v15, %v3633_v62  ;;  %v6906_v4 = vor.u32 8388608, %v6905_v49  ;;  %v6926_v56 = vor.u32 %v6925_v11, %v6924_v45 }
 0x67b   : > { %8994 = vcosq.f32 %v6882_v29  ;;  %v6929_v41 = vor.u32 %v6928_v18, %v6927_v52  ;;  %vm13907_vm4 = vcmp.le.f32.partialorder %v3570_v51, 0.7853982  ;;  %v3656_v44 = vsub.s32 4, %v3632_v24 }
 0x67c   : > { %8996 = vsinq.f32 %v6882_v29  ;;  %v3636_v0 = vsub.s32 0, %v13903_v46  ;;  %v6914_v39 = vshrl.u32 %v9287_v61, %v6913_v32  ;;  %vm6930_vm5 = vcmp.lt.s32.totalorder %v6911_v17, 1 }
 0x67d   : > { %vm6932_vm6 = vcmp.lt.s32.totalorder %v6911_v17, 3  ;;  %vm6933_vm7 = vcmp.lt.s32.totalorder %v6911_v17, 4  ;;  %v3677_v47 = vand.u32 2139095040, %v13885_v59  ;;  %v6938_v25 = vsel %vm6930_vm5, %v6917_v38, %v6920_v16 }
 0x67e   : > { %v8125_v54 = vmin.u32 %v3636_v0, %v13903_v46  ;;  %v6934_v15 = vsel %vm6930_vm5, %v6914_v39, %v6917_v38  ;;  %v6935_v40 = vsel %vm6933_vm7, %v6923_v20, 2102212464  ;;  %v6939_v7 = vsel %vm6933_vm7, %v6926_v56, 920167782 }
 0x67f   : > { %v6936_v51 = vsel %vm6932_vm6, %v6920_v16, %v6935_v40  ;;  %v6942_v57 = vsel %vm6930_vm5, %v6920_v16, %v6923_v20  ;;  %v6943_v58 = vsel %vm6933_vm7, %v6929_v41, 1326507024  ;;  %v6888_v49 = vand.u32 3, %v6887_v60 }
 0x680   : > { %v3638_v27 = vclz %v8125_v54  ;;  %v3657_v32 = vsel %vm3572_vm2, %v3656_v44, %v3632_v24  ;;  %v6946_v2 = vshll.u32 %v6906_v4, 8  ;;  %vm6931_vm8 = vcmp.lt.s32.totalorder %v6911_v17, 2 }
 0x681   : > { %v6940_v55 = vsel %vm6932_vm6, %v6923_v20, %v6939_v7  ;;  %v6944_v13 = vsel %vm6932_vm6, %v6926_v56, %v6943_v58  ;;  %v3678_v42 = vshrl.u32 %v3677_v47, 23  ;;  %v6937_v31 = vsel %vm6931_vm8, %v6934_v15, %v6936_v51 }
 0x682   : > { %v8126_v30 = vadd.s32 4294967294, %v3638_v27  ;;  %v6941_v62 = vsel %vm6931_vm8, %v6938_v25, %v6940_v55  ;;  %v6945_v21 = vsel %vm6931_vm8, %v6942_v57, %v6944_v13  ;;  %vm6890_vm9 = vcmp.eq.s32.totalorder %v6888_v49, 0  ;;  %v13940_v25 = vpop.f32.mrb[28].mxu0 }
 0x683   : > { %v13920_v45 = vmul.u32.u64.low %v6946_v2, %v6945_v21  ;;  %v13921_v11 = vmul.u32.u64.high %v6946_v2, %v6945_v21, %v13920_v45  ;;  %v13923_v34 = vmul.u32.u64.low %v6946_v2, %v6941_v62  ;;  %v13924_v60 = vmul.u32.u64.high %v6946_v2, %v6941_v62, %v13923_v34 }
 0x684   : > { %vm6893_vm10 = vcmp.eq.s32.totalorder %v6888_v49, 2  ;;  %vm8127_vm11 = vcmp.lt.s32.totalorder %v8126_v30, 0  ;;  %v8128_v24 = vadd.s32 4294967169, %v3678_v42  ;;  %v3626_v17 = vadd.s32 %v13843_v26, %v13853_v28 }
 0x685   : > { %v8995_v38 = vpop.eup %8994  ;;  %v3641_v52 = vsel %vm8127_vm11, 0, %v8126_v30  ;;  %v3659_v18 = vsel %vm13907_vm4, 0, %v3657_v32  ;;  %v3674_v29 = vand.u32 2147483647, %v13885_v59  ;;  %v6953_v41 = vmul.u32 %v6946_v2, %v6937_v31 }
 0x686   : > { %v8997_v16 = vpop.eup %8996  ;;  %v6894_v20 = vxor.u32 2147483648, %v8995_v38  ;;  %v3642_v4 = vsub.s32 32, %v3641_v52  ;;  %v3646_v56 = vsub.s32 4294967266, %v3641_v52  ;;  %v3643_v44 = vshll.u32 %v13903_v46, %v3641_v52 }
 0x687   : > { %v6891_v0 = vxor.u32 2147483648, %v8997_v16  ;;  %vm6955_vm12 = vc.u32 %v13921_v11, %v13923_v34  ;;  %v6956_v39 = vadd.s32 1, %v13924_v60  ;;  %v3684_v54 = vadd.s32 1, %v8128_v24 }
 0x688   : > { %v6895_v26 = vsel %vm6893_vm10, %v6894_v20, %v8997_v16  ;;  %v3644_v28 = vshrl.u32 %v3626_v17, %v3642_v4  ;;  %v3647_v47 = vadd.s32 127, %v3646_v56  ;;  %vm6886_vm13 = vweird.f32 %v13638_v50 }
 0x689   : > { %vm6889_vm14 = vcmp.lt.s32.totalorder %v6888_v49, 2  ;;  %v6892_v15 = vsel %vm6890_vm9, %v8995_v38, %v6891_v0  ;;  %v6957_v40 = vsel %vm6955_vm12, %v6956_v39, %v13924_v60  ;;  %v3663_v27 = vadd.s32 3, %v3659_v18 }
 0x68a   : > { %v6896_v46 = vsel %vm6889_vm14, %v6892_v15, %v6895_v26  ;;  %v3645_v51 = vor.u32 %v3644_v28, %v3643_v44  ;;  %v3648_v7 = vshll.u32 %v3647_v47, 23  ;;  %v6958_v57 = vadd.s32 %v6957_v40, %v6953_v41 }
 0x68b   : > { %v6897_v58 = vsel %vm6886_vm13, nan, %v6896_v46  ;;  %v3681_v32 = vand.u32 8388607, %v3674_v29  ;;  %vm3685_vm15 = vcmp.gt.s32.totalorder %v3684_v54, 0  ;;  %v991_v49 = vmul.f32 %v9649_v12, %v13882_v48 }
 0x68c   : > { %7785 = vst [vmem:[%s10000_s14 + $0x1b8] sm:$0xff] %v6897_v58  ;;  %v3649_v2 = vor.u32 4788187, %v3648_v7  ;;  %v6959_v50 = vadd.s32 536870912, %v6958_v57  ;;  %v3686_v55 = vsel %vm3685_vm15, %v3684_v54, 0  ;;  %v3652_v30 = vcvt.s32.f32 %v3645_v51 }
 0x68d   : > { %v3688_v13 = vand.u32 31, %v3686_v55  ;;  %v13947_v62 = vand.u32 3, %v3663_v27  ;;  %vm6900_vm0 = vcmp.lt.s32.totalorder %v13788_v63, 0  ;;  %v3682_v21 = vor.u32 8388608, %v3681_v32 }
 0x68e   : > { %v3650_v42 = vand.u32 2147483647, %v3649_v2  ;;  %v6960_v31 = vshrl.u32 %v6959_v50, 30  ;;  %v13952_v17 = vadd.f32 %v9656_v19, %v991_v49  ;;  %v3687_v44 = vshrl.u32 %v3686_v55, 5 }
 0x68f   : > { %v3689_v45 = vsub.s32 32, %v3688_v13  ;;  %v3691_v38 = vshll.u32 %v9287_v61, %v3688_v13  ;;  %v3694_v48 = vshll.u32 %v9288_v1, %v3688_v13  ;;  %v3697_v56 = vshll.u32 %v9289_v3, %v3688_v13 }
 0x690   : > { %v3653_v60 = vmul.f32 %v3652_v30, %v3650_v42  ;;  %v6961_v24 = vshll.u32 %v6960_v31, 30  ;;  %v6984_v0 = vsub.s32 4, %v6960_v31  ;;  %v3700_v26 = vshll.u32 %v9290_v5, %v3688_v13 }
 0x691   : > { %v3692_v52 = vshrl.u32 %v9288_v1, %v3689_v45  ;;  %v3695_v18 = vshrl.u32 %v9289_v3, %v3689_v45  ;;  %v3698_v16 = vshrl.u32 %v9290_v5, %v3689_v45  ;;  %v3701_v41 = vshrl.u32 %v9291_v10, %v3689_v45 }
 0x692   : > { %v3654_v20 = vxor.u32 2147483648, %v3653_v60  ;;  %v13958_v4 = vsub.s32 %v6958_v57, %v6961_v24  ;;  %vm13971_vm3 = vcmp.le.f32.partialorder %v6898_v43, 0.7853982  ;;  %v3703_v7 = vshll.u32 %v9291_v10, %v3688_v13 }
 0x693   : > { %v3693_v39 = vor.u32 %v3692_v52, %v3691_v38  ;;  %v3696_v54 = vor.u32 %v3695_v18, %v3694_v48  ;;  %v3699_v15 = vor.u32 %v3698_v16, %v3697_v56  ;;  %v3702_v51 = vor.u32 %v3701_v41, %v3700_v26  ;;  %v13989_v52 = vpop.f32.mrb[28].mxu1 }
 0x694   : > { %v3655_v28 = vsel %vm3572_vm2, %v3654_v20, %v3653_v60  ;;  %v6964_v47 = vsub.s32 0, %v13958_v4  ;;  %v3704_v57 = vshrl.u32 %v9292_v22, %v3689_v45  ;;  %v13978_v27 = vshll.u32 %v3682_v21, 8 }
 0x695   : > { %v3658_v40 = vsel %vm13907_vm4, %v13733_v35, %v3655_v28  ;;  %v7005_v32 = vand.u32 2139095040, %v13952_v17  ;;  %v6985_v37 = vsel %vm6900_vm0, %v6984_v0, %v6960_v31  ;;  %v3690_v43 = vshrl.u32 %v9287_v61, %v3689_v45 }
 0x696   : > { %8998 = vcosq.f32 %v3658_v40  ;;  %v8253_v58 = vmin.u32 %v6964_v47, %v13958_v4  ;;  %v3705_v2 = vor.u32 %v3704_v57, %v3703_v7  ;;  %vm3706_vm1 = vcmp.lt.s32.totalorder %v3687_v44, 1 }
 0x697   : > { %9000 = vsinq.f32 %v3658_v40  ;;  %vm3707_vm2 = vcmp.lt.s32.totalorder %v3687_v44, 2  ;;  %vm3709_vm4 = vcmp.lt.s32.totalorder %v3687_v44, 4  ;;  %vm3708_vm5 = vcmp.lt.s32.totalorder %v3687_v44, 3 }
 0x698   : > { %v6966_v50 = vclz %v8253_v58  ;;  %v3711_v55 = vsel %vm3709_vm4, %v3699_v15, 2102212464  ;;  %v3714_v49 = vsel %vm3706_vm1, %v3693_v39, %v3696_v54  ;;  %v3715_v13 = vsel %vm3709_vm4, %v3702_v51, 920167782 }
 0x699   : > { %vm3669_vm6 = vcmp.eq.s32.totalorder %v13947_v62, 2  ;;  %v3710_v30 = vsel %vm3706_vm1, %v3690_v43, %v3693_v39  ;;  %v3716_v21 = vsel %vm3708_vm5, %v3699_v15, %v3715_v13  ;;  %v3718_v60 = vsel %vm3706_vm1, %v3696_v54, %v3699_v15 }
 0x69a   : > { %v8254_v42 = vadd.s32 4294967294, %v6966_v50  ;;  %vm3666_vm7 = vcmp.eq.s32.totalorder %v13947_v62, 0  ;;  %v3712_v31 = vsel %vm3708_vm5, %v3696_v54, %v3711_v55  ;;  %v3717_v45 = vsel %vm3707_vm2, %v3714_v49, %v3716_v21 }
 0x69b   : > { %v3719_v24 = vsel %vm3709_vm4, %v3705_v2, 1326507024  ;;  %v7006_v38 = vshrl.u32 %v7005_v32, 23  ;;  %v13993_v18 = vmul.u32.u64.low %v13978_v27, %v3717_v45  ;;  %v13994_v16 = vmul.u32.u64.high %v13978_v27, %v3717_v45, %v13993_v18 }
 0x69c   : > { %vm8255_vm8 = vcmp.lt.s32.totalorder %v8254_v42, 0  ;;  %v3720_v48 = vsel %vm3708_vm5, %v3702_v51, %v3719_v24  ;;  %vm3662_vm9 = vweird.f32 %v13733_v35  ;;  %v7002_v41 = vand.u32 2147483647, %v13952_v17 }
 0x69d   : > { %v6969_v20 = vsel %vm8255_vm8, 0, %v8254_v42  ;;  %v3721_v56 = vsel %vm3707_vm2, %v3718_v60, %v3720_v48  ;;  %v8256_v0 = vadd.s32 4294967169, %v7006_v38  ;;  %v6954_v39 = vadd.s32 %v13923_v34, %v13921_v11 }
 0x69e   : > { %v6970_v26 = vsub.s32 32, %v6969_v20  ;;  %v6974_v28 = vsub.s32 4294967266, %v6969_v20  ;;  %v6987_v47 = vsel %vm13971_vm3, 0, %v6985_v37  ;;  %v3713_v54 = vsel %vm3707_vm2, %v3710_v30, %v3712_v31 }
 0x69f   : > { %v14006_v15 = vmul.u32.u64.low %v13978_v27, %v3721_v56  ;;  %v14007_v40 = vmul.u32.u64.high %v13978_v27, %v3721_v56, %v14006_v15  ;;  %v7012_v51 = vadd.s32 1, %v8256_v0  ;;  %v6971_v57 = vshll.u32 %v13958_v4, %v6969_v20 }
 0x6a0   : > { %v8999_v7 = vpop.eup %8998  ;;  %v6972_v58 = vshrl.u32 %v6954_v39, %v6970_v26  ;;  %v6975_v32 = vadd.s32 127, %v6974_v28  ;;  %v3732_v43 = vadd.s32 1, %v13994_v16  ;;  %v6991_v2 = vadd.s32 3, %v6987_v47 }
 0x6a1   : > { %v9001_v11 = vpop.eup %9000  ;;  %v3670_v34 = vxor.u32 2147483648, %v8999_v7  ;;  %v7009_v37 = vand.u32 8388607, %v7002_v41  ;;  %vm7013_vm10 = vcmp.gt.s32.totalorder %v7012_v51, 0  ;;  %v3729_v4 = vmul.u32 %v13978_v27, %v3713_v54 }
 0x6a2   : > { %v3667_v44 = vxor.u32 2147483648, %v9001_v11  ;;  %v6973_v50 = vor.u32 %v6972_v58, %v6971_v57  ;;  %v6976_v55 = vshll.u32 %v6975_v32, 23  ;;  %v7014_v49 = vsel %vm7013_vm10, %v7012_v51, 0 }
 0x6a3   : > { %v3671_v13 = vsel %vm3669_vm6, %v3670_v34, %v9001_v11  ;;  %vm3731_vm11 = vc.u32 %v14007_v40, %v13993_v18  ;;  %v828_v42 = vadd.f32 %v13563_v33, %v9643_v6  ;;  %vm3665_vm12 = vcmp.lt.s32.totalorder %v13947_v62, 2 }
 0x6a4   : > { %v3668_v30 = vsel %vm3666_vm7, %v8999_v7, %v3667_v44  ;;  %v6977_v21 = vor.u32 4788187, %v6976_v55  ;;  %v3733_v60 = vsel %vm3731_vm11, %v3732_v43, %v13994_v16  ;;  %v14024_v45 = vand.u32 3, %v6991_v2 }
 0x6a5   : > { %v3672_v31 = vsel %vm3665_vm12, %v3668_v30, %v3671_v13  ;;  %v3734_v24 = vadd.s32 %v3733_v60, %v3729_v4  ;;  %v7016_v38 = vand.u32 31, %v7014_v49  ;;  %v6980_v20 = vcvt.s32.f32 %v6973_v50 }
 0x6a6   : > { %v3673_v27 = vsel %vm3662_vm9, nan, %v3672_v31  ;;  %v6978_v48 = vand.u32 2147483647, %v6977_v21  ;;  %v7010_v56 = vor.u32 8388608, %v7009_v37  ;;  %v7015_v0 = vshrl.u32 %v7014_v49, 5 }
 0x6a7   : > { %7754 = vst [vmem:[%s10000_s14 + $0xc0] sm:$0xff] %v3673_v27  ;;  %v3735_v33 = vadd.s32 536870912, %v3734_v24  ;;  %v7017_v39 = vsub.s32 32, %v7016_v38  ;;  %v960_v62 = vmul.f32 %v9647_v9, %v828_v42  ;;  %v7019_v16 = vshll.u32 %v9287_v61, %v7016_v38 }
 0x6a8   : > { %v6981_v26 = vmul.f32 %v6980_v20, %v6978_v48  ;;  %v7022_v28 = vshll.u32 %v9288_v1, %v7016_v38  ;;  %v7025_v47 = vshll.u32 %v9289_v3, %v7016_v38  ;;  %v7028_v51 = vshll.u32 %v9290_v5, %v7016_v38 }
 0x6a9   : > { %v3736_v54 = vshrl.u32 %v3735_v33, 30  ;;  %v7020_v35 = vshrl.u32 %v9288_v1, %v7017_v39  ;;  %v7023_v15 = vshrl.u32 %v9289_v3, %v7017_v39  ;;  %v7026_v57 = vshrl.u32 %v9290_v5, %v7017_v39 }
 0x6aa   : > { %v6982_v7 = vxor.u32 2147483648, %v6981_v26  ;;  %v7029_v58 = vshrl.u32 %v9291_v10, %v7017_v39  ;;  %v7032_v32 = vshrl.u32 %v9292_v22, %v7017_v39  ;;  %v7031_v34 = vshll.u32 %v9291_v10, %v7016_v38 }
 0x6ab   : > { %v3737_v43 = vshll.u32 %v3736_v54, 30  ;;  %v7021_v11 = vor.u32 %v7020_v35, %v7019_v16  ;;  %v14040_v2 = vshll.u32 %v7010_v56, 8  ;;  %v7024_v44 = vor.u32 %v7023_v15, %v7022_v28 }
 0x6ac   : > { %v6983_v37 = vsel %vm6900_vm0, %v6982_v7, %v6981_v26  ;;  %v7027_v50 = vor.u32 %v7026_v57, %v7025_v47  ;;  %v7030_v55 = vor.u32 %v7029_v58, %v7028_v51  ;;  %v7033_v4 = vor.u32 %v7032_v32, %v7031_v34 }
 0x6ad   : > { %v6986_v49 = vsel %vm13971_vm3, %v13788_v63, %v6983_v37  ;;  %v14047_v13 = vsub.s32 %v3734_v24, %v3737_v43  ;;  %v14050_v42 = vadd.f32 %v9652_v14, %v960_v62  ;;  %vm7034_vm13 = vcmp.lt.s32.totalorder %v7015_v0, 1  ;;  %v14081_v43 = vpop.f32.mrb[29].mxu0 }
 0x6ae   : > { %9002 = vcosq.f32 %v6986_v49  ;;  %vm7035_vm14 = vcmp.lt.s32.totalorder %v7015_v0, 2  ;;  %vm7037_vm15 = vcmp.lt.s32.totalorder %v7015_v0, 4  ;;  %vm7036_vm0 = vcmp.lt.s32.totalorder %v7015_v0, 3 }
 0x6af   : > { %9004 = vsinq.f32 %v6986_v49  ;;  %v3740_v30 = vsub.s32 0, %v14047_v13  ;;  %v7039_v21 = vsel %vm7037_vm15, %v7027_v50, 2102212464  ;;  %v3760_v60 = vsub.s32 4, %v3736_v54 }
 0x6b0   : > { %v7018_v31 = vshrl.u32 %v9287_v61, %v7017_v39  ;;  %v7042_v46 = vsel %vm7034_vm13, %v7021_v11, %v7024_v44  ;;  %v7043_v38 = vsel %vm7037_vm15, %v7030_v55, 920167782  ;;  %v7046_v48 = vsel %vm7034_vm13, %v7024_v44, %v7027_v50 }
 0x6b1   : > { %v8129_v24 = vmin.u32 %v3740_v30, %v14047_v13  ;;  %v7044_v27 = vsel %vm7036_vm0, %v7027_v50, %v7043_v38  ;;  %v7047_v20 = vsel %vm7037_vm15, %v7033_v4, 1326507024  ;;  %v7040_v33 = vsel %vm7036_vm0, %v7024_v44, %v7039_v21 }
 0x6b2   : > { %v7038_v56 = vsel %vm7034_vm13, %v7018_v31, %v7021_v11  ;;  %v7045_v62 = vsel %vm7035_vm14, %v7042_v46, %v7044_v27  ;;  %v7048_v26 = vsel %vm7036_vm0, %v7030_v55, %v7047_v20  ;;  %vm3676_vm3 = vcmp.lt.s32.totalorder %v13885_v59, 0 }
 0x6b3   : > { %v3742_v16 = vclz %v8129_v24  ;;  %v3761_v28 = vsel %vm3676_vm3, %v3760_v60, %v3736_v54  ;;  %v7049_v39 = vsel %vm7035_vm14, %v7046_v48, %v7048_v26  ;;  %vm6990_vm1 = vweird.f32 %v13788_v63 }
 0x6b4   : > { %v14061_v47 = vmul.u32.u64.low %v14040_v2, %v7045_v62  ;;  %v14062_v35 = vmul.u32.u64.high %v14040_v2, %v7045_v62, %v14061_v47  ;;  %v7041_v51 = vsel %vm7035_vm14, %v7038_v56, %v7040_v33  ;;  %vm6994_vm2 = vcmp.eq.s32.totalorder %v14024_v45, 0 }
 0x6b5   : > { %v8130_v15 = vadd.s32 4294967294, %v3742_v16  ;;  %v14068_v7 = vmul.u32.u64.low %v14040_v2, %v7049_v39  ;;  %v14069_v57 = vmul.u32.u64.high %v14040_v2, %v7049_v39, %v14068_v7  ;;  %vm14074_vm4 = vcmp.le.f32.partialorder %v3674_v29, 0.7853982 }
 0x6b6   : > { %v3781_v58 = vand.u32 2139095040, %v14050_v42  ;;  %v908_v32 = vadd.f32 %v13684_v23, %v9643_v6  ;;  %vm6997_vm5 = vcmp.eq.s32.totalorder %v14024_v45, 2  ;;  %v3730_v0 = vadd.s32 %v13993_v18, %v14007_v40 }
 0x6b7   : > { %vm8131_vm6 = vcmp.lt.s32.totalorder %v8130_v15, 0  ;;  %v3763_v11 = vsel %vm14074_vm4, 0, %v3761_v28  ;;  %v7057_v37 = vmul.u32 %v14040_v2, %v7041_v51  ;;  %v7060_v44 = vadd.s32 1, %v14062_v35 }
 0x6b8   : > { %v9003_v29 = vpop.eup %9002  ;;  %v3745_v34 = vsel %vm8131_vm6, 0, %v8130_v15  ;;  %v3782_v50 = vshrl.u32 %v3781_v58, 23  ;;  %v3778_v30 = vand.u32 2147483647, %v14050_v42  ;;  %vm7059_vm7 = vc.u32 %v14069_v57, %v14061_v47 }
 0x6b9   : > { %v9005_v55 = vpop.eup %9004  ;;  %v6998_v23 = vxor.u32 2147483648, %v9003_v29  ;;  %v3746_v49 = vsub.s32 32, %v3745_v34  ;;  %v3750_v4 = vsub.s32 4294967266, %v3745_v34  ;;  %v3747_v18 = vshll.u32 %v14047_v13, %v3745_v34 }
 0x6ba   : > { %v6995_v21 = vxor.u32 2147483648, %v9005_v55  ;;  %v8132_v40 = vadd.s32 4294967169, %v3782_v50  ;;  %v7061_v46 = vsel %vm7059_vm7, %v7060_v44, %v14062_v35  ;;  %vm6993_vm8 = vcmp.lt.s32.totalorder %v14024_v45, 2 }
 0x6bb   : > { %v6999_v60 = vsel %vm6997_vm5, %v6998_v23, %v9005_v55  ;;  %v3748_v2 = vshrl.u32 %v3730_v0, %v3746_v49  ;;  %v3751_v31 = vadd.s32 127, %v3750_v4  ;;  %v7062_v24 = vadd.s32 %v7061_v46, %v7057_v37 }
 0x6bc   : > { %v6996_v38 = vsel %vm6994_vm2, %v9003_v29, %v6995_v21  ;;  %v3788_v27 = vadd.s32 1, %v8132_v40  ;;  %v830_v56 = vadd.f32 %v13753_v53, %v9645_v8  ;;  %v3767_v62 = vadd.s32 3, %v3763_v11 }
 0x6bd   : > { %v7000_v13 = vsel %vm6993_vm8, %v6996_v38, %v6999_v60  ;;  %v3749_v48 = vor.u32 %v3748_v2, %v3747_v18  ;;  %v3752_v20 = vshll.u32 %v3751_v31, 23  ;;  %v7063_v26 = vadd.s32 536870912, %v7062_v24 }
 0x6be   : > { %v7001_v33 = vsel %vm6990_vm1, nan, %v7000_v13  ;;  %vm3789_vm9 = vcmp.gt.s32.totalorder %v3788_v27, 0  ;;  %v3785_v45 = vand.u32 8388607, %v3778_v30  ;;  %v992_v39 = vmul.f32 %v9647_v9, %v908_v32 }
 0x6bf   : > { %7786 = vst [vmem:[%s10000_s14 + $0x1c0] sm:$0xff] %v7001_v33  ;;  %v3753_v16 = vor.u32 4788187, %v3752_v20  ;;  %v3790_v28 = vsel %vm3789_vm9, %v3788_v27, 0  ;;  %v7064_v35 = vshrl.u32 %v7063_v26, 30  ;;  %v3756_v7 = vcvt.s32.f32 %v3749_v48 }
 0x6c0   : > { %v3792_v15 = vand.u32 31, %v3790_v28  ;;  %v14108_v58 = vand.u32 3, %v3767_v62  ;;  %vm7004_vm10 = vcmp.lt.s32.totalorder %v13952_v17, 0  ;;  %v3786_v11 = vor.u32 8388608, %v3785_v45 }
 0x6c1   : > { %v3754_v51 = vand.u32 2147483647, %v3753_v16  ;;  %v7065_v53 = vshll.u32 %v7064_v35, 30  ;;  %v14112_v29 = vadd.f32 %v9652_v14, %v992_v39  ;;  %v14115_v34 = vmul.f32 %v9649_v12, %v830_v56 }
 0x6c2   : > { %v3793_v63 = vsub.s32 32, %v3792_v15  ;;  %v7058_v32 = vadd.s32 %v14061_v47, %v14069_v57  ;;  %v14121_v44 = vshrl.u32 %v3790_v28, 5  ;;  %v3795_v23 = vshll.u32 %v9287_v61, %v3792_v15  ;;  %v14153_v28 = vpop.f32.mrb[29].mxu1 }
 0x6c3   : > { %v3757_v0 = vmul.f32 %v3756_v7, %v3754_v51  ;;  %v14119_v37 = vsub.s32 %v7062_v24, %v7065_v53  ;;  %v3798_v18 = vshll.u32 %v9288_v1, %v3792_v15  ;;  %v3801_v40 = vshll.u32 %v9289_v3, %v3792_v15 }
 0x6c4   : > { %v3796_v50 = vshrl.u32 %v9288_v1, %v3793_v63  ;;  %v3799_v49 = vshrl.u32 %v9289_v3, %v3793_v63  ;;  %v3802_v4 = vshrl.u32 %v9290_v5, %v3793_v63  ;;  %v3805_v47 = vshrl.u32 %v9291_v10, %v3793_v63 }
 0x6c5   : > { %v3758_v55 = vxor.u32 2147483648, %v3757_v0  ;;  %v7068_v21 = vsub.s32 0, %v14119_v37  ;;  %v7088_v60 = vsub.s32 4, %v7064_v35  ;;  %v3804_v31 = vshll.u32 %v9290_v5, %v3792_v15 }
 0x6c6   : > { %v3797_v2 = vor.u32 %v3796_v50, %v3795_v23  ;;  %v3800_v24 = vor.u32 %v3799_v49, %v3798_v18  ;;  %v3803_v27 = vor.u32 %v3802_v4, %v3801_v40  ;;  %v3807_v48 = vshll.u32 %v9291_v10, %v3792_v15 }
 0x6c7   : > { %v3759_v57 = vsel %vm3676_vm3, %v3758_v55, %v3757_v0  ;;  %v8257_v38 = vmin.u32 %v7068_v21, %v14119_v37  ;;  %v3806_v13 = vor.u32 %v3805_v47, %v3804_v31  ;;  %v3808_v20 = vshrl.u32 %v9292_v22, %v3793_v63 }
 0x6c8   : > { %v3762_v46 = vsel %vm14074_vm4, %v13885_v59, %v3759_v57  ;;  %vm14142_vm11 = vcmp.le.f32.partialorder %v7002_v41, 0.7853982  ;;  %v14146_v54 = vshll.u32 %v3786_v11, 8  ;;  %v7109_v62 = vand.u32 2139095040, %v14112_v29 }
 0x6c9   : > { %9006 = vcosq.f32 %v3762_v46  ;;  %v7070_v33 = vclz %v8257_v38  ;;  %v7089_v26 = vsel %vm7004_vm10, %v7088_v60, %v7064_v35  ;;  %v3794_v16 = vshrl.u32 %v9287_v61, %v3793_v63 }
 0x6ca   : > { %9008 = vsinq.f32 %v3762_v46  ;;  %v3809_v45 = vor.u32 %v3808_v20, %v3807_v48  ;;  %vm3810_vm12 = vcmp.lt.s32.totalorder %v14121_v44, 1  ;;  %vm3812_vm13 = vcmp.lt.s32.totalorder %v14121_v44, 3 }
 0x6cb   : > { %v8258_v39 = vadd.s32 4294967294, %v7070_v33  ;;  %vm3813_vm14 = vcmp.lt.s32.totalorder %v14121_v44, 4  ;;  %v3818_v41 = vsel %vm3810_vm12, %v3797_v2, %v3800_v24  ;;  %v3822_v35 = vsel %vm3810_vm12, %v3800_v24, %v3803_v27 }
 0x6cc   : > { %v3815_v15 = vsel %vm3813_vm14, %v3803_v27, 2102212464  ;;  %v3819_v51 = vsel %vm3813_vm14, %v3806_v13, 920167782  ;;  %v3823_v7 = vsel %vm3813_vm14, %v3809_v45, 1326507024  ;;  %v3814_v11 = vsel %vm3810_vm12, %v3794_v16, %v3797_v2 }
 0x6cd   : > { %vm3770_vm15 = vcmp.eq.s32.totalorder %v14108_v58, 0  ;;  %vm8259_vm0 = vcmp.lt.s32.totalorder %v8258_v39, 0  ;;  %vm3811_vm3 = vcmp.lt.s32.totalorder %v14121_v44, 2  ;;  %v3820_v53 = vsel %vm3812_vm13, %v3803_v27, %v3819_v51 }
 0x6ce   : > { %v3824_v63 = vsel %vm3812_vm13, %v3806_v13, %v3823_v7  ;;  %vm3769_vm1 = vcmp.lt.s32.totalorder %v14108_v58, 2  ;;  %v7073_v0 = vsel %vm8259_vm0, 0, %v8258_v39  ;;  %v3821_v50 = vsel %vm3811_vm3, %v3818_v41, %v3820_v53 }
 0x6cf   : > { %v3825_v55 = vsel %vm3811_vm3, %v3822_v35, %v3824_v63  ;;  %vm3766_vm2 = vweird.f32 %v13885_v59  ;;  %v7074_v23 = vsub.s32 32, %v7073_v0  ;;  %v7078_v49 = vsub.s32 4294967266, %v7073_v0 }
 0x6d0   : > { %v3816_v4 = vsel %vm3812_vm13, %v3800_v24, %v3815_v15  ;;  %v7110_v21 = vshrl.u32 %v7109_v62, 23  ;;  %v14178_v18 = vmul.u32.u64.low %v14146_v54, %v3825_v55  ;;  %v14179_v40 = vmul.u32.u64.high %v14146_v54, %v3825_v55, %v14178_v18 }
 0x6d1   : > { %v14182_v47 = vmul.u32.u64.low %v14146_v54, %v3821_v50  ;;  %v14183_v57 = vmul.u32.u64.high %v14146_v54, %v3821_v50, %v14182_v47  ;;  %v7075_v60 = vshll.u32 %v14119_v37, %v7073_v0  ;;  %v7076_v2 = vshrl.u32 %v7058_v32, %v7074_v23 }
 0x6d2   : > { %v7079_v31 = vadd.s32 127, %v7078_v49  ;;  %v8260_v46 = vadd.s32 4294967169, %v7110_v21  ;;  %vm3773_vm4 = vcmp.eq.s32.totalorder %v14108_v58, 2  ;;  %v7091_v24 = vsel %vm14142_vm11, 0, %v7089_v26 }
 0x6d3   : > { %v9007_v38 = vpop.eup %9006  ;;  %v3817_v27 = vsel %vm3811_vm3, %v3814_v11, %v3816_v4  ;;  %v7106_v13 = vand.u32 2147483647, %v14112_v29  ;;  %v7077_v33 = vor.u32 %v7076_v2, %v7075_v60  ;;  %vm3835_vm5 = vc.u32 %v14179_v40, %v14182_v47 }
 0x6d4   : > { %v9009_v48 = vpop.eup %9008  ;;  %v3774_v20 = vxor.u32 2147483648, %v9007_v38  ;;  %v7080_v62 = vshll.u32 %v7079_v31, 23  ;;  %v7116_v16 = vadd.s32 1, %v8260_v46  ;;  %v3836_v32 = vadd.s32 1, %v14183_v57 }
 0x6d5   : > { %v3771_v37 = vxor.u32 2147483648, %v9009_v48  ;;  %v14198_v26 = vadd.f32 %v9656_v19, %v14115_v34  ;;  %v3833_v39 = vmul.u32 %v14146_v54, %v3817_v27  ;;  %v7095_v15 = vadd.s32 3, %v7091_v24 }
 0x6d6   : > { %v3775_v44 = vsel %vm3773_vm4, %v3774_v20, %v9009_v48  ;;  %v7081_v45 = vor.u32 4788187, %v7080_v62  ;;  %vm7117_vm6 = vcmp.gt.s32.totalorder %v7116_v16, 0  ;;  %v3837_v51 = vsel %vm3835_vm5, %v3836_v32, %v14183_v57 }
 0x6d7   : > { %v3772_v41 = vsel %vm3770_vm15, %v9007_v38, %v3771_v37  ;;  %v7118_v35 = vsel %vm7117_vm6, %v7116_v16, 0  ;;  %v7084_v63 = vcvt.s32.f32 %v7077_v33  ;;  %v3838_v0 = vadd.s32 %v3837_v51, %v3833_v39 }
 0x6d8   : > { %v3776_v7 = vsel %vm3769_vm1, %v3772_v41, %v3775_v44  ;;  %v7082_v53 = vand.u32 2147483647, %v7081_v45  ;;  %v7120_v11 = vand.u32 31, %v7118_v35  ;;  %v7113_v55 = vand.u32 8388607, %v7106_v13 }
 0x6d9   : > { %v3777_v34 = vsel %vm3766_vm2, nan, %v3776_v7  ;;  %v3839_v50 = vadd.s32 536870912, %v3838_v0  ;;  %v14213_v23 = vadd.f32 %v13825_v36, %v9645_v8  ;;  %v14215_v49 = vand.u32 3, %v7095_v15 }
 0x6da   : > { %7755 = vst [vmem:[%s10000_s14 + $0xc8] sm:$0xff] %v3777_v34  ;;  %v7085_v54 = vmul.f32 %v7084_v63, %v7082_v53  ;;  %v7119_v58 = vshrl.u32 %v7118_v35, 5  ;;  %v7121_v4 = vsub.s32 32, %v7120_v11  ;;  %v3885_v21 = vand.u32 2139095040, %v14198_v26 }
 0x6db   : > { %v14218_v59 = vshrl.u32 %v3839_v50, 30  ;;  %v7123_v57 = vshll.u32 %v9287_v61, %v7120_v11  ;;  %v7126_v60 = vshll.u32 %v9288_v1, %v7120_v11  ;;  %v7129_v36 = vshll.u32 %v9289_v3, %v7120_v11 }
 0x6dc   : > { %v7086_v18 = vxor.u32 2147483648, %v7085_v54  ;;  %v7124_v2 = vshrl.u32 %v9288_v1, %v7121_v4  ;;  %v7127_v31 = vshrl.u32 %v9289_v3, %v7121_v4  ;;  %v7130_v46 = vshrl.u32 %v9290_v5, %v7121_v4 }
 0x6dd   : > { %v3841_v24 = vshll.u32 %v14218_v59, 30  ;;  %v7132_v27 = vshll.u32 %v9290_v5, %v7120_v11  ;;  %v7133_v48 = vshrl.u32 %v9291_v10, %v7121_v4  ;;  %v7114_v32 = vor.u32 8388608, %v7113_v55 }
 0x6de   : > { %v7087_v38 = vsel %vm7004_vm10, %v7086_v18, %v7085_v54  ;;  %v7125_v33 = vor.u32 %v7124_v2, %v7123_v57  ;;  %v7128_v62 = vor.u32 %v7127_v31, %v7126_v60  ;;  %v7131_v16 = vor.u32 %v7130_v46, %v7129_v36  ;;  %v14262_v36 = vpop.f32.mrb[30].mxu0 }
 0x6df   : > { %v7090_v20 = vsel %vm14142_vm11, %v13952_v17, %v7087_v38  ;;  %v14234_v37 = vsub.s32 %v3838_v0, %v3841_v24  ;;  %v7134_v44 = vor.u32 %v7133_v48, %v7132_v27  ;;  %v7135_v45 = vshll.u32 %v9291_v10, %v7120_v11 }
 0x6e0   : > { %9010 = vcosq.f32 %v7090_v20  ;;  %v7136_v39 = vshrl.u32 %v9292_v22, %v7121_v4  ;;  %v3886_v41 = vshrl.u32 %v3885_v21, 23  ;;  %vm3780_vm7 = vcmp.lt.s32.totalorder %v14050_v42, 0 }
 0x6e1   : > { %9012 = vsinq.f32 %v7090_v20  ;;  %v3844_v15 = vsub.s32 0, %v14234_v37  ;;  %vm7138_vm8 = vcmp.lt.s32.totalorder %v7119_v58, 1  ;;  %vm7140_vm9 = vcmp.lt.s32.totalorder %v7119_v58, 3 }
 0x6e2   : > { %vm7141_vm10 = vcmp.lt.s32.totalorder %v7119_v58, 4  ;;  %v7137_v56 = vor.u32 %v7136_v39, %v7135_v45  ;;  %v7146_v35 = vsel %vm7138_vm8, %v7125_v33, %v7128_v62  ;;  %v7122_v63 = vshrl.u32 %v9287_v61, %v7121_v4 }
 0x6e3   : > { %v7143_v51 = vsel %vm7141_vm10, %v7131_v16, 2102212464  ;;  %v7147_v7 = vsel %vm7141_vm10, %v7134_v44, 920167782  ;;  %v8133_v53 = vmin.u32 %v3844_v15, %v14234_v37  ;;  %vm7139_vm11 = vcmp.lt.s32.totalorder %v7119_v58, 2 }
 0x6e4   : > { %v7148_v0 = vsel %vm7140_vm9, %v7131_v16, %v7147_v7  ;;  %v7150_v11 = vsel %vm7138_vm8, %v7128_v62, %v7131_v16  ;;  %v7151_v54 = vsel %vm7141_vm10, %v7137_v56, 1326507024  ;;  %v7154_v50 = vshll.u32 %v7114_v32, 8 }
 0x6e5   : > { %v7149_v34 = vsel %vm7139_vm11, %v7146_v35, %v7148_v0  ;;  %vm7097_vm12 = vcmp.lt.s32.totalorder %v14215_v49, 2  ;;  %vm14249_vm13 = vcmp.le.f32.partialorder %v3778_v30, 0.7853982  ;;  %v3846_v21 = vclz %v8133_v53 }
 0x6e6   : > { %v7142_v4 = vsel %vm7138_vm8, %v7122_v63, %v7125_v33  ;;  %v7144_v18 = vsel %vm7140_vm9, %v7128_v62, %v7143_v51  ;;  %vm7094_vm14 = vweird.f32 %v13952_v17  ;;  %v3864_v57 = vsub.s32 4, %v14218_v59 }
 0x6e7   : > { %v7152_v60 = vsel %vm7140_vm9, %v7134_v44, %v7151_v54  ;;  %v14258_v2 = vmul.u32.u64.low %v7154_v50, %v7149_v34  ;;  %v14259_v31 = vmul.u32.u64.high %v7154_v50, %v7149_v34, %v14258_v2  ;;  %vm7098_vm15 = vcmp.eq.s32.totalorder %v14215_v49, 0 }
 0x6e8   : > { %v8134_v30 = vadd.s32 4294967294, %v3846_v21  ;;  %v7153_v46 = vsel %vm7139_vm11, %v7150_v11, %v7152_v60  ;;  %v8136_v38 = vadd.s32 4294967169, %v3886_v41  ;;  %vm7101_vm0 = vcmp.eq.s32.totalorder %v14215_v49, 2 }
 0x6e9   : > { %v7145_v24 = vsel %vm7139_vm11, %v7142_v4, %v7144_v18  ;;  %v14268_v27 = vmul.u32.u64.low %v7154_v50, %v7153_v46  ;;  %v14269_v48 = vmul.u32.u64.high %v7154_v50, %v7153_v46, %v14268_v27  ;;  %v3834_v33 = vadd.s32 %v14182_v47, %v14179_v40 }
 0x6ea   : > { %v9011_v20 = vpop.eup %9010  ;;  %vm8135_vm3 = vcmp.lt.s32.totalorder %v8134_v30, 0  ;;  %v3882_v62 = vand.u32 2147483647, %v14198_v26  ;;  %v3892_v16 = vadd.s32 1, %v8136_v38  ;;  %v3865_v39 = vsel %vm3780_vm7, %v3864_v57, %v14218_v59 }
 0x6eb   : > { %v9013_v32 = vpop.eup %9012  ;;  %v7102_v44 = vxor.u32 2147483648, %v9011_v20  ;;  %v3849_v45 = vsel %vm8135_vm3, 0, %v8134_v30  ;;  %v7164_v58 = vadd.s32 1, %v14259_v31  ;;  %v7161_v51 = vmul.u32 %v7154_v50, %v7145_v24 }
 0x6ec   : > { %v7099_v41 = vxor.u32 2147483648, %v9013_v32  ;;  %v3850_v15 = vsub.s32 32, %v3849_v45  ;;  %v3854_v56 = vsub.s32 4294967266, %v3849_v45  ;;  %v3851_v47 = vshll.u32 %v14234_v37, %v3849_v45 }
 0x6ed   : > { %v7103_v40 = vsel %vm7101_vm0, %v7102_v44, %v9013_v32  ;;  %vm7163_vm1 = vc.u32 %v14269_v48, %v14258_v2  ;;  %vm3893_vm2 = vcmp.gt.s32.totalorder %v3892_v16, 0  ;;  %v3867_v0 = vsel %vm14249_vm13, 0, %v3865_v39 }
 0x6ee   : > { %v7100_v35 = vsel %vm7098_vm15, %v9011_v20, %v7099_v41  ;;  %v3852_v59 = vshrl.u32 %v3834_v33, %v3850_v15  ;;  %v3855_v7 = vadd.s32 127, %v3854_v56  ;;  %v7165_v53 = vsel %vm7163_vm1, %v7164_v58, %v14259_v31 }
 0x6ef   : > { %v7104_v63 = vsel %vm7097_vm12, %v7100_v35, %v7103_v40  ;;  %v7166_v34 = vadd.s32 %v7165_v53, %v7161_v51  ;;  %v3894_v11 = vsel %vm3893_vm2, %v3892_v16, 0  ;;  %v3889_v21 = vand.u32 8388607, %v3882_v62 }
 0x6f0   : > { %v7105_v37 = vsel %vm7094_vm14, nan, %v7104_v63  ;;  %v3853_v54 = vor.u32 %v3852_v59, %v3851_v47  ;;  %v3856_v50 = vshll.u32 %v3855_v7, 23  ;;  %v3896_v18 = vand.u32 31, %v3894_v11 }
 0x6f1   : > { %7787 = vst [vmem:[%s10000_s14 + $0x1c8] sm:$0xff] %v7105_v37  ;;  %v7167_v4 = vadd.s32 536870912, %v7166_v34  ;;  %v14297_v49 = vadd.f32 %v13940_v25, %v9643_v6  ;;  %v3871_v60 = vadd.s32 3, %v3867_v0  ;;  %v993_v17 = vmul.f32 %v9649_v12, %v14213_v23 }
 0x6f2   : > { %v3857_v57 = vor.u32 4788187, %v3856_v50  ;;  %v3897_v30 = vsub.s32 32, %v3896_v18  ;;  %v3860_v38 = vcvt.s32.f32 %v3853_v54  ;;  %v3890_v24 = vor.u32 8388608, %v3889_v21 }
 0x6f3   : > { %v7168_v31 = vshrl.u32 %v7167_v4, 30  ;;  %v14301_v27 = vshrl.u32 %v3894_v11, 5  ;;  %v3899_v33 = vshll.u32 %v9287_v61, %v3896_v18  ;;  %v3902_v32 = vshll.u32 %v9288_v1, %v3896_v18 }
 0x6f4   : > { %v3858_v46 = vand.u32 2147483647, %v3857_v57  ;;  %v3900_v16 = vshrl.u32 %v9288_v1, %v3897_v30  ;;  %v3903_v44 = vshrl.u32 %v9289_v3, %v3897_v30  ;;  %v3906_v45 = vshrl.u32 %v9290_v5, %v3897_v30 }
 0x6f5   : > { %v7169_v20 = vshll.u32 %v7168_v31, 30  ;;  %v3909_v39 = vshrl.u32 %v9291_v10, %v3897_v30  ;;  %v3905_v58 = vshll.u32 %v9289_v3, %v3896_v18  ;;  %v3908_v41 = vshll.u32 %v9290_v5, %v3896_v18 }
 0x6f6   : > { %v3861_v25 = vmul.f32 %v3860_v38, %v3858_v46  ;;  %v3912_v15 = vshrl.u32 %v9292_v22, %v3897_v30  ;;  %v14314_v51 = vand.u32 3, %v3871_v60  ;;  %v3901_v40 = vor.u32 %v3900_v16, %v3899_v33 }
 0x6f7   : > { %v14309_v23 = vsub.s32 %v7166_v34, %v7169_v20  ;;  %v3904_v47 = vor.u32 %v3903_v44, %v3902_v32  ;;  %vm7108_vm4 = vcmp.lt.s32.totalorder %v14112_v29, 0  ;;  %v3907_v59 = vor.u32 %v3906_v45, %v3905_v58 }
 0x6f8   : > { %v3862_v56 = vxor.u32 2147483648, %v3861_v25  ;;  %v3910_v7 = vor.u32 %v3909_v39, %v3908_v41  ;;  %v3911_v53 = vshll.u32 %v9291_v10, %v3896_v18  ;;  %vm3914_vm5 = vcmp.lt.s32.totalorder %v14301_v27, 1 }
 0x6f9   : > { %v7172_v35 = vsub.s32 0, %v14309_v23  ;;  %v3930_v0 = vshll.u32 %v3890_v24, 8  ;;  %v14323_v34 = vadd.f32 %v9656_v19, %v993_v17  ;;  %vm3917_vm6 = vcmp.lt.s32.totalorder %v14301_v27, 4 }
 0x6fa   : > { %v3863_v63 = vsel %vm3780_vm7, %v3862_v56, %v3861_v25  ;;  %v3913_v54 = vor.u32 %v3912_v15, %v3911_v53  ;;  %v3898_v50 = vshrl.u32 %v9287_v61, %v3897_v30  ;;  %v3922_v21 = vsel %vm3914_vm5, %v3901_v40, %v3904_v47  ;;  %v14361_v56 = vpop.f32.mrb[30].mxu1 }
 0x6fb   : > { %v3866_v11 = vsel %vm14249_vm13, %v14050_v42, %v3863_v63  ;;  %v8261_v37 = vmin.u32 %v7172_v35, %v14309_v23  ;;  %v3923_v4 = vsel %vm3917_vm6, %v3910_v7, 920167782  ;;  %vm3916_vm7 = vcmp.lt.s32.totalorder %v14301_v27, 3 }
 0x6fc   : > { %9014 = vcosq.f32 %v3866_v11  ;;  %v3919_v55 = vsel %vm3917_vm6, %v3907_v59, 2102212464  ;;  %v7192_v57 = vsub.s32 4, %v7168_v31  ;;  %vm3915_vm8 = vcmp.lt.s32.totalorder %v14301_v27, 2 }
 0x6fd   : > { %9016 = vsinq.f32 %v3866_v11  ;;  %v7174_v18 = vclz %v8261_v37  ;;  %v3924_v60 = vsel %vm3916_vm7, %v3907_v59, %v3923_v4  ;;  %v3926_v30 = vsel %vm3914_vm5, %v3904_v47, %v3907_v59 }
 0x6fe   : > { %v3918_v46 = vsel %vm3914_vm5, %v3898_v50, %v3901_v40  ;;  %v3925_v38 = vsel %vm3915_vm8, %v3922_v21, %v3924_v60  ;;  %v3927_v24 = vsel %vm3917_vm6, %v3913_v54, 1326507024  ;;  %v3920_v20 = vsel %vm3916_vm7, %v3904_v47, %v3919_v55 }
 0x6ff   : > { %v8262_v17 = vadd.s32 4294967294, %v7174_v18  ;;  %v3928_v33 = vsel %vm3916_vm7, %v3910_v7, %v3927_v24  ;;  %v14347_v16 = vmul.u32.u64.low %v3930_v0, %v3925_v38  ;;  %v14348_v32 = vmul.u32.u64.high %v3930_v0, %v3925_v38, %v14347_v16 }
 0x700   : > { %v7162_v25 = vadd.s32 %v14258_v2, %v14269_v48  ;;  %v3929_v44 = vsel %vm3915_vm8, %v3926_v30, %v3928_v33  ;;  %v7213_v45 = vand.u32 2139095040, %v14323_v34  ;;  %v7193_v58 = vsel %vm7108_vm4, %v7192_v57, %v7168_v31 }
 0x701   : > { %vm8263_vm9 = vcmp.lt.s32.totalorder %v8262_v17, 0  ;;  %v14358_v41 = vmul.u32.u64.low %v3930_v0, %v3929_v44  ;;  %v14359_v15 = vmul.u32.u64.high %v3930_v0, %v3929_v44, %v14358_v41  ;;  %vm3870_vm10 = vweird.f32 %v14050_v42 }
 0x702   : > { %v7177_v39 = vsel %vm8263_vm9, 0, %v8262_v17  ;;  %v3921_v2 = vsel %vm3915_vm8, %v3918_v46, %v3920_v20  ;;  %v7214_v48 = vshrl.u32 %v7213_v45, 23  ;;  %vm3873_vm11 = vcmp.lt.s32.totalorder %v14314_v51, 2 }
 0x703   : > { %v7178_v40 = vsub.s32 32, %v7177_v39  ;;  %v7182_v47 = vsub.s32 4294967266, %v7177_v39  ;;  %vm3877_vm12 = vcmp.eq.s32.totalorder %v14314_v51, 2  ;;  %vm14370_vm13 = vcmp.le.f32.partialorder %v7106_v13, 0.7853982 }
 0x704   : > { %v3940_v35 = vadd.s32 1, %v14348_v32  ;;  %v7179_v59 = vshll.u32 %v14309_v23, %v7177_v39  ;;  %v8264_v63 = vadd.s32 4294967169, %v7214_v48  ;;  %v7195_v11 = vsel %vm14370_vm13, 0, %v7193_v58 }
 0x705   : > { %v7180_v7 = vshrl.u32 %v7162_v25, %v7178_v40  ;;  %v7183_v53 = vadd.s32 127, %v7182_v47  ;;  %v3937_v37 = vmul.u32 %v3930_v0, %v3921_v2  ;;  %vm3939_vm14 = vc.u32 %v14359_v15, %v14347_v16 }
 0x706   : > { %v9015_v27 = vpop.eup %9014  ;;  %v7210_v13 = vand.u32 2147483647, %v14323_v34  ;;  %v3941_v18 = vsel %vm3939_vm14, %v3940_v35, %v14348_v32  ;;  %v7220_v57 = vadd.s32 1, %v8264_v63  ;;  %v962_v60 = vmul.f32 %v9647_v9, %v14297_v49 }
 0x707   : > { %v9017_v54 = vpop.eup %9016  ;;  %v3878_v50 = vxor.u32 2147483648, %v9015_v27  ;;  %v7181_v21 = vor.u32 %v7180_v7, %v7179_v59  ;;  %v7184_v4 = vshll.u32 %v7183_v53, 23  ;;  %v3942_v55 = vadd.s32 %v3941_v18, %v3937_v37 }
 0x708   : > { %v3875_v23 = vxor.u32 2147483648, %v9017_v54  ;;  %vm3874_vm15 = vcmp.eq.s32.totalorder %v14314_v51, 0  ;;  %v7199_v17 = vadd.s32 3, %v7195_v11  ;;  %v7217_v24 = vand.u32 8388607, %v7210_v13 }
 0x709   : > { %v3879_v0 = vsel %vm3877_vm12, %v3878_v50, %v9017_v54  ;;  %v7185_v30 = vor.u32 4788187, %v7184_v4  ;;  %v3943_v38 = vadd.s32 536870912, %v3942_v55  ;;  %vm7221_vm0 = vcmp.gt.s32.totalorder %v7220_v57, 0 }
 0x70a   : > { %v3876_v46 = vsel %vm3874_vm15, %v9015_v27, %v3875_v23  ;;  %v7188_v32 = vcvt.s32.f32 %v7181_v21  ;;  %v7222_v49 = vsel %vm7221_vm0, %v7220_v57, 0  ;;  %v14396_v39 = vadd.f32 %v9652_v14, %v962_v60 }
 0x70b   : > { %v3880_v20 = vsel %vm3873_vm11, %v3876_v46, %v3879_v0  ;;  %v7186_v33 = vand.u32 2147483647, %v7185_v30  ;;  %v14393_v44 = vshrl.u32 %v3943_v38, 30  ;;  %v7224_v45 = vand.u32 31, %v7222_v49 }
 0x70c   : > { %v3881_v25 = vsel %vm3870_vm10, nan, %v3880_v20  ;;  %v14400_v51 = vand.u32 3, %v7199_v17  ;;  %v7218_v2 = vor.u32 8388608, %v7217_v24  ;;  %v14404_v48 = vadd.f32 %v13989_v52, %v9643_v6 }
 0x70d   : > { %7756 = vst [vmem:[%s10000_s14 + $0xd0] sm:$0xff] %v3881_v25  ;;  %v7189_v58 = vmul.f32 %v7188_v32, %v7186_v33  ;;  %v3945_v41 = vshll.u32 %v14393_v44, 30  ;;  %v7225_v40 = vsub.s32 32, %v7224_v45  ;;  %v7223_v35 = vshrl.u32 %v7222_v49, 5 }
 0x70e   : > { %v3989_v7 = vand.u32 2139095040, %v14396_v39  ;;  %v7227_v63 = vshll.u32 %v9287_v61, %v7224_v45  ;;  %v7230_v54 = vshll.u32 %v9288_v1, %v7224_v45  ;;  %v7233_v50 = vshll.u32 %v9289_v3, %v7224_v45 }
 0x70f   : > { %v7190_v47 = vxor.u32 2147483648, %v7189_v58  ;;  %v14406_v42 = vsub.s32 %v3942_v55, %v3945_v41  ;;  %v7228_v59 = vshrl.u32 %v9288_v1, %v7225_v40  ;;  %v7231_v27 = vshrl.u32 %v9289_v3, %v7225_v40 }
 0x710   : > { %v7234_v11 = vshrl.u32 %v9290_v5, %v7225_v40  ;;  %v7236_v4 = vshll.u32 %v9290_v5, %v7224_v45  ;;  %v7237_v18 = vshrl.u32 %v9291_v10, %v7225_v40  ;;  %v7239_v31 = vshll.u32 %v9291_v10, %v7224_v45 }
 0x711   : > { %v7191_v53 = vsel %vm7108_vm4, %v7190_v47, %v7189_v58  ;;  %v3948_v37 = vsub.s32 0, %v14406_v42  ;;  %v7229_v21 = vor.u32 %v7228_v59, %v7227_v63  ;;  %v7232_v55 = vor.u32 %v7231_v27, %v7230_v54  ;;  %v14437_v59 = vpop.f32.mrb[31].mxu0 }
 0x712   : > { %v7194_v52 = vsel %vm14370_vm13, %v14112_v29, %v7191_v53  ;;  %v7235_v57 = vor.u32 %v7234_v11, %v7233_v50  ;;  %v7238_v60 = vor.u32 %v7237_v18, %v7236_v4  ;;  %v7240_v0 = vshrl.u32 %v9292_v22, %v7225_v40 }
 0x713   : > { %9018 = vcosq.f32 %v7194_v52  ;;  %v8137_v23 = vmin.u32 %v3948_v37, %v14406_v42  ;;  %v14426_v30 = vshll.u32 %v7218_v2, 8  ;;  %v7226_v46 = vshrl.u32 %v9287_v61, %v7225_v40 }
 0x714   : > { %9020 = vsinq.f32 %v7194_v52  ;;  %vm7242_vm3 = vcmp.lt.s32.totalorder %v7223_v35, 1  ;;  %v3990_v38 = vshrl.u32 %v3989_v7, 23  ;;  %v7241_v24 = vor.u32 %v7240_v0, %v7239_v31 }
 0x715   : > { %v3950_v17 = vclz %v8137_v23  ;;  %vm7243_vm1 = vcmp.lt.s32.totalorder %v7223_v35, 2  ;;  %vm7244_vm2 = vcmp.lt.s32.totalorder %v7223_v35, 3  ;;  %vm7245_vm4 = vcmp.lt.s32.totalorder %v7223_v35, 4 }
 0x716   : > { %vm7202_vm5 = vcmp.eq.s32.totalorder %v14400_v51, 0  ;;  %v7247_v33 = vsel %vm7245_vm4, %v7235_v57, 2102212464  ;;  %v7250_v32 = vsel %vm7242_vm3, %v7229_v21, %v7232_v55  ;;  %v7251_v49 = vsel %vm7245_vm4, %v7238_v60, 920167782 }
 0x717   : > { %v8138_v20 = vadd.s32 4294967294, %v3950_v17  ;;  %vm7201_vm6 = vcmp.lt.s32.totalorder %v14400_v51, 2  ;;  %v7246_v25 = vsel %vm7242_vm3, %v7226_v46, %v7229_v21  ;;  %v7252_v45 = vsel %vm7244_vm2, %v7235_v57, %v7251_v49 }
 0x718   : > { %v7254_v58 = vsel %vm7242_vm3, %v7232_v55, %v7235_v57  ;;  %v7255_v41 = vsel %vm7245_vm4, %v7241_v24, 1326507024  ;;  %vm7198_vm7 = vweird.f32 %v14112_v29  ;;  %vm3884_vm8 = vcmp.lt.s32.totalorder %v14198_v26, 0 }
 0x719   : > { %vm8139_vm9 = vcmp.lt.s32.totalorder %v8138_v20, 0  ;;  %v7248_v40 = vsel %vm7244_vm2, %v7232_v55, %v7247_v33  ;;  %v7253_v47 = vsel %vm7243_vm1, %v7250_v32, %v7252_v45  ;;  %v7256_v2 = vsel %vm7244_vm2, %v7238_v60, %v7255_v41 }
 0x71a   : > { %v3953_v7 = vsel %vm8139_vm9, 0, %v8138_v20  ;;  %v7257_v53 = vsel %vm7243_vm1, %v7254_v58, %v7256_v2  ;;  %v14441_v63 = vmul.u32.u64.low %v14426_v30, %v7253_v47  ;;  %v14442_v27 = vmul.u32.u64.high %v14426_v30, %v7253_v47, %v14441_v63 }
 0x71b   : > { %vm7205_vm10 = vcmp.eq.s32.totalorder %v14400_v51, 2  ;;  %v3938_v11 = vadd.s32 %v14347_v16, %v14359_v15  ;;  %v3954_v52 = vsub.s32 32, %v3953_v7  ;;  %v3958_v37 = vsub.s32 4294967266, %v3953_v7 }
 0x71c   : > { %v7249_v50 = vsel %vm7243_vm1, %v7246_v25, %v7248_v40  ;;  %v14450_v21 = vmul.u32.u64.low %v14426_v30, %v7257_v53  ;;  %v14451_v4 = vmul.u32.u64.high %v14426_v30, %v7257_v53, %v14450_v21  ;;  %v8140_v18 = vadd.s32 4294967169, %v3990_v38 }
 0x71d   : > { %v9019_v54 = vpop.eup %9018  ;;  %v3955_v57 = vshll.u32 %v14406_v42, %v3953_v7  ;;  %v3956_v60 = vshrl.u32 %v3938_v11, %v3954_v52  ;;  %v3959_v31 = vadd.s32 127, %v3958_v37  ;;  %v3968_v17 = vsub.s32 4, %v14393_v44 }
 0x71e   : > { %v9021_v23 = vpop.eup %9020  ;;  %v7206_v55 = vxor.u32 2147483648, %v9019_v54  ;;  %v7268_v16 = vadd.s32 1, %v14442_v27  ;;  %v3996_v15 = vadd.s32 1, %v8140_v18  ;;  %v3986_v38 = vand.u32 2147483647, %v14396_v39 }
 0x71f   : > { %v7203_v0 = vxor.u32 2147483648, %v9021_v23  ;;  %v3957_v46 = vor.u32 %v3956_v60, %v3955_v57  ;;  %v3960_v24 = vshll.u32 %v3959_v31, 23  ;;  %v7265_v42 = vmul.u32 %v14426_v30, %v7249_v50 }
 0x720   : > { %v7207_v35 = vsel %vm7205_vm10, %v7206_v55, %v9021_v23  ;;  %vm7267_vm11 = vc.u32 %v14451_v4, %v14441_v63  ;;  %vm3997_vm12 = vcmp.gt.s32.totalorder %v3996_v15, 0  ;;  %v994_v25 = vmul.f32 %v9647_v9, %v14404_v48 }
 0x721   : > { %v7204_v20 = vsel %vm7202_vm5, %v9019_v54, %v7203_v0  ;;  %v3961_v32 = vor.u32 4788187, %v3960_v24  ;;  %v7269_v49 = vsel %vm7267_vm11, %v7268_v16, %v14442_v27  ;;  %v3969_v30 = vsel %vm3884_vm8, %v3968_v17, %v14393_v44 }
 0x722   : > { %v7208_v33 = vsel %vm7201_vm6, %v7204_v20, %v7207_v35  ;;  %v7270_v58 = vadd.s32 %v7269_v49, %v7265_v42  ;;  %v3998_v41 = vsel %vm3997_vm12, %v3996_v15, 0  ;;  %v3964_v47 = vcvt.s32.f32 %v3957_v46 }
 0x723   : > { %v7209_v45 = vsel %vm7198_vm7, nan, %v7208_v33  ;;  %v3962_v40 = vand.u32 2147483647, %v3961_v32  ;;  %v4000_v51 = vand.u32 31, %v3998_v41  ;;  %vm14477_vm13 = vcmp.le.f32.partialorder %v3882_v62, 0.7853982 }
 0x724   : > { %7788 = vst [vmem:[%s10000_s14 + $0x1d0] sm:$0xff] %v7209_v45  ;;  %v7271_v48 = vadd.s32 536870912, %v7270_v58  ;;  %v3993_v29 = vand.u32 8388607, %v3986_v38  ;;  %v3971_v44 = vsel %vm14477_vm13, 0, %v3969_v30  ;;  %v14486_v27 = vadd.f32 %v9652_v14, %v994_v25 }
 0x725   : > { %v3965_v7 = vmul.f32 %v3964_v47, %v3962_v40  ;;  %v4001_v53 = vsub.s32 32, %v4000_v51  ;;  %v3999_v52 = vshrl.u32 %v3998_v41, 5  ;;  %v4003_v62 = vshll.u32 %v9287_v61, %v4000_v51 }
 0x726   : > { %v14488_v11 = vshrl.u32 %v7271_v48, 30  ;;  %v4006_v37 = vshll.u32 %v9288_v1, %v4000_v51  ;;  %v4009_v18 = vshll.u32 %v9289_v3, %v4000_v51  ;;  %v4012_v57 = vshll.u32 %v9290_v5, %v4000_v51 }
 0x727   : > { %v3966_v54 = vxor.u32 2147483648, %v3965_v7  ;;  %v4004_v50 = vshrl.u32 %v9288_v1, %v4001_v53  ;;  %v4007_v21 = vshrl.u32 %v9289_v3, %v4001_v53  ;;  %v4010_v55 = vshrl.u32 %v9290_v5, %v4001_v53 }
 0x728   : > { %v7273_v23 = vshll.u32 %v14488_v11, 30  ;;  %v4013_v60 = vshrl.u32 %v9291_v10, %v4001_v53  ;;  %v4015_v17 = vshll.u32 %v9291_v10, %v4000_v51  ;;  %v4016_v16 = vshrl.u32 %v9292_v22, %v4001_v53 }
 0x729   : > { %v3967_v31 = vsel %vm3884_vm8, %v3966_v54, %v3965_v7  ;;  %v4005_v0 = vor.u32 %v4004_v50, %v4003_v62  ;;  %v4008_v46 = vor.u32 %v4007_v21, %v4006_v37  ;;  %v4011_v24 = vor.u32 %v4010_v55, %v4009_v18 }
 0x72a   : > { %v3970_v15 = vsel %vm14477_vm13, %v14198_v26, %v3967_v31  ;;  %v14506_v35 = vsub.s32 %v7270_v58, %v7273_v23  ;;  %v3994_v20 = vor.u32 8388608, %v3993_v29  ;;  %v4014_v42 = vor.u32 %v4013_v60, %v4012_v57  ;;  %v14517_v23 = vpop.f32.mrb[31].mxu1 }
 0x72b   : > { %9022 = vcosq.f32 %v3970_v15  ;;  %v4017_v33 = vor.u32 %v4016_v16, %v4015_v17  ;;  %v3975_v32 = vadd.s32 3, %v3971_v44  ;;  %v4002_v25 = vshrl.u32 %v9287_v61, %v4001_v53 }
 0x72c   : > { %9024 = vsinq.f32 %v3970_v15  ;;  %v7276_v49 = vsub.s32 0, %v14506_v35  ;;  %vm4018_vm14 = vcmp.lt.s32.totalorder %v3999_v52, 1  ;;  %vm4020_vm15 = vcmp.lt.s32.totalorder %v3999_v52, 3 }
 0x72d   : > { %vm4021_vm0 = vcmp.lt.s32.totalorder %v3999_v52, 4  ;;  %v7317_v45 = vand.u32 2139095040, %v14486_v27  ;;  %v4022_v58 = vsel %vm4018_vm14, %v4002_v25, %v4005_v0  ;;  %v4026_v40 = vsel %vm4018_vm14, %v4005_v0, %v4008_v46 }
 0x72e   : > { %v8265_v30 = vmin.u32 %v7276_v49, %v14506_v35  ;;  %v4023_v41 = vsel %vm4021_vm0, %v4011_v24, 2102212464  ;;  %v4027_v51 = vsel %vm4021_vm0, %v4014_v42, 920167782  ;;  %v4030_v2 = vsel %vm4018_vm14, %v4008_v46, %v4011_v24 }
 0x72f   : > { %v4024_v47 = vsel %vm4020_vm15, %v4008_v46, %v4023_v41  ;;  %v4031_v48 = vsel %vm4021_vm0, %v4017_v33, 1326507024  ;;  %v3976_v29 = vand.u32 3, %v3975_v32  ;;  %vm7212_vm3 = vcmp.lt.s32.totalorder %v14323_v34, 0 }
 0x730   : > { %v7278_v7 = vclz %v8265_v30  ;;  %v4034_v44 = vshll.u32 %v3994_v20, 8  ;;  %vm4019_vm1 = vcmp.lt.s32.totalorder %v3999_v52, 2  ;;  %v4028_v53 = vsel %vm4020_vm15, %v4011_v24, %v4027_v51 }
 0x731   : > { %v4032_v62 = vsel %vm4020_vm15, %v4014_v42, %v4031_v48  ;;  %v7318_v37 = vshrl.u32 %v7317_v45, 23  ;;  %vm3974_vm2 = vweird.f32 %v14198_v26  ;;  %v4025_v50 = vsel %vm4019_vm1, %v4022_v58, %v4024_v47 }
 0x732   : > { %v8266_v54 = vadd.s32 4294967294, %v7278_v7  ;;  %v4029_v21 = vsel %vm4019_vm1, %v4026_v40, %v4028_v53  ;;  %v4033_v18 = vsel %vm4019_vm1, %v4030_v2, %v4032_v62  ;;  %vm14521_vm4 = vcmp.le.f32.partialorder %v7210_v13, 0.7853982 }
 0x733   : > { %v14525_v57 = vmul.u32.u64.low %v4034_v44, %v4033_v18  ;;  %v14526_v60 = vmul.u32.u64.high %v4034_v44, %v4033_v18, %v14525_v57  ;;  %v14528_v52 = vmul.u32.u64.low %v4034_v44, %v4029_v21  ;;  %v14529_v31 = vmul.u32.u64.high %v4034_v44, %v4029_v21, %v14528_v52 }
 0x734   : > { %vm3978_vm5 = vcmp.eq.s32.totalorder %v3976_v29, 0  ;;  %vm3981_vm6 = vcmp.eq.s32.totalorder %v3976_v29, 2  ;;  %vm8267_vm7 = vcmp.lt.s32.totalorder %v8266_v54, 0  ;;  %v8268_v0 = vadd.s32 4294967169, %v7318_v37 }
 0x735   : > { %v9023_v17 = vpop.eup %9022  ;;  %v7266_v16 = vadd.s32 %v14441_v63, %v14451_v4  ;;  %v7281_v15 = vsel %vm8267_vm7, 0, %v8266_v54  ;;  %v7296_v13 = vsub.s32 4, %v14488_v11  ;;  %v7314_v46 = vand.u32 2147483647, %v14486_v27 }
 0x736   : > { %v9025_v24 = vpop.eup %9024  ;;  %v3982_v20 = vxor.u32 2147483648, %v9023_v17  ;;  %v7282_v42 = vsub.s32 32, %v7281_v15  ;;  %v7286_v33 = vsub.s32 4294967266, %v7281_v15  ;;  %v4041_v32 = vmul.u32 %v4034_v44, %v4025_v50 }
 0x737   : > { %v3979_v49 = vxor.u32 2147483648, %v9025_v24  ;;  %v7283_v25 = vshll.u32 %v14506_v35, %v7281_v15  ;;  %vm4043_vm8 = vc.u32 %v14526_v60, %v14528_v52  ;;  %v4044_v45 = vadd.s32 1, %v14529_v31 }
 0x738   : > { %v3983_v63 = vsel %vm3981_vm6, %v3982_v20, %v9025_v24  ;;  %v7284_v4 = vshrl.u32 %v7266_v16, %v7282_v42  ;;  %v7287_v30 = vadd.s32 127, %v7286_v33  ;;  %v7324_v58 = vadd.s32 1, %v8268_v0 }
 0x739   : > { %vm3977_vm9 = vcmp.lt.s32.totalorder %v3976_v29, 2  ;;  %v3980_v41 = vsel %vm3978_vm5, %v9023_v17, %v3979_v49  ;;  %v7297_v40 = vsel %vm7212_vm3, %v7296_v13, %v14488_v11  ;;  %v4045_v35 = vsel %vm4043_vm8, %v4044_v45, %v14529_v31 }
 0x73a   : > { %v3984_v47 = vsel %vm3977_vm9, %v3980_v41, %v3983_v63  ;;  %v7285_v51 = vor.u32 %v7284_v4, %v7283_v25  ;;  %v7288_v2 = vshll.u32 %v7287_v30, 23  ;;  %v4046_v48 = vadd.s32 %v4045_v35, %v4041_v32 }
 0x73b   : > { %v3985_v7 = vsel %vm3974_vm2, nan, %v3984_v47  ;;  %v7321_v44 = vand.u32 8388607, %v7314_v46  ;;  %vm7325_vm10 = vcmp.gt.s32.totalorder %v7324_v58, 0  ;;  %v836_v29 = vadd.f32 %v14081_v43, %v9645_v8 }
 0x73c   : > { %7757 = vst [vmem:[%s10000_s14 + $0xd8] sm:$0xff] %v3985_v7  ;;  %v7289_v53 = vor.u32 4788187, %v7288_v2  ;;  %v7299_v11 = vsel %vm14521_vm4, 0, %v7297_v40  ;;  %v4047_v62 = vadd.s32 536870912, %v4046_v48  ;;  %v7326_v37 = vsel %vm7325_vm10, %v7324_v58, 0 }
 0x73d   : > { %v7328_v54 = vand.u32 31, %v7326_v37  ;;  %v7292_v21 = vcvt.s32.f32 %v7285_v51  ;;  %v7303_v26 = vadd.s32 3, %v7299_v11  ;;  %v963_v31 = vmul.f32 %v9649_v12, %v836_v29 }
 0x73e   : > { %v7290_v50 = vand.u32 2147483647, %v7289_v53  ;;  %v14555_v18 = vshrl.u32 %v4047_v62, 30  ;;  %v7322_v43 = vor.u32 8388608, %v7321_v44  ;;  %v7327_v25 = vshrl.u32 %v7326_v37, 5 }
 0x73f   : > { %v7329_v57 = vsub.s32 32, %v7328_v54  ;;  %v7331_v16 = vshll.u32 %v9287_v61, %v7328_v54  ;;  %v7334_v13 = vshll.u32 %v9288_v1, %v7328_v54  ;;  %v7337_v32 = vshll.u32 %v9289_v3, %v7328_v54 }
 0x740   : > { %v7293_v0 = vmul.f32 %v7292_v21, %v7290_v50  ;;  %v4049_v17 = vshll.u32 %v14555_v18, 30  ;;  %v7340_v63 = vshll.u32 %v9290_v5, %v7328_v54  ;;  %v14570_v4 = vadd.f32 %v9656_v19, %v963_v31 }
 0x741   : > { %v7332_v15 = vshrl.u32 %v9288_v1, %v7329_v57  ;;  %v7335_v24 = vshrl.u32 %v9289_v3, %v7329_v57  ;;  %v7338_v20 = vshrl.u32 %v9290_v5, %v7329_v57  ;;  %v7341_v49 = vshrl.u32 %v9291_v10, %v7329_v57 }
 0x742   : > { %v7294_v42 = vxor.u32 2147483648, %v7293_v0  ;;  %v14564_v33 = vsub.s32 %v4046_v48, %v4049_v17  ;;  %v7343_v51 = vshll.u32 %v9291_v10, %v7328_v54  ;;  %v7344_v2 = vshrl.u32 %v9292_v22, %v7329_v57 }
 0x743   : > { %v7333_v45 = vor.u32 %v7332_v15, %v7331_v16  ;;  %v7336_v41 = vor.u32 %v7335_v24, %v7334_v13  ;;  %v7339_v40 = vor.u32 %v7338_v20, %v7337_v32  ;;  %v7342_v47 = vor.u32 %v7341_v49, %v7340_v63 }
 0x744   : > { %v7295_v30 = vsel %vm7212_vm3, %v7294_v42, %v7293_v0  ;;  %v4052_v58 = vsub.s32 0, %v14564_v33  ;;  %v14580_v48 = vand.u32 3, %v7303_v26  ;;  %v14583_v44 = vshll.u32 %v7322_v43, 8 }
 0x745   : > { %v7298_v35 = vsel %vm14521_vm4, %v14323_v34, %v7295_v30  ;;  %v7330_v29 = vshrl.u32 %v9287_v61, %v7329_v57  ;;  %v7345_v53 = vor.u32 %v7344_v2, %v7343_v51  ;;  %v4093_v11 = vand.u32 2139095040, %v14570_v4 }
 0x746   : > { %9026 = vcosq.f32 %v7298_v35  ;;  %v8141_v7 = vmin.u32 %v4052_v58, %v14564_v33  ;;  %vm3988_vm11 = vcmp.lt.s32.totalorder %v14396_v39, 0  ;;  %vm7346_vm12 = vcmp.lt.s32.totalorder %v7327_v25, 1 }
 0x747   : > { %9028 = vsinq.f32 %v7298_v35  ;;  %vm7347_vm13 = vcmp.lt.s32.totalorder %v7327_v25, 2  ;;  %vm7349_vm14 = vcmp.lt.s32.totalorder %v7327_v25, 4  ;;  %vm7348_vm15 = vcmp.lt.s32.totalorder %v7327_v25, 3 }
 0x748   : > { %v4054_v55 = vclz %v8141_v7  ;;  %v7351_v62 = vsel %vm7349_vm14, %v7339_v40, 2102212464  ;;  %v7354_v37 = vsel %vm7346_vm12, %v7333_v45, %v7336_v41  ;;  %v7355_v54 = vsel %vm7349_vm14, %v7342_v47, 920167782 }
 0x749   : > { %vm7309_vm0 = vcmp.eq.s32.totalorder %v14580_v48, 2  ;;  %v7350_v21 = vsel %vm7346_vm12, %v7330_v29, %v7333_v45  ;;  %v7356_v26 = vsel %vm7348_vm15, %v7339_v40, %v7355_v54  ;;  %v7358_v57 = vsel %vm7346_vm12, %v7336_v41, %v7339_v40 }
 0x74a   : > { %v8142_v50 = vadd.s32 4294967294, %v4054_v55  ;;  %vm14592_vm3 = vcmp.le.f32.partialorder %v3986_v38, 0.7853982  ;;  %v7352_v0 = vsel %vm7348_vm15, %v7336_v41, %v7351_v62  ;;  %v7357_v17 = vsel %vm7347_vm13, %v7354_v37, %v7356_v26 }
 0x74b   : > { %v7359_v43 = vsel %vm7349_vm14, %v7345_v53, 1326507024  ;;  %v4094_v16 = vshrl.u32 %v4093_v11, 23  ;;  %vm7305_vm1 = vcmp.lt.s32.totalorder %v14580_v48, 2  ;;  %vm7302_vm4 = vweird.f32 %v14323_v34 }
 0x74c   : > { %vm8143_vm2 = vcmp.lt.s32.totalorder %v8142_v50, 0  ;;  %v7360_v15 = vsel %vm7348_vm15, %v7342_v47, %v7359_v43  ;;  %v14601_v13 = vmul.u32.u64.low %v14583_v44, %v7357_v17  ;;  %v14602_v24 = vmul.u32.u64.high %v14583_v44, %v7357_v17, %v14601_v13 }
 0x74d   : > { %v4057_v38 = vsel %vm8143_vm2, 0, %v8142_v50  ;;  %v4072_v20 = vsub.s32 4, %v14555_v18  ;;  %v7361_v42 = vsel %vm7347_vm13, %v7358_v57, %v7360_v15  ;;  %v8144_v32 = vadd.s32 4294967169, %v4094_v16 }
 0x74e   : > { %v4042_v49 = vadd.s32 %v14528_v52, %v14526_v60  ;;  %v4058_v45 = vsub.s32 32, %v4057_v38  ;;  %v4062_v63 = vsub.s32 4294967266, %v4057_v38  ;;  %v916_v30 = vadd.f32 %v14153_v28, %v9645_v8 }
 0x74f   : > { %v7353_v58 = vsel %vm7347_vm13, %v7350_v21, %v7352_v0  ;;  %v14614_v41 = vmul.u32.u64.low %v14583_v44, %v7361_v42  ;;  %v14615_v40 = vmul.u32.u64.high %v14583_v44, %v7361_v42, %v14614_v41  ;;  %v4100_v35 = vadd.s32 1, %v8144_v32 }
 0x750   : > { %v9027_v47 = vpop.eup %9026  ;;  %v4059_v51 = vshll.u32 %v14564_v33, %v4057_v38  ;;  %v4060_v2 = vshrl.u32 %v4042_v49, %v4058_v45  ;;  %v4063_v7 = vadd.s32 127, %v4062_v63  ;;  %v7372_v29 = vadd.s32 1, %v14602_v24 }
 0x751   : > { %v9029_v60 = vpop.eup %9028  ;;  %v7310_v52 = vxor.u32 2147483648, %v9027_v47  ;;  %v4073_v28 = vsel %vm3988_vm11, %v4072_v20, %v14555_v18  ;;  %v4090_v25 = vand.u32 2147483647, %v14570_v4  ;;  %vm4101_vm5 = vcmp.gt.s32.totalorder %v4100_v35, 0 }
 0x752   : > { %v7307_v53 = vxor.u32 2147483648, %v9029_v60  ;;  %v4061_v11 = vor.u32 %v4060_v2, %v4059_v51  ;;  %v4064_v55 = vshll.u32 %v4063_v7, 23  ;;  %v4102_v62 = vsel %vm4101_vm5, %v4100_v35, 0 }
 0x753   : > { %vm7306_vm6 = vcmp.eq.s32.totalorder %v14580_v48, 0  ;;  %v7311_v33 = vsel %vm7309_vm0, %v7310_v52, %v9029_v60  ;;  %v7369_v37 = vmul.u32 %v14583_v44, %v7353_v58  ;;  %vm7371_vm7 = vc.u32 %v14615_v40, %v14601_v13 }
 0x754   : > { %v7308_v54 = vsel %vm7306_vm6, %v9027_v47, %v7307_v53  ;;  %v4065_v18 = vor.u32 4788187, %v4064_v55  ;;  %v4075_v50 = vsel %vm14592_vm3, 0, %v4073_v28  ;;  %v7373_v21 = vsel %vm7371_vm7, %v7372_v29, %v14602_v24 }
 0x755   : > { %v7312_v26 = vsel %vm7305_vm1, %v7308_v54, %v7311_v33  ;;  %v7374_v57 = vadd.s32 %v7373_v21, %v7369_v37  ;;  %v4097_v0 = vand.u32 8388607, %v4090_v25  ;;  %v4104_v17 = vand.u32 31, %v4102_v62 }
 0x756   : > { %v7313_v44 = vsel %vm7302_vm4, nan, %v7312_v26  ;;  %v4066_v43 = vand.u32 2147483647, %v4065_v18  ;;  %v4068_v16 = vcvt.s32.f32 %v4061_v11  ;;  %v995_v15 = vmul.f32 %v9649_v12, %v916_v30 }
 0x757   : > { %7789 = vst [vmem:[%s10000_s14 + $0x1d8] sm:$0xff] %v7313_v44  ;;  %v4079_v38 = vadd.s32 3, %v4075_v50  ;;  %v7375_v20 = vadd.s32 536870912, %v7374_v57  ;;  %v14640_v42 = vshrl.u32 %v4102_v62, 5  ;;  %v4105_v24 = vsub.s32 32, %v4104_v17 }
 0x758   : > { %v4069_v48 = vmul.f32 %v4068_v16, %v4066_v43  ;;  %v4107_v32 = vshll.u32 %v9287_v61, %v4104_v17  ;;  %v4110_v49 = vshll.u32 %v9288_v1, %v4104_v17  ;;  %v4113_v45 = vshll.u32 %v9289_v3, %v4104_v17 }
 0x759   : > { %v7376_v63 = vshrl.u32 %v7375_v20, 30  ;;  %v4108_v34 = vshrl.u32 %v9288_v1, %v4105_v24  ;;  %v4111_v58 = vshrl.u32 %v9289_v3, %v4105_v24  ;;  %v4116_v30 = vshll.u32 %v9290_v5, %v4104_v17 }
 0x75a   : > { %v4070_v41 = vxor.u32 2147483648, %v4069_v48  ;;  %v4114_v35 = vshrl.u32 %v9290_v5, %v4105_v24  ;;  %v4117_v47 = vshrl.u32 %v9291_v10, %v4105_v24  ;;  %v4120_v51 = vshrl.u32 %v9292_v22, %v4105_v24 }
 0x75b   : > { %v7377_v2 = vshll.u32 %v7376_v63, 30  ;;  %v4098_v7 = vor.u32 8388608, %v4097_v0  ;;  %v4109_v29 = vor.u32 %v4108_v34, %v4107_v32  ;;  %v4119_v60 = vshll.u32 %v9291_v10, %v4104_v17 }
 0x75c   : > { %v4071_v52 = vsel %vm3988_vm11, %v4070_v41, %v4069_v48  ;;  %vm7316_vm8 = vcmp.lt.s32.totalorder %v14486_v27, 0  ;;  %v4112_v28 = vor.u32 %v4111_v58, %v4110_v49  ;;  %v4115_v53 = vor.u32 %v4114_v35, %v4113_v45 }
 0x75d   : > { %v4118_v11 = vor.u32 %v4117_v47, %v4116_v30  ;;  %v4074_v55 = vsel %vm14592_vm3, %v14396_v39, %v4071_v52  ;;  %v14658_v62 = vsub.s32 %v7374_v57, %v7377_v2  ;;  %v4121_v33 = vor.u32 %v4120_v51, %v4119_v60 }
 0x75e   : > { %v14661_v37 = vadd.f32 %v9656_v19, %v995_v15  ;;  %9030 = vcosq.f32 %v4074_v55  ;;  %vm4122_vm9 = vcmp.lt.s32.totalorder %v14640_v42, 1  ;;  %vm4123_vm10 = vcmp.lt.s32.totalorder %v14640_v42, 2 }
 0x75f   : > { %vm4124_vm11 = vcmp.lt.s32.totalorder %v14640_v42, 3  ;;  %9032 = vsinq.f32 %v4074_v55  ;;  %vm14668_vm12 = vcmp.le.f32.partialorder %v7314_v46, 0.7853982  ;;  %v7380_v31 = vsub.s32 0, %v14658_v62 }
 0x760   : > { %v4106_v18 = vshrl.u32 %v9287_v61, %v4105_v24  ;;  %vm4125_vm13 = vcmp.lt.s32.totalorder %v14640_v42, 4  ;;  %v7400_v50 = vsub.s32 4, %v7376_v63  ;;  %v4130_v26 = vsel %vm4122_vm9, %v4109_v29, %v4112_v28 }
 0x761   : > { %v4127_v21 = vsel %vm4125_vm13, %v4115_v53, 2102212464  ;;  %v4131_v57 = vsel %vm4125_vm13, %v4118_v11, 920167782  ;;  %v8269_v0 = vmin.u32 %v7380_v31, %v14658_v62  ;;  %v4134_v17 = vsel %vm4122_vm9, %v4112_v28, %v4115_v53 }
 0x762   : > { %v4132_v46 = vsel %vm4124_vm11, %v4115_v53, %v4131_v57  ;;  %v4135_v44 = vsel %vm4125_vm13, %v4121_v33, 1326507024  ;;  %v4080_v43 = vand.u32 3, %v4079_v38  ;;  %v4138_v20 = vshll.u32 %v4098_v7, 8 }
 0x763   : > { %v4133_v16 = vsel %vm4123_vm10, %v4130_v26, %v4132_v46  ;;  %v4136_v15 = vsel %vm4124_vm11, %v4118_v11, %v4135_v44  ;;  %v7382_v24 = vclz %v8269_v0  ;;  %v4126_v48 = vsel %vm4122_vm9, %v4106_v18, %v4109_v29 }
 0x764   : > { %v4128_v32 = vsel %vm4124_vm11, %v4112_v28, %v4127_v21  ;;  %v838_v49 = vadd.f32 %v14262_v36, %v9643_v6  ;;  %v4137_v38 = vsel %vm4123_vm10, %v4134_v17, %v4136_v15  ;;  %v7421_v58 = vand.u32 2139095040, %v14661_v37 }
 0x765   : > { %v14694_v45 = vmul.u32.u64.low %v4138_v20, %v4133_v16  ;;  %v14695_v34 = vmul.u32.u64.high %v4138_v20, %v4133_v16, %v14694_v45  ;;  %vm4078_vm14 = vweird.f32 %v14396_v39  ;;  %v8270_v30 = vadd.s32 4294967294, %v7382_v24 }
 0x766   : > { %v7401_v41 = vsel %vm7316_vm8, %v7400_v50, %v7376_v63  ;;  %v14702_v35 = vmul.u32.u64.low %v4138_v20, %v4137_v38  ;;  %v14703_v47 = vmul.u32.u64.high %v4138_v20, %v4137_v38, %v14702_v35  ;;  %vm4081_vm15 = vcmp.lt.s32.totalorder %v4080_v43, 2 }
 0x767   : > { %vm4082_vm0 = vcmp.eq.s32.totalorder %v4080_v43, 0  ;;  %v4129_v36 = vsel %vm4123_vm10, %v4126_v48, %v4128_v32  ;;  %v7422_v51 = vshrl.u32 %v7421_v58, 23  ;;  %vm4085_vm3 = vcmp.eq.s32.totalorder %v4080_v43, 2 }
 0x768   : > { %v7370_v2 = vadd.s32 %v14601_v13, %v14615_v40  ;;  %vm8271_vm1 = vcmp.lt.s32.totalorder %v8270_v30, 0  ;;  %v7418_v7 = vand.u32 2147483647, %v14661_v37  ;;  %v9031_v29 = vpop.eup %9030  ;;  %v7403_v63 = vsel %vm14668_vm12, 0, %v7401_v41 }
 0x769   : > { %v7385_v60 = vsel %vm8271_vm1, 0, %v8270_v30  ;;  %v4148_v52 = vadd.s32 1, %v14695_v34  ;;  %v8272_v28 = vadd.s32 4294967169, %v7422_v51  ;;  %v9033_v53 = vpop.eup %9032  ;;  %v4086_v11 = vxor.u32 2147483648, %v9031_v29 }
 0x76a   : > { %v7386_v42 = vsub.s32 32, %v7385_v60  ;;  %v7390_v55 = vsub.s32 4294967266, %v7385_v60  ;;  %v4145_v33 = vmul.u32 %v4138_v20, %v4129_v36  ;;  %v4083_v31 = vxor.u32 2147483648, %v9033_v53 }
 0x76b   : > { %v7387_v18 = vshll.u32 %v14658_v62, %v7385_v60  ;;  %vm4147_vm2 = vc.u32 %v14703_v47, %v14694_v45  ;;  %v7428_v13 = vadd.s32 1, %v8272_v28  ;;  %v4087_v40 = vsel %vm4085_vm3, %v4086_v11, %v9033_v53 }
 0x76c   : > { %v7388_v50 = vshrl.u32 %v7370_v2, %v7386_v42  ;;  %v7391_v21 = vadd.s32 127, %v7390_v55  ;;  %v4149_v26 = vsel %vm4147_vm2, %v4148_v52, %v14695_v34  ;;  %v4084_v57 = vsel %vm4082_vm0, %v9031_v29, %v4083_v31 }
 0x76d   : > { %v7407_v0 = vadd.s32 3, %v7403_v63  ;;  %v4150_v46 = vadd.s32 %v4149_v26, %v4145_v33  ;;  %vm7429_vm4 = vcmp.gt.s32.totalorder %v7428_v13, 0  ;;  %v4088_v17 = vsel %vm4081_vm15, %v4084_v57, %v4087_v40 }
 0x76e   : > { %v7389_v44 = vor.u32 %v7388_v50, %v7387_v18  ;;  %v7392_v62 = vshll.u32 %v7391_v21, 23  ;;  %v7430_v16 = vsel %vm7429_vm4, %v7428_v13, 0  ;;  %v4089_v15 = vsel %vm4078_vm14, nan, %v4088_v17 }
 0x76f   : > { %v4151_v20 = vadd.s32 536870912, %v4150_v46  ;;  %v7425_v24 = vand.u32 8388607, %v7418_v7  ;;  %v7432_v48 = vand.u32 31, %v7430_v16  ;;  %7758 = vst [vmem:[%s10000_s14 + $0xe0] sm:$0xff] %v4089_v15  ;;  %v14729_v43 = vadd.f32 %v14361_v56, %v9643_v6 }
 0x770   : > { %v7393_v32 = vor.u32 4788187, %v7392_v62  ;;  %v7396_v30 = vcvt.s32.f32 %v7389_v44  ;;  %v14731_v41 = vand.u32 3, %v7407_v0  ;;  %v964_v39 = vmul.f32 %v9647_v9, %v838_v49 }
 0x771   : > { %v14725_v38 = vshrl.u32 %v4151_v20, 30  ;;  %v7433_v34 = vsub.s32 32, %v7432_v48  ;;  %v7426_v36 = vor.u32 8388608, %v7425_v24  ;;  %v7435_v51 = vshll.u32 %v9287_v61, %v7432_v48 }
 0x772   : > { %v7394_v58 = vand.u32 2147483647, %v7393_v32  ;;  %v7438_v52 = vshll.u32 %v9288_v1, %v7432_v48  ;;  %v7441_v49 = vshll.u32 %v9289_v3, %v7432_v48  ;;  %v7431_v11 = vshrl.u32 %v7430_v16, 5 }
 0x773   : > { %v4153_v35 = vshll.u32 %v14725_v38, 30  ;;  %v7436_v2 = vshrl.u32 %v9288_v1, %v7433_v34  ;;  %v7439_v60 = vshrl.u32 %v9289_v3, %v7433_v34  ;;  %v7442_v63 = vshrl.u32 %v9290_v5, %v7433_v34 }
 0x774   : > { %v7397_v29 = vmul.f32 %v7396_v30, %v7394_v58  ;;  %v7445_v6 = vshrl.u32 %v9291_v10, %v7433_v34  ;;  %v7448_v28 = vshrl.u32 %v9292_v22, %v7433_v34  ;;  %v7444_v42 = vshll.u32 %v9290_v5, %v7432_v48 }
 0x775   : > { %v14740_v56 = vsub.s32 %v4150_v46, %v4153_v35  ;;  %v7447_v55 = vshll.u32 %v9291_v10, %v7432_v48  ;;  %v7437_v31 = vor.u32 %v7436_v2, %v7435_v51  ;;  %v7440_v18 = vor.u32 %v7439_v60, %v7438_v52 }
 0x776   : > { %v7398_v53 = vxor.u32 2147483648, %v7397_v29  ;;  %v7443_v13 = vor.u32 %v7442_v63, %v7441_v49  ;;  %vm4092_vm5 = vcmp.lt.s32.totalorder %v14570_v4, 0  ;;  %v4146_v50 = vadd.s32 %v14694_v45, %v14703_v47 }
 0x777   : > { %v4156_v33 = vsub.s32 0, %v14740_v56  ;;  %v7446_v21 = vor.u32 %v7445_v6, %v7444_v42  ;;  %v14754_v26 = vadd.f32 %v9652_v14, %v964_v39  ;;  %v7449_v46 = vor.u32 %v7448_v28, %v7447_v55 }
 0x778   : > { %v7399_v40 = vsel %vm7316_vm8, %v7398_v53, %v7397_v29  ;;  %v7466_v17 = vshll.u32 %v7426_v36, 8  ;;  %v4176_v44 = vsub.s32 4, %v14725_v38  ;;  %vm7450_vm6 = vcmp.lt.s32.totalorder %v7431_v11, 1 }
 0x779   : > { %v7402_v57 = vsel %vm14668_vm12, %v14486_v27, %v7399_v40  ;;  %v8145_v0 = vmin.u32 %v4156_v33, %v14740_v56  ;;  %vm7453_vm7 = vcmp.lt.s32.totalorder %v7431_v11, 4  ;;  %vm14763_vm8 = vcmp.le.f32.partialorder %v4090_v25, 0.7853982 }
 0x77a   : > { %9034 = vcosq.f32 %v7402_v57  ;;  %v7455_v62 = vsel %vm7453_vm7, %v7443_v13, 2102212464  ;;  %v7458_v54 = vsel %vm7450_vm6, %v7437_v31, %v7440_v18  ;;  %v7434_v16 = vshrl.u32 %v9287_v61, %v7433_v34 }
 0x77b   : > { %9036 = vsinq.f32 %v7402_v57  ;;  %v4158_v47 = vclz %v8145_v0  ;;  %vm7452_vm9 = vcmp.lt.s32.totalorder %v7431_v11, 3  ;;  %v7459_v15 = vsel %vm7453_vm7, %v7446_v21, 920167782 }
 0x77c   : > { %v7462_v20 = vsel %vm7450_vm6, %v7440_v18, %v7443_v13  ;;  %vm7451_vm10 = vcmp.lt.s32.totalorder %v7431_v11, 2  ;;  %v7460_v48 = vsel %vm7452_vm9, %v7443_v13, %v7459_v15  ;;  %v7463_v32 = vsel %vm7453_vm7, %v7449_v46, 1326507024 }
 0x77d   : > { %v8146_v24 = vadd.s32 4294967294, %v4158_v47  ;;  %v7454_v58 = vsel %vm7450_vm6, %v7434_v16, %v7437_v31  ;;  %v7456_v30 = vsel %vm7452_vm9, %v7440_v18, %v7455_v62  ;;  %v7461_v39 = vsel %vm7451_vm10, %v7458_v54, %v7460_v48 }
 0x77e   : > { %v7464_v25 = vsel %vm7452_vm9, %v7446_v21, %v7463_v32  ;;  %v14770_v36 = vmul.u32.u64.low %v7466_v17, %v7461_v39  ;;  %v14771_v51 = vmul.u32.u64.high %v7466_v17, %v7461_v39, %v14770_v36  ;;  %v4197_v60 = vand.u32 2139095040, %v14754_v26 }
 0x77f   : > { %vm8147_vm11 = vcmp.lt.s32.totalorder %v8146_v24, 0  ;;  %v7465_v35 = vsel %vm7451_vm10, %v7462_v20, %v7464_v25  ;;  %vm7406_vm12 = vweird.f32 %v14486_v27  ;;  %v4177_v52 = vsel %vm4092_vm5, %v4176_v44, %v14725_v38 }
 0x780   : > { %v4161_v34 = vsel %vm8147_vm11, 0, %v8146_v24  ;;  %v14774_v2 = vmul.u32.u64.low %v7466_v17, %v7465_v35  ;;  %v14775_v29 = vmul.u32.u64.high %v7466_v17, %v7465_v35, %v14774_v2  ;;  %v7457_v49 = vsel %vm7451_vm10, %v7454_v58, %v7456_v30 }
 0x781   : > { %v4162_v63 = vsub.s32 32, %v4161_v34  ;;  %v4166_v6 = vsub.s32 4294967266, %v4161_v34  ;;  %vm7409_vm13 = vcmp.lt.s32.totalorder %v14731_v41, 2  ;;  %vm7413_vm14 = vcmp.eq.s32.totalorder %v14731_v41, 2 }
 0x782   : > { %v4194_v28 = vand.u32 2147483647, %v14754_v26  ;;  %v4198_v53 = vshrl.u32 %v4197_v60, 23  ;;  %v4163_v42 = vshll.u32 %v14740_v56, %v4161_v34  ;;  %v7476_v31 = vadd.s32 1, %v14771_v51 }
 0x783   : > { %v4164_v55 = vshrl.u32 %v4146_v50, %v4162_v63  ;;  %v4167_v33 = vadd.s32 127, %v4166_v6  ;;  %v4179_v13 = vsel %vm14763_vm8, 0, %v4177_v52  ;;  %v7473_v38 = vmul.u32 %v7466_v17, %v7457_v49 }
 0x784   : > { %v9035_v18 = vpop.eup %9034  ;;  %vm7475_vm15 = vc.u32 %v14775_v29, %v14770_v36  ;;  %v8148_v11 = vadd.s32 4294967169, %v4198_v53  ;;  %v996_v47 = vmul.f32 %v9647_v9, %v14729_v43  ;;  %vm7410_vm0 = vcmp.eq.s32.totalorder %v14731_v41, 0 }
 0x785   : > { %v9037_v40 = vpop.eup %9036  ;;  %v7414_v21 = vxor.u32 2147483648, %v9035_v18  ;;  %v4165_v57 = vor.u32 %v4164_v55, %v4163_v42  ;;  %v4168_v0 = vshll.u32 %v4167_v33, 23  ;;  %v7477_v46 = vsel %vm7475_vm15, %v7476_v31, %v14771_v51 }
 0x786   : > { %v7411_v56 = vxor.u32 2147483648, %v9037_v40  ;;  %v7478_v50 = vadd.s32 %v7477_v46, %v7473_v38  ;;  %v4204_v44 = vadd.s32 1, %v8148_v11  ;;  %v4183_v54 = vadd.s32 3, %v4179_v13 }
 0x787   : > { %v7415_v17 = vsel %vm7413_vm14, %v7414_v21, %v9037_v40  ;;  %v4169_v62 = vor.u32 4788187, %v4168_v0  ;;  %v4201_v20 = vand.u32 8388607, %v4194_v28  ;;  %v4172_v32 = vcvt.s32.f32 %v4165_v57 }
 0x788   : > { %v7412_v16 = vsel %vm7410_vm0, %v9035_v18, %v7411_v56  ;;  %v7479_v15 = vadd.s32 536870912, %v7478_v50  ;;  %vm4205_vm3 = vcmp.gt.s32.totalorder %v4204_v44, 0  ;;  %v14807_v39 = vadd.f32 %v9652_v14, %v996_v47 }
 0x789   : > { %v7416_v24 = vsel %vm7409_vm13, %v7412_v16, %v7415_v17  ;;  %v4170_v48 = vand.u32 2147483647, %v4169_v62  ;;  %v4206_v9 = vsel %vm4205_vm3, %v4204_v44, 0  ;;  %v14811_v41 = vand.u32 3, %v4183_v54 }
 0x78a   : > { %v7417_v43 = vsel %vm7406_vm12, nan, %v7416_v24  ;;  %v14804_v58 = vshrl.u32 %v7479_v15, 30  ;;  %v4208_v30 = vand.u32 31, %v4206_v9  ;;  %v4202_v2 = vor.u32 8388608, %v4201_v20 }
 0x78b   : > { %7790 = vst [vmem:[%s10000_s14 + $0x1e0] sm:$0xff] %v7417_v43  ;;  %v4173_v25 = vmul.f32 %v4172_v32, %v4170_v48  ;;  %v14815_v60 = vadd.f32 %v14437_v59, %v9645_v8  ;;  %v4207_v63 = vshrl.u32 %v4206_v9, 5  ;;  %v7525_v14 = vand.u32 2139095040, %v14807_v39 }
 0x78c   : > { %v7481_v35 = vshll.u32 %v14804_v58, 30  ;;  %v4209_v51 = vsub.s32 32, %v4208_v30  ;;  %v4211_v49 = vshll.u32 %v9287_v61, %v4208_v30  ;;  %v4214_v33 = vshll.u32 %v9288_v1, %v4208_v30 }
 0x78d   : > { %v4174_v34 = vxor.u32 2147483648, %v4173_v25  ;;  %v4217_v31 = vshll.u32 %v9289_v3, %v4208_v30  ;;  %v4220_v13 = vshll.u32 %v9290_v5, %v4208_v30  ;;  %v4223_v45 = vshll.u32 %v9291_v10, %v4208_v30 }
 0x78e   : > { %v14817_v27 = vsub.s32 %v7478_v50, %v7481_v35  ;;  %v4212_v6 = vshrl.u32 %v9288_v1, %v4209_v51  ;;  %v4215_v53 = vshrl.u32 %v9289_v3, %v4209_v51  ;;  %v4218_v42 = vshrl.u32 %v9290_v5, %v4209_v51 }
 0x78f   : > { %v4175_v52 = vsel %vm4092_vm5, %v4174_v34, %v4173_v25  ;;  %v4221_v38 = vshrl.u32 %v9291_v10, %v4209_v51  ;;  %v4224_v0 = vshrl.u32 %v9292_v22, %v4209_v51  ;;  %v4242_v46 = vshll.u32 %v4202_v2, 8 }
 0x790   : > { %v4178_v59 = vsel %vm14763_vm8, %v14570_v4, %v4175_v52  ;;  %v7484_v55 = vsub.s32 0, %v14817_v27  ;;  %v4213_v18 = vor.u32 %v4212_v6, %v4211_v49  ;;  %v4216_v40 = vor.u32 %v4215_v53, %v4214_v33 }
 0x791   : > { %9038 = vcosq.f32 %v4178_v59  ;;  %v4219_v21 = vor.u32 %v4218_v42, %v4217_v31  ;;  %v4222_v57 = vor.u32 %v4221_v38, %v4220_v13  ;;  %v4210_v50 = vshrl.u32 %v9287_v61, %v4209_v51 }
 0x792   : > { %9040 = vsinq.f32 %v4178_v59  ;;  %v8273_v11 = vmin.u32 %v7484_v55, %v14817_v27  ;;  %vm4226_vm1 = vcmp.lt.s32.totalorder %v4207_v63, 1  ;;  %v7526_v44 = vshrl.u32 %v7525_v14, 23 }
 0x793   : > { %v4225_v47 = vor.u32 %v4224_v0, %v4223_v45  ;;  %vm4227_vm2 = vcmp.lt.s32.totalorder %v4207_v63, 2  ;;  %vm4228_vm4 = vcmp.lt.s32.totalorder %v4207_v63, 3  ;;  %vm4229_vm5 = vcmp.lt.s32.totalorder %v4207_v63, 4 }
 0x794   : > { %v7486_v56 = vclz %v8273_v11  ;;  %vm4186_vm6 = vcmp.eq.s32.totalorder %v14811_v41, 0  ;;  %v4231_v62 = vsel %vm4229_vm5, %v4219_v21, 2102212464  ;;  %v4234_v54 = vsel %vm4226_vm1, %v4213_v18, %v4216_v40 }
 0x795   : > { %v4235_v16 = vsel %vm4229_vm5, %v4222_v57, 920167782  ;;  %vm4185_vm7 = vcmp.lt.s32.totalorder %v14811_v41, 2  ;;  %v4230_v15 = vsel %vm4226_vm1, %v4210_v50, %v4213_v18  ;;  %v4238_v24 = vsel %vm4226_vm1, %v4216_v40, %v4219_v21 }
 0x796   : > { %v8274_v17 = vadd.s32 4294967294, %v7486_v56  ;;  %v4236_v20 = vsel %vm4228_vm4, %v4219_v21, %v4235_v16  ;;  %v4239_v48 = vsel %vm4229_vm5, %v4225_v47, 1326507024  ;;  %vm4182_vm8 = vweird.f32 %v14570_v4 }
 0x797   : > { %vm7420_vm9 = vcmp.lt.s32.totalorder %v14661_v37, 0  ;;  %v4232_v32 = vsel %vm4228_vm4, %v4216_v40, %v4231_v62  ;;  %v4237_v9 = vsel %vm4227_vm2, %v4234_v54, %v4236_v20  ;;  %v4240_v43 = vsel %vm4228_vm4, %v4222_v57, %v4239_v48 }
 0x798   : > { %vm8275_vm10 = vcmp.lt.s32.totalorder %v8274_v17, 0  ;;  %v4241_v25 = vsel %vm4227_vm2, %v4238_v24, %v4240_v43  ;;  %v14847_v35 = vmul.u32.u64.low %v4242_v46, %v4237_v9  ;;  %v14848_v51 = vmul.u32.u64.high %v4242_v46, %v4237_v9, %v14847_v35 }
 0x799   : > { %v7489_v30 = vsel %vm8275_vm10, 0, %v8274_v17  ;;  %vm4189_vm11 = vcmp.eq.s32.totalorder %v14811_v41, 2  ;;  %v7474_v34 = vadd.s32 %v14770_v36, %v14775_v29  ;;  %v4233_v52 = vsel %vm4227_vm2, %v4230_v15, %v4232_v32 }
 0x79a   : > { %v7490_v2 = vsub.s32 32, %v7489_v30  ;;  %v7494_v6 = vsub.s32 4294967266, %v7489_v30  ;;  %v14855_v49 = vmul.u32.u64.low %v4242_v46, %v4241_v25  ;;  %v14856_v53 = vmul.u32.u64.high %v4242_v46, %v4241_v25, %v14855_v49 }
 0x79b   : > { %v9039_v14 = vpop.eup %9038  ;;  %v8276_v42 = vadd.s32 4294967169, %v7526_v44  ;;  %v7491_v33 = vshll.u32 %v14817_v27, %v7489_v30  ;;  %v7504_v38 = vsub.s32 4, %v14804_v58  ;;  %v4252_v36 = vadd.s32 1, %v14848_v51 }
 0x79c   : > { %v9041_v59 = vpop.eup %9040  ;;  %v4190_v55 = vxor.u32 2147483648, %v9039_v14  ;;  %v7492_v31 = vshrl.u32 %v7474_v34, %v7490_v2  ;;  %v7495_v18 = vadd.s32 127, %v7494_v6  ;;  %v7522_v21 = vand.u32 2147483647, %v14807_v39 }
 0x79d   : > { %v4187_v13 = vxor.u32 2147483648, %v9041_v59  ;;  %v7532_v29 = vadd.s32 1, %v8276_v42  ;;  %v4249_v27 = vmul.u32 %v4242_v46, %v4233_v52  ;;  %vm4251_vm12 = vc.u32 %v14856_v53, %v14847_v35 }
 0x79e   : > { %v4191_v63 = vsel %vm4189_vm11, %v4190_v55, %v9041_v59  ;;  %v7493_v11 = vor.u32 %v7492_v31, %v7491_v33  ;;  %v7496_v40 = vshll.u32 %v7495_v18, 23  ;;  %v4253_v56 = vsel %vm4251_vm12, %v4252_v36, %v14848_v51 }
 0x79f   : > { %v4188_v57 = vsel %vm4186_vm6, %v9039_v14, %v4187_v13  ;;  %vm7533_vm13 = vcmp.gt.s32.totalorder %v7532_v29, 0  ;;  %v965_v50 = vmul.f32 %v9649_v12, %v14815_v60  ;;  %v7505_v46 = vsel %vm7420_vm9, %v7504_v38, %v14804_v58 }
 0x7a0   : > { %v4192_v45 = vsel %vm4185_vm7, %v4188_v57, %v4191_v63  ;;  %v7497_v0 = vor.u32 4788187, %v7496_v40  ;;  %v4254_v47 = vadd.s32 %v4253_v56, %v4249_v27  ;;  %v7534_v17 = vsel %vm7533_vm13, %v7532_v29, 0 }
 0x7a1   : > { %v4193_v44 = vsel %vm4182_vm8, nan, %v4192_v45  ;;  %v7500_v54 = vcvt.s32.f32 %v7493_v11  ;;  %v7536_v41 = vand.u32 31, %v7534_v17  ;;  %vm14881_vm14 = vcmp.le.f32.partialorder %v7418_v7, 0.7853982 }
 0x7a2   : > { %7759 = vst [vmem:[%s10000_s14 + $0xe8] sm:$0xff] %v4193_v44  ;;  %v7498_v62 = vand.u32 2147483647, %v7497_v0  ;;  %v4255_v60 = vadd.s32 536870912, %v4254_v47  ;;  %v7529_v4 = vand.u32 8388607, %v7522_v21  ;;  %v14889_v15 = vadd.f32 %v14517_v23, %v9645_v8 }
 0x7a3   : > { %v7507_v20 = vsel %vm14881_vm14, 0, %v7505_v46  ;;  %v7537_v24 = vsub.s32 32, %v7536_v41  ;;  %v14894_v48 = vadd.f32 %v9656_v19, %v965_v50  ;;  %v7535_v32 = vshrl.u32 %v7534_v17, 5 }
 0x7a4   : > { %v7501_v58 = vmul.f32 %v7500_v54, %v7498_v62  ;;  %v14896_v7 = vshrl.u32 %v4255_v60, 30  ;;  %v7539_v9 = vshll.u32 %v9287_v61, %v7536_v41  ;;  %v7542_v43 = vshll.u32 %v9288_v1, %v7536_v41 }
 0x7a5   : > { %v7540_v25 = vshrl.u32 %v9288_v1, %v7537_v24  ;;  %v7543_v8 = vshrl.u32 %v9289_v3, %v7537_v24  ;;  %v7545_v23 = vshll.u32 %v9289_v3, %v7536_v41  ;;  %v7546_v34 = vshrl.u32 %v9290_v5, %v7537_v24 }
 0x7a6   : > { %v7502_v30 = vxor.u32 2147483648, %v7501_v58  ;;  %v4257_v51 = vshll.u32 %v14896_v7, 30  ;;  %v7548_v2 = vshll.u32 %v9290_v5, %v7536_v41  ;;  %v7549_v6 = vshrl.u32 %v9291_v10, %v7537_v24 }
 0x7a7   : > { %v7541_v52 = vor.u32 %v7540_v25, %v7539_v9  ;;  %v7551_v49 = vshll.u32 %v9291_v10, %v7536_v41  ;;  %v7552_v42 = vshrl.u32 %v9292_v22, %v7537_v24  ;;  %v7544_v33 = vor.u32 %v7543_v8, %v7542_v43 }
 0x7a8   : > { %v7503_v14 = vsel %vm7420_vm9, %v7502_v30, %v7501_v58  ;;  %v14914_v55 = vsub.s32 %v4254_v47, %v4257_v51  ;;  %v7547_v31 = vor.u32 %v7546_v34, %v7545_v23  ;;  %v7511_v18 = vadd.s32 3, %v7507_v20 }
 0x7a9   : > { %v7506_v59 = vsel %vm14881_vm14, %v14661_v37, %v7503_v14  ;;  %v7550_v13 = vor.u32 %v7549_v6, %v7548_v2  ;;  %v7553_v38 = vor.u32 %v7552_v42, %v7551_v49  ;;  %v7530_v29 = vor.u32 8388608, %v7529_v4 }
 0x7aa   : > { %9042 = vcosq.f32 %v7506_v59  ;;  %v4260_v36 = vsub.s32 0, %v14914_v55  ;;  %v7538_v63 = vshrl.u32 %v9287_v61, %v7537_v24  ;;  %vm7554_vm15 = vcmp.lt.s32.totalorder %v7535_v32, 1 }
 0x7ab   : > { %9044 = vsinq.f32 %v7506_v59  ;;  %vm7556_vm0 = vcmp.lt.s32.totalorder %v7535_v32, 3  ;;  %vm7557_vm3 = vcmp.lt.s32.totalorder %v7535_v32, 4  ;;  %v4301_v11 = vand.u32 2139095040, %v14894_v48 }
 0x7ac   : > { %v8149_v40 = vmin.u32 %v4260_v36, %v14914_v55  ;;  %v7558_v57 = vsel %vm7554_vm15, %v7538_v63, %v7541_v52  ;;  %v7559_v27 = vsel %vm7557_vm3, %v7547_v31, 2102212464  ;;  %v7562_v45 = vsel %vm7554_vm15, %v7541_v52, %v7544_v33 }
 0x7ad   : > { %v7560_v0 = vsel %vm7556_vm0, %v7544_v33, %v7559_v27  ;;  %v7563_v56 = vsel %vm7557_vm3, %v7550_v13, 920167782  ;;  %v7566_v50 = vsel %vm7554_vm15, %v7544_v33, %v7547_v31  ;;  %v7567_v44 = vsel %vm7557_vm3, %v7553_v38, 1326507024 }
 0x7ae   : > { %v7512_v46 = vand.u32 3, %v7511_v18  ;;  %vm4196_vm1 = vcmp.lt.s32.totalorder %v14754_v26, 0  ;;  %v4262_v47 = vclz %v8149_v40  ;;  %v7570_v17 = vshll.u32 %v7530_v29, 8 }
 0x7af   : > { %vm7555_vm2 = vcmp.lt.s32.totalorder %v7535_v32, 2  ;;  %v7564_v62 = vsel %vm7556_vm0, %v7547_v31, %v7563_v56  ;;  %v7568_v54 = vsel %vm7556_vm0, %v7550_v13, %v7567_v44  ;;  %v4302_v41 = vshrl.u32 %v4301_v11, 23 }
 0x7b0   : > { %vm7510_vm4 = vweird.f32 %v14661_v37  ;;  %v8150_v16 = vadd.s32 4294967294, %v4262_v47  ;;  %v7561_v60 = vsel %vm7555_vm2, %v7558_v57, %v7560_v0  ;;  %v7565_v4 = vsel %vm7555_vm2, %v7562_v45, %v7564_v62 }
 0x7b1   : > { %v7569_v58 = vsel %vm7555_vm2, %v7566_v50, %v7568_v54  ;;  %v14928_v9 = vmul.u32.u64.low %v7570_v17, %v7565_v4  ;;  %v14929_v43 = vmul.u32.u64.high %v7570_v17, %v7565_v4, %v14928_v9  ;;  %vm7514_vm5 = vcmp.eq.s32.totalorder %v7512_v46, 0 }
 0x7b2   : > { %v14925_v20 = vmul.u32.u64.low %v7570_v17, %v7569_v58  ;;  %v14926_v24 = vmul.u32.u64.high %v7570_v17, %v7569_v58, %v14925_v20  ;;  %vm7517_vm6 = vcmp.eq.s32.totalorder %v7512_v46, 2  ;;  %vm8151_vm7 = vcmp.lt.s32.totalorder %v8150_v16, 0 }
 0x7b3   : > { %v8152_v30 = vadd.s32 4294967169, %v4302_v41  ;;  %v4250_v25 = vadd.s32 %v14847_v35, %v14856_v53  ;;  %v4265_v8 = vsel %vm8151_vm7, 0, %v8150_v16  ;;  %v4280_v23 = vsub.s32 4, %v14896_v7 }
 0x7b4   : > { %v9043_v32 = vpop.eup %9042  ;;  %v4298_v51 = vand.u32 2147483647, %v14894_v48  ;;  %v4266_v6 = vsub.s32 32, %v4265_v8  ;;  %v4270_v14 = vsub.s32 4294967266, %v4265_v8  ;;  %v7577_v52 = vmul.u32 %v7570_v17, %v7561_v60 }
 0x7b5   : > { %v9045_v34 = vpop.eup %9044  ;;  %v7518_v2 = vxor.u32 2147483648, %v9043_v32  ;;  %v4267_v42 = vshll.u32 %v14914_v55, %v4265_v8  ;;  %vm7579_vm8 = vc.u32 %v14926_v24, %v14928_v9  ;;  %v7580_v59 = vadd.s32 1, %v14929_v43 }
 0x7b6   : > { %v7515_v49 = vxor.u32 2147483648, %v9045_v34  ;;  %v4268_v53 = vshrl.u32 %v4250_v25, %v4266_v6  ;;  %v4271_v33 = vadd.s32 127, %v4270_v14  ;;  %v4308_v31 = vadd.s32 1, %v8152_v30 }
 0x7b7   : > { %v7519_v35 = vsel %vm7517_vm6, %v7518_v2, %v9045_v34  ;;  %vm7513_vm9 = vcmp.lt.s32.totalorder %v7512_v46, 2  ;;  %v4281_v13 = vsel %vm4196_vm1, %v4280_v23, %v14896_v7  ;;  %v7581_v55 = vsel %vm7579_vm8, %v7580_v59, %v14929_v43 }
 0x7b8   : > { %v7516_v18 = vsel %vm7514_vm5, %v9043_v32, %v7515_v49  ;;  %v4269_v36 = vor.u32 %v4268_v53, %v4267_v42  ;;  %v4272_v29 = vshll.u32 %v4271_v33, 23  ;;  %v7582_v63 = vadd.s32 %v7581_v55, %v7577_v52 }
 0x7b9   : > { %v7520_v38 = vsel %vm7513_vm9, %v7516_v18, %v7519_v35  ;;  %vm14950_vm10 = vcmp.le.f32.partialorder %v4194_v28, 0.7853982  ;;  %v4305_v57 = vand.u32 8388607, %v4298_v51  ;;  %vm4309_vm11 = vcmp.gt.s32.totalorder %v4308_v31, 0 }
 0x7ba   : > { %v7521_v11 = vsel %vm7510_vm4, nan, %v7520_v38  ;;  %v4273_v7 = vor.u32 4788187, %v4272_v29  ;;  %v4283_v27 = vsel %vm14950_vm10, 0, %v4281_v13  ;;  %v7583_v45 = vadd.s32 536870912, %v7582_v63 }
 0x7bb   : > { %7791 = vst [vmem:[%s10000_s14 + $0x1e8] sm:$0xff] %v7521_v11  ;;  %v4310_v0 = vsel %vm4309_vm11, %v4308_v31, 0  ;;  %v4276_v50 = vcvt.s32.f32 %v4269_v36  ;;  %v4287_v28 = vadd.s32 3, %v4283_v27  ;;  %v997_v47 = vmul.f32 %v9649_v12, %v14889_v15 }
 0x7bc   : > { %v4312_v56 = vand.u32 31, %v4310_v0  ;;  %v4274_v37 = vand.u32 2147483647, %v4273_v7  ;;  %v14959_v44 = vshrl.u32 %v7583_v45, 30  ;;  %v4306_v54 = vor.u32 8388608, %v4305_v57 }
 0x7bd   : > { %v4311_v15 = vshrl.u32 %v4310_v0, 5  ;;  %v14975_v8 = vadd.f32 %v9656_v19, %v997_v47  ;;  %v14985_v59 = vand.u32 3, %v4287_v28  ;;  %vm7524_vm0 = vcmp.lt.s32.totalorder %v14807_v39, 0 }
 0x7be   : > { %v4313_v46 = vsub.s32 32, %v4312_v56  ;;  %v4277_v17 = vmul.f32 %v4276_v50, %v4274_v37  ;;  %v7585_v62 = vshll.u32 %v14959_v44, 30  ;;  %v4315_v41 = vshll.u32 %v9287_v61, %v4312_v56 }
 0x7bf   : > { %v4318_v60 = vshll.u32 %v9288_v1, %v4312_v56  ;;  %v4321_v30 = vshll.u32 %v9289_v3, %v4312_v56  ;;  %v4324_v25 = vshll.u32 %v9290_v5, %v4312_v56  ;;  %v4327_v49 = vshll.u32 %v9291_v10, %v4312_v56 }
 0x7c0   : > { %v4316_v16 = vshrl.u32 %v9288_v1, %v4313_v46  ;;  %v4319_v4 = vshrl.u32 %v9289_v3, %v4313_v46  ;;  %v4322_v58 = vshrl.u32 %v9290_v5, %v4313_v46  ;;  %v4278_v20 = vxor.u32 2147483648, %v4277_v17 }
 0x7c1   : > { %v14969_v43 = vsub.s32 %v7582_v63, %v7585_v62  ;;  %v4325_v12 = vshrl.u32 %v9291_v10, %v4313_v46  ;;  %v4328_v42 = vshrl.u32 %v9292_v22, %v4313_v46  ;;  %v14988_v35 = vshll.u32 %v4306_v54, 8 }
 0x7c2   : > { %v4317_v32 = vor.u32 %v4316_v16, %v4315_v41  ;;  %v4279_v23 = vsel %vm4196_vm1, %v4278_v20, %v4277_v17  ;;  %v4320_v2 = vor.u32 %v4319_v4, %v4318_v60  ;;  %v4323_v6 = vor.u32 %v4322_v58, %v4321_v30 }
 0x7c3   : > { %v7588_v34 = vsub.s32 0, %v14969_v43  ;;  %v4282_v14 = vsel %vm14950_vm10, %v14754_v26, %v4279_v23  ;;  %v4326_v52 = vor.u32 %v4325_v12, %v4324_v25  ;;  %v4314_v53 = vshrl.u32 %v9287_v61, %v4313_v46 }
 0x7c4   : > { %9046 = vcosq.f32 %v4282_v14  ;;  %v4329_v33 = vor.u32 %v4328_v42, %v4327_v49  ;;  %v7629_v31 = vand.u32 2139095040, %v14975_v8  ;;  %vm4330_vm12 = vcmp.lt.s32.totalorder %v4311_v15, 1 }
 0x7c5   : > { %v8277_v19 = vmin.u32 %v7588_v34, %v14969_v43  ;;  %9048 = vsinq.f32 %v4282_v14  ;;  %vm4331_vm13 = vcmp.lt.s32.totalorder %v4311_v15, 2  ;;  %vm4333_vm14 = vcmp.lt.s32.totalorder %v4311_v15, 4 }
 0x7c6   : > { %vm4332_vm15 = vcmp.lt.s32.totalorder %v4311_v15, 3  ;;  %v4335_v13 = vsel %vm4333_vm14, %v4323_v6, 2102212464  ;;  %v4338_v55 = vsel %vm4330_vm12, %v4317_v32, %v4320_v2  ;;  %v4339_v38 = vsel %vm4333_vm14, %v4326_v52, 920167782 }
 0x7c7   : > { %v7590_v18 = vclz %v8277_v19  ;;  %v4334_v29 = vsel %vm4330_vm12, %v4314_v53, %v4317_v32  ;;  %v4340_v63 = vsel %vm4332_vm15, %v4323_v6, %v4339_v38  ;;  %v4342_v11 = vsel %vm4330_vm12, %v4320_v2, %v4323_v6 }
 0x7c8   : > { %v4336_v40 = vsel %vm4332_vm15, %v4320_v2, %v4335_v13  ;;  %v4341_v57 = vsel %vm4331_vm13, %v4338_v55, %v4340_v63  ;;  %v4343_v7 = vsel %vm4333_vm14, %v4329_v33, 1326507024  ;;  %v7630_v27 = vshrl.u32 %v7629_v31, 23 }
 0x7c9   : > { %v8278_v36 = vadd.s32 4294967294, %v7590_v18  ;;  %v4344_v45 = vsel %vm4332_vm15, %v4326_v52, %v4343_v7  ;;  %v14995_v0 = vmul.u32.u64.low %v14988_v35, %v4341_v57  ;;  %v14996_v56 = vmul.u32.u64.high %v14988_v35, %v4341_v57, %v14995_v0 }
 0x7ca   : > { %vm4286_vm1 = vweird.f32 %v14754_v26  ;;  %vm4289_vm2 = vcmp.lt.s32.totalorder %v14985_v59, 2  ;;  %v4345_v50 = vsel %vm4331_vm13, %v4342_v11, %v4344_v45  ;;  %v8280_v28 = vadd.s32 4294967169, %v7630_v27 }
 0x7cb   : > { %vm8279_vm3 = vcmp.lt.s32.totalorder %v8278_v36, 0  ;;  %v7578_v46 = vadd.s32 %v14928_v9, %v14926_v24  ;;  %v7608_v62 = vsub.s32 4, %v14959_v44  ;;  %v4337_v54 = vsel %vm4331_vm13, %v4334_v29, %v4336_v40 }
 0x7cc   : > { %v7593_v37 = vsel %vm8279_vm3, 0, %v8278_v36  ;;  %v15007_v41 = vmul.u32.u64.low %v14988_v35, %v4345_v50  ;;  %v15008_v16 = vmul.u32.u64.high %v14988_v35, %v4345_v50, %v15007_v41  ;;  %v7636_v60 = vadd.s32 1, %v8280_v28 }
 0x7cd   : > { %v7594_v47 = vsub.s32 32, %v7593_v37  ;;  %v7598_v17 = vsub.s32 4294967266, %v7593_v37  ;;  %v7595_v58 = vshll.u32 %v14969_v43, %v7593_v37  ;;  %v4356_v12 = vadd.s32 1, %v14996_v56 }
 0x7ce   : > { %v9047_v4 = vpop.eup %9046  ;;  %vm4293_vm4 = vcmp.eq.s32.totalorder %v14985_v59, 2  ;;  %v7626_v9 = vand.u32 2147483647, %v14975_v8  ;;  %vm7637_vm5 = vcmp.gt.s32.totalorder %v7636_v60, 0  ;;  %vm4290_vm6 = vcmp.eq.s32.totalorder %v14985_v59, 0 }
 0x7cf   : > { %v7596_v20 = vshrl.u32 %v7578_v46, %v7594_v47  ;;  %v7599_v30 = vadd.s32 127, %v7598_v17  ;;  %v9049_v32 = vpop.eup %9048  ;;  %v4294_v24 = vxor.u32 2147483648, %v9047_v4  ;;  %v7638_v34 = vsel %vm7637_vm5, %v7636_v60, 0 }
 0x7d0   : > { %v4291_v15 = vxor.u32 2147483648, %v9049_v32  ;;  %v4353_v43 = vmul.u32 %v14988_v35, %v4337_v54  ;;  %vm4355_vm7 = vc.u32 %v15008_v16, %v14995_v0  ;;  %v7609_v52 = vsel %vm7524_vm0, %v7608_v62, %v14959_v44 }
 0x7d1   : > { %v7597_v25 = vor.u32 %v7596_v20, %v7595_v58  ;;  %v7600_v23 = vshll.u32 %v7599_v30, 23  ;;  %v4295_v2 = vsel %vm4293_vm4, %v4294_v24, %v9049_v32  ;;  %v4357_v49 = vsel %vm4355_vm7, %v4356_v12, %v14996_v56 }
 0x7d2   : > { %v4292_v6 = vsel %vm4290_vm6, %v9047_v4, %v4291_v15  ;;  %vm15026_vm8 = vcmp.le.f32.partialorder %v7522_v21, 0.7853982  ;;  %v4358_v35 = vadd.s32 %v4357_v49, %v4353_v43  ;;  %v7640_v53 = vand.u32 31, %v7638_v34 }
 0x7d3   : > { %v7601_v14 = vor.u32 4788187, %v7600_v23  ;;  %v4296_v42 = vsel %vm4289_vm2, %v4292_v6, %v4295_v2  ;;  %v7604_v18 = vcvt.s32.f32 %v7597_v25  ;;  %v7633_v44 = vand.u32 8388607, %v7626_v9 }
 0x7d4   : > { %v4297_v33 = vsel %vm4286_vm1, nan, %v4296_v42  ;;  %v7611_v59 = vsel %vm15026_vm8, 0, %v7609_v52  ;;  %v4359_v13 = vadd.s32 536870912, %v4358_v35  ;;  %v7639_v55 = vshrl.u32 %v7638_v34, 5 }
 0x7d5   : > { %v7602_v31 = vand.u32 2147483647, %v7601_v14  ;;  %7760 = vst [vmem:[%s10000_s14 + $0xf0] sm:$0xff] %v4297_v33  ;;  %v7641_v21 = vsub.s32 32, %v7640_v53  ;;  %v7643_v36 = vshll.u32 %v9287_v61, %v7640_v53  ;;  %v7646_v29 = vshll.u32 %v9288_v1, %v7640_v53 }
 0x7d6   : > { %v7649_v26 = vshll.u32 %v9289_v3, %v7640_v53  ;;  %v15040_v63 = vshrl.u32 %v4359_v13, 30  ;;  %v7652_v57 = vshll.u32 %v9290_v5, %v7640_v53  ;;  %v7655_v28 = vshll.u32 %v9291_v10, %v7640_v53 }
 0x7d7   : > { %v7605_v38 = vmul.f32 %v7604_v18, %v7602_v31  ;;  %v7644_v11 = vshrl.u32 %v9288_v1, %v7641_v21  ;;  %v7647_v40 = vshrl.u32 %v9289_v3, %v7641_v21  ;;  %v7650_v27 = vshrl.u32 %v9290_v5, %v7641_v21 }
 0x7d8   : > { %v7653_v45 = vshrl.u32 %v9291_v10, %v7641_v21  ;;  %v7656_v56 = vshrl.u32 %v9292_v22, %v7641_v21  ;;  %v4361_v37 = vshll.u32 %v15040_v63, 30  ;;  %v7615_v5 = vadd.s32 3, %v7611_v59 }
 0x7d9   : > { %v7606_v7 = vxor.u32 2147483648, %v7605_v38  ;;  %v7645_v50 = vor.u32 %v7644_v11, %v7643_v36  ;;  %v7648_v1 = vor.u32 %v7647_v40, %v7646_v29  ;;  %v7651_v47 = vor.u32 %v7650_v27, %v7649_v26 }
 0x7da   : > { %v7654_v3 = vor.u32 %v7653_v45, %v7652_v57  ;;  %v4362_v62 = vsub.s32 %v4358_v35, %v4361_v37  ;;  %v7657_v54 = vor.u32 %v7656_v56, %v7655_v28  ;;  %v7634_v22 = vor.u32 8388608, %v7633_v44 }
 0x7db   : > { %v7607_v46 = vsel %vm7524_vm0, %v7606_v7, %v7605_v38  ;;  %vm7658_vm9 = vcmp.lt.s32.totalorder %v7639_v55, 1  ;;  %vm7659_vm10 = vcmp.lt.s32.totalorder %v7639_v55, 2  ;;  %vm7660_vm11 = vcmp.lt.s32.totalorder %v7639_v55, 3 }
 0x7dc   : > { %v7610_v17 = vsel %vm15026_vm8, %v14807_v39, %v7607_v46  ;;  %v4364_v41 = vsub.s32 0, %v4362_v62  ;;  %vm7661_vm12 = vcmp.lt.s32.totalorder %v7639_v55, 4  ;;  %v7642_v10 = vshrl.u32 %v9287_v61, %v7641_v21 }
 0x7dd   : > { %9050 = vcosq.f32 %v7610_v17  ;;  %v7663_v60 = vsel %vm7661_vm12, %v7651_v47, 2102212464  ;;  %v7666_v4 = vsel %vm7658_vm9, %v7645_v50, %v7648_v1  ;;  %v7667_v58 = vsel %vm7661_vm12, %v7654_v3, 920167782 }
 0x7de   : > { %9052 = vsinq.f32 %v7610_v17  ;;  %v8153_v20 = vmin.u32 %v4364_v41, %v4362_v62  ;;  %v7668_v30 = vsel %vm7660_vm11, %v7651_v47, %v7667_v58  ;;  %v7670_v12 = vsel %vm7658_vm9, %v7648_v1, %v7651_v47 }
 0x7df   : > { %v7671_v32 = vsel %vm7661_vm12, %v7657_v54, 1326507024  ;;  %v7669_v24 = vsel %vm7659_vm10, %v7666_v4, %v7668_v30  ;;  %v7674_v25 = vshll.u32 %v7634_v22, 8  ;;  %v7616_v23 = vand.u32 3, %v7615_v5 }
 0x7e0   : > { %v7672_v15 = vsel %vm7660_vm11, %v7654_v3, %v7671_v32  ;;  %v4366_v34 = vclz %v8153_v20  ;;  %v7662_v2 = vsel %vm7658_vm9, %v7642_v10, %v7645_v50  ;;  %v7664_v61 = vsel %vm7660_vm11, %v7648_v1, %v7663_v60 }
 0x7e1   : > { %v7673_v43 = vsel %vm7659_vm10, %v7670_v12, %v7672_v15  ;;  %v15064_v6 = vmul.u32.u64.low %v7674_v25, %v7669_v24  ;;  %v15065_v14 = vmul.u32.u64.high %v7674_v25, %v7669_v24, %v15064_v6  ;;  %v7665_v19 = vsel %vm7659_vm10, %v7662_v2, %v7664_v61 }
 0x7e2   : > { %v8154_v52 = vadd.s32 4294967294, %v4366_v34  ;;  %v15067_v49 = vmul.u32.u64.low %v7674_v25, %v7673_v43  ;;  %v15068_v42 = vmul.u32.u64.high %v7674_v25, %v7673_v43, %v15067_v49  ;;  %vm7618_vm14 = vcmp.eq.s32.totalorder %v7616_v23, 0 }
 0x7e3   : > { %vm7621_vm15 = vcmp.eq.s32.totalorder %v7616_v23, 2  ;;  %v7684_v33 = vadd.s32 1, %v15065_v14  ;;  %v4354_v44 = vadd.s32 %v14995_v0, %v15008_v16  ;;  %v7681_v36 = vmul.u32 %v7674_v25, %v7665_v19 }
 0x7e4   : > { %vm8155_vm13 = vcmp.lt.s32.totalorder %v8154_v52, 0  ;;  %vm7683_vm0 = vc.u32 %v15068_v42, %v15064_v6  ;;  %vm7617_vm3 = vcmp.lt.s32.totalorder %v7616_v23, 2  ;;  %vm7614_vm1 = vweird.f32 %v14807_v39 }
 0x7e5   : > { %v4369_v53 = vsel %vm8155_vm13, 0, %v8154_v52  ;;  %v7685_v11 = vsel %vm7683_vm0, %v7684_v33, %v15065_v14  ;;  %v4384_v47 = vsub.s32 4, %v15040_v63  ;;  %vm4300_vm2 = vcmp.lt.s32.totalorder %v14894_v48, 0 }
 0x7e6   : > { %v4370_v59 = vsub.s32 32, %v4369_v53  ;;  %v4374_v13 = vsub.s32 4294967266, %v4369_v53  ;;  %v4371_v38 = vshll.u32 %v4362_v62, %v4369_v53  ;;  %v7686_v57 = vadd.s32 %v7685_v11, %v7681_v36 }
 0x7e7   : > { %v9051_v35 = vpop.eup %9050  ;;  %vm4299_vm4 = vcmp.le.f32.partialorder %v4298_v51, 0.7853982  ;;  %v4385_v62 = vsel %vm4300_vm2, %v4384_v47, %v15040_v63  ;;  %v7682_v20 = vadd.s32 %v15064_v6, %v15068_v42  ;;  %vm4390_vm9 = vweird.f32 %v14894_v48 }
 0x7e8   : > { %v9053_v31 = vpop.eup %9052  ;;  %v7622_v18 = vxor.u32 2147483648, %v9051_v35  ;;  %v4372_v29 = vshrl.u32 %v4354_v44, %v4370_v59  ;;  %v4375_v26 = vadd.s32 127, %v4374_v13  ;;  %v7687_v45 = vadd.s32 536870912, %v7686_v57 }
 0x7e9   : > { %v7619_v21 = vxor.u32 2147483648, %v9053_v31  ;;  %v4387_v41 = vsel %vm4299_vm4, 0, %v4385_v62  ;;  %vm7628_vm10 = vcmp.lt.s32.totalorder %v14975_v8, 0  ;;  %vm7627_vm11 = vcmp.le.f32.partialorder %v7626_v9, 0.7853982 }
 0x7ea   : > { %v7623_v55 = vsel %vm7621_vm15, %v7622_v18, %v9053_v31  ;;  %v4373_v16 = vor.u32 %v4372_v29, %v4371_v38  ;;  %v4376_v7 = vshll.u32 %v4375_v26, 23  ;;  %v7688_v37 = vshrl.u32 %v7687_v45, 30 }
 0x7eb   : > { %v7620_v40 = vsel %vm7618_vm14, %v9051_v35, %v7619_v21  ;;  %v4391_v4 = vadd.s32 3, %v4387_v41  ;;  %vm7718_vm15 = vweird.f32 %v14975_v8 }
 0x7ec   : > { %v7624_v0 = vsel %vm7617_vm3, %v7620_v40, %v7623_v55  ;;  %v4377_v56 = vor.u32 4788187, %v4376_v7  ;;  %v4380_v28 = vcvt.s32.f32 %v4373_v16  ;;  %v7689_v46 = vshll.u32 %v7688_v37, 30 }
 0x7ed   : > { %v7625_v27 = vsel %vm7614_vm1, nan, %v7624_v0  ;;  %v4392_v32 = vand.u32 3, %v4391_v4  ;;  %v7712_v53 = vsub.s32 4, %v7688_v37 }
 0x7ee   : > { %7792 = vst [vmem:[%s10000_s14 + $0x1f0] sm:$0xff] %v7625_v27  ;;  %v4378_v50 = vand.u32 2147483647, %v4377_v56  ;;  %v7690_v3 = vsub.s32 %v7686_v57, %v7689_v46 }
 0x7ef   : > { %vm4397_vm6 = vcmp.eq.s32.totalorder %v4392_v32, 2  ;;  %vm4394_vm7 = vcmp.eq.s32.totalorder %v4392_v32, 0  ;;  %vm4393_vm8 = vcmp.lt.s32.totalorder %v4392_v32, 2  ;;  %v7713_v18 = vsel %vm7628_vm10, %v7712_v53, %v7688_v37 }
 0x7f0   : > { %v4381_v1 = vmul.f32 %v4380_v28, %v4378_v50  ;;  %v7692_v5 = vsub.s32 0, %v7690_v3  ;;  %v7715_v44 = vsel %vm7627_vm11, 0, %v7713_v18 }
 0x7f1   : > { %v7719_v59 = vadd.s32 3, %v7715_v44 }
 0x7f2   : > { %v4382_v17 = vxor.u32 2147483648, %v4381_v1  ;;  %v8281_v22 = vmin.u32 %v7692_v5, %v7690_v3 }
 0x7f3   : > { %v7720_v13 = vand.u32 3, %v7719_v59 }
 0x7f4   : > { %v4383_v39 = vsel %vm4300_vm2, %v4382_v17, %v4381_v1  ;;  %v7694_v10 = vclz %v8281_v22 }
 0x7f5   : > { %v4386_v54 = vsel %vm4299_vm4, %v14894_v48, %v4383_v39  ;;  %vm7725_vm12 = vcmp.eq.s32.totalorder %v7720_v13, 2  ;;  %vm7722_vm13 = vcmp.eq.s32.totalorder %v7720_v13, 0  ;;  %vm7721_vm14 = vcmp.lt.s32.totalorder %v7720_v13, 2 }
 0x7f6   : > { %9054 = vcosq.f32 %v4386_v54  ;;  %v8282_v60 = vadd.s32 4294967294, %v7694_v10 }
 0x7f7   : > { %9056 = vsinq.f32 %v4386_v54 }
 0x7f8   : > { %vm8283_vm5 = vcmp.lt.s32.totalorder %v8282_v60, 0 }
 0x7f9   : > { %v7697_v58 = vsel %vm8283_vm5, 0, %v8282_v60 }
 0x7fa   : > { %v7698_v30 = vsub.s32 32, %v7697_v58  ;;  %v7702_v12 = vsub.s32 4294967266, %v7697_v58  ;;  %v7699_v51 = vshll.u32 %v7690_v3, %v7697_v58 }
 0x7fc   : > { %v7700_v24 = vshrl.u32 %v7682_v20, %v7698_v30  ;;  %v7703_v15 = vadd.s32 127, %v7702_v12 }
 0x7fe   : > { %v7701_v34 = vor.u32 %v7700_v24, %v7699_v51  ;;  %v7704_v2 = vshll.u32 %v7703_v15, 23 }
 0x800   : > { %v9055_v63 = vpop.eup %9054  ;;  %v7705_v14 = vor.u32 4788187, %v7704_v2  ;;  %v7708_v42 = vcvt.s32.f32 %v7701_v34 }
 0x801   : > { %v9057_v25 = vpop.eup %9056  ;;  %v4398_v23 = vxor.u32 2147483648, %v9055_v63 }
 0x802   : > { %v4395_v61 = vxor.u32 2147483648, %v9057_v25  ;;  %v7706_v49 = vand.u32 2147483647, %v7705_v14 }
 0x803   : > { %v4399_v43 = vsel %vm4397_vm6, %v4398_v23, %v9057_v25 }
 0x804   : > { %v4396_v52 = vsel %vm4394_vm7, %v9055_v63, %v4395_v61  ;;  %v7709_v35 = vmul.f32 %v7708_v42, %v7706_v49 }
 0x805   : > { %v4400_v6 = vsel %vm4393_vm8, %v4396_v52, %v4399_v43 }
 0x806   : > { %v4401_v19 = vsel %vm4390_vm9, nan, %v4400_v6  ;;  %v7710_v33 = vxor.u32 2147483648, %v7709_v35 }
 0x807   : > { %7761 = vst [vmem:[%s10000_s14 + $0xf8] sm:$0xff] %v4401_v19 }
 0x808   : > { %v7711_v31 = vsel %vm7628_vm10, %v7710_v33, %v7709_v35 }
 0x809   : > { %v7714_v48 = vsel %vm7627_vm11, %v14975_v8, %v7711_v31 }
 0x80a   : > { %9058 = vcosq.f32 %v7714_v48 }
 0x80b   : > { %9060 = vsinq.f32 %v7714_v48 }
 0x814   : > { %v9059_v21 = vpop.eup %9058 }
 0x815   : > { %v9061_v38 = vpop.eup %9060  ;;  %v7726_v36 = vxor.u32 2147483648, %v9059_v21 }
 0x816   : > { %v7723_v9 = vxor.u32 2147483648, %v9061_v38 }
 0x817   : > { %v7727_v55 = vsel %vm7725_vm12, %v7726_v36, %v9061_v38 }
 0x818   : > { %v7724_v29 = vsel %vm7722_vm13, %v9059_v21, %v7723_v9 }
 0x819   : > { %v7728_v26 = vsel %vm7721_vm14, %v7724_v29, %v7727_v55 }
 0x81a   : > { %v7729_v11 = vsel %vm7718_vm15, nan, %v7728_v26 }
 0x81b   : > { %7793 = vst [vmem:[%s10000_s14 + $0x1f8] sm:$0xff] %v7729_v11 }
 0x81c   : > { %9163 = shalt.err (!%p9160_p12)
}
 0x81d   : > { %s9164_s10 = scalar_lea.hbm %s15098_s25, 8192  ;;  %s9168_s5 = scalar_lea.hbm %s15346_s13, 32768 }
 0x81e   : > { %p9165_p13 = scmp.ne.s32.totalorder %s15098_s25, %s9164_s10  ;;  %p9169_p5 = scmp.lt.u32.totalorder %s15098_s25, %s15346_s13 }
 0x81f   : > { %p9170_p2 = scmp.lt.u32.totalorder %s9168_s5, %s9164_s10  ;;  %p9172_p7 = scmp.lt.u32.totalorder %s9164_s10, %s15098_s25 }
 0x820   : > { %p9166_p8 = pnand %p9165_p13, %p15347_p1 }
 0x821   : > { %p9171_p0 = por %p9170_p2, %p9169_p5 }
 0x822   : > { %p9167_p11 = pneg %p9166_p8 }
 0x823   : > { %p9173_p10 = por %p9172_p7, %p9171_p0 }
 0x825   : > { %p9174_p3 = pnand %p9173_p10, %p9167_p11 }
 0x827   : > { %9177 = shalt.err (!%p9174_p3)
}
 0x828   : > { %s9294_s12 = smov 256   ;;  %s9295_s29 = smov 16  }
 0x829   : > { %8590 = dma.vmem_to_hbm [thread:$0]  (%p15347_p1), %s15100_s9, 8192, %s15098_s25, %s7795_s21, %s9294_s12, %s9294_s12, %s9295_s29  }
 0x82a PF: > { %s15348_s6 = sld [smem:[#allocation13_spill]]  ;;  %s15349_s24 = sld [smem:[#allocation15_spill]] }
 0x82b   : > { %p8610_p9 = scmp.ge.s32.totalorder %s9280_s28, 2 }
 0x830   : > { %s7826_s16 = sand.u32 1, %s15348_s6   ;;  %p15350_p6 = scmp.ne.s32.totalorder %s15349_s24, 0 }
 0x831   : > { %s7827_s4 = scalar_lea.sflag [#allocation4], %s7826_s16 }
 0x832   : > { %p8604_p4 = pnand %p8610_p9, %p15350_p6 }
 0x834   : > { %9235 = dma.done.wait (!%p8604_p4), %s7827_s4, 8192  }
 0x835   : > { %9237 = vsyncadd (!%p8604_p4), %s7827_s4, 4294959104  ;;  %s24_s28 = sadd.s32 1, %s9280_s28   ;;  %s15351_s9 = sld [smem:[#allocation16_spill]] }
 0x836   : > { %p21_p12 = scmp.ge.s32.totalorder %s24_s28, 6   ;;  %s15352_s3 = sld [smem:[#allocation18_spill]] }
 0x837   : > { %s15353_s18 = smov %s9244_s19  ;;  %s15354_s19 = smov %s9248_s20 }
 0x838   : > { %s15355_s20 = smov %s9520_s2  ;;  %s15356_s21 = smov %s9256_s22 }
 0x839   : > { %s15357_s22 = smov %s9260_s23  ;;  %s15358_s23 = smov %s9468_s7 }
 0x83a   : > { %s15359_s24 = smov %s9272_s26  ;;  %s15360_s25 = smov %s9276_s27 }
 0x83b   : > { %s15361_s26 = smov %s15351_s9  ;;  %23 = sbr.rel (!%p21_p12) target bundleno = 16 (0x10), region = 105 }
 0x83c   : > { %s15362_s27 = smov %s15352_s3 }
 0x842   :  { %7832 = vsyncpa [#allocation3], 1 }
 0x843   :  { %7834 = vsyncpa [#allocation3 + $0x1], 1 }
 0x844   :  { %7835 = vsyncpa [#allocation6], 1 }
 0x845   :  { %7837 = vsyncpa [#allocation6 + $0x1], 1 }
 0x846   :  { %7838 = vsyncpa [#allocation4], 1 }
 0x847   :  { %7840 = vsyncpa [#allocation4 + $0x1], 1 }

</bundles_post_ra>
